<compile_context>
chip_gen: v5e
topology: v5e:2x2
jax: 0.10.0
libtpu: 0.0.40
codegen_flags: <defaults>
</compile_context>

<pallas_src>
import functools
import math

import jax
import jax.numpy as jnp
from jax.experimental import pallas as pl
from jax.experimental.pallas import tpu as pltpu


# ----------------------------- Pallas kernel ---------------------------------

def _dit_block_kernel(
    x_ref, ada_ref,
    w_qkv_ref, b_qkv_ref,
    w_proj_ref, b_proj_ref,
    w_fc1_ref, b_fc1_ref,
    w_fc2_ref, b_fc2_ref,
    o_ref,
    *, num_heads: int,
):
    f32 = jnp.float32
    bf16 = jnp.bfloat16
    Bt, N, D = x_ref.shape
    H = num_heads
    Dh = D // H
    R = Bt * N                               # folded row count for dense matmuls
    sm_scale = 1.0 / math.sqrt(Dh)
    eps = 1e-6

    def layernorm(z):                        # LayerNorm, elementwise_affine=False
        mu = jnp.mean(z, axis=-1, keepdims=True)
        zc = z - mu
        var = jnp.mean(zc * zc, axis=-1, keepdims=True)
        return zc * jax.lax.rsqrt(var + eps)

    def gelu_tanh(z):                        # GELU(approximate='tanh')
        c0 = math.sqrt(2.0 / math.pi)
        return 0.5 * z * (1.0 + jnp.tanh(c0 * (z + 0.044715 * z * z * z)))

    def linear(a_f32, w_bf16_ref, b_f32_ref):
        # bf16 operands on the MXU, f32 accumulation, fused bias add.
        out = jnp.dot(a_f32.astype(bf16), w_bf16_ref[...],
                      preferred_element_type=f32)
        return out + b_f32_ref[...]

    x = x_ref[...].astype(f32)               # (Bt, N, D)  residual stream
    ada = ada_ref[...].astype(f32)           # (Bt, 6, D)  precomputed modulation
    shift_msa = ada[:, 0:1, :]
    scale_msa = ada[:, 1:2, :]
    gate_msa = ada[:, 2:3, :]
    shift_mlp = ada[:, 3:4, :]
    scale_mlp = ada[:, 4:5, :]
    gate_mlp = ada[:, 5:6, :]

    # ---- Attention branch ----
    h = layernorm(x) * (1.0 + scale_msa) + shift_msa                # modulate
    qkv = linear(h.reshape(R, D), w_qkv_ref, b_qkv_ref)             # (R, 3D)
    qkv = qkv.reshape(Bt, N, 3 * D)

    attn_rows = []
    for bi in range(Bt):                     # attention is per batch element
        q = qkv[bi, :, 0 * D:1 * D]
        k = qkv[bi, :, 1 * D:2 * D]
        v = qkv[bi, :, 2 * D:3 * D]
        head_outs = []
        for hd in range(H):
            sl = slice(hd * Dh, (hd + 1) * Dh)
            qh = q[:, sl].astype(bf16)
            kh = k[:, sl].astype(bf16)
            vh = v[:, sl].astype(bf16)
            s = jax.lax.dot_general(                                 # (N, N)
                qh, kh, dimension_numbers=(((1,), (1,)), ((), ())),
                preferred_element_type=f32) * sm_scale
            s = s - jnp.max(s, axis=-1, keepdims=True)
            p = jnp.exp(s)
            l = jnp.sum(p, axis=-1, keepdims=True)                   # (N, 1)
            oh = jnp.dot(p.astype(bf16), vh, preferred_element_type=f32)
            # Normalize after the PV matmul: (N,Dh) multiply + EUP reciprocal
            # instead of an (N,N) VALU divide.
            head_outs.append(oh * pl.reciprocal(l, approx=True))
        attn_rows.append(jnp.concatenate(head_outs, axis=-1))        # (N, D)
    attn2d = jnp.concatenate(attn_rows, axis=0)                      # (R, D)

    attn = linear(attn2d, w_proj_ref, b_proj_ref).reshape(Bt, N, D)
    x = x + gate_msa * attn

    # ---- MLP branch ----
    h2 = layernorm(x) * (1.0 + scale_mlp) + shift_mlp
    h2 = linear(h2.reshape(R, D), w_fc1_ref, b_fc1_ref)              # (R, M)
    h2 = gelu_tanh(h2)
    mlp = linear(h2, w_fc2_ref, b_fc2_ref).reshape(Bt, N, D)         # (Bt, N, D)
    x = x + gate_mlp * mlp

    o_ref[...] = x.astype(o_ref.dtype)


# ----------------------------- pallas_call wrapper ----------------------------

def _pick_block_batch(B, N, target_rows=256):
    """Largest divisor Bt of B with Bt*N <= target_rows; prefer >= 2 grid steps
    (v7x megacore) as long as the folded row count stays >= 128."""
    best = 1
    for bt in range(1, B + 1):
        if B % bt == 0 and bt * N <= max(N, target_rows):
            best = bt
    if B // best < 2:
        for bt in range(best - 1, 0, -1):
            if B % bt == 0 and bt * N >= min(128, best * N):
                best = bt
                break
    return best


@functools.partial(jax.jit, static_argnames=("num_heads",))
def dit_block_forward(x, c, params, *, num_heads):
    """x: (B, N, D) f32, c: (B, D) f32 -> (B, N, D) f32."""
    B, N, D = x.shape
    assert D % num_heads == 0
    # Keep every load/store lane-dense and (8,128)-aligned.
    assert D % 128 == 0 and N % 8 == 0, "DiTBlockPallas needs D%128==0 and N%8==0"

    x = x.astype(jnp.float32)
    c = c.astype(jnp.float32)

    # adaLN-Zero modulation in plain XLA (tiny (B,D)x(D,6D) matmul); the kernel
    # receives the six modulation vectors instead of the (D,6D) weight.
    c_act = c * jax.nn.sigmoid(c)                                    # SiLU
    ada = (c_act @ params["w_ada"] + params["b_ada"]).reshape(B, 6, D)

    w_qkv, b_qkv = params["w_qkv"], params["b_qkv"]
    w_proj, b_proj = params["w_proj"], params["b_proj"]
    w_fc1, b_fc1 = params["w_fc1"], params["b_fc1"]
    w_fc2, b_fc2 = params["w_fc2"], params["b_fc2"]

    Bt = _pick_block_batch(B, N)
    grid = (B // Bt,)

    def full_spec(p):
        # Whole-array block, same block every grid step (stays VMEM-resident).
        return pl.BlockSpec(p.shape, lambda b, nd=p.ndim: (0,) * nd)

    kernel = functools.partial(_dit_block_kernel, num_heads=num_heads)

    # Rough VMEM footprint estimate: bf16 weights (double-buffered), f32 x/out
    # blocks (double-buffered) and the f32 in-kernel working set.
    vmem_est = (
        4 * sum(int(w.size) for w in (w_qkv, w_proj, w_fc1, w_fc2))
        + 16 * Bt * N * D
        + 4 * Bt * N * (10 * D + num_heads * N)
    )
    vmem_limit = int(min(100 * 2 ** 20, max(32 * 2 ** 20, 2 * vmem_est)))

    return pl.pallas_call(
        kernel,
        out_shape=jax.ShapeDtypeStruct((B, N, D), jnp.float32),
        grid_spec=pltpu.PrefetchScalarGridSpec(
            num_scalar_prefetch=0,
            grid=grid,
            in_specs=[
                pl.BlockSpec((Bt, N, D), lambda b: (b, 0, 0)),   # x
                pl.BlockSpec((Bt, 6, D), lambda b: (b, 0, 0)),   # modulation
                full_spec(w_qkv), full_spec(b_qkv),
                full_spec(w_proj), full_spec(b_proj),
                full_spec(w_fc1), full_spec(b_fc1),
                full_spec(w_fc2), full_spec(b_fc2),
            ],
            out_specs=pl.BlockSpec((Bt, N, D), lambda b: (b, 0, 0)),
        ),
        compiler_params=pltpu.CompilerParams(
            dimension_semantics=("parallel",),                  # megacore sharding
            vmem_limit_bytes=vmem_limit,
        ),
    )(x, ada, w_qkv, b_qkv, w_proj, b_proj, w_fc1, b_fc1, w_fc2, b_fc2)


# ----------------------------- Module wrapper ---------------------------------

class DiTBlockPallas:
    """JAX/Pallas port of DiTBlock (adaLN-Zero conditioning)."""

    def __init__(self, hidden_size, num_heads, mlp_ratio=4.0,
                 key=jax.random.PRNGKey(0)):
        assert hidden_size % num_heads == 0
        self.hidden_size = hidden_size
        self.num_heads = num_heads
        self.mlp_hidden = int(hidden_size * mlp_ratio)
        D, M = hidden_size, self.mlp_hidden

        ks = jax.random.split(key, 10)

        def linear_init(kw, kb, fan_in, fan_out):
            # nn.Linear-style uniform(-1/sqrt(fan_in), 1/sqrt(fan_in)) init.
            bound = 1.0 / math.sqrt(fan_in)
            w = jax.random.uniform(kw, (fan_in, fan_out), jnp.float32,
                                   -bound, bound)
            b = jax.random.uniform(kb, (fan_out,), jnp.float32, -bound, bound)
            return w, b

        w_ada, b_ada = linear_init(ks[0], ks[1], D, 6 * D)
        w_qkv, b_qkv = linear_init(ks[2], ks[3], D, 3 * D)
        w_proj, b_proj = linear_init(ks[4], ks[5], D, D)
        w_fc1, b_fc1 = linear_init(ks[6], ks[7], D, M)
        w_fc2, b_fc2 = linear_init(ks[8], ks[9], M, D)

        # f32 master copies (pure-JAX reference uses these).
        self.params_f32 = dict(w_ada=w_ada, b_ada=b_ada,
                               w_qkv=w_qkv, b_qkv=b_qkv,
                               w_proj=w_proj, b_proj=b_proj,
                               w_fc1=w_fc1, b_fc1=b_fc1,
                               w_fc2=w_fc2, b_fc2=b_fc2)

        # Kernel-facing params: weights cast to bf16 ONCE here, biases f32 (1,out).
        # w_ada/b_ada stay f32 (adaLN matmul runs wrapper-side in XLA).
        bf16 = jnp.bfloat16
        self.params = dict(
            w_ada=w_ada, b_ada=b_ada,
            w_qkv=w_qkv.astype(bf16), b_qkv=b_qkv.reshape(1, -1),
            w_proj=w_proj.astype(bf16), b_proj=b_proj.reshape(1, -1),
            w_fc1=w_fc1.astype(bf16), b_fc1=b_fc1.reshape(1, -1),
            w_fc2=w_fc2.astype(bf16), b_fc2=b_fc2.reshape(1, -1),
        )

    def __call__(self, x, c):
        return dit_block_forward(x, c, self.params, num_heads=self.num_heads)


# ----------------------------- pure-JAX reference ------------------------------

def dit_block_reference(x, c, p, num_heads):
    """f32 reference with the exact PyTorch DiTBlock math."""
    B, N, D = x.shape
    Dh = D // num_heads

    def ln(z):
        mu = jnp.mean(z, -1, keepdims=True)
        zc = z - mu
        var = jnp.mean(zc * zc, -1, keepdims=True)
        return zc * jax.lax.rsqrt(var + 1e-6)

    def gelu_tanh(z):
        c0 = math.sqrt(2.0 / math.pi)
        return 0.5 * z * (1.0 + jnp.tanh(c0 * (z + 0.044715 * z ** 3)))

    ada = (c * jax.nn.sigmoid(c)) @ p["w_ada"] + p["b_ada"]        # (B, 6D)
    (shift_msa, scale_msa, gate_msa,
     shift_mlp, scale_mlp, gate_mlp) = jnp.split(ada, 6, axis=-1)

    h = ln(x) * (1.0 + scale_msa[:, None, :]) + shift_msa[:, None, :]
    qkv = h @ p["w_qkv"] + p["b_qkv"]                               # (B, N, 3D)
    qkv = qkv.reshape(B, N, 3, num_heads, Dh).transpose(2, 0, 3, 1, 4)
    q, k, v = qkv[0], qkv[1], qkv[2]                                # (B, H, N, Dh)
    s = jnp.einsum("bhqd,bhkd->bhqk", q, k) / math.sqrt(Dh)
    attn = jnp.einsum("bhqk,bhkd->bhqd", jax.nn.softmax(s, axis=-1), v)
    attn = attn.transpose(0, 2, 1, 3).reshape(B, N, D)
    attn = attn @ p["w_proj"] + p["b_proj"]
    x = x + gate_msa[:, None, :] * attn

    h2 = ln(x) * (1.0 + scale_mlp[:, None, :]) + shift_mlp[:, None, :]
    h2 = gelu_tanh(h2 @ p["w_fc1"] + p["b_fc1"])
    h2 = h2 @ p["w_fc2"] + p["b_fc2"]
    return x + gate_mlp[:, None, :] * h2


# ----------------------------------- main -------------------------------------

if __name__ == "__main__":
    key = jax.random.PRNGKey(0)
    k_x, k_c, k_p = jax.random.split(key, 3)

    # Small shapes implied by DiTBlock.forward: x (B, N, hidden), c (B, hidden).
    # hidden=128 keeps all kernel loads/stores lane-dense; B=4, N=64 gives
    # Bt=2 batch folding (128-row matmuls) and a 2-step grid.
    B, N, hidden, heads = 4, 64, 128, 4

    block = DiTBlockPallas(hidden_size=hidden, num_heads=heads,
                           mlp_ratio=4.0, key=k_p)

    x = jax.random.normal(k_x, (B, N, hidden), dtype=jnp.float32)
    c = jax.random.normal(k_c, (B, hidden), dtype=jnp.float32)

    out = block(x, c)
    out = jax.block_until_ready(out)

    ref = dit_block_reference(x, c, block.params_f32, heads)
    ref = jax.block_until_ready(ref)

    assert out.shape == ref.shape == (B, N, hidden)
    max_err = float(jnp.max(jnp.abs(out - ref)))
    # Tolerance accounts for bf16 MXU operands (f32 accumulation) in the kernel.
    assert jnp.allclose(out, ref, atol=5e-2, rtol=5e-2), \
        f"mismatch vs f32 reference, max abs err = {max_err}"

    print("KERNEL_OK")
</pallas_src>

<mosaic_0001>
module attributes {stable_mosaic.version = 11 : i64} {
  func.func @_dit_block_kernel(%arg0: i32, %arg1: memref<2x64x128xf32, #tpu.memory_space<vmem>>, %arg2: memref<2x6x128xf32, #tpu.memory_space<vmem>>, %arg3: memref<128x384xbf16, #tpu.memory_space<vmem>>, %arg4: memref<1x384xf32, #tpu.memory_space<vmem>>, %arg5: memref<128x128xbf16, #tpu.memory_space<vmem>>, %arg6: memref<1x128xf32, #tpu.memory_space<vmem>>, %arg7: memref<128x512xbf16, #tpu.memory_space<vmem>>, %arg8: memref<1x512xf32, #tpu.memory_space<vmem>>, %arg9: memref<512x128xbf16, #tpu.memory_space<vmem>>, %arg10: memref<1x128xf32, #tpu.memory_space<vmem>>, %arg11: memref<2x64x128xf32, #tpu.memory_space<vmem>>) attributes {dimension_semantics = [#tpu.dimension_semantics<parallel>], iteration_bounds = array<i64: 2>, scalar_prefetch = 0 : i64, scratch_operands = 0 : i64, tpu.core_type = #tpu.core_type<tc>, window_params = [{transform_indices = @transform_0, window_bounds = array<i64: 2, 64, 128>}, {transform_indices = @transform_1, window_bounds = array<i64: 2, 6, 128>}, {pipeline_mode = #tpu.pipeline_mode<synchronous>, transform_indices = @transform_2, window_bounds = array<i64: 128, 384>}, {pipeline_mode = #tpu.pipeline_mode<synchronous>, transform_indices = @transform_3, window_bounds = array<i64: 1, 384>}, {pipeline_mode = #tpu.pipeline_mode<synchronous>, transform_indices = @transform_4, window_bounds = array<i64: 128, 128>}, {pipeline_mode = #tpu.pipeline_mode<synchronous>, transform_indices = @transform_5, window_bounds = array<i64: 1, 128>}, {pipeline_mode = #tpu.pipeline_mode<synchronous>, transform_indices = @transform_6, window_bounds = array<i64: 128, 512>}, {pipeline_mode = #tpu.pipeline_mode<synchronous>, transform_indices = @transform_7, window_bounds = array<i64: 1, 512>}, {pipeline_mode = #tpu.pipeline_mode<synchronous>, transform_indices = @transform_8, window_bounds = array<i64: 512, 128>}, {pipeline_mode = #tpu.pipeline_mode<synchronous>, transform_indices = @transform_9, window_bounds = array<i64: 1, 128>}, {transform_indices = @transform_10, window_bounds = array<i64: 2, 64, 128>}]} {
    %c0 = arith.constant 0 : index
    %c0_0 = arith.constant 0 : index
    %c0_1 = arith.constant 0 : index
    %0 = vector.load %arg1[%c0, %c0_0, %c0_1] : memref<2x64x128xf32, #tpu.memory_space<vmem>>, vector<2x64x128xf32>
    %c0_2 = arith.constant 0 : index
    %c0_3 = arith.constant 0 : index
    %c0_4 = arith.constant 0 : index
    %1 = vector.load %arg2[%c0_2, %c0_3, %c0_4] : memref<2x6x128xf32, #tpu.memory_space<vmem>>, vector<2x6x128xf32>
    %2 = vector.extract_strided_slice %1 {offsets = [0, 0, 0], sizes = [2, 1, 128], strides = [1, 1, 1]} : vector<2x6x128xf32> to vector<2x1x128xf32>
    %3 = vector.extract_strided_slice %1 {offsets = [0, 1, 0], sizes = [2, 1, 128], strides = [1, 1, 1]} : vector<2x6x128xf32> to vector<2x1x128xf32>
    %4 = vector.extract_strided_slice %1 {offsets = [0, 2, 0], sizes = [2, 1, 128], strides = [1, 1, 1]} : vector<2x6x128xf32> to vector<2x1x128xf32>
    %5 = vector.extract_strided_slice %1 {offsets = [0, 3, 0], sizes = [2, 1, 128], strides = [1, 1, 1]} : vector<2x6x128xf32> to vector<2x1x128xf32>
    %6 = vector.extract_strided_slice %1 {offsets = [0, 4, 0], sizes = [2, 1, 128], strides = [1, 1, 1]} : vector<2x6x128xf32> to vector<2x1x128xf32>
    %7 = vector.extract_strided_slice %1 {offsets = [0, 5, 0], sizes = [2, 1, 128], strides = [1, 1, 1]} : vector<2x6x128xf32> to vector<2x1x128xf32>
    %cst = arith.constant dense<0.000000e+00> : vector<2x64xf32>
    %8 = vector.multi_reduction <add>, %0, %cst [2] : vector<2x64x128xf32> to vector<2x64xf32>
    %9 = vector.shape_cast %8 : vector<2x64xf32> to vector<2x64x1xf32>
    %cst_5 = arith.constant 1.280000e+02 : f32
    %10 = vector.broadcast %cst_5 : f32 to vector<2x64x1xf32>
    %11 = arith.divf %9, %10 : vector<2x64x1xf32>
    %12 = vector.broadcast %11 : vector<2x64x1xf32> to vector<2x64x128xf32>
    %13 = arith.subf %0, %12 : vector<2x64x128xf32>
    %14 = arith.mulf %13, %13 : vector<2x64x128xf32>
    %cst_6 = arith.constant dense<0.000000e+00> : vector<2x64xf32>
    %15 = vector.multi_reduction <add>, %14, %cst_6 [2] : vector<2x64x128xf32> to vector<2x64xf32>
    %16 = vector.shape_cast %15 : vector<2x64xf32> to vector<2x64x1xf32>
    %cst_7 = arith.constant 1.280000e+02 : f32
    %17 = vector.broadcast %cst_7 : f32 to vector<2x64x1xf32>
    %18 = arith.divf %16, %17 : vector<2x64x1xf32>
    %cst_8 = arith.constant 9.99999997E-7 : f32
    %19 = vector.broadcast %cst_8 : f32 to vector<2x64x1xf32>
    %20 = arith.addf %18, %19 : vector<2x64x1xf32>
    %21 = math.rsqrt %20 : vector<2x64x1xf32>
    %22 = vector.broadcast %21 : vector<2x64x1xf32> to vector<2x64x128xf32>
    %23 = arith.mulf %13, %22 : vector<2x64x128xf32>
    %cst_9 = arith.constant 1.000000e+00 : f32
    %24 = vector.broadcast %cst_9 : f32 to vector<2x1x128xf32>
    %25 = arith.addf %24, %3 : vector<2x1x128xf32>
    %26 = vector.broadcast %25 : vector<2x1x128xf32> to vector<2x64x128xf32>
    %27 = arith.mulf %23, %26 : vector<2x64x128xf32>
    %28 = vector.broadcast %2 : vector<2x1x128xf32> to vector<2x64x128xf32>
    %29 = arith.addf %27, %28 : vector<2x64x128xf32>
    %30 = vector.shape_cast %29 : vector<2x64x128xf32> to vector<128x128xf32>
    %31 = arith.truncf %30 : vector<128x128xf32> to vector<128x128xbf16>
    %c0_10 = arith.constant 0 : index
    %c0_11 = arith.constant 0 : index
    %32 = vector.load %arg3[%c0_10, %c0_11] : memref<128x384xbf16, #tpu.memory_space<vmem>>, vector<128x384xbf16>
    %cst_12 = arith.constant dense<0.000000e+00> : vector<128x384xf32>
    %33 = tpu.matmul %31, %32, %cst_12 {dimension_numbers = #tpu.dot_dimension_numbers<[1], [0], [0], [1], [0, 0, 1, 1], [], []>} : vector<128x128xbf16>, vector<128x384xbf16>, vector<128x384xf32> -> vector<128x384xf32>
    %c0_13 = arith.constant 0 : index
    %c0_14 = arith.constant 0 : index
    %34 = vector.load %arg4[%c0_13, %c0_14] : memref<1x384xf32, #tpu.memory_space<vmem>>, vector<1x384xf32>
    %35 = vector.broadcast %34 : vector<1x384xf32> to vector<128x384xf32>
    %36 = arith.addf %33, %35 : vector<128x384xf32>
    %37 = vector.shape_cast %36 : vector<128x384xf32> to vector<2x64x384xf32>
    %38 = vector.extract_strided_slice %37 {offsets = [0, 0, 0], sizes = [1, 64, 128], strides = [1, 1, 1]} : vector<2x64x384xf32> to vector<1x64x128xf32>
    %39 = vector.shape_cast %38 : vector<1x64x128xf32> to vector<64x128xf32>
    %40 = vector.extract_strided_slice %37 {offsets = [0, 0, 128], sizes = [1, 64, 128], strides = [1, 1, 1]} : vector<2x64x384xf32> to vector<1x64x128xf32>
    %41 = vector.shape_cast %40 : vector<1x64x128xf32> to vector<64x128xf32>
    %42 = vector.extract_strided_slice %37 {offsets = [0, 0, 256], sizes = [1, 64, 128], strides = [1, 1, 1]} : vector<2x64x384xf32> to vector<1x64x128xf32>
    %43 = vector.shape_cast %42 : vector<1x64x128xf32> to vector<64x128xf32>
    %44 = vector.extract_strided_slice %39 {offsets = [0, 0], sizes = [64, 32], strides = [1, 1]} : vector<64x128xf32> to vector<64x32xf32>
    %45 = arith.truncf %44 : vector<64x32xf32> to vector<64x32xbf16>
    %46 = vector.extract_strided_slice %41 {offsets = [0, 0], sizes = [64, 32], strides = [1, 1]} : vector<64x128xf32> to vector<64x32xf32>
    %47 = arith.truncf %46 : vector<64x32xf32> to vector<64x32xbf16>
    %48 = vector.extract_strided_slice %43 {offsets = [0, 0], sizes = [64, 32], strides = [1, 1]} : vector<64x128xf32> to vector<64x32xf32>
    %49 = arith.truncf %48 : vector<64x32xf32> to vector<64x32xbf16>
    %cst_15 = arith.constant dense<0.000000e+00> : vector<64x64xf32>
    %50 = tpu.matmul %45, %47, %cst_15 {dimension_numbers = #tpu.dot_dimension_numbers<[1], [1], [0], [0], [0, 0, 1, 0], [], []>} : vector<64x32xbf16>, vector<64x32xbf16>, vector<64x64xf32> -> vector<64x64xf32>
    %cst_16 = arith.constant 0.176776692 : f32
    %51 = vector.broadcast %cst_16 : f32 to vector<64x64xf32>
    %52 = arith.mulf %50, %51 : vector<64x64xf32>
    %cst_17 = arith.constant dense<0xFF800000> : vector<64xf32>
    %53 = vector.multi_reduction <maximumf>, %52, %cst_17 [1] : vector<64x64xf32> to vector<64xf32>
    %54 = vector.shape_cast %53 : vector<64xf32> to vector<64x1xf32>
    %55 = vector.broadcast %54 : vector<64x1xf32> to vector<64x64xf32>
    %56 = arith.subf %52, %55 : vector<64x64xf32>
    %57 = math.exp %56 : vector<64x64xf32>
    %cst_18 = arith.constant dense<0.000000e+00> : vector<64xf32>
    %58 = vector.multi_reduction <add>, %57, %cst_18 [1] : vector<64x64xf32> to vector<64xf32>
    %59 = vector.shape_cast %58 : vector<64xf32> to vector<64x1xf32>
    %60 = arith.truncf %57 : vector<64x64xf32> to vector<64x64xbf16>
    %cst_19 = arith.constant dense<0.000000e+00> : vector<64x32xf32>
    %61 = tpu.matmul %60, %49, %cst_19 {dimension_numbers = #tpu.dot_dimension_numbers<[1], [0], [0], [1], [0, 0, 1, 1], [], []>} : vector<64x64xbf16>, vector<64x32xbf16>, vector<64x32xf32> -> vector<64x32xf32>
    %62 = tpu.reciprocal %59 {approx = true} : vector<64x1xf32> -> vector<64x1xf32>
    %63 = vector.broadcast %62 : vector<64x1xf32> to vector<64x32xf32>
    %64 = arith.mulf %61, %63 : vector<64x32xf32>
    %65 = vector.extract_strided_slice %39 {offsets = [0, 32], sizes = [64, 32], strides = [1, 1]} : vector<64x128xf32> to vector<64x32xf32>
    %66 = arith.truncf %65 : vector<64x32xf32> to vector<64x32xbf16>
    %67 = vector.extract_strided_slice %41 {offsets = [0, 32], sizes = [64, 32], strides = [1, 1]} : vector<64x128xf32> to vector<64x32xf32>
    %68 = arith.truncf %67 : vector<64x32xf32> to vector<64x32xbf16>
    %69 = vector.extract_strided_slice %43 {offsets = [0, 32], sizes = [64, 32], strides = [1, 1]} : vector<64x128xf32> to vector<64x32xf32>
    %70 = arith.truncf %69 : vector<64x32xf32> to vector<64x32xbf16>
    %cst_20 = arith.constant dense<0.000000e+00> : vector<64x64xf32>
    %71 = tpu.matmul %66, %68, %cst_20 {dimension_numbers = #tpu.dot_dimension_numbers<[1], [1], [0], [0], [0, 0, 1, 0], [], []>} : vector<64x32xbf16>, vector<64x32xbf16>, vector<64x64xf32> -> vector<64x64xf32>
    %cst_21 = arith.constant 0.176776692 : f32
    %72 = vector.broadcast %cst_21 : f32 to vector<64x64xf32>
    %73 = arith.mulf %71, %72 : vector<64x64xf32>
    %cst_22 = arith.constant dense<0xFF800000> : vector<64xf32>
    %74 = vector.multi_reduction <maximumf>, %73, %cst_22 [1] : vector<64x64xf32> to vector<64xf32>
    %75 = vector.shape_cast %74 : vector<64xf32> to vector<64x1xf32>
    %76 = vector.broadcast %75 : vector<64x1xf32> to vector<64x64xf32>
    %77 = arith.subf %73, %76 : vector<64x64xf32>
    %78 = math.exp %77 : vector<64x64xf32>
    %cst_23 = arith.constant dense<0.000000e+00> : vector<64xf32>
    %79 = vector.multi_reduction <add>, %78, %cst_23 [1] : vector<64x64xf32> to vector<64xf32>
    %80 = vector.shape_cast %79 : vector<64xf32> to vector<64x1xf32>
    %81 = arith.truncf %78 : vector<64x64xf32> to vector<64x64xbf16>
    %cst_24 = arith.constant dense<0.000000e+00> : vector<64x32xf32>
    %82 = tpu.matmul %81, %70, %cst_24 {dimension_numbers = #tpu.dot_dimension_numbers<[1], [0], [0], [1], [0, 0, 1, 1], [], []>} : vector<64x64xbf16>, vector<64x32xbf16>, vector<64x32xf32> -> vector<64x32xf32>
    %83 = tpu.reciprocal %80 {approx = true} : vector<64x1xf32> -> vector<64x1xf32>
    %84 = vector.broadcast %83 : vector<64x1xf32> to vector<64x32xf32>
    %85 = arith.mulf %82, %84 : vector<64x32xf32>
    %86 = vector.extract_strided_slice %39 {offsets = [0, 64], sizes = [64, 32], strides = [1, 1]} : vector<64x128xf32> to vector<64x32xf32>
    %87 = arith.truncf %86 : vector<64x32xf32> to vector<64x32xbf16>
    %88 = vector.extract_strided_slice %41 {offsets = [0, 64], sizes = [64, 32], strides = [1, 1]} : vector<64x128xf32> to vector<64x32xf32>
    %89 = arith.truncf %88 : vector<64x32xf32> to vector<64x32xbf16>
    %90 = vector.extract_strided_slice %43 {offsets = [0, 64], sizes = [64, 32], strides = [1, 1]} : vector<64x128xf32> to vector<64x32xf32>
    %91 = arith.truncf %90 : vector<64x32xf32> to vector<64x32xbf16>
    %cst_25 = arith.constant dense<0.000000e+00> : vector<64x64xf32>
    %92 = tpu.matmul %87, %89, %cst_25 {dimension_numbers = #tpu.dot_dimension_numbers<[1], [1], [0], [0], [0, 0, 1, 0], [], []>} : vector<64x32xbf16>, vector<64x32xbf16>, vector<64x64xf32> -> vector<64x64xf32>
    %cst_26 = arith.constant 0.176776692 : f32
    %93 = vector.broadcast %cst_26 : f32 to vector<64x64xf32>
    %94 = arith.mulf %92, %93 : vector<64x64xf32>
    %cst_27 = arith.constant dense<0xFF800000> : vector<64xf32>
    %95 = vector.multi_reduction <maximumf>, %94, %cst_27 [1] : vector<64x64xf32> to vector<64xf32>
    %96 = vector.shape_cast %95 : vector<64xf32> to vector<64x1xf32>
    %97 = vector.broadcast %96 : vector<64x1xf32> to vector<64x64xf32>
    %98 = arith.subf %94, %97 : vector<64x64xf32>
    %99 = math.exp %98 : vector<64x64xf32>
    %cst_28 = arith.constant dense<0.000000e+00> : vector<64xf32>
    %100 = vector.multi_reduction <add>, %99, %cst_28 [1] : vector<64x64xf32> to vector<64xf32>
    %101 = vector.shape_cast %100 : vector<64xf32> to vector<64x1xf32>
    %102 = arith.truncf %99 : vector<64x64xf32> to vector<64x64xbf16>
    %cst_29 = arith.constant dense<0.000000e+00> : vector<64x32xf32>
    %103 = tpu.matmul %102, %91, %cst_29 {dimension_numbers = #tpu.dot_dimension_numbers<[1], [0], [0], [1], [0, 0, 1, 1], [], []>} : vector<64x64xbf16>, vector<64x32xbf16>, vector<64x32xf32> -> vector<64x32xf32>
    %104 = tpu.reciprocal %101 {approx = true} : vector<64x1xf32> -> vector<64x1xf32>
    %105 = vector.broadcast %104 : vector<64x1xf32> to vector<64x32xf32>
    %106 = arith.mulf %103, %105 : vector<64x32xf32>
    %107 = vector.extract_strided_slice %39 {offsets = [0, 96], sizes = [64, 32], strides = [1, 1]} : vector<64x128xf32> to vector<64x32xf32>
    %108 = arith.truncf %107 : vector<64x32xf32> to vector<64x32xbf16>
    %109 = vector.extract_strided_slice %41 {offsets = [0, 96], sizes = [64, 32], strides = [1, 1]} : vector<64x128xf32> to vector<64x32xf32>
    %110 = arith.truncf %109 : vector<64x32xf32> to vector<64x32xbf16>
    %111 = vector.extract_strided_slice %43 {offsets = [0, 96], sizes = [64, 32], strides = [1, 1]} : vector<64x128xf32> to vector<64x32xf32>
    %112 = arith.truncf %111 : vector<64x32xf32> to vector<64x32xbf16>
    %cst_30 = arith.constant dense<0.000000e+00> : vector<64x64xf32>
    %113 = tpu.matmul %108, %110, %cst_30 {dimension_numbers = #tpu.dot_dimension_numbers<[1], [1], [0], [0], [0, 0, 1, 0], [], []>} : vector<64x32xbf16>, vector<64x32xbf16>, vector<64x64xf32> -> vector<64x64xf32>
    %cst_31 = arith.constant 0.176776692 : f32
    %114 = vector.broadcast %cst_31 : f32 to vector<64x64xf32>
    %115 = arith.mulf %113, %114 : vector<64x64xf32>
    %cst_32 = arith.constant dense<0xFF800000> : vector<64xf32>
    %116 = vector.multi_reduction <maximumf>, %115, %cst_32 [1] : vector<64x64xf32> to vector<64xf32>
    %117 = vector.shape_cast %116 : vector<64xf32> to vector<64x1xf32>
    %118 = vector.broadcast %117 : vector<64x1xf32> to vector<64x64xf32>
    %119 = arith.subf %115, %118 : vector<64x64xf32>
    %120 = math.exp %119 : vector<64x64xf32>
    %cst_33 = arith.constant dense<0.000000e+00> : vector<64xf32>
    %121 = vector.multi_reduction <add>, %120, %cst_33 [1] : vector<64x64xf32> to vector<64xf32>
    %122 = vector.shape_cast %121 : vector<64xf32> to vector<64x1xf32>
    %123 = arith.truncf %120 : vector<64x64xf32> to vector<64x64xbf16>
    %cst_34 = arith.constant dense<0.000000e+00> : vector<64x32xf32>
    %124 = tpu.matmul %123, %112, %cst_34 {dimension_numbers = #tpu.dot_dimension_numbers<[1], [0], [0], [1], [0, 0, 1, 1], [], []>} : vector<64x64xbf16>, vector<64x32xbf16>, vector<64x32xf32> -> vector<64x32xf32>
    %125 = tpu.reciprocal %122 {approx = true} : vector<64x1xf32> -> vector<64x1xf32>
    %126 = vector.broadcast %125 : vector<64x1xf32> to vector<64x32xf32>
    %127 = arith.mulf %124, %126 : vector<64x32xf32>
    %128 = tpu.concatenate %64, %85, %106, %127 in 1 : vector<64x32xf32>, vector<64x32xf32>, vector<64x32xf32>, vector<64x32xf32> -> vector<64x128xf32>
    %129 = vector.extract_strided_slice %37 {offsets = [1, 0, 0], sizes = [1, 64, 128], strides = [1, 1, 1]} : vector<2x64x384xf32> to vector<1x64x128xf32>
    %130 = vector.shape_cast %129 : vector<1x64x128xf32> to vector<64x128xf32>
    %131 = vector.extract_strided_slice %37 {offsets = [1, 0, 128], sizes = [1, 64, 128], strides = [1, 1, 1]} : vector<2x64x384xf32> to vector<1x64x128xf32>
    %132 = vector.shape_cast %131 : vector<1x64x128xf32> to vector<64x128xf32>
    %133 = vector.extract_strided_slice %37 {offsets = [1, 0, 256], sizes = [1, 64, 128], strides = [1, 1, 1]} : vector<2x64x384xf32> to vector<1x64x128xf32>
    %134 = vector.shape_cast %133 : vector<1x64x128xf32> to vector<64x128xf32>
    %135 = vector.extract_strided_slice %130 {offsets = [0, 0], sizes = [64, 32], strides = [1, 1]} : vector<64x128xf32> to vector<64x32xf32>
    %136 = arith.truncf %135 : vector<64x32xf32> to vector<64x32xbf16>
    %137 = vector.extract_strided_slice %132 {offsets = [0, 0], sizes = [64, 32], strides = [1, 1]} : vector<64x128xf32> to vector<64x32xf32>
    %138 = arith.truncf %137 : vector<64x32xf32> to vector<64x32xbf16>
    %139 = vector.extract_strided_slice %134 {offsets = [0, 0], sizes = [64, 32], strides = [1, 1]} : vector<64x128xf32> to vector<64x32xf32>
    %140 = arith.truncf %139 : vector<64x32xf32> to vector<64x32xbf16>
    %cst_35 = arith.constant dense<0.000000e+00> : vector<64x64xf32>
    %141 = tpu.matmul %136, %138, %cst_35 {dimension_numbers = #tpu.dot_dimension_numbers<[1], [1], [0], [0], [0, 0, 1, 0], [], []>} : vector<64x32xbf16>, vector<64x32xbf16>, vector<64x64xf32> -> vector<64x64xf32>
    %cst_36 = arith.constant 0.176776692 : f32
    %142 = vector.broadcast %cst_36 : f32 to vector<64x64xf32>
    %143 = arith.mulf %141, %142 : vector<64x64xf32>
    %cst_37 = arith.constant dense<0xFF800000> : vector<64xf32>
    %144 = vector.multi_reduction <maximumf>, %143, %cst_37 [1] : vector<64x64xf32> to vector<64xf32>
    %145 = vector.shape_cast %144 : vector<64xf32> to vector<64x1xf32>
    %146 = vector.broadcast %145 : vector<64x1xf32> to vector<64x64xf32>
    %147 = arith.subf %143, %146 : vector<64x64xf32>
    %148 = math.exp %147 : vector<64x64xf32>
    %cst_38 = arith.constant dense<0.000000e+00> : vector<64xf32>
    %149 = vector.multi_reduction <add>, %148, %cst_38 [1] : vector<64x64xf32> to vector<64xf32>
    %150 = vector.shape_cast %149 : vector<64xf32> to vector<64x1xf32>
    %151 = arith.truncf %148 : vector<64x64xf32> to vector<64x64xbf16>
    %cst_39 = arith.constant dense<0.000000e+00> : vector<64x32xf32>
    %152 = tpu.matmul %151, %140, %cst_39 {dimension_numbers = #tpu.dot_dimension_numbers<[1], [0], [0], [1], [0, 0, 1, 1], [], []>} : vector<64x64xbf16>, vector<64x32xbf16>, vector<64x32xf32> -> vector<64x32xf32>
    %153 = tpu.reciprocal %150 {approx = true} : vector<64x1xf32> -> vector<64x1xf32>
    %154 = vector.broadcast %153 : vector<64x1xf32> to vector<64x32xf32>
    %155 = arith.mulf %152, %154 : vector<64x32xf32>
    %156 = vector.extract_strided_slice %130 {offsets = [0, 32], sizes = [64, 32], strides = [1, 1]} : vector<64x128xf32> to vector<64x32xf32>
    %157 = arith.truncf %156 : vector<64x32xf32> to vector<64x32xbf16>
    %158 = vector.extract_strided_slice %132 {offsets = [0, 32], sizes = [64, 32], strides = [1, 1]} : vector<64x128xf32> to vector<64x32xf32>
    %159 = arith.truncf %158 : vector<64x32xf32> to vector<64x32xbf16>
    %160 = vector.extract_strided_slice %134 {offsets = [0, 32], sizes = [64, 32], strides = [1, 1]} : vector<64x128xf32> to vector<64x32xf32>
    %161 = arith.truncf %160 : vector<64x32xf32> to vector<64x32xbf16>
    %cst_40 = arith.constant dense<0.000000e+00> : vector<64x64xf32>
    %162 = tpu.matmul %157, %159, %cst_40 {dimension_numbers = #tpu.dot_dimension_numbers<[1], [1], [0], [0], [0, 0, 1, 0], [], []>} : vector<64x32xbf16>, vector<64x32xbf16>, vector<64x64xf32> -> vector<64x64xf32>
    %cst_41 = arith.constant 0.176776692 : f32
    %163 = vector.broadcast %cst_41 : f32 to vector<64x64xf32>
    %164 = arith.mulf %162, %163 : vector<64x64xf32>
    %cst_42 = arith.constant dense<0xFF800000> : vector<64xf32>
    %165 = vector.multi_reduction <maximumf>, %164, %cst_42 [1] : vector<64x64xf32> to vector<64xf32>
    %166 = vector.shape_cast %165 : vector<64xf32> to vector<64x1xf32>
    %167 = vector.broadcast %166 : vector<64x1xf32> to vector<64x64xf32>
    %168 = arith.subf %164, %167 : vector<64x64xf32>
    %169 = math.exp %168 : vector<64x64xf32>
    %cst_43 = arith.constant dense<0.000000e+00> : vector<64xf32>
    %170 = vector.multi_reduction <add>, %169, %cst_43 [1] : vector<64x64xf32> to vector<64xf32>
    %171 = vector.shape_cast %170 : vector<64xf32> to vector<64x1xf32>
    %172 = arith.truncf %169 : vector<64x64xf32> to vector<64x64xbf16>
    %cst_44 = arith.constant dense<0.000000e+00> : vector<64x32xf32>
    %173 = tpu.matmul %172, %161, %cst_44 {dimension_numbers = #tpu.dot_dimension_numbers<[1], [0], [0], [1], [0, 0, 1, 1], [], []>} : vector<64x64xbf16>, vector<64x32xbf16>, vector<64x32xf32> -> vector<64x32xf32>
    %174 = tpu.reciprocal %171 {approx = true} : vector<64x1xf32> -> vector<64x1xf32>
    %175 = vector.broadcast %174 : vector<64x1xf32> to vector<64x32xf32>
    %176 = arith.mulf %173, %175 : vector<64x32xf32>
    %177 = vector.extract_strided_slice %130 {offsets = [0, 64], sizes = [64, 32], strides = [1, 1]} : vector<64x128xf32> to vector<64x32xf32>
    %178 = arith.truncf %177 : vector<64x32xf32> to vector<64x32xbf16>
    %179 = vector.extract_strided_slice %132 {offsets = [0, 64], sizes = [64, 32], strides = [1, 1]} : vector<64x128xf32> to vector<64x32xf32>
    %180 = arith.truncf %179 : vector<64x32xf32> to vector<64x32xbf16>
    %181 = vector.extract_strided_slice %134 {offsets = [0, 64], sizes = [64, 32], strides = [1, 1]} : vector<64x128xf32> to vector<64x32xf32>
    %182 = arith.truncf %181 : vector<64x32xf32> to vector<64x32xbf16>
    %cst_45 = arith.constant dense<0.000000e+00> : vector<64x64xf32>
    %183 = tpu.matmul %178, %180, %cst_45 {dimension_numbers = #tpu.dot_dimension_numbers<[1], [1], [0], [0], [0, 0, 1, 0], [], []>} : vector<64x32xbf16>, vector<64x32xbf16>, vector<64x64xf32> -> vector<64x64xf32>
    %cst_46 = arith.constant 0.176776692 : f32
    %184 = vector.broadcast %cst_46 : f32 to vector<64x64xf32>
    %185 = arith.mulf %183, %184 : vector<64x64xf32>
    %cst_47 = arith.constant dense<0xFF800000> : vector<64xf32>
    %186 = vector.multi_reduction <maximumf>, %185, %cst_47 [1] : vector<64x64xf32> to vector<64xf32>
    %187 = vector.shape_cast %186 : vector<64xf32> to vector<64x1xf32>
    %188 = vector.broadcast %187 : vector<64x1xf32> to vector<64x64xf32>
    %189 = arith.subf %185, %188 : vector<64x64xf32>
    %190 = math.exp %189 : vector<64x64xf32>
    %cst_48 = arith.constant dense<0.000000e+00> : vector<64xf32>
    %191 = vector.multi_reduction <add>, %190, %cst_48 [1] : vector<64x64xf32> to vector<64xf32>
    %192 = vector.shape_cast %191 : vector<64xf32> to vector<64x1xf32>
    %193 = arith.truncf %190 : vector<64x64xf32> to vector<64x64xbf16>
    %cst_49 = arith.constant dense<0.000000e+00> : vector<64x32xf32>
    %194 = tpu.matmul %193, %182, %cst_49 {dimension_numbers = #tpu.dot_dimension_numbers<[1], [0], [0], [1], [0, 0, 1, 1], [], []>} : vector<64x64xbf16>, vector<64x32xbf16>, vector<64x32xf32> -> vector<64x32xf32>
    %195 = tpu.reciprocal %192 {approx = true} : vector<64x1xf32> -> vector<64x1xf32>
    %196 = vector.broadcast %195 : vector<64x1xf32> to vector<64x32xf32>
    %197 = arith.mulf %194, %196 : vector<64x32xf32>
    %198 = vector.extract_strided_slice %130 {offsets = [0, 96], sizes = [64, 32], strides = [1, 1]} : vector<64x128xf32> to vector<64x32xf32>
    %199 = arith.truncf %198 : vector<64x32xf32> to vector<64x32xbf16>
    %200 = vector.extract_strided_slice %132 {offsets = [0, 96], sizes = [64, 32], strides = [1, 1]} : vector<64x128xf32> to vector<64x32xf32>
    %201 = arith.truncf %200 : vector<64x32xf32> to vector<64x32xbf16>
    %202 = vector.extract_strided_slice %134 {offsets = [0, 96], sizes = [64, 32], strides = [1, 1]} : vector<64x128xf32> to vector<64x32xf32>
    %203 = arith.truncf %202 : vector<64x32xf32> to vector<64x32xbf16>
    %cst_50 = arith.constant dense<0.000000e+00> : vector<64x64xf32>
    %204 = tpu.matmul %199, %201, %cst_50 {dimension_numbers = #tpu.dot_dimension_numbers<[1], [1], [0], [0], [0, 0, 1, 0], [], []>} : vector<64x32xbf16>, vector<64x32xbf16>, vector<64x64xf32> -> vector<64x64xf32>
    %cst_51 = arith.constant 0.176776692 : f32
    %205 = vector.broadcast %cst_51 : f32 to vector<64x64xf32>
    %206 = arith.mulf %204, %205 : vector<64x64xf32>
    %cst_52 = arith.constant dense<0xFF800000> : vector<64xf32>
    %207 = vector.multi_reduction <maximumf>, %206, %cst_52 [1] : vector<64x64xf32> to vector<64xf32>
    %208 = vector.shape_cast %207 : vector<64xf32> to vector<64x1xf32>
    %209 = vector.broadcast %208 : vector<64x1xf32> to vector<64x64xf32>
    %210 = arith.subf %206, %209 : vector<64x64xf32>
    %211 = math.exp %210 : vector<64x64xf32>
    %cst_53 = arith.constant dense<0.000000e+00> : vector<64xf32>
    %212 = vector.multi_reduction <add>, %211, %cst_53 [1] : vector<64x64xf32> to vector<64xf32>
    %213 = vector.shape_cast %212 : vector<64xf32> to vector<64x1xf32>
    %214 = arith.truncf %211 : vector<64x64xf32> to vector<64x64xbf16>
    %cst_54 = arith.constant dense<0.000000e+00> : vector<64x32xf32>
    %215 = tpu.matmul %214, %203, %cst_54 {dimension_numbers = #tpu.dot_dimension_numbers<[1], [0], [0], [1], [0, 0, 1, 1], [], []>} : vector<64x64xbf16>, vector<64x32xbf16>, vector<64x32xf32> -> vector<64x32xf32>
    %216 = tpu.reciprocal %213 {approx = true} : vector<64x1xf32> -> vector<64x1xf32>
    %217 = vector.broadcast %216 : vector<64x1xf32> to vector<64x32xf32>
    %218 = arith.mulf %215, %217 : vector<64x32xf32>
    %219 = tpu.concatenate %155, %176, %197, %218 in 1 : vector<64x32xf32>, vector<64x32xf32>, vector<64x32xf32>, vector<64x32xf32> -> vector<64x128xf32>
    %220 = tpu.concatenate %128, %219 in 0 : vector<64x128xf32>, vector<64x128xf32> -> vector<128x128xf32>
    %221 = arith.truncf %220 : vector<128x128xf32> to vector<128x128xbf16>
    %c0_55 = arith.constant 0 : index
    %c0_56 = arith.constant 0 : index
    %222 = vector.load %arg5[%c0_55, %c0_56] : memref<128x128xbf16, #tpu.memory_space<vmem>>, vector<128x128xbf16>
    %cst_57 = arith.constant dense<0.000000e+00> : vector<128x128xf32>
    %223 = tpu.matmul %221, %222, %cst_57 {dimension_numbers = #tpu.dot_dimension_numbers<[1], [0], [0], [1], [0, 0, 1, 1], [], []>} : vector<128x128xbf16>, vector<128x128xbf16>, vector<128x128xf32> -> vector<128x128xf32>
    %c0_58 = arith.constant 0 : index
    %c0_59 = arith.constant 0 : index
    %224 = vector.load %arg6[%c0_58, %c0_59] : memref<1x128xf32, #tpu.memory_space<vmem>>, vector<1x128xf32>
    %225 = vector.broadcast %224 : vector<1x128xf32> to vector<128x128xf32>
    %226 = arith.addf %223, %225 : vector<128x128xf32>
    %227 = vector.shape_cast %226 : vector<128x128xf32> to vector<2x64x128xf32>
    %228 = vector.broadcast %4 : vector<2x1x128xf32> to vector<2x64x128xf32>
    %229 = arith.mulf %228, %227 : vector<2x64x128xf32>
    %230 = arith.addf %0, %229 : vector<2x64x128xf32>
    %cst_60 = arith.constant dense<0.000000e+00> : vector<2x64xf32>
    %231 = vector.multi_reduction <add>, %230, %cst_60 [2] : vector<2x64x128xf32> to vector<2x64xf32>
    %232 = vector.shape_cast %231 : vector<2x64xf32> to vector<2x64x1xf32>
    %cst_61 = arith.constant 1.280000e+02 : f32
    %233 = vector.broadcast %cst_61 : f32 to vector<2x64x1xf32>
    %234 = arith.divf %232, %233 : vector<2x64x1xf32>
    %235 = vector.broadcast %234 : vector<2x64x1xf32> to vector<2x64x128xf32>
    %236 = arith.subf %230, %235 : vector<2x64x128xf32>
    %237 = arith.mulf %236, %236 : vector<2x64x128xf32>
    %cst_62 = arith.constant dense<0.000000e+00> : vector<2x64xf32>
    %238 = vector.multi_reduction <add>, %237, %cst_62 [2] : vector<2x64x128xf32> to vector<2x64xf32>
    %239 = vector.shape_cast %238 : vector<2x64xf32> to vector<2x64x1xf32>
    %cst_63 = arith.constant 1.280000e+02 : f32
    %240 = vector.broadcast %cst_63 : f32 to vector<2x64x1xf32>
    %241 = arith.divf %239, %240 : vector<2x64x1xf32>
    %cst_64 = arith.constant 9.99999997E-7 : f32
    %242 = vector.broadcast %cst_64 : f32 to vector<2x64x1xf32>
    %243 = arith.addf %241, %242 : vector<2x64x1xf32>
    %244 = math.rsqrt %243 : vector<2x64x1xf32>
    %245 = vector.broadcast %244 : vector<2x64x1xf32> to vector<2x64x128xf32>
    %246 = arith.mulf %236, %245 : vector<2x64x128xf32>
    %cst_65 = arith.constant 1.000000e+00 : f32
    %247 = vector.broadcast %cst_65 : f32 to vector<2x1x128xf32>
    %248 = arith.addf %247, %6 : vector<2x1x128xf32>
    %249 = vector.broadcast %248 : vector<2x1x128xf32> to vector<2x64x128xf32>
    %250 = arith.mulf %246, %249 : vector<2x64x128xf32>
    %251 = vector.broadcast %5 : vector<2x1x128xf32> to vector<2x64x128xf32>
    %252 = arith.addf %250, %251 : vector<2x64x128xf32>
    %253 = vector.shape_cast %252 : vector<2x64x128xf32> to vector<128x128xf32>
    %254 = arith.truncf %253 : vector<128x128xf32> to vector<128x128xbf16>
    %c0_66 = arith.constant 0 : index
    %c0_67 = arith.constant 0 : index
    %255 = vector.load %arg7[%c0_66, %c0_67] : memref<128x512xbf16, #tpu.memory_space<vmem>>, vector<128x512xbf16>
    %cst_68 = arith.constant dense<0.000000e+00> : vector<128x512xf32>
    %256 = tpu.matmul %254, %255, %cst_68 {dimension_numbers = #tpu.dot_dimension_numbers<[1], [0], [0], [1], [0, 0, 1, 1], [], []>} : vector<128x128xbf16>, vector<128x512xbf16>, vector<128x512xf32> -> vector<128x512xf32>
    %c0_69 = arith.constant 0 : index
    %c0_70 = arith.constant 0 : index
    %257 = vector.load %arg8[%c0_69, %c0_70] : memref<1x512xf32, #tpu.memory_space<vmem>>, vector<1x512xf32>
    %258 = vector.broadcast %257 : vector<1x512xf32> to vector<128x512xf32>
    %259 = arith.addf %256, %258 : vector<128x512xf32>
    %cst_71 = arith.constant 5.000000e-01 : f32
    %260 = vector.broadcast %cst_71 : f32 to vector<128x512xf32>
    %261 = arith.mulf %260, %259 : vector<128x512xf32>
    %cst_72 = arith.constant 4.471500e-02 : f32
    %262 = vector.broadcast %cst_72 : f32 to vector<128x512xf32>
    %263 = arith.mulf %262, %259 : vector<128x512xf32>
    %264 = arith.mulf %263, %259 : vector<128x512xf32>
    %265 = arith.mulf %264, %259 : vector<128x512xf32>
    %266 = arith.addf %259, %265 : vector<128x512xf32>
    %cst_73 = arith.constant 0.797884583 : f32
    %267 = vector.broadcast %cst_73 : f32 to vector<128x512xf32>
    %268 = arith.mulf %267, %266 : vector<128x512xf32>
    %269 = math.tanh %268 : vector<128x512xf32>
    %cst_74 = arith.constant 1.000000e+00 : f32
    %270 = vector.broadcast %cst_74 : f32 to vector<128x512xf32>
    %271 = arith.addf %270, %269 : vector<128x512xf32>
    %272 = arith.mulf %261, %271 : vector<128x512xf32>
    %273 = arith.truncf %272 : vector<128x512xf32> to vector<128x512xbf16>
    %c0_75 = arith.constant 0 : index
    %c0_76 = arith.constant 0 : index
    %274 = vector.load %arg9[%c0_75, %c0_76] : memref<512x128xbf16, #tpu.memory_space<vmem>>, vector<512x128xbf16>
    %cst_77 = arith.constant dense<0.000000e+00> : vector<128x128xf32>
    %275 = tpu.matmul %273, %274, %cst_77 {dimension_numbers = #tpu.dot_dimension_numbers<[1], [0], [0], [1], [0, 0, 1, 1], [], []>} : vector<128x512xbf16>, vector<512x128xbf16>, vector<128x128xf32> -> vector<128x128xf32>
    %c0_78 = arith.constant 0 : index
    %c0_79 = arith.constant 0 : index
    %276 = vector.load %arg10[%c0_78, %c0_79] : memref<1x128xf32, #tpu.memory_space<vmem>>, vector<1x128xf32>
    %277 = vector.broadcast %276 : vector<1x128xf32> to vector<128x128xf32>
    %278 = arith.addf %275, %277 : vector<128x128xf32>
    %279 = vector.shape_cast %278 : vector<128x128xf32> to vector<2x64x128xf32>
    %280 = vector.broadcast %7 : vector<2x1x128xf32> to vector<2x64x128xf32>
    %281 = arith.mulf %280, %279 : vector<2x64x128xf32>
    %282 = arith.addf %230, %281 : vector<2x64x128xf32>
    %c0_80 = arith.constant 0 : index
    %c0_81 = arith.constant 0 : index
    %c0_82 = arith.constant 0 : index
    %283 = vector.load %arg11[%c0_80, %c0_81, %c0_82] : memref<2x64x128xf32, #tpu.memory_space<vmem>>, vector<2x64x128xf32>
    tpu.vector_store %arg11[%c0_80, %c0_81, %c0_82], %282 {strides = array<i32>} : memref<2x64x128xf32, #tpu.memory_space<vmem>>, vector<2x64x128xf32>,
    return
  }
  func.func @transform_0(%arg0: i32) -> (i32, i32, i32) {
    %c0_i32 = arith.constant 0 : i32
    %c0_i32_0 = arith.constant 0 : i32
    %c0_i32_1 = arith.constant 0 : i32
    return %arg0, %c0_i32, %c0_i32_0 : i32, i32, i32
  }
  func.func @transform_1(%arg0: i32) -> (i32, i32, i32) {
    %c0_i32 = arith.constant 0 : i32
    %c0_i32_0 = arith.constant 0 : i32
    %c0_i32_1 = arith.constant 0 : i32
    return %arg0, %c0_i32, %c0_i32_0 : i32, i32, i32
  }
  func.func @transform_2(%arg0: i32) -> (i32, i32) {
    %c0_i32 = arith.constant 0 : i32
    %c0_i32_0 = arith.constant 0 : i32
    %c0_i32_1 = arith.constant 0 : i32
    return %c0_i32, %c0_i32_0 : i32, i32
  }
  func.func @transform_3(%arg0: i32) -> (i32, i32) {
    %c0_i32 = arith.constant 0 : i32
    %c0_i32_0 = arith.constant 0 : i32
    %c0_i32_1 = arith.constant 0 : i32
    return %c0_i32, %c0_i32_0 : i32, i32
  }
  func.func @transform_4(%arg0: i32) -> (i32, i32) {
    %c0_i32 = arith.constant 0 : i32
    %c0_i32_0 = arith.constant 0 : i32
    %c0_i32_1 = arith.constant 0 : i32
    return %c0_i32, %c0_i32_0 : i32, i32
  }
  func.func @transform_5(%arg0: i32) -> (i32, i32) {
    %c0_i32 = arith.constant 0 : i32
    %c0_i32_0 = arith.constant 0 : i32
    %c0_i32_1 = arith.constant 0 : i32
    return %c0_i32, %c0_i32_0 : i32, i32
  }
  func.func @transform_6(%arg0: i32) -> (i32, i32) {
    %c0_i32 = arith.constant 0 : i32
    %c0_i32_0 = arith.constant 0 : i32
    %c0_i32_1 = arith.constant 0 : i32
    return %c0_i32, %c0_i32_0 : i32, i32
  }
  func.func @transform_7(%arg0: i32) -> (i32, i32) {
    %c0_i32 = arith.constant 0 : i32
    %c0_i32_0 = arith.constant 0 : i32
    %c0_i32_1 = arith.constant 0 : i32
    return %c0_i32, %c0_i32_0 : i32, i32
  }
  func.func @transform_8(%arg0: i32) -> (i32, i32) {
    %c0_i32 = arith.constant 0 : i32
    %c0_i32_0 = arith.constant 0 : i32
    %c0_i32_1 = arith.constant 0 : i32
    return %c0_i32, %c0_i32_0 : i32, i32
  }
  func.func @transform_9(%arg0: i32) -> (i32, i32) {
    %c0_i32 = arith.constant 0 : i32
    %c0_i32_0 = arith.constant 0 : i32
    %c0_i32_1 = arith.constant 0 : i32
    return %c0_i32, %c0_i32_0 : i32, i32
  }
  func.func @transform_10(%arg0: i32) -> (i32, i32, i32) {
    %c0_i32 = arith.constant 0 : i32
    %c0_i32_0 = arith.constant 0 : i32
    %c0_i32_1 = arith.constant 0 : i32
    return %arg0, %c0_i32, %c0_i32_0 : i32, i32, i32
  }
}

</mosaic_0001>

<bundles_post_ra>
// kernel: dit_block_forward.1
= control target key start
LH: loop header
LB: loop body
LE: loop exit
PB: predicated region body
PF: predicated region fallthrough
CT: control target
= control target key end

     0   :  { %s9979_s0 = inlined_call_operand.vmem [shape: f32[4,64,128], index: 0, kind: input, shape index: {}]   ;;  %s9980_s1 = inlined_call_operand.vmem [shape: f32[4,6,128], index: 1, kind: input, shape index: {}]   ;;  %s9981_s2 = inlined_call_operand.hbm [shape: bf16[128,384], index: 2, kind: input, shape index: {}]   ;;  %s9982_s3 = inlined_call_operand.vmem [shape: f32[1,384], index: 3, kind: input, shape index: {}]   ;;  %s9983_s4 = inlined_call_operand.vmem [shape: bf16[128,128], index: 4, kind: input, shape index: {}]   ;;  %s9984_s5 = inlined_call_operand.vmem [shape: f32[1,128], index: 5, kind: input, shape index: {}]   ;;  %s9985_s6 = inlined_call_operand.vmem [shape: bf16[128,512], index: 6, kind: input, shape index: {}]   ;;  %s9986_s7 = inlined_call_operand.vmem [shape: f32[1,512], index: 7, kind: input, shape index: {}]   ;;  %s9987_s8 = inlined_call_operand.vmem [shape: bf16[512,128], index: 8, kind: input, shape index: {}]   ;;  %s9988_s9 = inlined_call_operand.vmem [shape: f32[1,128], index: 9, kind: input, shape index: {}]   ;;  %s9989_s10 = inlined_call_operand.hbm [shape: f32[4,64,128], index: 10, kind: output, shape index: {}]  }
   0x1   :  { %10014 = sst [smem:[#allocation24_spill]] %s9979_s0 }
   0x2   :  { %10015 = sst [smem:[#allocation25_spill]] %s9980_s1 }
   0x3   :  { %15 = vsyncpa [#allocation3], 0 }
   0x4   :  { %16 = vsyncpa [#allocation4], 0 }
   0x5   :  { %18 = vsyncpa [#allocation4 + $0x1], 0  ;;  %s6644_s13 = smov 0   ;;  %s6646_s14 = smov 0  }
   0x6   :  { %s6648_s15 = smov 0   ;;  %s6650_s16 = smov 0  }
   0x7 LB: > { %s6665_s17 = sadd.s32 4294967295, %s6578_s16   ;;  %s5259_s18 = sadd.s32 4294967294, %s6578_s16   ;;  %s6578_s16 = sphi %s6650_s16, %s10110_s16   ;;  %s6574_s15 = sphi %s6648_s15, %s10109_s15   ;;  %s6570_s14 = sphi %s6646_s14, %s10108_s14   ;;  %s6566_s13 = sphi %s6644_s13, %s10107_s13  }
   0x8   : > { %s6669_s19 = sadd.s32 1, %s6578_s16   ;;  %s251_s20 = sadd.s32 1, %s6574_s15 }
   0x9   : > { %s248_s21 = ssub.s32 %s6578_s16, %s6669_s19  ;;  %p261_p0 = scmp.ne.s32.totalorder %s6574_s15, %s6570_s14 }
   0xa   : > { %p249_p1 = scmp.eq.s32.totalorder %s248_s21, 0  ;;  %p262_p2 = scmp.eq.s32.totalorder %s6665_s17, 1 }
   0xb   : > { %p267_p3 = scmp.ne.s32.totalorder %s6570_s14, %s6566_s13  ;;  %p268_p4 = scmp.eq.s32.totalorder %s5259_s18, 1 }
   0xc   : > { %s6680_s22 = scalar_select %p249_p1, %s6574_s15, %s251_s20  }
   0xd   : > { %p6682_p5 = por %p262_p2, %p261_p0  ;;  %p6686_p6 = por %p268_p4, %p267_p3 }
   0xe   : > { %p5260_p7 = scmp.ge.s32.totalorder %s6578_s16, 1  ;;  %p275_p8 = scmp.lt.s32.totalorder %s6578_s16, 3 }
   0xf   : > { %p5846_p9 = scmp.eq.s32.totalorder %s6665_s17, 0  ;;  %s286_s27 = sshll.u32 %s9981_s2, 4  ;;  %s287_s27 = int_to_ptr.hbm [resolvable:$true] %s286_s27 }
  0x10   : > { %p276_p10 = pnand %p5260_p7, %p275_p8  ;;  %s6580_s28 = smov [#allocation2]  }
  0x11   : > { %s288_s29 = sshll.u32 %s6580_s28, 4  ;;  %s6581_s30 = smov 192   ;;  %s289_s29 = int_to_ptr.vmem [resolvable:$true] %s288_s29 }
  0x12   : > { %p5838_p11 = pneg %p276_p10  ;;  %s6582_s11 = smov 12  }
  0x13   : > { %344 = sbr.rel (%p276_p10) target bundleno = 2496 (0x9c0), region = 60 }
  0x14   : > { %p5839_p12 = pnand %p5846_p9, %p5838_p11 }
  0x16   : > { %5841 = dma.hbm_to_vmem [thread:$0]  (!%p5839_p12), %s287_s27, 3072, %s289_s29, [#allocation3], %s6581_s30, %s6581_s30, %s6582_s11  }
  0x18   : > { %6557 = dma.done.wait (%p5846_p9), [#allocation3], 3072  }
  0x19   : > { %6559 = vsyncadd (%p5846_p9), [#allocation3], 4294964224  ;;  %s5266_s12 = sshll.u32 %s6665_s17, 1  ;;  %s10018_s0 = sld [smem:[#allocation24_spill]]  ;;  %v6583_v12 = vmov 128.0  }
  0x1a   : > { %p390_p13 = scmp.lt.s32.totalorder %s5266_s12, 3  ;;  %6012 = vrcp.f32 %v6583_v12  ;;  %s10020_s1 = sld [smem:[#allocation25_spill]] }
  0x1b   : > { %s6586_s20 = smov 32   ;;  %s386_s21 = sand.u32 1, %s6570_s14  }
  0x1c   : > { %s10112_s12 = smov (!%p390_p13, %s5266_s12), 3 }
  0x1d   : > { %s5725_s18 = sshll.u32 %s10112_s12, 6  ;;  %s5270_s26 = sshll.u32 %s10112_s12, 3 }
  0x1e   : > { %s6584_s12 = smov 64  }
  0x1f   : > { %s6709_s25 = scalar_lea.vmem %s10018_s0, %s5725_s18  ;;  %s6585_s18 = smov 96  }
  0x20   : > { %v6712_v0 = vld [vmem:[%s6709_s25 + $0x20] sm:$0xff]  ;;  %v6715_v1 = vld [vmem:[%s6709_s25 + $0x10] sm:$0xff]  ;;  %v6721_v3 = vld [vmem:[%s6709_s25 + $0x28] sm:$0xff]  ;;  %v6013_v13 = vpop.eup %6012  ;;  %s6850_s29 = scalar_lea.vmem %s10020_s1, %s5270_s26  ;;  %s5265_s26 = sshll.u32 %s386_s21, 7 }
  0x21   : > { %v404_v2 = vld [vmem:[%s6709_s25] sm:$0xff]  ;;  %430 = vadd.xlane.f32.xlu2 %v6712_v0  ;;  %426 = vadd.xlane.f32.xlu1 %v6715_v1  ;;  %v407_v4 = vld [vmem:[%s6709_s25 + $0x18] sm:$0xff]  ;;  %v405_v5 = vld [vmem:[%s6709_s25 + $0x8] sm:$0xff]  ;;  %v455_v14 = vmul.f32 128.0, %v6013_v13  ;;  %vm459_vm0 = vweird.f32 %v6013_v13  ;;  %s9878_s0 = scalar_lea.vmem [#allocation5], %s5265_s26  ;;  %s6532_s26 = scalar_lea.hbm %s9989_s10, 256 }
  0x22   : > { %422 = vadd.xlane.f32.xlu0 %v404_v2  ;;  %v410_v6 = vld [vmem:[%s6709_s25 + $0x30] sm:$0xff]  ;;  %v6728_v7 = vld [vmem:[%s6709_s25 + $0x40] sm:$0xff]  ;;  %v6731_v8 = vld [vmem:[%s6709_s25 + $0x38] sm:$0xff]  ;;  %s5170_s28 = sshll.u32 %s9878_s0, 4  ;;  %s5171_s28 = int_to_ptr.vmem [resolvable:$true] %s5170_s28 }
  0x23   : > { %v413_v9 = vld [vmem:[%s6709_s25 + $0x48] sm:$0xff]  ;;  %v414_v10 = vld [vmem:[%s6709_s25 + $0x50] sm:$0xff]  ;;  %v6738_v11 = vld [vmem:[%s6709_s25 + $0x60] sm:$0xff]  ;;  %v456_v15 = vsub.f32 1.0, %v455_v14 }
  0x24   : > { %v6757_v33 = vld [vmem:[%s6709_s25 + $0x68] sm:$0xff]  ;;  %v6770_v42 = vld [vmem:[%s6709_s25 + $0x70] sm:$0xff]  ;;  %v6773_v43 = vld [vmem:[%s6709_s25 + $0x58] sm:$0xff] }
  0x25   : > { %v457_v16 = vmul.f32 %v6013_v13, %v456_v15  ;;  %v6805_v60 = vld [vmem:[%s6709_s25 + $0x78] sm:$0xff] }
  0x26   : > { %v5749_v14 = vld [vmem:[#allocation2 + $0xb8] sm:$0xf0] }
  0x27   : > { %v458_v17 = vadd.f32 %v6013_v13, %v457_v16 }
  0x29   : > { %432 = vadd.xlane.f32.xlu2 %v6721_v3  ;;  %428 = vadd.xlane.f32.xlu1 %v407_v4  ;;  %v6741_v18 = vsel %vm459_vm0, %v6013_v13, %v458_v17  ;;  %v5365_v13 = vld [vmem:[#allocation2 + $0xb0] sm:$0xf] }
  0x2a   : > { %424 = vadd.xlane.f32.xlu0 %v405_v5  ;;  %10019 = vst [vmem:[#allocation8_spill] sm:$0xff] %v6741_v18  ;;  %v5366_v16 = vor.u32 %v5749_v14, %v5365_v13  ;;  %v5345_v17 = vld [vmem:[#allocation2 + $0x90] sm:$0xf] }
  0x2c   : > { %1061 = vmatpush.bf16.msra.mxu2 %v5366_v16  ;;  %5824 = vmatpush.bf16.msra.mxu3 %v5366_v16  ;;  %v5730_v16 = vld [vmem:[#allocation2 + $0x20] sm:$0xf0] }
  0x31   : > { %434 = vadd.xlane.f32.xlu2 %v410_v6  ;;  %438 = vadd.xlane.f32.xlu1 %v6728_v7 }
  0x32   : > { %436 = vadd.xlane.f32.xlu0 %v6731_v8 }
  0x39   : > { %440 = vadd.xlane.f32.xlu2 %v413_v9 }
  0x3a   : > { %442 = vadd.xlane.f32.xlu0 %v414_v10 }
  0x41   : > { %446 = vadd.xlane.f32.xlu2 %v6738_v11 }
  0x94   : > { %v431_v19 = vpop.xlane.xlu2 %430  ;;  %v427_v20 = vpop.xlane.xlu1 %426 }
  0x95   : > { %v423_v21 = vpop.xlane.xlu0 %422  ;;  %v465_v39 = vmul.f32 %v6741_v18, %v431_v19  ;;  %v463_v40 = vmul.f32 %v6741_v18, %v427_v20  ;;  %v5745_v19 = vld [vmem:[#allocation2 + $0x98] sm:$0xf0] }
  0x96   : > { %v461_v22 = vmul.f32 %v6741_v18, %v423_v21  ;;  %v5346_v20 = vor.u32 %v5745_v19, %v5345_v17  ;;  %v5347_v21 = vld [vmem:[#allocation2 + $0x9c] sm:$0xf0]  ;;  %v5729_v17 = vld [vmem:[#allocation2 + $0x1c] sm:$0xf] }
  0x97   : > { %v6778_v45 = vsub.f32 %v6712_v0, %v465_v39  ;;  %v6781_v46 = vsub.f32 %v6715_v1, %v463_v40  ;;  %v5321_v40 = vld [vmem:[#allocation2 + $0x60] sm:$0xf] }
  0x98   : > { %v6744_v23 = vsub.f32 %v404_v2, %v461_v22  ;;  %v5353_v22 = vld [vmem:[#allocation2 + $0x98] sm:$0xf] }
  0x99   : > { %v497_v52 = vmul.f32 %v6778_v45, %v6778_v45  ;;  %v495_v53 = vmul.f32 %v6781_v46, %v6781_v46 }
  0x9a   : > { %v493_v24 = vmul.f32 %v6744_v23, %v6744_v23 }
  0x9c   : > { %509 = vadd.xlane.f32.xlu0 %v493_v24  ;;  %v433_v25 = vpop.xlane.xlu2 %432  ;;  %v429_v26 = vpop.xlane.xlu1 %428  ;;  %v5746_v24 = vld [vmem:[#allocation2 + $0xa0] sm:$0xf0] }
  0x9d   : > { %v464_v27 = vmul.f32 %v6741_v18, %v429_v26  ;;  %v425_v28 = vpop.xlane.xlu0 %424  ;;  %v466_v58 = vmul.f32 %v6741_v18, %v433_v25  ;;  %v5354_v26 = vor.u32 %v5746_v24, %v5353_v22 }
  0x9e   : > { %v462_v29 = vmul.f32 %v6741_v18, %v425_v28  ;;  %v5742_v28 = vld [vmem:[#allocation2 + $0x80] sm:$0xf0] }
  0x9f   : > { %v6750_v30 = vsub.f32 %v407_v4, %v464_v27  ;;  %v6809_v61 = vsub.f32 %v6721_v3, %v466_v58  ;;  %1062 = vmatpush.bf16.msra.mxu2 %v5354_v26  ;;  %v5333_v27 = vld [vmem:[#allocation2 + $0x78] sm:$0xf]  ;;  %5825 = vmatpush.bf16.msra.mxu3 %v5354_v26  ;;  %v5735_v58 = vld [vmem:[#allocation2 + $0x4c] sm:$0xf] }
  0xa0   : > { %v6752_v31 = vsub.f32 %v405_v5, %v462_v29  ;;  %v5741_v29 = vld [vmem:[#allocation2 + $0x7c] sm:$0xf] }
  0xa1   : > { %v496_v32 = vmul.f32 %v6750_v30, %v6750_v30  ;;  %v498_v63 = vmul.f32 %v6809_v61, %v6809_v61 }
  0xa2   : > { %v494_v34 = vmul.f32 %v6752_v31, %v6752_v31 }
  0xa3   : > { %515 = vadd.xlane.f32.xlu2 %v496_v32  ;;  %v5334_v32 = vor.u32 %v5742_v28, %v5333_v27  ;;  %v5273_v27 = vld [vmem:[#allocation2] sm:$0xf]  ;;  %v5727_v28 = vld [vmem:[#allocation2 + $0x8] sm:$0xf0] }
  0xa4   : > { %448 = vadd.xlane.f32.xlu0 %v6757_v33  ;;  %511 = vadd.xlane.f32.xlu1 %v494_v34  ;;  %v435_v35 = vpop.xlane.xlu2 %434  ;;  %v439_v62 = vpop.xlane.xlu1 %438  ;;  %v5335_v34 = vld [vmem:[#allocation2 + $0x84] sm:$0xf0] }
  0xa5   : > { %v467_v36 = vmul.f32 %v6741_v18, %v435_v35  ;;  %v437_v37 = vpop.xlane.xlu0 %436  ;;  %v469_v0 = vmul.f32 %v6741_v18, %v439_v62  ;;  %v5341_v35 = vld [vmem:[#allocation2 + $0x80] sm:$0xf]  ;;  %v5311_v62 = vld [vmem:[#allocation2 + $0x54] sm:$0xf0] }
  0xa6   : > { %v468_v51 = vmul.f32 %v6741_v18, %v437_v37  ;;  %v5338_v37 = vor.u32 %v5741_v29, %v5335_v34  ;;  %v5726_v29 = vld [vmem:[#allocation2 + $0x4] sm:$0xf]  ;;  %v5274_v34 = vor.u32 %v5727_v28, %v5273_v27 }
  0xa7   : > { %v6763_v38 = vsub.f32 %v410_v6, %v467_v36  ;;  %v6815_v1 = vsub.f32 %v6728_v7, %v469_v0  ;;  %v5359_v7 = vld [vmem:[#allocation2 + $0xb4] sm:$0xf0]  ;;  %v5743_v36 = vld [vmem:[#allocation2 + $0x88] sm:$0xf0]  ;;  %v5737_v0 = vld [vmem:[#allocation2 + $0x58] sm:$0xf0] }
  0xa8   : > { %v6797_v56 = vsub.f32 %v6731_v8, %v468_v51  ;;  %v5357_v8 = vld [vmem:[#allocation2 + $0xa8] sm:$0xf]  ;;  %v5342_v39 = vor.u32 %v5743_v36, %v5341_v35  ;;  %v5740_v51 = vld [vmem:[#allocation2 + $0x70] sm:$0xf0]  ;;  %v5275_v35 = vld [vmem:[#allocation2 + $0xc] sm:$0xf0] }
  0xa9   : > { %v499_v41 = vmul.f32 %v6763_v38, %v6763_v38  ;;  %v501_v4 = vmul.f32 %v6815_v1, %v6815_v1  ;;  %v5281_v36 = vld [vmem:[#allocation2 + $0x8] sm:$0xf] }
  0xaa   : > { %v500_v59 = vmul.f32 %v6797_v56, %v6797_v56  ;;  %1063 = vmatpush.bf16.msra.mxu2 %v5342_v39  ;;  %5826 = vmatpush.bf16.msra.mxu3 %v5342_v39  ;;  %v5728_v39 = vld [vmem:[#allocation2 + $0x10] sm:$0xf0] }
  0xab   : > { %521 = vadd.xlane.f32.xlu2 %v499_v41  ;;  %v5739_v41 = vld [vmem:[#allocation2 + $0x68] sm:$0xf0] }
  0xac   : > { %450 = vadd.xlane.f32.xlu0 %v6770_v42  ;;  %444 = vadd.xlane.f32.xlu1 %v6773_v43  ;;  %v441_v44 = vpop.xlane.xlu2 %440 }
  0xad   : > { %v470_v47 = vmul.f32 %v6741_v18, %v441_v44  ;;  %v443_v48 = vpop.xlane.xlu0 %442  ;;  %v5738_v44 = vld [vmem:[#allocation2 + $0x64] sm:$0xf] }
  0xae   : > { %v471_v50 = vmul.f32 %v6741_v18, %v443_v48  ;;  %v5323_v48 = vld [vmem:[#allocation2 + $0x6c] sm:$0xf0] }
  0xaf   : > { %v6784_v49 = vsub.f32 %v413_v9, %v470_v47  ;;  %v5748_v9 = vld [vmem:[#allocation2 + $0xb0] sm:$0xf0]  ;;  %v5322_v47 = vor.u32 %v5739_v41, %v5321_v40  ;;  %v5282_v40 = vor.u32 %v5728_v39, %v5281_v36 }
  0xb0   : > { %v6794_v55 = vsub.f32 %v414_v10, %v471_v50  ;;  %v5747_v10 = vld [vmem:[#allocation2 + $0xac] sm:$0xf]  ;;  %v5358_v12 = vor.u32 %v5748_v9, %v5357_v8  ;;  %v5329_v50 = vld [vmem:[#allocation2 + $0x68] sm:$0xf]  ;;  %v5732_v8 = vld [vmem:[#allocation2 + $0x34] sm:$0xf] }
  0xb1   : > { %v502_v54 = vmul.f32 %v6784_v49, %v6784_v49  ;;  %v5362_v15 = vor.u32 %v5747_v10, %v5359_v7  ;;  %v5299_v10 = vld [vmem:[#allocation2 + $0x3c] sm:$0xf0]  ;;  %v5734_v7 = vld [vmem:[#allocation2 + $0x40] sm:$0xf0] }
  0xb2   : > { %v503_v57 = vmul.f32 %v6794_v55, %v6794_v55  ;;  %963 = vmatpush.bf16.msra.mxu0 %v5358_v12  ;;  %v5305_v12 = vld [vmem:[#allocation2 + $0x38] sm:$0xf]  ;;  %v5302_v13 = vor.u32 %v5732_v8, %v5299_v10 }
  0xb3   : > { %527 = vadd.xlane.f32.xlu2 %v502_v54  ;;  %1012 = vmatpush.bf16.msra.mxu1 %v5362_v15  ;;  %v5309_v54 = vld [vmem:[#allocation2 + $0x48] sm:$0xf]  ;;  %v5306_v14 = vor.u32 %v5734_v7, %v5305_v12  ;;  %v5285_v15 = vld [vmem:[#allocation2 + $0x18] sm:$0xf] }
  0xb4   : > { %517 = vadd.xlane.f32.xlu0 %v497_v52  ;;  %513 = vadd.xlane.f32.xlu1 %v495_v53  ;;  %v447_v2 = vpop.xlane.xlu2 %446  ;;  %v5326_v52 = vor.u32 %v5738_v44, %v5323_v48  ;;  %v5330_v53 = vor.u32 %v5740_v51, %v5329_v50  ;;  %v5286_v19 = vor.u32 %v5730_v16, %v5285_v15 }
  0xb5   : > { %v473_v5 = vmul.f32 %v6741_v18, %v447_v2  ;;  %v5314_v2 = vor.u32 %v5735_v58, %v5311_v62 }
  0xb6   : > { %964 = vmatpush.bf16.msra.mxu0 %v5346_v20  ;;  %1064 = vmatpush.bf16.msra.mxu2 %v5330_v53  ;;  %v5293_v20 = vld [vmem:[#allocation2 + $0x20] sm:$0xf] }
  0xb7   : > { %v6821_v3 = vsub.f32 %v6738_v11, %v473_v5  ;;  %v5744_v11 = vld [vmem:[#allocation2 + $0x94] sm:$0xf]  ;;  %5827 = vmatpush.bf16.msra.mxu3 %v5330_v53  ;;  %v5297_v5 = vld [vmem:[#allocation2 + $0x30] sm:$0xf] }
  0xb8   : > { %v5350_v25 = vor.u32 %v5744_v11, %v5347_v21  ;;  %v5287_v11 = vld [vmem:[#allocation2 + $0x24] sm:$0xf0]  ;;  %v5731_v21 = vld [vmem:[#allocation2 + $0x28] sm:$0xf0] }
  0xb9   : > { %v505_v6 = vmul.f32 %v6821_v3, %v6821_v3  ;;  %v5290_v24 = vor.u32 %v5729_v17, %v5287_v11 }
  0xba   : > { %1013 = vmatpush.bf16.msra.mxu1 %v5350_v25  ;;  %965 = vmatpush.bf16.msra.mxu0 %v5334_v32  ;;  %v5294_v25 = vor.u32 %v5731_v21, %v5293_v20  ;;  %v420_v20 = vld [vmem:[%s6850_s29] sm:$0x3f] }
  0xbb   : > { %529 = vadd.xlane.f32.xlu2 %v503_v57  ;;  %v5736_v57 = vld [vmem:[#allocation2 + $0x50] sm:$0xf0] }
  0xbc   : > { %452 = vadd.xlane.f32.xlu1 %v6805_v60  ;;  %523 = vadd.xlane.f32.xlu0 %v500_v59  ;;  %v5310_v59 = vor.u32 %v5736_v57, %v5309_v54 }
  0xbe   : > { %1014 = vmatpush.bf16.msra.mxu1 %v5338_v37  ;;  %966 = vmatpush.bf16.msra.mxu0 %v5322_v47  ;;  %v5278_v37 = vor.u32 %v5726_v29, %v5275_v35  ;;  %v6868_v29 = vadd.f32 1.0, %v420_v20 }
  0xc0   : > { %10023 = vst [vmem:[#allocation9_spill] sm:$0xff] %v6868_v29 }
  0xc2   : > { %1015 = vmatpush.bf16.msra.mxu1 %v5326_v52  ;;  %967 = vmatpush.bf16.msra.mxu0 %v5310_v59 }
  0xc4   : > { %519 = vadd.xlane.f32.xlu1 %v498_v63  ;;  %v5317_v63 = vld [vmem:[#allocation2 + $0x50] sm:$0xf] }
  0xc6   : > { %1016 = vmatpush.bf16.msra.mxu1 %v5314_v2 }
  0xca   : > { %1017 = vmatpush.bf16.msra.mxu1 %v5302_v13 }
  0xcc   : > { %525 = vadd.xlane.f32.xlu1 %v501_v4  ;;  %v5318_v4 = vor.u32 %v5737_v0, %v5317_v63 }
  0xce   : > { %1065 = vmatpush.bf16.msra.mxu2 %v5318_v4  ;;  %5828 = vmatpush.bf16.msra.mxu3 %v5318_v4 }
  0xcf   : > { %1018 = vmatpush.bf16.msra.mxu1 %v5290_v24 }
  0xd2   : > { %1066 = vmatpush.bf16.msra.mxu2 %v5306_v14  ;;  %5829 = vmatpush.bf16.msra.mxu3 %v5306_v14 }
  0xd3   : > { %1019 = vmatpush.bf16.msra.mxu1 %v5278_v37 }
  0xd4   : > { %533 = vadd.xlane.f32.xlu1 %v505_v6  ;;  %v5733_v6 = vld [vmem:[#allocation2 + $0x38] sm:$0xf0] }
  0xd5   : > { %v5298_v9 = vor.u32 %v5733_v6, %v5297_v5 }
  0xd6   : > { %1067 = vmatpush.bf16.msra.mxu2 %v5294_v25  ;;  %5830 = vmatpush.bf16.msra.mxu3 %v5294_v25 }
  0xd7   : > { %968 = vmatpush.bf16.msra.mxu0 %v5298_v9 }
  0xda   : > { %1068 = vmatpush.bf16.msra.mxu2 %v5282_v40  ;;  %5831 = vmatpush.bf16.msra.mxu3 %v5282_v40 }
  0xdb   : > { %969 = vmatpush.bf16.msra.mxu0 %v5286_v19 }
  0xdf   : > { %970 = vmatpush.bf16.msra.mxu0 %v5274_v34 }
 0x10f   : > { %v510_v22 = vpop.xlane.xlu0 %509 }
 0x110   : > { %v541_v26 = vmul.f32 %v510_v22, %v6741_v18 }
 0x112   : > { %v557_v32 = vadd.f32 1e-06, %v541_v26 }
 0x114   : > { %6014 = vrsqrt.f32 %v557_v32  ;;  %vm579_vm2 = vweird.f32 %v557_v32 }
 0x116   : > { %v516_v41 = vpop.xlane.xlu2 %515 }
 0x117   : > { %v544_v44 = vmul.f32 %v516_v41, %v6741_v18  ;;  %v512_v47 = vpop.xlane.xlu1 %511  ;;  %v449_v48 = vpop.xlane.xlu0 %448 }
 0x118   : > { %v542_v50 = vmul.f32 %v512_v47, %v6741_v18  ;;  %v474_v51 = vmul.f32 %v6741_v18, %v449_v48 }
 0x119   : > { %v6829_v52 = vadd.f32 1e-06, %v544_v44  ;;  %v6880_v44 = vperm.slane %v6868_v29, 1 }
 0x11a   : > { %v6015_v53 = vpop.eup %6014  ;;  %v558_v54 = vadd.f32 1e-06, %v542_v50  ;;  %v6832_v57 = vsub.f32 %v6757_v33, %v474_v51 }
 0x11b   : > { %v574_v58 = vmul.f32 %v6015_v53, %v557_v32  ;;  %6016 = vrsqrt.f32 %v6829_v52  ;;  %vm580_vm1 = vweird.f32 %v6015_v53  ;;  %vm609_vm7 = vweird.f32 %v6829_v52 }
 0x11c   : > { %6018 = vrsqrt.f32 %v558_v54  ;;  %v506_v59 = vmul.f32 %v6832_v57, %v6832_v57  ;;  %vm6861_vm4 = vmor %vm579_vm2, %vm580_vm1  ;;  %vm589_vm5 = vweird.f32 %v558_v54 }
 0x11d   : > { %v575_v62 = vmul.f32 %v6015_v53, %v574_v58 }
 0x11e   : > { %535 = vadd.xlane.f32.xlu2 %v506_v59  ;;  %v522_v63 = vpop.xlane.xlu2 %521 }
 0x11f   : > { %v576_v0 = vmul.f32 0.5, %v575_v62  ;;  %v445_v2 = vpop.xlane.xlu1 %444  ;;  %v451_v4 = vpop.xlane.xlu0 %450  ;;  %v547_v58 = vmul.f32 %v522_v63, %v6741_v18 }
 0x120   : > { %v472_v5 = vmul.f32 %v6741_v18, %v445_v2  ;;  %v475_v8 = vmul.f32 %v6741_v18, %v451_v4 }
 0x121   : > { %v6838_v6 = vpop.eup %6016  ;;  %v577_v10 = vsub.f32 1.5, %v576_v0 }
 0x122   : > { %v6019_v33 = vpop.eup %6018  ;;  %v6843_v9 = vsub.f32 %v6773_v43, %v472_v5  ;;  %v604_v13 = vmul.f32 %v6838_v6, %v6829_v52  ;;  %v6855_v43 = vsub.f32 %v6770_v42, %v475_v8  ;;  %vm610_vm8 = vweird.f32 %v6838_v6 }
 0x123   : > { %v584_v12 = vmul.f32 %v6019_v33, %v558_v54  ;;  %v578_v16 = vmul.f32 %v6015_v53, %v577_v10  ;;  %vm590_vm3 = vweird.f32 %v6019_v33  ;;  %vm6900_vm9 = vmor %vm609_vm7, %vm610_vm8  ;;  %v6904_v8 = vadd.f32 1e-06, %v547_v58 }
 0x124   : > { %v504_v7 = vmul.f32 %v6843_v9, %v6843_v9  ;;  %v605_v24 = vmul.f32 %v6838_v6, %v604_v13  ;;  %v507_v28 = vmul.f32 %v6855_v43, %v6855_v43  ;;  %vm591_vm6 = vmor %vm589_vm5, %vm590_vm3 }
 0x125   : > { %v585_v14 = vmul.f32 %v6019_v33, %v584_v12  ;;  %v582_v34 = vsel %vm6861_vm4, %v6015_v53, %v578_v16  ;;  %v6883_v53 = vperm.slane %v420_v20, 0 }
 0x126   : > { %531 = vadd.xlane.f32.xlu0 %v504_v7  ;;  %v528_v15 = vpop.xlane.xlu2 %527  ;;  %v606_v36 = vmul.f32 0.5, %v605_v24  ;;  %v733_v40 = vmul.f32 %v582_v34, %v6744_v23 }
 0x127   : > { %v586_v17 = vmul.f32 0.5, %v585_v14  ;;  %v514_v19 = vpop.xlane.xlu1 %513  ;;  %v518_v11 = vpop.xlane.xlu0 %517  ;;  %v550_v42 = vmul.f32 %v528_v15, %v6741_v18 }
 0x128   : > { %v543_v21 = vmul.f32 %v514_v19, %v6741_v18  ;;  %v545_v22 = vmul.f32 %v518_v11, %v6741_v18  ;;  %v607_v48 = vsub.f32 1.5, %v606_v36  ;;  %v753_v59 = vmul.f32 %v6880_v44, %v733_v40 }
 0x129   : > { %v587_v25 = vsub.f32 1.5, %v586_v17  ;;  %v6875_v39 = vadd.f32 1e-06, %v550_v42 }
 0x12a   : > { %v559_v27 = vadd.f32 1e-06, %v543_v21  ;;  %v6872_v35 = vadd.f32 1e-06, %v545_v22  ;;  %v608_v2 = vmul.f32 %v6838_v6, %v607_v48  ;;  %v771_v52 = vadd.f32 %v6883_v53, %v753_v59 }
 0x12b   : > { %v588_v32 = vmul.f32 %v6019_v33, %v587_v25  ;;  %vm669_vm2 = vweird.f32 %v6875_v39 }
 0x12c   : > { %6020 = vrsqrt.f32 %v559_v27  ;;  %vm599_vm10 = vweird.f32 %v559_v27  ;;  %v612_v17 = vsel %vm6900_vm9, %v6838_v6, %v608_v2  ;;  %vm619_vm13 = vweird.f32 %v6872_v35 }
 0x12d   : > { %v592_v37 = vsel %vm591_vm6, %v6019_v33, %v588_v32  ;;  %6022 = vrsqrt.f32 %v6872_v35  ;;  %v736_v24 = vmul.f32 %v612_v17, %v6750_v30 }
 0x12e   : > { %537 = vadd.xlane.f32.xlu0 %v507_v28  ;;  %v734_v41 = vmul.f32 %v592_v37, %v6752_v31  ;;  %6024 = vrsqrt.f32 %v6875_v39 }
 0x12f   : > { %v453_v47 = vpop.xlane.xlu1 %452  ;;  %v524_v51 = vpop.xlane.xlu0 %523  ;;  %6026 = vrsqrt.f32 %v6904_v8  ;;  %v756_v32 = vmul.f32 %v6880_v44, %v736_v24 }
 0x130   : > { %v476_v50 = vmul.f32 %v6741_v18, %v453_v47  ;;  %v754_v23 = vmul.f32 %v6880_v44, %v734_v41  ;;  %v548_v0 = vmul.f32 %v524_v51, %v6741_v18 }
 0x132   : > { %v6021_v54 = vpop.eup %6020  ;;  %v6898_v5 = vsub.f32 %v6805_v60, %v476_v50  ;;  %v772_v10 = vadd.f32 %v6883_v53, %v754_v23  ;;  %v6912_v60 = vadd.f32 1e-06, %v548_v0  ;;  %v774_v50 = vadd.f32 %v6883_v53, %v756_v32 }
 0x133   : > { %v6889_v31 = vpop.eup %6022  ;;  %v594_v62 = vmul.f32 %v6021_v54, %v559_v27  ;;  %vm600_vm11 = vweird.f32 %v6021_v54 }
 0x134   : > { %v614_v63 = vmul.f32 %v6889_v31, %v6872_v35  ;;  %v508_v7 = vmul.f32 %v6898_v5, %v6898_v5  ;;  %v6910_v14 = vpop.eup %6024  ;;  %v787_v15 = vpack.c.bf16 %v772_v10, %v771_v52  ;;  %vm601_vm12 = vmor %vm599_vm10, %vm600_vm11  ;;  %6028 = vrsqrt.f32 %v6912_v60 }
 0x135   : > { %v595_v4 = vmul.f32 %v6021_v54, %v594_v62  ;;  %v664_v20 = vmul.f32 %v6910_v14, %v6875_v39  ;;  %v6929_v36 = vpop.eup %6026  ;;  %vm620_vm14 = vweird.f32 %v6889_v31  ;;  %vm670_vm3 = vweird.f32 %v6910_v14 }
 0x136   : > { %v615_v11 = vmul.f32 %v6889_v31, %v614_v63  ;;  %539 = vadd.xlane.f32.xlu1 %v508_v7  ;;  %971 = vmatmul.bf16.vlgmr.msra.gmra.mxu0 %v787_v15  ;;  %v634_v58 = vmul.f32 %v6929_v36, %v6904_v8  ;;  %vm6942_vm15 = vmor %vm619_vm13, %vm620_vm14  ;;  %vm649_vm8 = vweird.f32 %v6912_v60  ;;  %vm639_vm11 = vweird.f32 %v6904_v8 }
 0x137   : > { %v596_v12 = vmul.f32 0.5, %v595_v4  ;;  %v520_v13 = vpop.xlane.xlu1 %519  ;;  %1020 = vmatmul.bf16.vlgmr.msra.gmra.mxu1 %v787_v15  ;;  %1069 = vmatmul.bf16.vlgmr.msra.gmra.mxu2 %v787_v15  ;;  %v665_v42 = vmul.f32 %v6910_v14, %v664_v20  ;;  %vm6955_vm5 = vmor %vm669_vm2, %vm670_vm3 }
 0x138   : > { %v546_v16 = vmul.f32 %v520_v13, %v6741_v18  ;;  %v616_v25 = vmul.f32 0.5, %v615_v11  ;;  %v635_v63 = vmul.f32 %v6929_v36, %v634_v58 }
 0x139   : > { %v597_v19 = vsub.f32 1.5, %v596_v12  ;;  %v666_v48 = vmul.f32 0.5, %v665_v42  ;;  %v421_v12 = vld [vmem:[%s6850_s29 + $0x8] sm:$0x3f] }
 0x13a   : > { %v562_v22 = vadd.f32 1e-06, %v546_v16  ;;  %v617_v37 = vsub.f32 1.5, %v616_v25  ;;  %v6931_v40 = vpop.eup %6028  ;;  %v636_v16 = vmul.f32 0.5, %v635_v63  ;;  %v6960_v11 = vadd.f32 1.0, %v421_v12 }
 0x13b   : > { %v598_v21 = vmul.f32 %v6021_v54, %v597_v19  ;;  %v667_v62 = vsub.f32 1.5, %v666_v48  ;;  %vm650_vm9 = vweird.f32 %v6931_v40 }
 0x13c   : > { %6030 = vrsqrt.f32 %v562_v22  ;;  %v618_v51 = vmul.f32 %v6889_v31, %v617_v37  ;;  %vm629_vm0 = vweird.f32 %v562_v22  ;;  %10030 = vst [vmem:[#allocation10_spill] sm:$0xff] %v6960_v11  ;;  %v637_v25 = vsub.f32 1.5, %v636_v16  ;;  %vm6979_vm13 = vmor %vm649_vm8, %vm650_vm9 }
 0x13d   : > { %v602_v6 = vsel %vm601_vm12, %v6021_v54, %v598_v21  ;;  %v644_v54 = vmul.f32 %v6931_v40, %v6912_v60  ;;  %v668_v10 = vmul.f32 %v6910_v14, %v667_v62  ;;  %v6969_v42 = vperm.slane %v6960_v11, 1  ;;  %v530_v62 = vpop.xlane.xlu2 %529 }
 0x13e   : > { %v735_v26 = vmul.f32 %v602_v6, %v6781_v46  ;;  %v622_v2 = vsel %vm6942_vm15, %v6889_v31, %v618_v51  ;;  %vm640_vm12 = vweird.f32 %v6929_v36 }
 0x13f   : > { %v526_v27 = vpop.xlane.xlu1 %525  ;;  %v645_v4 = vmul.f32 %v6931_v40, %v644_v54  ;;  %v737_v31 = vmul.f32 %v622_v2, %v6778_v45  ;;  %v672_v20 = vsel %vm6955_vm5, %v6910_v14, %v668_v10  ;;  %vm641_vm14 = vmor %vm639_vm11, %vm640_vm12 }
 0x140   : > { %v549_v28 = vmul.f32 %v526_v27, %v6741_v18  ;;  %v755_v34 = vmul.f32 %v6880_v44, %v735_v26  ;;  %v742_v14 = vmul.f32 %v672_v20, %v6784_v49 }
 0x141   : > { %v646_v15 = vmul.f32 0.5, %v645_v4  ;;  %v757_v24 = vmul.f32 %v6880_v44, %v737_v31 }
 0x142   : > { %v565_v30 = vadd.f32 1e-06, %v549_v28  ;;  %v773_v41 = vadd.f32 %v6883_v53, %v755_v34  ;;  %v6031_v47 = vpop.eup %6030  ;;  %v762_v49 = vmul.f32 %v6969_v42, %v742_v14 }
 0x143   : > { %v624_v46 = vmul.f32 %v6031_v47, %v562_v22  ;;  %vm630_vm1 = vweird.f32 %v6031_v47  ;;  %v647_v6 = vsub.f32 1.5, %v646_v15  ;;  %v775_v28 = vadd.f32 %v6883_v53, %v757_v24 }
 0x144   : > { %6032 = vrsqrt.f32 %v565_v30  ;;  %v788_v35 = vpack.c.bf16 %v774_v50, %v773_v41  ;;  %vm631_vm4 = vmor %vm629_vm0, %vm630_vm1  ;;  %vm659_vm6 = vweird.f32 %v565_v30 }
 0x145   : > { %v625_v23 = vmul.f32 %v6031_v47, %v624_v46  ;;  %v648_v34 = vmul.f32 %v6931_v40, %v647_v6 }
 0x146   : > { %976 = vmatmul.bf16.gmra.mxu0 %v788_v35 }
 0x147   : > { %v626_v0 = vmul.f32 0.5, %v625_v23  ;;  %1025 = vmatmul.bf16.gmra.mxu1 %v788_v35  ;;  %1074 = vmatmul.bf16.gmra.mxu2 %v788_v35  ;;  %v652_v8 = vsel %vm6979_vm13, %v6931_v40, %v648_v34 }
 0x148   : > { %v740_v51 = vmul.f32 %v652_v8, %v6797_v56  ;;  %v551_v56 = vmul.f32 %v530_v62, %v6741_v18 }
 0x149   : > { %v627_v33 = vsub.f32 1.5, %v626_v0 }
 0x14a   : > { %v6033_v52 = vpop.eup %6032  ;;  %v760_v59 = vmul.f32 %v6880_v44, %v740_v51  ;;  %v567_v0 = vadd.f32 1e-06, %v551_v56 }
 0x14b   : > { %v628_v7 = vmul.f32 %v6031_v47, %v627_v33  ;;  %v654_v13 = vmul.f32 %v6033_v52, %v565_v30  ;;  %vm660_vm7 = vweird.f32 %v6033_v52  ;;  %v638_v30 = vmul.f32 %v6929_v36, %v637_v25 }
 0x14c   : > { %vm661_vm10 = vmor %vm659_vm6, %vm660_vm7  ;;  %v778_v23 = vadd.f32 %v6883_v53, %v760_v59  ;;  %6034 = vrsqrt.f32 %v567_v0  ;;  %vm679_vm15 = vweird.f32 %v567_v0 }
 0x14d   : > { %v632_v17 = vsel %vm631_vm4, %v6031_v47, %v628_v7  ;;  %v655_v19 = vmul.f32 %v6033_v52, %v654_v13  ;;  %v6986_v47 = vperm.slane %v421_v12, 0  ;;  %v642_v46 = vsel %vm641_vm14, %v6929_v36, %v638_v30 }
 0x14e   : > { %v738_v21 = vmul.f32 %v632_v17, %v6809_v61  ;;  %v739_v58 = vmul.f32 %v642_v46, %v6763_v38  ;;  %v534_v38 = vpop.xlane.xlu1 %533 }
 0x14f   : > { %v656_v22 = vmul.f32 0.5, %v655_v19  ;;  %v553_v63 = vmul.f32 %v534_v38, %v6741_v18 }
 0x150   : > { %v758_v45 = vmul.f32 %v6880_v44, %v738_v21  ;;  %v759_v40 = vmul.f32 %v6880_v44, %v739_v58 }
 0x151   : > { %v657_v26 = vsub.f32 1.5, %v656_v22 }
 0x152   : > { %v776_v61 = vadd.f32 %v6883_v53, %v758_v45  ;;  %v777_v35 = vadd.f32 %v6883_v53, %v759_v40  ;;  %v6035_v4 = vpop.eup %6034 }
 0x153   : > { %v658_v27 = vmul.f32 %v6033_v52, %v657_v26  ;;  %v674_v33 = vmul.f32 %v6035_v4, %v567_v0  ;;  %vm680_vm0 = vweird.f32 %v6035_v4 }
 0x154   : > { %v789_v37 = vpack.c.bf16 %v776_v61, %v775_v28  ;;  %v790_v36 = vpack.c.bf16 %v778_v23, %v777_v35  ;;  %vm681_vm1 = vmor %vm679_vm15, %vm680_vm0 }
 0x155   : > { %v662_v60 = vsel %vm661_vm10, %v6033_v52, %v658_v27  ;;  %v569_v52 = vadd.f32 1e-06, %v553_v63  ;;  %v675_v10 = vmul.f32 %v6035_v4, %v674_v33  ;;  %v827_v63 = vld [vmem:[%s9982_s3] sm:$0x7] }
 0x156   : > { %v741_v41 = vmul.f32 %v662_v60, %v6815_v1  ;;  %981 = vmatmul.bf16.gmra.mxu0 %v789_v37  ;;  %v780_v1 = vadd.f32 %v6986_v47, %v762_v49 }
 0x157   : > { %1030 = vmatmul.bf16.gmra.mxu1 %v789_v37  ;;  %1079 = vmatmul.bf16.gmra.mxu2 %v789_v37  ;;  %v676_v13 = vmul.f32 0.5, %v675_v10  ;;  %vm699_vm7 = vweird.f32 %v569_v52 }
 0x158   : > { %v761_v48 = vmul.f32 %v6969_v42, %v741_v41 }
 0x159   : > { %v677_v16 = vsub.f32 1.5, %v676_v13 }
 0x15a   : > { %v779_v50 = vadd.f32 %v6986_v47, %v761_v48 }
 0x15b   : > { %v678_v24 = vmul.f32 %v6035_v4, %v677_v16 }
 0x15c   : > { %v791_v54 = vpack.c.bf16 %v780_v1, %v779_v50 }
 0x15d   : > { %v682_v14 = vsel %vm681_vm1, %v6035_v4, %v678_v24  ;;  %vm1122_vm1 = vcmask 261120  }
 0x15e   : > { %1089 = vmatmul.bf16.vlgmr.msra.gmra.mxu3 %v791_v54  ;;  %v743_v37 = vmul.f32 %v682_v14, %v6794_v55 }
 0x160   : > { %v763_v1 = vmul.f32 %v6969_v42, %v743_v37 }
 0x166   : > { %986 = vmatmul.bf16.gmra.mxu0 %v790_v36 }
 0x167   : > { %1035 = vmatmul.bf16.gmra.mxu1 %v790_v36  ;;  %1084 = vmatmul.bf16.gmra.mxu2 %v790_v36 }
 0x176   : > { %991 = vmatmul.bf16.gmra.mxu0 %v791_v54 }
 0x177   : > { %1040 = vmatmul.bf16.gmra.mxu1 %v791_v54 }
 0x191   : > { %v536_v2 = vpop.xlane.xlu2 %535 }
 0x192   : > { %v554_v44 = vmul.f32 %v536_v2, %v6741_v18 }
 0x194   : > { %v570_v53 = vadd.f32 1e-06, %v554_v44 }
 0x196   : > { %6036 = vrsqrt.f32 %v570_v53  ;;  %vm709_vm5 = vweird.f32 %v570_v53 }
 0x197   : > { %6038 = vrsqrt.f32 %v569_v52 }
 0x199   : > { %v532_v12 = vpop.xlane.xlu0 %531 }
 0x19a   : > { %v552_v39 = vmul.f32 %v532_v12, %v6741_v18  ;;  %v7052_v12 = vperm.slane %v827_v63, 0 }
 0x19c   : > { %v568_v7 = vadd.f32 1e-06, %v552_v39  ;;  %v7005_v31 = vpop.eup %6036  ;;  %v7054_v39 = vperm.slane %v827_v63, 1 }
 0x19d   : > { %v7007_v15 = vpop.eup %6038  ;;  %v704_v19 = vmul.f32 %v7005_v31, %v570_v53  ;;  %vm710_vm6 = vweird.f32 %v7005_v31 }
 0x19e   : > { %6040 = vrsqrt.f32 %v568_v7  ;;  %v694_v21 = vmul.f32 %v7007_v15, %v569_v52  ;;  %vm689_vm3 = vweird.f32 %v568_v7  ;;  %vm700_vm8 = vweird.f32 %v7007_v15  ;;  %vm7028_vm9 = vmor %vm709_vm5, %vm710_vm6 }
 0x19f   : > { %v705_v45 = vmul.f32 %v7005_v31, %v704_v19  ;;  %vm7034_vm10 = vmor %vm699_vm7, %vm700_vm8 }
 0x1a0   : > { %v695_v26 = vmul.f32 %v7007_v15, %v694_v21 }
 0x1a1   : > { %v538_v17 = vpop.xlane.xlu0 %537  ;;  %v706_v28 = vmul.f32 0.5, %v705_v45 }
 0x1a2   : > { %v555_v22 = vmul.f32 %v538_v17, %v6741_v18  ;;  %v696_v32 = vmul.f32 0.5, %v695_v26 }
 0x1a3   : > { %v707_v49 = vsub.f32 1.5, %v706_v28 }
 0x1a4   : > { %v6041_v20 = vpop.eup %6040  ;;  %v7014_v61 = vadd.f32 1e-06, %v555_v22  ;;  %v697_v46 = vsub.f32 1.5, %v696_v32 }
 0x1a5   : > { %v684_v6 = vmul.f32 %v6041_v20, %v568_v7  ;;  %vm690_vm2 = vweird.f32 %v6041_v20  ;;  %v708_v54 = vmul.f32 %v7005_v31, %v707_v49 }
 0x1a6   : > { %6042 = vrsqrt.f32 %v7014_v61  ;;  %vm691_vm4 = vmor %vm689_vm3, %vm690_vm2  ;;  %v698_v58 = vmul.f32 %v7007_v15, %v697_v46  ;;  %vm719_vm13 = vweird.f32 %v7014_v61  ;;  %vm1184_vm2 = vcmask 523264  }
 0x1a7   : > { %v685_v25 = vmul.f32 %v6041_v20, %v684_v6  ;;  %v712_v56 = vsel %vm7028_vm9, %v7005_v31, %v708_v54  ;;  %vm2108_vm3 = vcmask 785408  }
 0x1a8   : > { %v702_v2 = vsel %vm7034_vm10, %v7007_v15, %v698_v58  ;;  %v746_v53 = vmul.f32 %v712_v56, %v6832_v57 }
 0x1a9   : > { %v686_v27 = vmul.f32 0.5, %v685_v25  ;;  %v540_v60 = vpop.xlane.xlu1 %539  ;;  %v745_v52 = vmul.f32 %v702_v2, %v6821_v3 }
 0x1aa   : > { %v556_v41 = vmul.f32 %v540_v60, %v6741_v18  ;;  %v766_v31 = vmul.f32 %v6969_v42, %v746_v53 }
 0x1ab   : > { %v687_v34 = vsub.f32 1.5, %v686_v27  ;;  %v765_v19 = vmul.f32 %v6969_v42, %v745_v52 }
 0x1ac   : > { %v572_v48 = vadd.f32 1e-06, %v556_v41  ;;  %v7022_v51 = vpop.eup %6042  ;;  %v784_v45 = vadd.f32 %v6986_v47, %v766_v31  ;;  %v7085_v41 = vperm.slane %v827_v63, 2 }
 0x1ad   : > { %v688_v30 = vmul.f32 %v6041_v20, %v687_v34  ;;  %v714_v35 = vmul.f32 %v7022_v51, %v7014_v61  ;;  %vm720_vm14 = vweird.f32 %v7022_v51  ;;  %v783_v14 = vadd.f32 %v6986_v47, %v765_v19 }
 0x1ae   : > { %6044 = vrsqrt.f32 %v572_v48  ;;  %vm729_vm11 = vweird.f32 %v572_v48  ;;  %vm721_vm0 = vmor %vm719_vm13, %vm720_vm14 }
 0x1af   : > { %v692_v8 = vsel %vm691_vm4, %v6041_v20, %v688_v30  ;;  %v715_v44 = vmul.f32 %v7022_v51, %v714_v35  ;;  %v793_v61 = vpack.c.bf16 %v784_v45, %v783_v14 }
 0x1b0   : > { %v744_v50 = vmul.f32 %v692_v8, %v6843_v9  ;;  %v781_v9 = vadd.f32 %v6986_v47, %v763_v1 }
 0x1b1   : > { %v716_v7 = vmul.f32 0.5, %v715_v44 }
 0x1b2   : > { %v764_v55 = vmul.f32 %v6969_v42, %v744_v50 }
 0x1b3   : > { %v972_v0 = vpop.f32.mrf.mxu0  ;;  %v717_v22 = vsub.f32 1.5, %v716_v7 }
 0x1b4   : > { %v782_v40 = vadd.f32 %v6986_v47, %v764_v55  ;;  %v6045_v62 = vpop.eup %6044  ;;  %v1021_v38 = vpop.f32.mrf.mxu1  ;;  %v973_v20 = vadd.f32 %v972_v0, %v7052_v12 }
 0x1b5   : > { %v724_v4 = vmul.f32 %v6045_v62, %v572_v48  ;;  %v1022_v57 = vadd.f32 %v1021_v38, %v7054_v39  ;;  %vm730_vm12 = vweird.f32 %v6045_v62  ;;  %v718_v27 = vmul.f32 %v7022_v51, %v717_v22 }
 0x1b6   : > { %v792_v36 = vpack.c.bf16 %v782_v40, %v781_v9  ;;  %vm7069_vm15 = vmor %vm729_vm11, %vm730_vm12 }
 0x1b7   : > { %v725_v33 = vmul.f32 %v6045_v62, %v724_v4  ;;  %v722_v60 = vsel %vm721_vm0, %v7022_v51, %v718_v27 }
 0x1b8   : > { %996 = vmatmul.bf16.gmra.mxu0 %v792_v36  ;;  %1045 = vmatmul.bf16.gmra.mxu1 %v792_v36  ;;  %v747_v49 = vmul.f32 %v722_v60, %v6855_v43 }
 0x1b9   : > { %1094 = vmatmul.bf16.gmra.mxu3 %v792_v36  ;;  %v726_v10 = vmul.f32 0.5, %v725_v33 }
 0x1ba   : > { %v1070_v13 = vpop.f32.mrf.mxu2  ;;  %v767_v51 = vmul.f32 %v6969_v42, %v747_v49 }
 0x1bb   : > { %v727_v15 = vsub.f32 1.5, %v726_v10  ;;  %v974_v16 = vpop.f32.mrf.mxu0 }
 0x1bc   : > { %v1023_v17 = vpop.f32.mrf.mxu1  ;;  %v975_v3 = vadd.f32 %v974_v16, %v7052_v12  ;;  %v785_v9 = vadd.f32 %v6986_v47, %v767_v51 }
 0x1bd   : > { %v1024_v21 = vadd.f32 %v1023_v17, %v7054_v39  ;;  %v728_v25 = vmul.f32 %v6045_v62, %v727_v15 }
 0x1be   : > { %v7062_v24 = vpack.c.bf16 %v975_v3, %v973_v20 }
 0x1bf   : > { %v7064_v6 = vpack.c.bf16 %v1024_v21, %v1022_v57  ;;  %v732_v28 = vsel %vm7069_vm15, %v6045_v62, %v728_v25 }
 0x1c0   : > { %1322 = vrot.lane.b32.xlu0 %v7062_v24, %s6585_s18  ;;  %v748_v30 = vmul.f32 %v732_v28, %v6898_v5  ;;  %v1071_v5 = vadd.f32 %v1070_v13, %v7085_v41 }
 0x1c1   : > { %1560 = vrot.lane.b32.xlu1 %v7064_v6, %s6584_s12  ;;  %1334 = vrot.lane.b32.xlu2 %v7064_v6, %s6585_s18  ;;  %v1136_v27 = vsel %vm1122_vm1, %v7064_v6, 0 }
 0x1c2   : > { %v1072_v32 = vpop.f32.mrf.mxu2  ;;  %v768_v48 = vmul.f32 %v6969_v42, %v748_v30 }
 0x1c3   : > { %v977_v37 = vpop.f32.mrf.mxu0  ;;  %v1073_v8 = vadd.f32 %v1072_v32, %v7085_v41 }
 0x1c4   : > { %v1026_v34 = vpop.f32.mrf.mxu1  ;;  %v786_v58 = vadd.f32 %v6986_v47, %v768_v48  ;;  %v978_v35 = vadd.f32 %v977_v37, %v7052_v12 }
 0x1c5   : > { %v1027_v50 = vadd.f32 %v1026_v34, %v7054_v39  ;;  %v7100_v55 = vpack.c.bf16 %v1073_v8, %v1071_v5 }
 0x1c6   : > { %v794_v40 = vpack.c.bf16 %v786_v58, %v785_v9 }
 0x1c8   : > { %1001 = vmatmul.bf16.gmra.mxu0 %v793_v61  ;;  %1050 = vmatmul.bf16.gmra.mxu1 %v793_v61 }
 0x1c9   : > { %1099 = vmatmul.bf16.gmra.mxu3 %v793_v61  ;;  %1552 = vrot.lane.b32.xlu1 %v7062_v24, %s6584_s12 }
 0x1ca   : > { %1774 = vrot.lane.b32.xlu2 %v7062_v24, %s6586_s20  ;;  %1782 = vrot.lane.b32.xlu0 %v7064_v6, %s6586_s20  ;;  %v1075_v54 = vpop.f32.mrf.mxu2 }
 0x1cb   : > { %v979_v59 = vpop.f32.mrf.mxu0  ;;  %v1076_v0 = vadd.f32 %v1075_v54, %v7085_v41 }
 0x1cc   : > { %v1028_v46 = vpop.f32.mrf.mxu1  ;;  %v980_v42 = vadd.f32 %v979_v59, %v7052_v12 }
 0x1cd   : > { %v1029_v1 = vadd.f32 %v1028_v46, %v7054_v39 }
 0x1ce   : > { %v1111_v36 = vpack.c.bf16 %v980_v42, %v978_v35 }
 0x1cf   : > { %v1115_v43 = vpack.c.bf16 %v1029_v1, %v1027_v50 }
 0x1d1   : > { %1705 = vrot.lane.b32.xlu1 %v7100_v55, %s6584_s12  ;;  %v1139_v21 = vsel %vm1122_vm1, %v1115_v43, 0 }
 0x1d2   : > { %1483 = vrot.lane.b32.xlu2 %v7100_v55, %s6585_s18  ;;  %1562 = vrot.lane.b32.xlu0 %v1115_v43, %s6584_s12  ;;  %v1077_v62 = vpop.f32.mrf.mxu2 }
 0x1d3   : > { %v1078_v47 = vadd.f32 %v1077_v62, %v7085_v41  ;;  %v982_v34 = vpop.f32.mrf.mxu0 }
 0x1d4   : > { %v1031_v23 = vpop.f32.mrf.mxu1  ;;  %v983_v6 = vadd.f32 %v982_v34, %v7052_v12 }
 0x1d5   : > { %v1119_v2 = vpack.c.bf16 %v1078_v47, %v1076_v0  ;;  %v1032_v19 = vadd.f32 %v1031_v23, %v7054_v39 }
 0x1d8   : > { %1006 = vmatmul.bf16.gmra.mxu0 %v794_v40  ;;  %1055 = vmatmul.bf16.gmra.mxu1 %v794_v40 }
 0x1d9   : > { %1104 = vmatmul.bf16.gmra.mxu3 %v794_v40 }
 0x1da   : > { %1927 = vrot.lane.b32.xlu2 %v7100_v55, %s6586_s20  ;;  %1776 = vrot.lane.b32.xlu0 %v1111_v36, %s6586_s20  ;;  %v1080_v4 = vpop.f32.mrf.mxu2 }
 0x1db   : > { %v1081_v61 = vadd.f32 %v1080_v4, %v7085_v41  ;;  %v984_v32 = vpop.f32.mrf.mxu0 }
 0x1dc   : > { %v1033_v56 = vpop.f32.mrf.mxu1  ;;  %v985_v60 = vadd.f32 %v984_v32, %v7052_v12 }
 0x1dd   : > { %v1034_v16 = vadd.f32 %v1033_v56, %v7054_v39 }
 0x1de   : > { %v1112_v30 = vpack.c.bf16 %v985_v60, %v983_v6 }
 0x1df   : > { %v1116_v20 = vpack.c.bf16 %v1034_v16, %v1032_v19 }
 0x1e1   : > { %v1090_v38 = vpop.f32.mrf.mxu3  ;;  %v1142_v3 = vsel %vm1122_vm1, %v1116_v20, 0 }
 0x1e2   : > { %1485 = vrot.lane.b32.xlu0 %v1119_v2, %s6585_s18  ;;  %v1091_v33 = vadd.f32 %v1090_v38, %v7085_v41  ;;  %v1082_v31 = vpop.f32.mrf.mxu2 }
 0x1e3   : > { %v1083_v26 = vadd.f32 %v1082_v31, %v7085_v41  ;;  %v987_v37 = vpop.f32.mrf.mxu0 }
 0x1e4   : > { %v1036_v44 = vpop.f32.mrf.mxu1 }
 0x1e5   : > { %v1037_v7 = vadd.f32 %v1036_v44, %v7054_v39  ;;  %v1120_v28 = vpack.c.bf16 %v1083_v26, %v1081_v61 }
 0x1e9   : > { %v1092_v63 = vpop.f32.mrf.mxu3 }
 0x1ea   : > { %v1093_v53 = vadd.f32 %v1092_v63, %v7085_v41  ;;  %1929 = vrot.lane.b32.xlu0 %v1119_v2, %s6586_s20  ;;  %v1085_v57 = vpop.f32.mrf.mxu2 }
 0x1eb   : > { %v1086_v25 = vadd.f32 %v1085_v57, %v7085_v41  ;;  %v989_v49 = vpop.f32.mrf.mxu0 }
 0x1ec   : > { %v7120_v52 = vpack.c.bf16 %v1093_v53, %v1091_v33  ;;  %v1038_v10 = vpop.f32.mrf.mxu1  ;;  %v990_v48 = vadd.f32 %v989_v49, %v7052_v12 }
 0x1ed   : > { %v1039_v13 = vadd.f32 %v1038_v10, %v7054_v39 }
 0x1ee   : > { %2932 = vrot.lane.b32.xlu1 %v7120_v52, %s6586_s20  ;;  %2488 = vrot.lane.b32.xlu2 %v7120_v52, %s6585_s18 }
 0x1ef   : > { %v7128_v15 = vpack.c.bf16 %v1039_v13, %v1037_v7 }
 0x1f1   : > { %v1145_v17 = vsel %vm1122_vm1, %v7128_v15, 0 }
 0x1f2   : > { %1151 = vmatpush.bf16.xpose.msrb.mxu3 %v1145_v17  ;;  %v1087_v22 = vpop.f32.mrf.mxu2 }
 0x1f3   : > { %v1088_v45 = vadd.f32 %v1087_v22, %v7085_v41  ;;  %v992_v56 = vpop.f32.mrf.mxu0 }
 0x1f4   : > { %v1041_v58 = vpop.f32.mrf.mxu1 }
 0x1f5   : > { %v7146_v14 = vpack.c.bf16 %v1088_v45, %v1086_v25  ;;  %v1042_v53 = vadd.f32 %v1041_v58, %v7054_v39 }
 0x1f6   : > { %1336 = vrot.lane.b32.xlu1 %v1115_v43, %s6585_s18  ;;  %2710 = vrot.lane.b32.xlu2 %v7120_v52, %s6584_s12 }
 0x1fa   : > { %1152 = vmatpush.bf16.xpose.msrb.mxu3 %v1142_v3 }
 0x1fb   : > { %v994_v44 = vpop.f32.mrf.mxu0 }
 0x1fc   : > { %v1043_v42 = vpop.f32.mrf.mxu1  ;;  %v995_v19 = vadd.f32 %v994_v44, %v7052_v12 }
 0x1fe   : > { %1554 = vrot.lane.b32.xlu1 %v1111_v36, %s6584_s12  ;;  %1324 = vrot.lane.b32.xlu2 %v1111_v36, %s6585_s18 }
 0x202   : > { %1153 = vmatpush.bf16.xpose.msrb.mxu3 %v1139_v21 }
 0x206   : > { %1707 = vrot.lane.b32.xlu1 %v1119_v2, %s6584_s12  ;;  %1784 = vrot.lane.b32.xlu2 %v1115_v43, %s6586_s20 }
 0x20a   : > { %1154 = vmatpush.bf16.xpose.msrb.mxu3 %v1136_v27 }
 0x211   : > { %5367 = vmatmul.msk.bf16.vlgmr.msrb.gmra.mxu3 %vm1122_vm1, %v7062_v24  ;;  %v988_v24 = vadd.f32 %v987_v37, %v7052_v12 }
 0x212   : > { %1277 = vmatpush.bf16.msra.mxu3 %v7146_v14 }
 0x213   : > { %v7161_v46 = vpack.c.bf16 %v990_v48, %v988_v24 }
 0x216   : > { %1278 = vmatpush.bf16.msra.mxu3 %v1120_v28 }
 0x21a   : > { %1279 = vmatpush.bf16.msra.mxu3 %v1119_v2 }
 0x21b   : > { %v7178_v43 = vpop.permute.xlu2 %1334 }
 0x21e   : > { %1280 = vmatpush.bf16.msra.mxu3 %v7100_v55 }
 0x221   : > { %5368 = vmatmul.msk.bf16.gmra.mxu3 %vm1122_vm1, %v1111_v36 }
 0x224   : > { %v7183_v9 = vpop.permute.xlu2 %1774 }
 0x22c   : > { %v7198_v62 = vpop.permute.xlu2 %1483 }
 0x231   : > { %5369 = vmatmul.msk.bf16.gmra.mxu3 %vm1122_vm1, %v1112_v30 }
 0x232   : > { %v7230_v31 = vpop.permute.xlu0 %1322 }
 0x233   : > { %v7212_v33 = vpop.permute.xlu1 %1560 }
 0x234   : > { %v7210_v4 = vpop.permute.xlu2 %1927 }
 0x235   : > { %v1046_v38 = vpop.f32.mrf.mxu1  ;;  %v997_v7 = vpop.f32.mrf.mxu0 }
 0x236   : > { %v1047_v61 = vadd.f32 %v1046_v38, %v7054_v39  ;;  %v998_v48 = vadd.f32 %v997_v7, %v7052_v12 }
 0x23b   : > { %v7234_v17 = vpop.permute.xlu1 %1552 }
 0x23c   : > { %v1095_v8 = vpop.f32.mrf.mxu3  ;;  %v7248_v21 = vpop.permute.xlu0 %1782 }
 0x23d   : > { %v1096_v50 = vadd.f32 %v1095_v8, %v7085_v41  ;;  %v1048_v63 = vpop.f32.mrf.mxu1 }
 0x23e   : > { %v1049_v27 = vadd.f32 %v1048_v63, %v7054_v39 }
 0x240   : > { %v7266_v60 = vpack.c.bf16 %v1049_v27, %v1047_v61 }
 0x241   : > { %5370 = vmatmul.msk.bf16.gmra.mxu3 %vm1122_vm1, %v7161_v46 }
 0x243   : > { %v7250_v45 = vpop.permute.xlu1 %1705 }
 0x244   : > { %v1097_v5 = vpop.f32.mrf.mxu3  ;;  %v7264_v34 = vpop.permute.xlu0 %1562 }
 0x245   : > { %v1098_v1 = vadd.f32 %v1097_v5, %v7085_v41  ;;  %v1051_v16 = vpop.f32.mrf.mxu1 }
 0x246   : > { %v1052_v8 = vadd.f32 %v1051_v16, %v7054_v39 }
 0x247   : > { %v7167_v51 = vpack.c.bf16 %v1098_v1, %v1096_v50 }
 0x248   : > { %v7222_v10 = vpop.permute.xlu2 %2488 }
 0x249   : > { %2934 = vrot.lane.b32.xlu2 %v7167_v51, %s6586_s20  ;;  %2712 = vrot.lane.b32.xlu1 %v7167_v51, %s6584_s12 }
 0x24a   : > { %2490 = vrot.lane.b32.xlu0 %v7167_v51, %s6585_s18 }
 0x24c   : > { %v1100_v55 = vpop.f32.mrf.mxu3  ;;  %v7286_v5 = vpop.permute.xlu0 %1776 }
 0x24d   : > { %v1101_v23 = vadd.f32 %v1100_v55, %v7085_v41  ;;  %v1053_v22 = vpop.f32.mrf.mxu1 }
 0x24e   : > { %v1054_v6 = vadd.f32 %v1053_v22, %v7054_v39 }
 0x250   : > { %v7238_v57 = vpop.permute.xlu2 %2710  ;;  %v7280_v24 = vpack.c.bf16 %v1054_v6, %v1052_v8 }
 0x251   : > { %1326 = vrot.lane.b32.xlu2 %v1112_v30, %s6585_s18  ;;  %1778 = vrot.lane.b32.xlu1 %v1112_v30, %s6586_s20 }
 0x252   : > { %1338 = vrot.lane.b32.xlu0 %v1116_v20, %s6585_s18 }
 0x254   : > { %v1102_v54 = vpop.f32.mrf.mxu3 }
 0x255   : > { %v1103_v40 = vadd.f32 %v1102_v54, %v7085_v41  ;;  %v1056_v32 = vpop.f32.mrf.mxu1 }
 0x256   : > { %v1057_v58 = vadd.f32 %v1056_v32, %v7054_v39 }
 0x257   : > { %v7191_v35 = vpack.c.bf16 %v1103_v40, %v1101_v23  ;;  %v7306_v23 = vpop.permute.xlu0 %1485 }
 0x258   : > { %v7252_v25 = vpop.permute.xlu2 %1324 }
 0x259   : > { %1786 = vrot.lane.b32.xlu2 %v1116_v20, %s6586_s20  ;;  %1709 = vrot.lane.b32.xlu1 %v1120_v28, %s6584_s12 }
 0x25a   : > { %1564 = vrot.lane.b32.xlu0 %v1116_v20, %s6584_s12  ;;  %v993_v20 = vadd.f32 %v992_v56, %v7052_v12 }
 0x25c   : > { %v1105_v59 = vpop.f32.mrf.mxu3  ;;  %v7240_v3 = vpack.c.bf16 %v995_v19, %v993_v20 }
 0x25d   : > { %v1106_v0 = vadd.f32 %v1105_v59, %v7085_v41  ;;  %v1058_v50 = vpop.f32.mrf.mxu1 }
 0x25e   : > { %v1059_v1 = vadd.f32 %v1058_v50, %v7054_v39 }
 0x260   : > { %v7275_v37 = vpop.permute.xlu2 %1784  ;;  %v7298_v40 = vpack.c.bf16 %v1059_v1, %v1057_v58 }
 0x261   : > { %1556 = vrot.lane.b32.xlu2 %v1112_v30, %s6584_s12  ;;  %1566 = vrot.lane.b32.xlu1 %v7128_v15, %s6584_s12 }
 0x262   : > { %1931 = vrot.lane.b32.xlu0 %v1120_v28, %s6586_s20 }
 0x264   : > { %v1107_v36 = vpop.f32.mrf.mxu3 }
 0x265   : > { %v1108_v47 = vadd.f32 %v1107_v36, %v7085_v41  ;;  %v1044_v41 = vadd.f32 %v1043_v42, %v7054_v39 }
 0x267   : > { %v7202_v2 = vpack.c.bf16 %v1108_v47, %v1106_v0  ;;  %v7224_v13 = vpack.c.bf16 %v1044_v41, %v1042_v53  ;;  %v7329_v53 = vpop.permute.xlu0 %1929 }
 0x269   : > { %1487 = vrot.lane.b32.xlu2 %v1120_v28, %s6585_s18  ;;  %1788 = vrot.lane.b32.xlu1 %v7128_v15, %s6586_s20  ;;  %v7262_v28 = vpop.permute.xlu1 %2932 }
 0x26a   : > { %2714 = vrot.lane.b32.xlu0 %v7191_v35, %s6584_s12  ;;  %10039 = vst [vmem:[#allocation11_spill] sm:$0xff] %v7262_v28 }
 0x271   : > { %2492 = vrot.lane.b32.xlu2 %v7191_v35, %s6585_s18  ;;  %2494 = vrot.lane.b32.xlu1 %v7202_v2, %s6585_s18 }
 0x272   : > { %1328 = vrot.lane.b32.xlu0 %v7161_v46, %s6585_s18 }
 0x279   : > { %2936 = vrot.lane.b32.xlu2 %v7191_v35, %s6586_s20  ;;  %2716 = vrot.lane.b32.xlu1 %v7202_v2, %s6584_s12 }
 0x27a   : > { %1780 = vrot.lane.b32.xlu0 %v7161_v46, %s6586_s20 }
 0x281   : > { %1340 = vrot.lane.b32.xlu2 %v7128_v15, %s6585_s18  ;;  %2339 = vrot.lane.b32.xlu1 %v7224_v13, %s6585_s18  ;;  %v999_v15 = vpop.f32.mrf.mxu0 }
 0x282   : > { %1711 = vrot.lane.b32.xlu0 %v7146_v14, %s6584_s12  ;;  %v1000_v30 = vadd.f32 %v999_v15, %v7052_v12 }
 0x289   : > { %1558 = vrot.lane.b32.xlu2 %v7161_v46, %s6584_s12  ;;  %2787 = vrot.lane.b32.xlu1 %v7224_v13, %s6586_s20  ;;  %v1002_v26 = vpop.f32.mrf.mxu0  ;;  %v7284_v46 = vpack.c.bf16 %v1000_v30, %v998_v48 }
 0x28a   : > { %2327 = vrot.lane.b32.xlu0 %v7240_v3, %s6585_s18  ;;  %v1003_v47 = vadd.f32 %v1002_v26, %v7052_v12 }
 0x291   : > { %1489 = vrot.lane.b32.xlu2 %v7146_v14, %s6585_s18  ;;  %2779 = vrot.lane.b32.xlu1 %v7240_v3, %s6586_s20  ;;  %v1004_v49 = vpop.f32.mrf.mxu0 }
 0x292   : > { %2557 = vrot.lane.b32.xlu0 %v7240_v3, %s6584_s12  ;;  %v1005_v39 = vadd.f32 %v1004_v49, %v7052_v12 }
 0x294   : > { %v1156_v54 = vpop.f32.mrf.mxu3  ;;  %v7316_v0 = vpack.c.bf16 %v1005_v39, %v1003_v47 }
 0x299   : > { %1933 = vrot.lane.b32.xlu2 %v7146_v14, %s6586_s20  ;;  %2789 = vrot.lane.b32.xlu1 %v7266_v60, %s6586_s20  ;;  %v7282_v14 = vpop.permute.xlu1 %1336  ;;  %v1007_v59 = vpop.f32.mrf.mxu0 }
 0x29a   : > { %2567 = vrot.lane.b32.xlu0 %v7266_v60, %s6584_s12  ;;  %v1008_v7 = vadd.f32 %v1007_v59, %v7052_v12 }
 0x29c   : > { %v7314_v56 = vpop.f32.mrf.mxu3 }
 0x2a1   : > { %2938 = vrot.lane.b32.xlu2 %v7202_v2, %s6586_s20  ;;  %2343 = vrot.lane.b32.xlu1 %v7280_v24, %s6585_s18  ;;  %v7300_v42 = vpop.permute.xlu1 %1554  ;;  %v1009_v38 = vpop.f32.mrf.mxu0 }
 0x2a2   : > { %2559 = vrot.lane.b32.xlu0 %v7284_v46, %s6584_s12  ;;  %v1010_v44 = vadd.f32 %v1009_v38, %v7052_v12 }
 0x2a3   : > { %v7295_v55 = vpop.permute.xlu2 %2934 }
 0x2a4   : > { %10040 = vst [vmem:[#allocation12_spill] sm:$0xff] %v7295_v55  ;;  %v7332_v16 = vpack.c.bf16 %v1010_v44, %v1008_v7  ;;  %v7334_v19 = vpop.f32.mrf.mxu3  ;;  %v7379_v7 = vmul.f32 0.17677669, %v1156_v54 }
 0x2a9   : > { %2565 = vrot.lane.b32.xlu2 %v7224_v13, %s6584_s12  ;;  %2571 = vrot.lane.b32.xlu1 %v7298_v40, %s6584_s12  ;;  %v7325_v63 = vpop.permute.xlu1 %1707 }
 0x2aa   : > { %2569 = vrot.lane.b32.xlu0 %v7280_v24, %s6584_s12 }
 0x2ab   : > { %v7310_v36 = vpop.permute.xlu2 %1326 }
 0x2ac   : > { %v1163_v12 = vpop.f32.mrf.mxu3 }
 0x2ad   : > { %v7394_v54 = vmul.f32 0.17677669, %v1163_v12  ;;  %v2151_v12 = vsel %vm1122_vm1, %v7298_v40, 0 }
 0x2b1   : > { %2341 = vrot.lane.b32.xlu2 %v7266_v60, %s6585_s18  ;;  %2793 = vrot.lane.b32.xlu1 %v7298_v40, %s6586_s20 }
 0x2b2   : > { %2783 = vrot.lane.b32.xlu0 %v7316_v0, %s6586_s20 }
 0x2b3   : > { %v7327_v41 = vpop.permute.xlu2 %1786 }
 0x2b4   : > { %v7362_v30 = vpop.f32.mrf.mxu3 }
 0x2b9   : > { %2329 = vrot.lane.b32.xlu2 %v7284_v46, %s6585_s18  ;;  %2563 = vrot.lane.b32.xlu1 %v7332_v16, %s6584_s12 }
 0x2ba   : > { %2345 = vrot.lane.b32.xlu0 %v7298_v40, %s6585_s18  ;;  %v1355_v40 = vsel %vm1122_vm1, %v7178_v43, 0 }
 0x2bb   : > { %v7342_v20 = vpop.permute.xlu2 %1556  ;;  %v7344_v15 = vpop.permute.xlu1 %2712 }
 0x2bc   : > { %v7346_v22 = vpop.permute.xlu0 %2490  ;;  %v7371_v58 = vpop.f32.mrf.mxu3 }
 0x2c1   : > { %2781 = vrot.lane.b32.xlu2 %v7284_v46, %s6586_s20 }
 0x2c2   : > { %2333 = vrot.lane.b32.xlu0 %v7332_v16, %s6585_s18 }
 0x2c3   : > { %v1488_v26 = vpop.permute.xlu2 %1487  ;;  %v7352_v27 = vpop.permute.xlu1 %1778 }
 0x2c4   : > { %v1339_v61 = vpop.permute.xlu0 %1338 }
 0x2c9   : > { %2331 = vrot.lane.b32.xlu2 %v7316_v0, %s6585_s18 }
 0x2ca   : > { %2785 = vrot.lane.b32.xlu0 %v7332_v16, %s6586_s20 }
 0x2cb   : > { %v7358_v32 = vpop.permute.xlu2 %2492  ;;  %v7360_v6 = vpop.permute.xlu1 %1709 }
 0x2cc   : > { %v1565_v49 = vpop.permute.xlu0 %1564 }
 0x2cd   : > { %v1587_v44 = vsel %vm1122_vm1, %v1565_v49, 0  ;;  %v1584_v49 = vsel %vm1122_vm1, %v7264_v34, 0  ;;  %v1581_v34 = vsel %vm1122_vm1, %v7212_v33, 0 }
 0x2d1   : > { %2791 = vrot.lane.b32.xlu2 %v7280_v24, %s6586_s20 }
 0x2d3   : > { %v7366_v8 = vpop.permute.xlu2 %2936  ;;  %v1567_v48 = vpop.permute.xlu1 %1566 }
 0x2d4   : > { %v7368_v50 = vpop.permute.xlu0 %1931  ;;  %v1590_v1 = vsel %vm1122_vm1, %v1567_v48, 0  ;;  %v7381_v48 = vpop.f32.mrf.mxu3 }
 0x2d5   : > { %1596 = vmatpush.bf16.xpose.msrb.mxu2 %v1590_v1  ;;  %v1185_v1 = vsel %vm1184_vm2, %v7379_v7, -inf }
 0x2d9   : > { %2561 = vrot.lane.b32.xlu2 %v7316_v0, %s6584_s12 }
 0x2db   : > { %v1341_v59 = vpop.permute.xlu2 %1340  ;;  %v1789_v39 = vpop.permute.xlu1 %1788 }
 0x2dc   : > { %v7375_v47 = vpop.permute.xlu0 %2714  ;;  %v1364_v38 = vsel %vm1122_vm1, %v1341_v59, 0  ;;  %v1361_v59 = vsel %vm1122_vm1, %v1339_v61, 0  ;;  %v1358_v61 = vsel %vm1122_vm1, %v7282_v14, 0 }
 0x2dd   : > { %1370 = vmatpush.bf16.xpose.msrb.mxu0 %v1364_v38  ;;  %1597 = vmatpush.bf16.xpose.msrb.mxu2 %v1587_v44  ;;  %v1173_v38 = vpop.f32.mrf.mxu3  ;;  %v1194_v44 = vsel %vm1184_vm2, %v7394_v54, -inf }
 0x2e3   : > { %v7385_v11 = vpop.permute.xlu2 %1558  ;;  %v7387_v29 = vpop.permute.xlu1 %2494  ;;  %1186 = vmax.xlane.f32.xlu1 %v1185_v1 }
 0x2e4   : > { %v7389_v18 = vpop.permute.xlu0 %1328 }
 0x2e5   : > { %1371 = vmatpush.bf16.xpose.msrb.mxu0 %v1361_v59  ;;  %1598 = vmatpush.bf16.xpose.msrb.mxu2 %v1584_v49  ;;  %v7408_v59 = vmul.f32 0.17677669, %v1173_v38  ;;  %v7411_v49 = vmul.f32 0.17677669, %v7314_v56  ;;  %v2148_v56 = vsel %vm1122_vm1, %v7280_v24, 0 }
 0x2e6   : > { %v7428_v38 = vmul.f32 0.17677669, %v7334_v19  ;;  %v1809_v19 = vsel %vm1122_vm1, %v7327_v41, 0  ;;  %v2142_v41 = vsel %vm1122_vm1, %v7224_v13, 0 }
 0x2e7   : > { %v1188_v33 = vsel %vm1184_vm2, %v7411_v49, -inf }
 0x2e8   : > { %v1191_v43 = vsel %vm1184_vm2, %v7428_v38, -inf }
 0x2eb   : > { %v1490_v28 = vpop.permute.xlu2 %1489  ;;  %v7398_v55 = vpop.permute.xlu1 %2716  ;;  %1195 = vmax.xlane.f32.xlu1 %v1194_v44 }
 0x2ec   : > { %v7400_v1 = vpop.permute.xlu0 %1780  ;;  %1511 = vmatpush.bf16.msrb.mxu1 %v1490_v28  ;;  %v1206_v28 = vsel %vm1184_vm2, %v7408_v59, -inf }
 0x2ed   : > { %1372 = vmatpush.bf16.xpose.msrb.mxu0 %v1358_v61  ;;  %1599 = vmatpush.bf16.xpose.msrb.mxu2 %v1581_v34 }
 0x2f0   : > { %1512 = vmatpush.bf16.msrb.mxu1 %v1488_v26  ;;  %v1812_v26 = vsel %vm1122_vm1, %v1789_v39, 0 }
 0x2f3   : > { %v7415_v44 = vpop.permute.xlu1 %2339  ;;  %1207 = vmax.xlane.f32.xlu1 %v1206_v28  ;;  %v1934_v61 = vpop.permute.xlu2 %1933 }
 0x2f4   : > { %1189 = vmax.xlane.f32.xlu0 %v1188_v33  ;;  %v1712_v14 = vpop.permute.xlu0 %1711  ;;  %1513 = vmatpush.bf16.msrb.mxu1 %v7306_v23  ;;  %v7439_v23 = vmul.f32 0.17677669, %v7362_v30 }
 0x2f5   : > { %2157 = vmatpush.bf16.xpose.msra.mxu2 %v2151_v12  ;;  %1733 = vmatpush.bf16.msrb.mxu3 %v1712_v14 }
 0x2f6   : > { %5383 = vmatmul.msk.bf16.vlgmr.msrb.gmra.mxu2 %vm1122_vm1, %v7234_v17  ;;  %1373 = vmatpush.bf16.xpose.msrb.mxu0 %v1355_v40 }
 0x2f8   : > { %1514 = vmatpush.bf16.msrb.mxu1 %v7198_v62  ;;  %v2145_v62 = vsel %vm1122_vm1, %v7266_v60, 0  ;;  %v7458_v60 = vmul.f32 0.17677669, %v7371_v58  ;;  %v7470_v58 = vmul.f32 0.17677669, %v7381_v48 }
 0x2f9   : > { %1734 = vmatpush.bf16.msrb.mxu3 %v7360_v6  ;;  %v1197_v6 = vsel %vm1184_vm2, %v7439_v23, -inf }
 0x2fb   : > { %v7432_v17 = vpop.permute.xlu1 %2787  ;;  %v7476_v13 = vpop.permute.xlu2 %2938 }
 0x2fc   : > { %1955 = vmatpush.bf16.msra.mxu1 %v1934_v61  ;;  %1192 = vmax.xlane.f32.xlu0 %v1191_v43  ;;  %v7436_v24 = vpop.permute.xlu0 %2327 }
 0x2fd   : > { %2158 = vmatpush.bf16.xpose.msra.mxu2 %v2148_v56  ;;  %5375 = vmatmul.msk.bf16.vlgmr.msrb.gmra.mxu0 %vm1122_vm1, %v7230_v31 }
 0x2fe   : > { %1818 = vmatpush.bf16.xpose.msra.mxu0 %v1812_v26  ;;  %1735 = vmatpush.bf16.msrb.mxu3 %v7325_v63 }
 0x300   : > { %1956 = vmatpush.bf16.msra.mxu1 %v7368_v50 }
 0x302   : > { %1736 = vmatpush.bf16.msrb.mxu3 %v7250_v45  ;;  %1198 = vmax.xlane.f32.xlu2 %v1197_v6  ;;  %v1806_v45 = vsel %vm1122_vm1, %v7275_v37, 0  ;;  %v1203_v37 = vsel %vm1184_vm2, %v7470_v58, -inf }
 0x303   : > { %v7453_v31 = vpop.permute.xlu1 %2779  ;;  %v2566_v48 = vpop.permute.xlu2 %2565 }
 0x304   : > { %1957 = vmatpush.bf16.msra.mxu1 %v7329_v53  ;;  %v7455_v63 = vpop.permute.xlu0 %2557  ;;  %v1200_v53 = vsel %vm1184_vm2, %v7458_v60, -inf  ;;  %v2586_v56 = vsel %vm1122_vm1, %v2566_v48, 0 }
 0x305   : > { %2159 = vmatpush.bf16.xpose.msra.mxu2 %v2145_v62 }
 0x306   : > { %1819 = vmatpush.bf16.xpose.msra.mxu0 %v1809_v19  ;;  %5384 = vmatmul.msk.bf16.gmra.mxu2 %vm1122_vm1, %v7300_v42 }
 0x308   : > { %1958 = vmatpush.bf16.msra.mxu1 %v7210_v4  ;;  %v1803_v4 = vsel %vm1122_vm1, %v7248_v21, 0 }
 0x30a   : > { %1201 = vmax.xlane.f32.xlu2 %v1200_v53 }
 0x30b   : > { %v2790_v30 = vpop.permute.xlu1 %2789  ;;  %v2342_v21 = vpop.permute.xlu2 %2341 }
 0x30c   : > { %v2568_v50 = vpop.permute.xlu0 %2567 }
 0x30d   : > { %2160 = vmatpush.bf16.xpose.msra.mxu2 %v2142_v41  ;;  %5376 = vmatmul.msk.bf16.gmra.mxu0 %vm1122_vm1, %v7252_v25  ;;  %v2808_v41 = vsel %vm1122_vm1, %v7432_v17, 0 }
 0x30e   : > { %1820 = vmatpush.bf16.xpose.msra.mxu0 %v1806_v45 }
 0x312   : > { %1204 = vmax.xlane.f32.xlu2 %v1203_v37 }
 0x313   : > { %v2344_v42 = vpop.permute.xlu1 %2343 }
 0x314   : > { %v7480_v39 = vpop.permute.xlu0 %2559 }
 0x316   : > { %1821 = vmatpush.bf16.xpose.msra.mxu0 %v1803_v4  ;;  %5385 = vmatmul.msk.bf16.gmra.mxu2 %vm1122_vm1, %v7342_v20  ;;  %v7492_v20 = vpop.permute.xlu2 %2329 }
 0x31b   : > { %v2572_v34 = vpop.permute.xlu1 %2571 }
 0x31c   : > { %v2595_v25 = vsel %vm1122_vm1, %v2572_v34, 0  ;;  %v2570_v12 = vpop.permute.xlu0 %2569 }
 0x31d   : > { %5377 = vmatmul.msk.bf16.gmra.mxu0 %vm1122_vm1, %v7310_v36  ;;  %2601 = vmatpush.bf16.xpose.msrb.mxu2 %v2595_v25  ;;  %v2592_v33 = vsel %vm1122_vm1, %v2570_v12, 0  ;;  %v2589_v36 = vsel %vm1122_vm1, %v2568_v50, 0 }
 0x31e   : > { %v7502_v26 = vpop.permute.xlu2 %2781 }
 0x323   : > { %v2794_v43 = vpop.permute.xlu1 %2793 }
 0x324   : > { %v7487_v28 = vpop.permute.xlu0 %2783  ;;  %v2817_v62 = vsel %vm1122_vm1, %v2794_v43, 0 }
 0x325   : > { %2602 = vmatpush.bf16.xpose.msrb.mxu2 %v2592_v33 }
 0x326   : > { %5386 = vmatmul.msk.bf16.gmra.mxu2 %vm1122_vm1, %v7385_v11  ;;  %v2366_v11 = vsel %vm1122_vm1, %v2344_v42, 0  ;;  %v7507_v61 = vpop.permute.xlu2 %2331 }
 0x32c   : > { %v2346_v14 = vpop.permute.xlu0 %2345 }
 0x32d   : > { %v2369_v40 = vsel %vm1122_vm1, %v2346_v14, 0  ;;  %5378 = vmatmul.msk.bf16.gmra.mxu0 %vm1122_vm1, %v7389_v18  ;;  %2603 = vmatpush.bf16.xpose.msrb.mxu2 %v2589_v36  ;;  %v2363_v18 = vsel %vm1122_vm1, %v2342_v21, 0 }
 0x32e   : > { %2375 = vmatpush.bf16.xpose.msrb.mxu0 %v2369_v40  ;;  %v2792_v19 = vpop.permute.xlu2 %2791 }
 0x334   : > { %v7517_v6 = vpop.permute.xlu0 %2333 }
 0x335   : > { %2604 = vmatpush.bf16.xpose.msrb.mxu2 %v2586_v56 }
 0x336   : > { %5399 = vmatmul.msk.bf16.vlgmr.msra.gmra.mxu2 %vm1122_vm1, %v7240_v3  ;;  %2376 = vmatpush.bf16.xpose.msrb.mxu0 %v2366_v11  ;;  %v2360_v3 = vsel %vm1122_vm1, %v7415_v44, 0  ;;  %v7522_v44 = vpop.permute.xlu1 %2563 }
 0x33d   : > { %5391 = vmatmul.msk.bf16.vlgmr.msra.gmra.mxu0 %vm1122_vm1, %v7183_v9  ;;  %v2814_v9 = vsel %vm1122_vm1, %v2792_v19, 0 }
 0x33e   : > { %2377 = vmatpush.bf16.xpose.msrb.mxu0 %v2363_v18 }
 0x346   : > { %5400 = vmatmul.msk.bf16.gmra.mxu2 %vm1122_vm1, %v7284_v46  ;;  %2378 = vmatpush.bf16.xpose.msrb.mxu0 %v2360_v3  ;;  %v2811_v46 = vsel %vm1122_vm1, %v2790_v30, 0 }
 0x34d   : > { %5392 = vmatmul.msk.bf16.gmra.mxu0 %vm1122_vm1, %v7286_v5  ;;  %v7528_v5 = vpop.permute.xlu0 %2785 }
 0x34e   : > { %2823 = vmatpush.bf16.xpose.msra.mxu0 %v2817_v62 }
 0x356   : > { %2824 = vmatpush.bf16.xpose.msra.mxu0 %v2814_v9  ;;  %5401 = vmatmul.msk.bf16.gmra.mxu2 %vm1122_vm1, %v7316_v0  ;;  %v1187_v45 = vpop.xlane.xlu1 %1186 }
 0x357   : > { %v1209_v53 = vsub.f32 %v7379_v7, %v1187_v45 }
 0x359   : > { %v1217_v0 = vmul.f32 1.442695, %v1209_v53 }
 0x35b   : > { %6046 = vpow2.f32 %v1217_v0 }
 0x35d   : > { %5393 = vmatmul.msk.bf16.gmra.mxu0 %vm1122_vm1, %v7352_v27  ;;  %v7534_v27 = vpop.permute.xlu2 %2561 }
 0x35e   : > { %2825 = vmatpush.bf16.xpose.msra.mxu0 %v2811_v46  ;;  %v1196_v42 = vpop.xlane.xlu1 %1195 }
 0x35f   : > { %v1212_v34 = vsub.f32 %v7394_v54, %v1196_v42 }
 0x361   : > { %v6047_v37 = vpop.eup %6046 }
 0x362   : > { %v1233_v9 = vsel %vm1184_vm2, %v6047_v37, 0.0 }
 0x366   : > { %2826 = vmatpush.bf16.xpose.msra.mxu0 %v2808_v41  ;;  %5402 = vmatmul.msk.bf16.gmra.mxu2 %vm1122_vm1, %v7332_v16  ;;  %v1208_v53 = vpop.xlane.xlu1 %1207 }
 0x367   : > { %v1190_v30 = vpop.xlane.xlu0 %1189 }
 0x368   : > { %v1210_v50 = vsub.f32 %v7411_v49, %v1190_v30 }
 0x36a   : > { %v1219_v4 = vmul.f32 1.442695, %v1210_v50 }
 0x36c   : > { %6048 = vpow2.f32 %v1219_v4 }
 0x36d   : > { %5394 = vmatmul.msk.bf16.gmra.mxu0 %vm1122_vm1, %v7400_v1  ;;  %v1223_v1 = vmul.f32 1.442695, %v1212_v34 }
 0x36f   : > { %v1193_v17 = vpop.xlane.xlu0 %1192 }
 0x370   : > { %v1211_v7 = vsub.f32 %v7428_v38, %v1193_v17 }
 0x372   : > { %v7538_v48 = vpop.eup %6048  ;;  %v1221_v25 = vmul.f32 1.442695, %v1211_v7 }
 0x373   : > { %v1257_v16 = vpack.c.bf16 %v7538_v48, %v6047_v37 }
 0x374   : > { %6050 = vpow2.f32 %v1221_v25 }
 0x375   : > { %5371 = vmatmul.msk.bf16.vlgmr.msra.gmra.mxu3 %vm1184_vm2, %v1257_v16  ;;  %v1199_v49 = vpop.xlane.xlu2 %1198  ;;  %6052 = vpow2.f32 %v1223_v1 }
 0x376   : > { %5415 = vmatmul.msk.bf16.vlgmr.msrb.gmra.mxu2 %vm1122_vm1, %v7455_v63  ;;  %2282 = vmatpush.bf16.msra.mxu3 %v7202_v2  ;;  %v1213_v18 = vsub.f32 %v7439_v23, %v1199_v49 }
 0x378   : > { %v1225_v3 = vmul.f32 1.442695, %v1213_v18 }
 0x379   : > { %v1601_v12 = vpop.f32.mrf.mxu2 }
 0x37a   : > { %2283 = vmatpush.bf16.msra.mxu3 %v7191_v35  ;;  %v1375_v21 = vpop.f32.mrf.mxu0  ;;  %v7555_v2 = vpop.eup %6050  ;;  %v7557_v14 = vmul.f32 0.17677669, %v1601_v12  ;;  %v1236_v12 = vsel %vm1184_vm2, %v7538_v48, 0.0 }
 0x37b   : > { %v7548_v38 = vmul.f32 0.17677669, %v1375_v21  ;;  %v7561_v40 = vpop.eup %6052 }
 0x37c   : > { %v1258_v56 = vpack.c.bf16 %v7561_v40, %v7555_v2  ;;  %v1242_v48 = vsel %vm1184_vm2, %v7561_v40, 0.0 }
 0x37d   : > { %5407 = vmatmul.msk.bf16.vlgmr.msrb.gmra.mxu0 %vm1122_vm1, %v7436_v24  ;;  %v1403_v54 = vsel %vm1184_vm2, %v7548_v38, -inf  ;;  %v1202_v63 = vpop.xlane.xlu2 %1201 }
 0x37e   : > { %2284 = vmatpush.bf16.msra.mxu3 %v7167_v51  ;;  %1404 = vmax.xlane.f32.xlu2 %v1403_v54  ;;  %v1214_v36 = vsub.f32 %v7458_v60, %v1202_v63  ;;  %v1629_v60 = vsel %vm1184_vm2, %v7557_v14, -inf }
 0x380   : > { %v1227_v43 = vmul.f32 1.442695, %v1214_v36  ;;  %v1239_v36 = vsel %vm1184_vm2, %v7555_v2, 0.0 }
 0x381   : > { %v1603_v33 = vpop.f32.mrf.mxu2 }
 0x382   : > { %v7559_v35 = vmul.f32 0.17677669, %v1603_v33  ;;  %2285 = vmatpush.bf16.msra.mxu3 %v7120_v52  ;;  %v1377_v24 = vpop.f32.mrf.mxu0  ;;  %6054 = vpow2.f32 %v1227_v43 }
 0x383   : > { %v7565_v11 = vmul.f32 0.17677669, %v1377_v24  ;;  %6056 = vpow2.f32 %v1225_v3 }
 0x384   : > { %v1632_v51 = vsel %vm1184_vm2, %v7559_v35, -inf }
 0x385   : > { %1633 = vmax.xlane.f32.xlu0 %v1632_v51  ;;  %5372 = vmatmul.msk.bf16.gmra.mxu3 %vm1184_vm2, %v1258_v56  ;;  %v1406_v52 = vsel %vm1184_vm2, %v7565_v11, -inf  ;;  %v1205_v46 = vpop.xlane.xlu2 %1204 }
 0x386   : > { %5416 = vmatmul.msk.bf16.gmra.mxu2 %vm1122_vm1, %v7480_v39  ;;  %1407 = vmax.xlane.f32.xlu1 %v1406_v52  ;;  %v1215_v50 = vsub.f32 %v7470_v58, %v1205_v46 }
 0x387   : > { %1630 = vmax.xlane.f32.xlu2 %v1629_v60 }
 0x388   : > { %v7586_v41 = vpop.eup %6054  ;;  %v1229_v16 = vmul.f32 1.442695, %v1215_v50 }
 0x389   : > { %v1606_v62 = vpop.f32.mrf.mxu2  ;;  %v6057_v30 = vpop.eup %6056 }
 0x38a   : > { %v1380_v19 = vpop.f32.mrf.mxu0  ;;  %v7588_v0 = vmul.f32 0.17677669, %v1606_v62  ;;  %v1259_v37 = vpack.c.bf16 %v7586_v41, %v6057_v30  ;;  %6058 = vpow2.f32 %v1229_v16  ;;  %v1245_v2 = vsel %vm1184_vm2, %v6057_v30, 0.0 }
 0x38b   : > { %v7579_v23 = vmul.f32 0.17677669, %v1380_v19  ;;  %v1248_v30 = vsel %vm1184_vm2, %v7586_v41, 0.0 }
 0x38c   : > { %v1635_v7 = vsel %vm1184_vm2, %v7588_v0, -inf }
 0x38d   : > { %1234 = vadd.xlane.f32.xlu0 %v1233_v9  ;;  %5408 = vmatmul.msk.bf16.gmra.mxu0 %vm1122_vm1, %v7492_v20  ;;  %v1409_v39 = vsel %vm1184_vm2, %v7579_v23, -inf  ;;  %v1216_v20 = vsub.f32 %v7408_v59, %v1208_v53 }
 0x38f   : > { %1410 = vmax.xlane.f32.xlu2 %v1409_v39  ;;  %v1231_v58 = vmul.f32 1.442695, %v1216_v20 }
 0x390   : > { %v7614_v21 = vpop.eup %6058 }
 0x391   : > { %v1608_v45 = vpop.f32.mrf.mxu2  ;;  %6060 = vpow2.f32 %v1231_v58 }
 0x392   : > { %v1382_v4 = vpop.f32.mrf.mxu0  ;;  %v7602_v49 = vmul.f32 0.17677669, %v1608_v45 }
 0x393   : > { %v7591_v17 = vmul.f32 0.17677669, %v1382_v4 }
 0x394   : > { %v1638_v1 = vsel %vm1184_vm2, %v7602_v49, -inf }
 0x395   : > { %5373 = vmatmul.msk.bf16.gmra.mxu3 %vm1184_vm2, %v1259_v37  ;;  %v1412_v42 = vsel %vm1184_vm2, %v7591_v17, -inf }
 0x396   : > { %5417 = vmatmul.msk.bf16.gmra.mxu2 %vm1122_vm1, %v7534_v27  ;;  %1413 = vmax.xlane.f32.xlu0 %v1412_v42 }
 0x397   : > { %1636 = vmax.xlane.f32.xlu2 %v1635_v7  ;;  %v7616_v63 = vpop.eup %6060 }
 0x399   : > { %v1611_v34 = vpop.f32.mrf.mxu2 }
 0x39a   : > { %v1385_v59 = vpop.f32.mrf.mxu0  ;;  %v7627_v51 = vmul.f32 0.17677669, %v1611_v34 }
 0x39b   : > { %v7604_v25 = vmul.f32 0.17677669, %v1385_v59 }
 0x39d   : > { %5409 = vmatmul.msk.bf16.gmra.mxu0 %vm1122_vm1, %v7507_v61  ;;  %v1415_v27 = vsel %vm1184_vm2, %v7604_v25, -inf  ;;  %v1260_v61 = vpack.c.bf16 %v7616_v63, %v7614_v21 }
 0x39e   : > { %1416 = vmax.xlane.f32.xlu1 %v1415_v27  ;;  %1639 = vmax.xlane.f32.xlu0 %v1638_v1 }
 0x39f   : > { %1237 = vadd.xlane.f32.xlu2 %v1236_v12 }
 0x3a1   : > { %v1613_v54 = vpop.f32.mrf.mxu2 }
 0x3a2   : > { %v1387_v33 = vpop.f32.mrf.mxu0  ;;  %v7650_v46 = vmul.f32 0.17677669, %v1613_v54 }
 0x3a3   : > { %v7638_v60 = vmul.f32 0.17677669, %v1387_v33 }
 0x3a4   : > { %v1644_v50 = vsel %vm1184_vm2, %v7650_v46, -inf }
 0x3a5   : > { %5374 = vmatmul.msk.bf16.gmra.mxu3 %vm1184_vm2, %v1260_v61 }
 0x3a6   : > { %5418 = vmatmul.msk.bf16.gmra.mxu2 %vm1122_vm1, %v7522_v44  ;;  %1240 = vadd.xlane.f32.xlu0 %v1239_v36  ;;  %v1641_v44 = vsel %vm1184_vm2, %v7627_v51, -inf }
 0x3a7   : > { %1243 = vadd.xlane.f32.xlu2 %v1242_v48 }
 0x3a9   : > { %v1616_v24 = vpop.f32.mrf.mxu2 }
 0x3aa   : > { %v7629_v56 = vmul.f32 0.17677669, %v1616_v24  ;;  %v1390_v18 = vpop.f32.mrf.mxu0 }
 0x3ab   : > { %v7662_v20 = vmul.f32 0.17677669, %v1390_v18 }
 0x3ac   : > { %v1647_v52 = vsel %vm1184_vm2, %v7629_v56, -inf }
 0x3ad   : > { %1648 = vmax.xlane.f32.xlu1 %v1647_v52  ;;  %5410 = vmatmul.msk.bf16.gmra.mxu0 %vm1122_vm1, %v7517_v6  ;;  %v1418_v6 = vsel %vm1184_vm2, %v7638_v60, -inf  ;;  %v1421_v58 = vsel %vm1184_vm2, %v7662_v20, -inf }
 0x3ae   : > { %1642 = vmax.xlane.f32.xlu0 %v1641_v44 }
 0x3af   : > { %1246 = vadd.xlane.f32.xlu2 %v1245_v2 }
 0x3b1   : > { %v1618_v40 = vpop.f32.mrf.mxu2 }
 0x3b2   : > { %v7640_v43 = vmul.f32 0.17677669, %v1618_v40  ;;  %v1392_v3 = vpop.f32.mrf.mxu0 }
 0x3b3   : > { %v7642_v62 = vmul.f32 0.17677669, %v1392_v3 }
 0x3b4   : > { %v1650_v9 = vsel %vm1184_vm2, %v7640_v43, -inf }
 0x3b5   : > { %v1424_v19 = vsel %vm1184_vm2, %v7642_v62, -inf }
 0x3b6   : > { %1425 = vmax.xlane.f32.xlu1 %v1424_v19  ;;  %1419 = vmax.xlane.f32.xlu0 %v1418_v6 }
 0x3b7   : > { %1651 = vmax.xlane.f32.xlu2 %v1650_v9 }
 0x3b9   : > { %v2162_v39 = vpop.f32.mrf.mxu2 }
 0x3ba   : > { %v7652_v45 = vmul.f32 0.17677669, %v2162_v39  ;;  %v1823_v53 = vpop.f32.mrf.mxu0 }
 0x3bb   : > { %v7664_v42 = vmul.f32 0.17677669, %v1823_v53 }
 0x3bc   : > { %v2190_v4 = vsel %vm1184_vm2, %v7652_v45, -inf }
 0x3bd   : > { %5423 = vmatmul.msk.bf16.vlgmr.msra.gmra.mxu0 %vm1122_vm1, %v7453_v31  ;;  %v1851_v31 = vsel %vm1184_vm2, %v7664_v42, -inf }
 0x3be   : > { %1249 = vadd.xlane.f32.xlu1 %v1248_v30  ;;  %1645 = vmax.xlane.f32.xlu0 %v1644_v50 }
 0x3bf   : > { %2191 = vmax.xlane.f32.xlu2 %v2190_v4 }
 0x3c1   : > { %v2164_v37 = vpop.f32.mrf.mxu2 }
 0x3c2   : > { %v1825_v7 = vpop.f32.mrf.mxu0  ;;  %v7674_v59 = vmul.f32 0.17677669, %v2164_v37 }
 0x3c3   : > { %v7666_v16 = vmul.f32 0.17677669, %v1825_v7 }
 0x3c4   : > { %v2193_v54 = vsel %vm1184_vm2, %v7674_v59, -inf }
 0x3c5   : > { %v1854_v41 = vsel %vm1184_vm2, %v7666_v16, -inf }
 0x3c6   : > { %1852 = vmax.xlane.f32.xlu1 %v1851_v31  ;;  %1422 = vmax.xlane.f32.xlu0 %v1421_v58 }
 0x3c7   : > { %1855 = vmax.xlane.f32.xlu2 %v1854_v41 }
 0x3c9   : > { %v2167_v34 = vpop.f32.mrf.mxu2 }
 0x3ca   : > { %v1828_v27 = vpop.f32.mrf.mxu0  ;;  %v7684_v61 = vmul.f32 0.17677669, %v2167_v34 }
 0x3cb   : > { %v7676_v1 = vmul.f32 0.17677669, %v1828_v27 }
 0x3cc   : > { %v2196_v18 = vsel %vm1184_vm2, %v7684_v61, -inf }
 0x3cd   : > { %5424 = vmatmul.msk.bf16.gmra.mxu0 %vm1122_vm1, %v7502_v26  ;;  %v1857_v12 = vsel %vm1184_vm2, %v7676_v1, -inf }
 0x3ce   : > { %1858 = vmax.xlane.f32.xlu1 %v1857_v12  ;;  %2194 = vmax.xlane.f32.xlu0 %v2193_v54 }
 0x3d1   : > { %v2169_v33 = vpop.f32.mrf.mxu2 }
 0x3d2   : > { %v7686_v36 = vmul.f32 0.17677669, %v2169_v33  ;;  %v1830_v48 = vpop.f32.mrf.mxu0 }
 0x3d3   : > { %v7688_v24 = vmul.f32 0.17677669, %v1830_v48 }
 0x3d4   : > { %v2199_v52 = vsel %vm1184_vm2, %v7686_v36, -inf }
 0x3d5   : > { %v1860_v26 = vsel %vm1184_vm2, %v7688_v24, -inf }
 0x3d6   : > { %2197 = vmax.xlane.f32.xlu1 %v2196_v18  ;;  %1861 = vmax.xlane.f32.xlu2 %v1860_v26 }
 0x3d7   : > { %2200 = vmax.xlane.f32.xlu0 %v2199_v52 }
 0x3d9   : > { %v2172_v44 = vpop.f32.mrf.mxu2 }
 0x3da   : > { %v1833_v2 = vpop.f32.mrf.mxu0  ;;  %v7702_v6 = vmul.f32 0.17677669, %v2172_v44 }
 0x3db   : > { %v7696_v40 = vmul.f32 0.17677669, %v1833_v2 }
 0x3dc   : > { %v2202_v53 = vsel %vm1184_vm2, %v7702_v6, -inf }
 0x3dd   : > { %5425 = vmatmul.msk.bf16.gmra.mxu0 %vm1122_vm1, %v7487_v28  ;;  %v1863_v3 = vsel %vm1184_vm2, %v7696_v40, -inf }
 0x3de   : > { %1864 = vmax.xlane.f32.xlu1 %v1863_v3 }
 0x3e1   : > { %v2174_v19 = vpop.f32.mrf.mxu2 }
 0x3e2   : > { %v1835_v9 = vpop.f32.mrf.mxu0  ;;  %v7710_v28 = vmul.f32 0.17677669, %v2174_v19 }
 0x3e3   : > { %v7704_v39 = vmul.f32 0.17677669, %v1835_v9 }
 0x3e4   : > { %v2205_v31 = vsel %vm1184_vm2, %v7710_v28, -inf }
 0x3e5   : > { %v1866_v30 = vsel %vm1184_vm2, %v7704_v39, -inf }
 0x3e6   : > { %2203 = vmax.xlane.f32.xlu1 %v2202_v53  ;;  %1867 = vmax.xlane.f32.xlu0 %v1866_v30 }
 0x3e9   : > { %v2177_v50 = vpop.f32.mrf.mxu2 }
 0x3ea   : > { %v7712_v4 = vmul.f32 0.17677669, %v2177_v50  ;;  %v1838_v37 = vpop.f32.mrf.mxu0 }
 0x3eb   : > { %v7720_v58 = vmul.f32 0.17677669, %v1838_v37 }
 0x3ec   : > { %v2208_v7 = vsel %vm1184_vm2, %v7712_v4, -inf }
 0x3ed   : > { %2209 = vmax.xlane.f32.xlu2 %v2208_v7  ;;  %5426 = vmatmul.msk.bf16.gmra.mxu0 %vm1122_vm1, %v7528_v5  ;;  %v1869_v48 = vsel %vm1184_vm2, %v7720_v58, -inf }
 0x3ee   : > { %2206 = vmax.xlane.f32.xlu0 %v2205_v31 }
 0x3f1   : > { %v2179_v41 = vpop.f32.mrf.mxu2  ;;  %v1405_v34 = vpop.xlane.xlu2 %1404 }
 0x3f2   : > { %v1840_v27 = vpop.f32.mrf.mxu0  ;;  %v1427_v54 = vsub.f32 %v7548_v38, %v1405_v34  ;;  %v7730_v44 = vmul.f32 0.17677669, %v2179_v41 }
 0x3f3   : > { %v7722_v12 = vmul.f32 0.17677669, %v1840_v27 }
 0x3f4   : > { %v1435_v18 = vmul.f32 1.442695, %v1427_v54 }
 0x3f5   : > { %v1872_v33 = vsel %vm1184_vm2, %v7722_v12, -inf }
 0x3f6   : > { %1873 = vmax.xlane.f32.xlu1 %v1872_v33  ;;  %1870 = vmax.xlane.f32.xlu0 %v1869_v48  ;;  %6062 = vpow2.f32 %v1435_v18 }
 0x3f8   : > { %v1634_v5 = vpop.xlane.xlu0 %1633 }
 0x3f9   : > { %v1654_v26 = vsub.f32 %v7559_v35, %v1634_v5  ;;  %v2606_v52 = vpop.f32.mrf.mxu2  ;;  %v1408_v2 = vpop.xlane.xlu1 %1407  ;;  %v2211_v35 = vsel %vm1184_vm2, %v7730_v44, -inf }
 0x3fa   : > { %v1631_v3 = vpop.xlane.xlu2 %1630  ;;  %v7732_v9 = vmul.f32 0.17677669, %v2606_v52  ;;  %v1428_v38 = vsub.f32 %v7565_v11, %v1408_v2  ;;  %v2380_v30 = vpop.f32.mrf.mxu0 }
 0x3fb   : > { %v1663_v19 = vmul.f32 1.442695, %v1654_v26  ;;  %v1653_v53 = vsub.f32 %v7557_v14, %v1631_v3  ;;  %v7736_v50 = vmul.f32 0.17677669, %v2380_v30 }
 0x3fc   : > { %v1437_v37 = vmul.f32 1.442695, %v1428_v38  ;;  %v2634_v11 = vsel %vm1184_vm2, %v7732_v9, -inf  ;;  %v6063_v34 = vpop.eup %6062 }
 0x3fd   : > { %v1661_v7 = vmul.f32 1.442695, %v1653_v53  ;;  %6064 = vpow2.f32 %v1663_v19  ;;  %v2408_v31 = vsel %vm1184_vm2, %v7736_v50, -inf  ;;  %v1451_v52 = vsel %vm1184_vm2, %v6063_v34, 0.0 }
 0x3fe   : > { %6066 = vpow2.f32 %v1437_v37  ;;  %2212 = vmax.xlane.f32.xlu1 %v2211_v35  ;;  %2409 = vmax.xlane.f32.xlu2 %v2408_v31 }
 0x3ff   : > { %6068 = vpow2.f32 %v1661_v7  ;;  %2635 = vmax.xlane.f32.xlu0 %v2634_v11 }
 0x400   : > { %v7744_v14 = vpop.xlane.xlu0 %1234 }
 0x401   : > { %v2608_v5 = vpop.f32.mrf.mxu2 }
 0x402   : > { %v1411_v41 = vpop.xlane.xlu2 %1410  ;;  %v2382_v27 = vpop.f32.mrf.mxu0 }
 0x403   : > { %v6065_v54 = vpop.eup %6064  ;;  %v7746_v33 = vmul.f32 0.17677669, %v2382_v27  ;;  %v1429_v26 = vsub.f32 %v7579_v23, %v1411_v41 }
 0x404   : > { %v6067_v48 = vpop.eup %6066 }
 0x405   : > { %v6069_v18 = vpop.eup %6068  ;;  %v2411_v2 = vsel %vm1184_vm2, %v7746_v33, -inf  ;;  %v1475_v3 = vpack.c.bf16 %v6067_v48, %v6063_v34  ;;  %v1439_v38 = vmul.f32 1.442695, %v1429_v26 }
 0x406   : > { %v1701_v19 = vpack.c.bf16 %v6065_v54, %v6069_v18  ;;  %1452 = vadd.xlane.f32.xlu2 %v1451_v52  ;;  %v1677_v11 = vsel %vm1184_vm2, %v6069_v18, 0.0 }
 0x407   : > { %2412 = vmax.xlane.f32.xlu0 %v2411_v2  ;;  %5379 = vmatmul.msk.bf16.vlgmr.msrb.gmra.mxu1 %vm1184_vm2, %v1475_v3  ;;  %6070 = vpow2.f32 %v1439_v38 }
 0x408   : > { %5387 = vmatmul.msk.bf16.vlgmr.msrb.gmra.mxu3 %vm1184_vm2, %v1701_v19  ;;  %2516 = vmatpush.bf16.msrb.mxu1 %v7387_v29 }
 0x409   : > { %2738 = vmatpush.bf16.msrb.mxu3 %v7398_v55  ;;  %v1414_v23 = vpop.xlane.xlu0 %1413  ;;  %v2611_v29 = vpop.f32.mrf.mxu2  ;;  %v1454_v55 = vsel %vm1184_vm2, %v6067_v48, 0.0 }
 0x40a   : > { %v1637_v53 = vpop.xlane.xlu2 %1636  ;;  %v1430_v37 = vsub.f32 %v7591_v17, %v1414_v23  ;;  %v2385_v7 = vpop.f32.mrf.mxu0 }
 0x40b   : > { %v1655_v30 = vsub.f32 %v7588_v0, %v1637_v53  ;;  %v7763_v0 = vmul.f32 0.17677669, %v2608_v5  ;;  %v7776_v52 = vmul.f32 0.17677669, %v2385_v7 }
 0x40c   : > { %v1441_v31 = vmul.f32 1.442695, %v1430_v37  ;;  %2517 = vmatpush.bf16.msrb.mxu1 %v7358_v32  ;;  %v7790_v37 = vmul.f32 0.17677669, %v2611_v29 }
 0x40d   : > { %v1665_v35 = vmul.f32 1.442695, %v1655_v30  ;;  %2739 = vmatpush.bf16.msrb.mxu3 %v7375_v47  ;;  %v6071_v34 = vpop.eup %6070  ;;  %v2637_v5 = vsel %vm1184_vm2, %v7763_v0, -inf  ;;  %v2414_v53 = vsel %vm1184_vm2, %v7776_v52, -inf }
 0x40e   : > { %1678 = vadd.xlane.f32.xlu2 %v1677_v11  ;;  %v1457_v23 = vsel %vm1184_vm2, %v6071_v34, 0.0 }
 0x40f   : > { %6072 = vpow2.f32 %v1665_v35  ;;  %1455 = vadd.xlane.f32.xlu0 %v1454_v55 }
 0x410   : > { %6074 = vpow2.f32 %v1441_v31  ;;  %2518 = vmatpush.bf16.msrb.mxu1 %v7346_v22 }
 0x411   : > { %2740 = vmatpush.bf16.msrb.mxu3 %v7344_v15  ;;  %v1640_v17 = vpop.xlane.xlu0 %1639  ;;  %v1680_v15 = vsel %vm1184_vm2, %v6065_v54, 0.0 }
 0x412   : > { %v7766_v32 = vpop.xlane.xlu2 %1237  ;;  %v1656_v47 = vsub.f32 %v7602_v49, %v1640_v17  ;;  %v2387_v41 = vpop.f32.mrf.mxu0 }
 0x413   : > { %v2613_v49 = vpop.f32.mrf.mxu2  ;;  %v7778_v2 = vmul.f32 0.17677669, %v2387_v41 }
 0x414   : > { %v1667_v18 = vmul.f32 1.442695, %v1656_v47  ;;  %2519 = vmatpush.bf16.msrb.mxu1 %v7222_v10  ;;  %v1417_v10 = vpop.xlane.xlu1 %1416  ;;  %v7794_v11 = vmul.f32 0.17677669, %v2613_v49 }
 0x415   : > { %v6073_v27 = vpop.eup %6072  ;;  %2741 = vmatpush.bf16.msrb.mxu3 %v7238_v57  ;;  %v2417_v54 = vsel %vm1184_vm2, %v7778_v2, -inf }
 0x416   : > { %v6075_v48 = vpop.eup %6074  ;;  %v1683_v22 = vsel %vm1184_vm2, %v6073_v27, 0.0  ;;  %2638 = vmax.xlane.f32.xlu2 %v2637_v5  ;;  %6076 = vpow2.f32 %v1667_v18  ;;  %v2640_v18 = vsel %vm1184_vm2, %v7790_v37, -inf }
 0x417   : > { %1684 = vadd.xlane.f32.xlu1 %v1683_v22  ;;  %v1476_v26 = vpack.c.bf16 %v6075_v48, %v6071_v34  ;;  %1681 = vadd.xlane.f32.xlu0 %v1680_v15 }
 0x419   : > { %5380 = vmatmul.msk.bf16.gmra.mxu1 %vm1184_vm2, %v1476_v26  ;;  %v7780_v57 = vpop.xlane.xlu0 %1240 }
 0x41a   : > { %v7782_v3 = vpop.xlane.xlu2 %1243  ;;  %v2390_v19 = vpop.f32.mrf.mxu0 }
 0x41b   : > { %v7792_v7 = vmul.f32 0.17677669, %v2390_v19  ;;  %v2616_v47 = vpop.f32.mrf.mxu2  ;;  %v1460_v19 = vsel %vm1184_vm2, %v6075_v48, 0.0 }
 0x41c   : > { %v6077_v38 = vpop.eup %6076 }
 0x41d   : > { %v1702_v30 = vpack.c.bf16 %v6077_v38, %v6073_v27  ;;  %v1431_v27 = vsub.f32 %v7604_v25, %v1417_v10  ;;  %v2420_v29 = vsel %vm1184_vm2, %v7792_v7, -inf }
 0x41e   : > { %2415 = vmax.xlane.f32.xlu2 %v2414_v53 }
 0x41f   : > { %2418 = vmax.xlane.f32.xlu1 %v2417_v54  ;;  %1458 = vadd.xlane.f32.xlu0 %v1457_v23  ;;  %v1443_v22 = vmul.f32 1.442695, %v1431_v27 }
 0x420   : > { %5388 = vmatmul.msk.bf16.gmra.mxu3 %vm1184_vm2, %v1702_v30  ;;  %v1649_v35 = vpop.xlane.xlu1 %1648  ;;  %v1686_v30 = vsel %vm1184_vm2, %v6077_v38, 0.0 }
 0x421   : > { %v1643_v31 = vpop.xlane.xlu0 %1642 }
 0x422   : > { %v1657_v55 = vsub.f32 %v7627_v51, %v1643_v31  ;;  %v7797_v17 = vpop.f32.mrf.mxu0  ;;  %v7799_v41 = vpop.xlane.xlu2 %1246  ;;  %v2643_v51 = vsel %vm1184_vm2, %v7794_v11, -inf }
 0x423   : > { %v2618_v53 = vpop.f32.mrf.mxu2 }
 0x424   : > { %v1669_v34 = vmul.f32 1.442695, %v1657_v55  ;;  %v7814_v31 = vmul.f32 0.17677669, %v2618_v53 }
 0x426   : > { %6078 = vpow2.f32 %v1669_v34  ;;  %2641 = vmax.xlane.f32.xlu2 %v2640_v18  ;;  %v2649_v18 = vsel %vm1184_vm2, %v7814_v31, -inf }
 0x427   : > { %2421 = vmax.xlane.f32.xlu1 %v2420_v29  ;;  %2644 = vmax.xlane.f32.xlu0 %v2643_v51  ;;  %6080 = vpow2.f32 %v1443_v22  ;;  %v1659_v22 = vsub.f32 %v7629_v56, %v1649_v35 }
 0x429   : > { %v1426_v5 = vpop.xlane.xlu1 %1425  ;;  %v1420_v15 = vpop.xlane.xlu0 %1419  ;;  %v1673_v56 = vmul.f32 1.442695, %v1659_v22 }
 0x42a   : > { %v1432_v26 = vsub.f32 %v7638_v60, %v1420_v15  ;;  %v7809_v49 = vpop.f32.mrf.mxu0  ;;  %v1652_v23 = vpop.xlane.xlu2 %1651  ;;  %v1434_v15 = vsub.f32 %v7642_v62, %v1426_v5 }
 0x42b   : > { %v7841_v22 = vpop.f32.mrf.mxu3 }
 0x42c   : > { %v6079_v25 = vpop.eup %6078  ;;  %v1445_v10 = vmul.f32 1.442695, %v1432_v26  ;;  %v1449_v5 = vmul.f32 1.442695, %v1434_v15 }
 0x42d   : > { %v1689_v54 = vsel %vm1184_vm2, %v6079_v25, 0.0  ;;  %v6081_v29 = vpop.eup %6080 }
 0x42e   : > { %1461 = vadd.xlane.f32.xlu2 %v1460_v19  ;;  %6082 = vpow2.f32 %v1445_v10  ;;  %v1463_v38 = vsel %vm1184_vm2, %v6081_v29, 0.0 }
 0x42f   : > { %1690 = vadd.xlane.f32.xlu1 %v1689_v54  ;;  %1687 = vadd.xlane.f32.xlu0 %v1686_v30  ;;  %v7828_v30 = vmul.f32 0.17677669, %v2616_v47 }
 0x431   : > { %v7816_v60 = vpop.xlane.xlu1 %1249  ;;  %v1646_v55 = vpop.xlane.xlu0 %1645 }
 0x432   : > { %v1658_v34 = vsub.f32 %v7650_v46, %v1646_v55  ;;  %v2397_v27 = vpop.f32.mrf.mxu0  ;;  %v2621_v46 = vpop.f32.mrf.mxu2 }
 0x433   : > { %v7825_v19 = vpop.xlane.xlu2 %2191  ;;  %v7833_v62 = vmul.f32 0.17677669, %v2621_v46 }
 0x434   : > { %v1671_v48 = vmul.f32 1.442695, %v1658_v34  ;;  %v6083_v51 = vpop.eup %6082 }
 0x435   : > { %v1466_v26 = vsel %vm1184_vm2, %v6083_v51, 0.0  ;;  %v1477_v10 = vpack.c.bf16 %v6083_v51, %v6081_v29  ;;  %v1660_v29 = vsub.f32 %v7640_v43, %v1652_v23  ;;  %v2646_v51 = vsel %vm1184_vm2, %v7828_v30, -inf }
 0x436   : > { %6084 = vpow2.f32 %v1671_v48  ;;  %1467 = vadd.xlane.f32.xlu2 %v1466_v26  ;;  %v2652_v47 = vsel %vm1184_vm2, %v7833_v62, -inf  ;;  %v7844_v43 = vmul.f32 0.17677669, %v7797_v17 }
 0x437   : > { %2650 = vmax.xlane.f32.xlu1 %v2649_v18  ;;  %1464 = vadd.xlane.f32.xlu0 %v1463_v38  ;;  %6086 = vpow2.f32 %v1673_v56 }
 0x438   : > { %5381 = vmatmul.msk.bf16.gmra.mxu1 %vm1184_vm2, %v1477_v10  ;;  %6088 = vpow2.f32 %v1449_v5  ;;  %v2423_v56 = vsel %vm1184_vm2, %v7844_v43, -inf }
 0x439   : > { %v1853_v54 = vpop.xlane.xlu1 %1852  ;;  %v1423_v53 = vpop.xlane.xlu0 %1422 }
 0x43a   : > { %v1433_v35 = vsub.f32 %v7662_v20, %v1423_v53  ;;  %v7831_v55 = vpop.f32.mrf.mxu0  ;;  %v1675_v20 = vmul.f32 1.442695, %v1660_v29  ;;  %v1875_v10 = vsub.f32 %v7664_v42, %v1853_v54 }
 0x43b   : > { %v1856_v23 = vpop.xlane.xlu2 %1855 }
 0x43c   : > { %v6085_v34 = vpop.eup %6084  ;;  %v1447_v48 = vmul.f32 1.442695, %v1433_v35  ;;  %v1876_v53 = vsub.f32 %v7666_v16, %v1856_v23  ;;  %v7858_v16 = vmul.f32 0.17677669, %v2397_v27 }
 0x43d   : > { %v1703_v18 = vpack.c.bf16 %v6085_v34, %v6079_v25  ;;  %v6087_v15 = vpop.eup %6086 }
 0x43e   : > { %6090 = vpow2.f32 %v1447_v48  ;;  %2653 = vmax.xlane.f32.xlu2 %v2652_v47  ;;  %v7846_v26 = vpop.eup %6088  ;;  %v1695_v17 = vsel %vm1184_vm2, %v6087_v15, 0.0  ;;  %v1883_v48 = vmul.f32 1.442695, %v1875_v10  ;;  %v1885_v54 = vmul.f32 1.442695, %v1876_v53 }
 0x43f   : > { %2647 = vmax.xlane.f32.xlu0 %v2646_v51  ;;  %5389 = vmatmul.msk.bf16.gmra.mxu3 %vm1184_vm2, %v1703_v18  ;;  %6092 = vpow2.f32 %v1675_v20  ;;  %v7860_v51 = vpop.f32.mrf.mxu3  ;;  %v2214_v20 = vsub.f32 %v7652_v45, %v7825_v19  ;;  %v2429_v53 = vsel %vm1184_vm2, %v7858_v16, -inf }
 0x440   : > { %6094 = vpow2.f32 %v1883_v48 }
 0x441   : > { %v1859_v38 = vpop.xlane.xlu1 %1858  ;;  %v2195_v35 = vpop.xlane.xlu0 %2194  ;;  %6096 = vpow2.f32 %v1885_v54  ;;  %v2222_v45 = vmul.f32 1.442695, %v2214_v20 }
 0x442   : > { %v2830_v25 = vpop.f32.mrf.mxu0  ;;  %v2215_v47 = vsub.f32 %v7674_v59, %v2195_v35  ;;  %v1877_v10 = vsub.f32 %v7676_v1, %v1859_v38 }
 0x443   : > { %v7876_v38 = vmul.f32 0.17677669, %v2830_v25 }
 0x444   : > { %v6091_v46 = vpop.eup %6090  ;;  %v2224_v59 = vmul.f32 1.442695, %v2215_v47  ;;  %v1887_v35 = vmul.f32 1.442695, %v1877_v10 }
 0x445   : > { %v1469_v5 = vsel %vm1184_vm2, %v6091_v46, 0.0  ;;  %v1478_v29 = vpack.c.bf16 %v7846_v26, %v6091_v46  ;;  %v6093_v42 = vpop.eup %6092  ;;  %v2859_v25 = vsel %vm1184_vm2, %v7876_v38, -inf }
 0x446   : > { %1696 = vadd.xlane.f32.xlu2 %v1695_v17  ;;  %1470 = vadd.xlane.f32.xlu1 %v1469_v5  ;;  %v1704_v46 = vpack.c.bf16 %v6093_v42, %v6087_v15  ;;  %v1698_v27 = vsel %vm1184_vm2, %v6093_v42, 0.0  ;;  %v7872_v15 = vmul.f32 0.17677669, %v7809_v49  ;;  %6098 = vpow2.f32 %v2224_v59 }
 0x447   : > { %2424 = vmax.xlane.f32.xlu0 %v2423_v56  ;;  %v1692_v56 = vsel %vm1184_vm2, %v6085_v34, 0.0  ;;  %v6095_v34 = vpop.eup %6094  ;;  %6100 = vpow2.f32 %v2222_v45 }
 0x448   : > { %5382 = vmatmul.msk.bf16.gmra.mxu1 %vm1184_vm2, %v1478_v29  ;;  %v6097_v5 = vpop.eup %6096  ;;  %v7878_v29 = vpop.f32.mrf.mxu3  ;;  %6102 = vpow2.f32 %v1887_v35  ;;  %v2426_v42 = vsel %vm1184_vm2, %v7872_v15, -inf  ;;  %v1899_v47 = vsel %vm1184_vm2, %v6095_v34, 0.0 }
 0x449   : > { %v2198_v23 = vpop.xlane.xlu1 %2197  ;;  %v1862_v17 = vpop.xlane.xlu2 %1861  ;;  %v1923_v49 = vpack.c.bf16 %v6097_v5, %v6095_v34 }
 0x44a   : > { %v7856_v18 = vpop.f32.mrf.mxu0  ;;  %v2201_v19 = vpop.xlane.xlu0 %2200  ;;  %v1878_v48 = vsub.f32 %v7688_v24, %v1862_v17 }
 0x44b   : > { %v2623_v17 = vpop.f32.mrf.mxu2 }
 0x44c   : > { %v1889_v10 = vmul.f32 1.442695, %v1878_v48 }
 0x44e   : > { %2430 = vmax.xlane.f32.xlu2 %v2429_v53  ;;  %1699 = vadd.xlane.f32.xlu1 %v1698_v27  ;;  %v2217_v27 = vsub.f32 %v7686_v36, %v2201_v19  ;;  %6104 = vpow2.f32 %v1889_v10  ;;  %v1902_v36 = vsel %vm1184_vm2, %v6097_v5, 0.0 }
 0x44f   : > { %1693 = vadd.xlane.f32.xlu0 %v1692_v56  ;;  %5390 = vmatmul.msk.bf16.gmra.mxu3 %vm1184_vm2, %v1704_v46  ;;  %v7887_v46 = vpop.eup %6098  ;;  %v2216_v56 = vsub.f32 %v7684_v61, %v2198_v23 }
 0x450   : > { %v7890_v24 = vpop.eup %6100  ;;  %v7904_v23 = vpop.f32.mrf.mxu3 }
 0x451   : > { %v1865_v54 = vpop.xlane.xlu1 %1864  ;;  %v6103_v53 = vpop.eup %6102  ;;  %v2262_v45 = vpack.c.bf16 %v7887_v46, %v7890_v24  ;;  %v2226_v48 = vmul.f32 1.442695, %v2216_v56 }
 0x452   : > { %v7874_v1 = vpop.f32.mrf.mxu0  ;;  %v1879_v35 = vsub.f32 %v7696_v40, %v1865_v54  ;;  %v1905_v61 = vsel %vm1184_vm2, %v6103_v53, 0.0  ;;  %v2228_v40 = vmul.f32 1.442695, %v2217_v27 }
 0x453   : > { %6106 = vpow2.f32 %v2226_v48  ;;  %v7929_v48 = vmul.f32 0.17677669, %v7831_v55 }
 0x454   : > { %6108 = vpow2.f32 %v2228_v40 }
 0x456   : > { %1900 = vadd.xlane.f32.xlu2 %v1899_v47  ;;  %2860 = vmax.xlane.f32.xlu1 %v2859_v25  ;;  %v6105_v47 = vpop.eup %6104  ;;  %v10042_v25 = vld [vmem:[#allocation11_spill] sm:$0xff] }
 0x457   : > { %2427 = vmax.xlane.f32.xlu0 %v2426_v42  ;;  %v7906_v42 = vmul.f32 0.17677669, %v2623_v17  ;;  %v1908_v56 = vsel %vm1184_vm2, %v6105_v47, 0.0  ;;  %v1924_v27 = vpack.c.bf16 %v6105_v47, %v6103_v53 }
 0x458   : > { %5395 = vmatmul.msk.bf16.vlgmr.msra.gmra.mxu1 %vm1184_vm2, %v1923_v49  ;;  %v10041_v49 = vld [vmem:[#allocation12_spill] sm:$0xff]  ;;  %v7926_v17 = vpop.f32.mrf.mxu3 }
 0x459   : > { %v1868_v20 = vpop.xlane.xlu0 %1867  ;;  %2960 = vmatpush.bf16.msra.mxu1 %v7476_v13  ;;  %v1472_v13 = vsel %vm1184_vm2, %v7846_v26, 0.0  ;;  %v2204_v19 = vpop.xlane.xlu1 %2203 }
 0x45a   : > { %v2838_v59 = vpop.f32.mrf.mxu0  ;;  %v1880_v34 = vsub.f32 %v7704_v39, %v1868_v20  ;;  %v1891_v39 = vmul.f32 1.442695, %v1879_v35  ;;  %v2655_v20 = vsel %vm1184_vm2, %v7906_v42, -inf }
 0x45b   : > { %v7909_v54 = vmul.f32 0.17677669, %v2838_v59 }
 0x45c   : > { %v1893_v26 = vmul.f32 1.442695, %v1880_v34  ;;  %6110 = vpow2.f32 %v1891_v39 }
 0x45d   : > { %2961 = vmatpush.bf16.msra.mxu1 %v7366_v8  ;;  %v2868_v10 = vsel %vm1184_vm2, %v7909_v54, -inf }
 0x45e   : > { %1906 = vadd.xlane.f32.xlu2 %v1905_v61  ;;  %1903 = vadd.xlane.f32.xlu1 %v1902_v36  ;;  %6112 = vpow2.f32 %v1893_v26  ;;  %v2218_v26 = vsub.f32 %v7702_v6, %v2204_v19 }
 0x45f   : > { %1473 = vadd.xlane.f32.xlu0 %v1472_v13  ;;  %5403 = vmatmul.msk.bf16.vlgmr.msra.gmra.mxu3 %vm1184_vm2, %v2262_v45  ;;  %v7921_v45 = vpop.eup %6106 }
 0x460   : > { %v7919_v59 = vpop.xlane.xlu2 %2209  ;;  %10043 = vst [vmem:[#allocation12_spill] sm:$0xff] %v7921_v45  ;;  %v7924_v13 = vpop.eup %6108  ;;  %v2230_v6 = vmul.f32 1.442695, %v2218_v26 }
 0x461   : > { %v2207_v8 = vpop.xlane.xlu0 %2206  ;;  %2962 = vmatpush.bf16.msra.mxu1 %v10041_v49  ;;  %v2263_v49 = vpack.c.bf16 %v7924_v13, %v7921_v45 }
 0x462   : > { %v7911_v5 = vpop.f32.mrf.mxu0  ;;  %v6111_v53 = vpop.eup %6110  ;;  %v2219_v40 = vsub.f32 %v7710_v28, %v2207_v8 }
 0x463   : > { %v1911_v55 = vsel %vm1184_vm2, %v6111_v53, 0.0 }
 0x464   : > { %v6113_v36 = vpop.eup %6112  ;;  %v2232_v28 = vmul.f32 1.442695, %v2219_v40 }
 0x465   : > { %2963 = vmatpush.bf16.msra.mxu1 %v10042_v25  ;;  %v2856_v25 = vsel %vm1184_vm2, %v7929_v48, -inf  ;;  %v1925_v26 = vpack.c.bf16 %v6113_v36, %v6111_v53 }
 0x466   : > { %2869 = vmax.xlane.f32.xlu2 %v2868_v10  ;;  %1909 = vadd.xlane.f32.xlu1 %v1908_v56 }
 0x467   : > { %2656 = vmax.xlane.f32.xlu0 %v2655_v20  ;;  %v7943_v20 = vmul.f32 0.17677669, %v7856_v18 }
 0x468   : > { %5396 = vmatmul.msk.bf16.gmra.mxu1 %vm1184_vm2, %v1924_v27 }
 0x469   : > { %v1874_v35 = vpop.xlane.xlu1 %1873  ;;  %v1871_v34 = vpop.xlane.xlu0 %1870  ;;  %v2862_v18 = vsel %vm1184_vm2, %v7943_v20, -inf }
 0x46a   : > { %v1882_v61 = vsub.f32 %v7722_v12, %v1874_v35  ;;  %v1881_v47 = vsub.f32 %v7720_v58, %v1871_v34  ;;  %v1914_v12 = vsel %vm1184_vm2, %v6113_v36, 0.0  ;;  %v2843_v8 = vpop.f32.mrf.mxu0  ;;  %v7948_v34 = vpop.f32.mrf.mxu3 }
 0x46b   : > { %v7946_v27 = vmul.f32 0.17677669, %v2843_v8 }
 0x46c   : > { %v1897_v39 = vmul.f32 1.442695, %v1882_v61  ;;  %v1895_v58 = vmul.f32 1.442695, %v1881_v47 }
 0x46e   : > { %6114 = vpow2.f32 %v1897_v39  ;;  %1912 = vadd.xlane.f32.xlu2 %v1911_v55  ;;  %1915 = vadd.xlane.f32.xlu1 %v1914_v12 }
 0x46f   : > { %2857 = vmax.xlane.f32.xlu0 %v2856_v25  ;;  %5404 = vmatmul.msk.bf16.gmra.mxu3 %vm1184_vm2, %v2263_v49  ;;  %6116 = vpow2.f32 %v2232_v28 }
 0x470   : > { %6118 = vpow2.f32 %v2230_v6 }
 0x471   : > { %v2410_v19 = vpop.xlane.xlu2 %2409  ;;  %6120 = vpow2.f32 %v1895_v58  ;;  %v2213_v49 = vpop.xlane.xlu1 %2212  ;;  %v2220_v58 = vsub.f32 %v7712_v4, %v7919_v59  ;;  %v7984_v4 = vmul.f32 0.17677669, %v7911_v5 }
 0x472   : > { %v2432_v10 = vsub.f32 %v7736_v50, %v2410_v19  ;;  %v2636_v56 = vpop.xlane.xlu0 %2635  ;;  %v2874_v50 = vsel %vm1184_vm2, %v7946_v27, -inf  ;;  %v2221_v6 = vsub.f32 %v7730_v44, %v2213_v49  ;;  %v7971_v19 = vpop.f32.mrf.mxu3  ;;  %v1251_v49 = vsel %vm1184_vm2, %v7614_v21, 0.0 }
 0x473   : > { %v2658_v39 = vsub.f32 %v7732_v9, %v2636_v56  ;;  %v7962_v9 = vmul.f32 0.17677669, %v7874_v1 }
 0x474   : > { %v6115_v35 = vpop.eup %6114  ;;  %v2440_v61 = vmul.f32 1.442695, %v2432_v10  ;;  %v2236_v56 = vmul.f32 1.442695, %v2221_v6 }
 0x475   : > { %v1920_v40 = vsel %vm1184_vm2, %v6115_v35, 0.0  ;;  %v7959_v25 = vpop.eup %6116  ;;  %v2666_v55 = vmul.f32 1.442695, %v2658_v39  ;;  %v2865_v1 = vsel %vm1184_vm2, %v7962_v9, -inf }
 0x476   : > { %6122 = vpow2.f32 %v2440_v61  ;;  %2875 = vmax.xlane.f32.xlu2 %v2874_v50  ;;  %1921 = vadd.xlane.f32.xlu1 %v1920_v40  ;;  %10044 = vst [vmem:[#allocation11_spill] sm:$0xff] %v7959_v25  ;;  %v7964_v28 = vpop.eup %6118  ;;  %v2234_v40 = vmul.f32 1.442695, %v2220_v58  ;;  %v2871_v50 = vsel %vm1184_vm2, %v7984_v4, -inf }
 0x477   : > { %2863 = vmax.xlane.f32.xlu0 %v2862_v18  ;;  %10045 = vst [vmem:[#allocation13_spill] sm:$0xff] %v7964_v28  ;;  %v6121_v8 = vpop.eup %6120  ;;  %v2264_v36 = vpack.c.bf16 %v7959_v25, %v7964_v28  ;;  %6124 = vpow2.f32 %v2666_v55 }
 0x478   : > { %5397 = vmatmul.msk.bf16.gmra.mxu1 %vm1184_vm2, %v1925_v26  ;;  %v1917_v44 = vsel %vm1184_vm2, %v6121_v8, 0.0  ;;  %6126 = vpow2.f32 %v2236_v56  ;;  %v2845_v26 = vpop.f32.mrf.mxu0  ;;  %v1926_v55 = vpack.c.bf16 %v6115_v35, %v6121_v8 }
 0x479   : > { %v7957_v47 = vpop.xlane.xlu2 %1452  ;;  %6128 = vpow2.f32 %v2234_v40 }
 0x47a   : > { %v2413_v12 = vpop.xlane.xlu0 %2412  ;;  %v7997_v6 = vpop.f32.mrf.mxu3 }
 0x47b   : > { %v2433_v18 = vsub.f32 %v7746_v33, %v2413_v12  ;;  %10046 = vst [vmem:[#allocation14_spill] sm:$0xff] %v7997_v6 }
 0x47c   : > { %v7967_v53 = vpop.eup %6122 }
 0x47d   : > { %v2456_v10 = vsel %vm1184_vm2, %v7967_v53, 0.0  ;;  %v7988_v39 = vpop.eup %6124 }
 0x47e   : > { %2457 = vadd.xlane.f32.xlu1 %v2456_v10  ;;  %1918 = vadd.xlane.f32.xlu2 %v1917_v44  ;;  %v2682_v5 = vsel %vm1184_vm2, %v7988_v39, 0.0  ;;  %v8000_v58 = vpop.eup %6126 }
 0x47f   : > { %2866 = vmax.xlane.f32.xlu0 %v2865_v1  ;;  %5405 = vmatmul.msk.bf16.gmra.mxu3 %vm1184_vm2, %v2264_v36  ;;  %v2442_v36 = vmul.f32 1.442695, %v2433_v18  ;;  %10047 = vst [vmem:[#allocation15_spill] sm:$0xff] %v8000_v58  ;;  %v8002_v1 = vmul.f32 0.17677669, %v2845_v26  ;;  %v8007_v44 = vpop.eup %6128 }
 0x480   : > { %10048 = vst [vmem:[#allocation16_spill] sm:$0xff] %v8007_v44  ;;  %v2265_v8 = vpack.c.bf16 %v8000_v58, %v8007_v44 }
 0x481   : > { %v7981_v61 = vpop.xlane.xlu2 %1678  ;;  %6130 = vpow2.f32 %v2442_v36  ;;  %v2877_v56 = vsel %vm1184_vm2, %v8002_v1, -inf }
 0x482   : > { %v7986_v59 = vpop.xlane.xlu0 %1455 }
 0x484   : > { %v8014_v40 = vpop.f32.mrf.mxu1 }
 0x486   : > { %1252 = vadd.xlane.f32.xlu1 %v1251_v49  ;;  %2683 = vadd.xlane.f32.xlu2 %v2682_v5 }
 0x487   : > { %2872 = vmax.xlane.f32.xlu0 %v2871_v50  ;;  %v6131_v5 = vpop.eup %6130 }
 0x488   : > { %5398 = vmatmul.msk.bf16.gmra.mxu1 %vm1184_vm2, %v1926_v55 }
 0x489   : > { %v2639_v12 = vpop.xlane.xlu2 %2638 }
 0x48a   : > { %v1685_v33 = vpop.xlane.xlu1 %1684  ;;  %v2659_v10 = vsub.f32 %v7763_v0, %v2639_v12  ;;  %v8005_v21 = vpop.xlane.xlu0 %1681 }
 0x48b   : > { %v8016_v18 = vpop.f32.mrf.mxu3 }
 0x48c   : > { %v2668_v35 = vmul.f32 1.442695, %v2659_v10 }
 0x48e   : > { %6132 = vpow2.f32 %v2668_v35  ;;  %v2459_v35 = vsel %vm1184_vm2, %v6131_v5, 0.0 }
 0x48f   : > { %2878 = vmax.xlane.f32.xlu0 %v2877_v56  ;;  %5406 = vmatmul.msk.bf16.gmra.mxu3 %vm1184_vm2, %v2265_v8  ;;  %v2480_v8 = vpack.c.bf16 %v6131_v5, %v7967_v53 }
 0x491   : > { %v2416_v50 = vpop.xlane.xlu2 %2415 }
 0x492   : > { %v2419_v0 = vpop.xlane.xlu1 %2418  ;;  %v2434_v26 = vsub.f32 %v7776_v52, %v2416_v50  ;;  %v8019_v49 = vpop.xlane.xlu0 %1458 }
 0x493   : > { %v2435_v10 = vsub.f32 %v7778_v2, %v2419_v0  ;;  %v1518_v50 = vpop.f32.mrf.mxu1  ;;  %v8029_v25 = vpop.f32.mrf.mxu3 }
 0x494   : > { %v6133_v55 = vpop.eup %6132  ;;  %v2444_v36 = vmul.f32 1.442695, %v2434_v26 }
 0x495   : > { %v2685_v12 = vsel %vm1184_vm2, %v6133_v55, 0.0  ;;  %v2446_v44 = vmul.f32 1.442695, %v2435_v10  ;;  %v2706_v53 = vpack.c.bf16 %v6133_v55, %v7988_v39 }
 0x496   : > { %2686 = vadd.xlane.f32.xlu1 %v2685_v12  ;;  %6134 = vpow2.f32 %v2444_v36 }
 0x497   : > { %2460 = vadd.xlane.f32.xlu0 %v2459_v35  ;;  %6136 = vrcp.f32 %v1685_v33 }
 0x498   : > { %5411 = vmatmul.msk.bf16.vlgmr.msrb.gmra.mxu1 %vm1184_vm2, %v2480_v8  ;;  %6138 = vpow2.f32 %v2446_v44 }
 0x499   : > { %v2642_v52 = vpop.xlane.xlu2 %2641 }
 0x49a   : > { %v8026_v56 = vpop.xlane.xlu1 %2421  ;;  %v2660_v26 = vsub.f32 %v7790_v37, %v2642_v52  ;;  %v2645_v58 = vpop.xlane.xlu0 %2644 }
 0x49b   : > { %v2661_v0 = vsub.f32 %v7794_v11, %v2645_v58  ;;  %v8041_v33 = vpop.f32.mrf.mxu1 }
 0x49c   : > { %v2670_v2 = vmul.f32 1.442695, %v2660_v26  ;;  %v6135_v12 = vpop.eup %6134 }
 0x49d   : > { %v2462_v5 = vsel %vm1184_vm2, %v6135_v12, 0.0  ;;  %v2672_v36 = vmul.f32 1.442695, %v2661_v0  ;;  %v6137_v8 = vpop.eup %6136 }
 0x49e   : > { %6140 = vpow2.f32 %v2670_v2  ;;  %v8039_v11 = vpop.eup %6138 }
 0x49f   : > { %2463 = vadd.xlane.f32.xlu0 %v2462_v5  ;;  %5419 = vmatmul.msk.bf16.vlgmr.msrb.gmra.mxu3 %vm1184_vm2, %v2706_v53  ;;  %6142 = vpow2.f32 %v2672_v36  ;;  %v2481_v55 = vpack.c.bf16 %v8039_v11, %v6135_v12 }
 0x4a1   : > { %v8035_v10 = vpop.xlane.xlu2 %1461 }
 0x4a2   : > { %v8037_v37 = vpop.xlane.xlu1 %1690  ;;  %v1688_v35 = vpop.xlane.xlu0 %1687 }
 0x4a3   : > { %v1743_v52 = vpop.f32.mrf.mxu3  ;;  %6144 = vrcp.f32 %v1688_v35  ;;  %v8055_v28 = vpop.f32.mrf.mxu1 }
 0x4a4   : > { %v8043_v39 = vmul.f32 %v6137_v8, %v1743_v52  ;;  %v6141_v58 = vpop.eup %6140  ;;  %6146 = vrcp.f32 %v7986_v59 }
 0x4a5   : > { %v2688_v44 = vsel %vm1184_vm2, %v6141_v58, 0.0  ;;  %6148 = vrcp.f32 %v7957_v47  ;;  %v8050_v26 = vpop.eup %6142 }
 0x4a6   : > { %2689 = vadd.xlane.f32.xlu2 %v2688_v44  ;;  %v2707_v52 = vpack.c.bf16 %v8050_v26, %v6141_v58 }
 0x4a8   : > { %5412 = vmatmul.msk.bf16.gmra.mxu1 %vm1184_vm2, %v2481_v55 }
 0x4a9   : > { %v6145_v53 = vpop.eup %6144  ;;  %v1468_v5 = vpop.xlane.xlu2 %1467 }
 0x4aa   : > { %v2651_v2 = vpop.xlane.xlu1 %2650  ;;  %v1465_v0 = vpop.xlane.xlu0 %1464 }
 0x4ab   : > { %v1745_v36 = vpop.f32.mrf.mxu3  ;;  %v6147_v8 = vpop.eup %6146  ;;  %v2663_v47 = vsub.f32 %v7814_v31, %v2651_v2  ;;  %6150 = vrcp.f32 %v1465_v0 }
 0x4ac   : > { %v8052_v35 = vmul.f32 %v6145_v53, %v1745_v36  ;;  %v1545_v59 = vmul.f32 %v6147_v8, %v1518_v50  ;;  %v6149_v44 = vpop.eup %6148  ;;  %6152 = vrcp.f32 %v8005_v21 }
 0x4ad   : > { %v1544_v55 = vmul.f32 %v6149_v44, %v8014_v40  ;;  %v2676_v53 = vmul.f32 1.442695, %v2663_v47  ;;  %6154 = vrcp.f32 %v7981_v61  ;;  %v2436_v40 = vsub.f32 %v7792_v7, %v8026_v56 }
 0x4ae   : > { %v5905_v12 = vpack.i.bf16 %v8052_v35, %v8043_v39 }
 0x4af   : > { %5420 = vmatmul.msk.bf16.gmra.mxu3 %vm1184_vm2, %v2707_v52  ;;  %v5890_v45 = vpack.i.bf16 %v1545_v59, %v1544_v55  ;;  %6156 = vpow2.f32 %v2676_v53 }
 0x4b1   : > { %v8063_v36 = vpop.xlane.xlu2 %2653  ;;  %v6151_v2 = vpop.eup %6150 }
 0x4b2   : > { %v2648_v50 = vpop.xlane.xlu0 %2647  ;;  %v6153_v21 = vpop.eup %6152 }
 0x4b3   : > { %v2662_v58 = vsub.f32 %v7828_v30, %v2648_v50  ;;  %5891 = vrot.lane.b32.xlu0 %v5890_v45, %s6586_s20  ;;  %v1767_v59 = vmul.f32 %v6153_v21, %v8029_v25  ;;  %v6155_v52 = vpop.eup %6154  ;;  %v2448_v30 = vmul.f32 1.442695, %v2436_v40 }
 0x4b4   : > { %v1766_v45 = vmul.f32 %v6155_v52, %v8016_v18 }
 0x4b5   : > { %v2674_v31 = vmul.f32 1.442695, %v2662_v58  ;;  %v1526_v0 = vpop.f32.mrf.mxu1  ;;  %v8075_v55 = vpop.eup %6156 }
 0x4b6   : > { %v8070_v8 = vmul.f32 %v6151_v2, %v1526_v0  ;;  %v5895_v56 = vpack.i.bf16 %v1767_v59, %v1766_v45 }
 0x4b7   : > { %6158 = vpow2.f32 %v2674_v31 }
 0x4b8   : > { %6160 = vrcp.f32 %v1468_v5 }
 0x4b9   : > { %v1697_v61 = vpop.xlane.xlu2 %1696  ;;  %v1471_v53 = vpop.xlane.xlu1 %1470  ;;  %6162 = vpow2.f32 %v2448_v30 }
 0x4ba   : > { %v2425_v44 = vpop.xlane.xlu0 %2424 }
 0x4bb   : > { %v2437_v47 = vsub.f32 %v7844_v43, %v2425_v44 }
 0x4bd   : > { %v8077_v7 = vpop.eup %6158  ;;  %v2450_v50 = vmul.f32 1.442695, %v2437_v47  ;;  %v1528_v5 = vpop.f32.mrf.mxu1 }
 0x4be   : > { %v6161_v58 = vpop.eup %6160  ;;  %v2708_v25 = vpack.c.bf16 %v8075_v55, %v8077_v7  ;;  %5896 = vrot.lane.b32.xlu2 %v5895_v56, %s6584_s12 }
 0x4bf   : > { %6164 = vpow2.f32 %v2450_v50  ;;  %v8081_v31 = vmul.f32 %v6161_v58, %v1528_v5  ;;  %v8088_v0 = vpop.eup %6162 }
 0x4c0   : > { %6166 = vrcp.f32 %v1471_v53  ;;  %5421 = vmatmul.msk.bf16.gmra.mxu3 %vm1184_vm2, %v2708_v25 }
 0x4c1   : > { %6168 = vrcp.f32 %v8037_v37  ;;  %v2431_v40 = vpop.xlane.xlu2 %2430 }
 0x4c2   : > { %v1694_v18 = vpop.xlane.xlu0 %1693  ;;  %v1748_v2 = vpop.f32.mrf.mxu3  ;;  %v2439_v52 = vsub.f32 %v7858_v16, %v2431_v40 }
 0x4c3   : > { %6170 = vrcp.f32 %v1694_v18  ;;  %v1700_v40 = vpop.xlane.xlu1 %1699 }
 0x4c4   : > { %v2454_v37 = vmul.f32 1.442695, %v2439_v52 }
 0x4c5   : > { %v8090_v21 = vpop.eup %6164  ;;  %v1531_v30 = vpop.f32.mrf.mxu1 }
 0x4c6   : > { %v6167_v59 = vpop.eup %6166  ;;  %v2482_v44 = vpack.c.bf16 %v8090_v21, %v8088_v0  ;;  %6172 = vpow2.f32 %v2454_v37 }
 0x4c7   : > { %v8095_v45 = vmul.f32 %v6167_v59, %v1531_v30  ;;  %v6169_v47 = vpop.eup %6168 }
 0x4c8   : > { %5413 = vmatmul.msk.bf16.gmra.mxu1 %vm1184_vm2, %v2482_v44  ;;  %v1770_v58 = vmul.f32 %v6169_v47, %v1748_v2 }
 0x4c9   : > { %v6171_v56 = vpop.eup %6170 }
 0x4ca   : > { %v2428_v53 = vpop.xlane.xlu0 %2427  ;;  %v1750_v50 = vpop.f32.mrf.mxu3 }
 0x4cb   : > { %v2438_v5 = vsub.f32 %v7872_v15, %v2428_v53  ;;  %v1771_v25 = vmul.f32 %v6171_v56, %v1750_v50  ;;  %v2664_v15 = vsub.f32 %v7833_v62, %v8063_v36 }
 0x4cc   : > { %v8100_v44 = vpop.eup %6172 }
 0x4cd   : > { %v2452_v18 = vmul.f32 1.442695, %v2438_v5  ;;  %v5915_v43 = vpack.i.bf16 %v1771_v25, %v1770_v58  ;;  %v1533_v16 = vpop.f32.mrf.mxu1  ;;  %v2678_v37 = vmul.f32 1.442695, %v2664_v15  ;;  %v2861_v5 = vpop.xlane.xlu1 %2860 }
 0x4ce   : > { %v2881_v15 = vsub.f32 %v7876_v38, %v2861_v5 }
 0x4cf   : > { %6174 = vpow2.f32 %v2452_v18  ;;  %5916 = vrot.lane.b32.xlu1 %v5915_v43, %s6584_s12  ;;  %v2465_v18 = vsel %vm1184_vm2, %v8039_v11, 0.0 }
 0x4d0   : > { %6176 = vrcp.f32 %v1697_v61 }
 0x4d2   : > { %v1474_v59 = vpop.xlane.xlu0 %1473  ;;  %v1753_v30 = vpop.f32.mrf.mxu3 }
 0x4d3   : > { %6178 = vrcp.f32 %v1474_v59 }
 0x4d4   : > { %6180 = vrcp.f32 %v1700_v40 }
 0x4d5   : > { %v8102_v52 = vpop.eup %6174  ;;  %v8106_v2 = vpop.f32.mrf.mxu1  ;;  %6182 = vpow2.f32 %v2678_v37 }
 0x4d6   : > { %v2483_v47 = vpack.c.bf16 %v8100_v44, %v8102_v52  ;;  %v6177_v56 = vpop.eup %6176 }
 0x4d7   : > { %v8113_v25 = vmul.f32 %v6177_v56, %v1753_v30 }
 0x4d8   : > { %5414 = vmatmul.msk.bf16.gmra.mxu1 %vm1184_vm2, %v2483_v47 }
 0x4d9   : > { %v6179_v61 = vpop.eup %6178 }
 0x4da   : > { %v6181_v43 = vpop.eup %6180  ;;  %v8111_v53 = vmul.f32 %v6179_v61, %v1533_v16  ;;  %v2657_v50 = vpop.xlane.xlu0 %2656 }
 0x4db   : > { %v1755_v58 = vpop.f32.mrf.mxu3  ;;  %v2665_v62 = vsub.f32 %v7906_v42, %v2657_v50  ;;  %v2890_v42 = vmul.f32 1.442695, %v2881_v15  ;;  %v8129_v56 = vpop.eup %6182 }
 0x4dc   : > { %v8116_v36 = vmul.f32 %v6181_v43, %v1755_v58  ;;  %v1901_v61 = vpop.xlane.xlu2 %1900  ;;  %v1904_v50 = vpop.xlane.xlu1 %1903 }
 0x4dd   : > { %v2680_v59 = vmul.f32 1.442695, %v2665_v62  ;;  %2466 = vadd.xlane.f32.xlu0 %v2465_v18  ;;  %v8125_v30 = vpop.f32.mrf.mxu1 }
 0x4df   : > { %6184 = vpow2.f32 %v2680_v59 }
 0x4e0   : > { %6186 = vrcp.f32 %v8035_v10  ;;  %v2691_v10 = vsel %vm1184_vm2, %v8050_v26, 0.0 }
 0x4e1   : > { %6188 = vrcp.f32 %v8019_v49 }
 0x4e2   : > { %v2858_v47 = vpop.xlane.xlu0 %2857  ;;  %6190 = vpow2.f32 %v2890_v42 }
 0x4e3   : > { %v2880_v11 = vsub.f32 %v7929_v48, %v2858_v47 }
 0x4e4   : > { %v1907_v42 = vpop.xlane.xlu2 %1906  ;;  %v1910_v26 = vpop.xlane.xlu1 %1909 }
 0x4e5   : > { %v8132_v43 = vpop.eup %6184  ;;  %v2888_v37 = vmul.f32 1.442695, %v2880_v11  ;;  %v8134_v38 = vpop.f32.mrf.mxu1 }
 0x4e6   : > { %v2709_v58 = vpack.c.bf16 %v8132_v43, %v8129_v56  ;;  %v6187_v48 = vpop.eup %6186 }
 0x4e7   : > { %6192 = vpow2.f32 %v2888_v37  ;;  %2692 = vadd.xlane.f32.xlu2 %v2691_v10  ;;  %v6189_v49 = vpop.eup %6188  ;;  %v1547_v62 = vmul.f32 %v6187_v48, %v8055_v28  ;;  %v8150_v48 = vpop.f32.mrf.mxu3 }
 0x4e8   : > { %5422 = vmatmul.msk.bf16.gmra.mxu3 %vm1184_vm2, %v2709_v58  ;;  %v8142_v18 = vpop.eup %6190  ;;  %v1546_v15 = vmul.f32 %v6189_v49, %v8041_v33  ;;  %10049 = vst [vmem:[#allocation17_spill] sm:$0xff] %v8150_v48 }
 0x4ea   : > { %v2864_v5 = vpop.xlane.xlu0 %2863  ;;  %v5900_v40 = vpack.i.bf16 %v1547_v62, %v1546_v15 }
 0x4eb   : > { %v2882_v11 = vsub.f32 %v7943_v20, %v2864_v5 }
 0x4ec   : > { %v2870_v49 = vpop.xlane.xlu2 %2869  ;;  %v8155_v5 = vpop.xlane.xlu1 %1915 }
 0x4ed   : > { %v6193_v59 = vpop.eup %6192  ;;  %v1967_v37 = vpop.f32.mrf.mxu1  ;;  %v2892_v58 = vmul.f32 1.442695, %v2882_v11 }
 0x4ee   : > { %v2928_v47 = vpack.c.bf16 %v8142_v18, %v6193_v59  ;;  %v2904_v20 = vsel %vm1184_vm2, %v6193_v59, 0.0 }
 0x4ef   : > { %6194 = vpow2.f32 %v2892_v58  ;;  %v2884_v58 = vsub.f32 %v7909_v54, %v2870_v49 }
 0x4f0   : > { %5427 = vmatmul.msk.bf16.vlgmr.msra.gmra.mxu1 %vm1184_vm2, %v2928_v47  ;;  %v8162_v47 = vpop.f32.mrf.mxu3 }
 0x4f1   : > { %5901 = vrot.lane.b32.xlu0 %v5900_v40, %s6586_s20  ;;  %10050 = vst [vmem:[#allocation18_spill] sm:$0xff] %v8162_v47 }
 0x4f2   : > { %v2867_v10 = vpop.xlane.xlu0 %2866 }
 0x4f3   : > { %v2883_v28 = vsub.f32 %v7962_v9, %v2867_v10 }
 0x4f4   : > { %v8174_v10 = vpop.xlane.xlu2 %1912 }
 0x4f5   : > { %v2894_v16 = vmul.f32 1.442695, %v2883_v28  ;;  %v8152_v33 = vpop.f32.mrf.mxu1  ;;  %v8157_v15 = vpop.eup %6194 }
 0x4f6   : > { %v8176_v28 = vpop.xlane.xlu1 %1921 }
 0x4f7   : > { %6196 = vpow2.f32 %v2894_v16 }
 0x4f8   : > { %6198 = vrcp.f32 %v1904_v50  ;;  %v8180_v54 = vpop.f32.mrf.mxu3 }
 0x4f9   : > { %2905 = vadd.xlane.f32.xlu1 %v2904_v20  ;;  %10051 = vst [vmem:[#allocation19_spill] sm:$0xff] %v8180_v54 }
 0x4fa   : > { %v2873_v62 = vpop.xlane.xlu0 %2872 }
 0x4fb   : > { %v2885_v9 = vsub.f32 %v7984_v4, %v2873_v62  ;;  %v2896_v4 = vmul.f32 1.442695, %v2884_v58 }
 0x4fd   : > { %v8159_v40 = vpop.eup %6196  ;;  %v8164_v11 = vpop.f32.mrf.mxu1  ;;  %v2898_v59 = vmul.f32 1.442695, %v2885_v9 }
 0x4fe   : > { %v2929_v16 = vpack.c.bf16 %v8159_v40, %v8157_v15  ;;  %v6199_v62 = vpop.eup %6198  ;;  %v2876_v9 = vpop.xlane.xlu2 %2875 }
 0x4ff   : > { %5906 = vrot.lane.b32.xlu2 %v5905_v12, %s6584_s12  ;;  %6200 = vpow2.f32 %v2898_v59  ;;  %v1989_v12 = vmul.f32 %v6199_v62, %v8125_v30  ;;  %v2458_v58 = vpop.xlane.xlu1 %2457  ;;  %v2886_v54 = vsub.f32 %v7946_v27, %v2876_v9  ;;  %v2468_v9 = vsel %vm1184_vm2, %v8088_v0, 0.0 }
 0x500   : > { %5428 = vmatmul.msk.bf16.gmra.mxu1 %vm1184_vm2, %v2929_v16  ;;  %6202 = vrcp.f32 %v1901_v61  ;;  %v8195_v62 = vpop.f32.mrf.mxu3 }
 0x501   : > { %6204 = vpow2.f32 %v2896_v4 }
 0x502   : > { %v2879_v49 = vpop.xlane.xlu0 %2878  ;;  %6206 = vrcp.f32 %v1910_v26  ;;  %v2900_v26 = vmul.f32 1.442695, %v2886_v54 }
 0x503   : > { %v2887_v50 = vsub.f32 %v8002_v1, %v2879_v49  ;;  %6208 = vrcp.f32 %v1907_v42 }
 0x504   : > { %6210 = vrcp.f32 %v2458_v58 }
 0x505   : > { %v8178_v20 = vpop.f32.mrf.mxu1  ;;  %v8182_v39 = vpop.eup %6200  ;;  %v2902_v30 = vmul.f32 1.442695, %v2887_v50 }
 0x506   : > { %v6203_v35 = vpop.eup %6202 }
 0x507   : > { %v8185_v16 = vpop.eup %6204  ;;  %v1988_v61 = vmul.f32 %v6203_v35, %v8106_v2  ;;  %6212 = vpow2.f32 %v2902_v30 }
 0x508   : > { %v2930_v4 = vpack.c.bf16 %v8182_v39, %v8185_v16  ;;  %v6207_v1 = vpop.eup %6206  ;;  %6214 = vpow2.f32 %v2900_v26  ;;  %v1254_v26 = vsel %vm1184_vm2, %v7616_v63, 0.0 }
 0x509   : > { %v5920_v47 = vpack.i.bf16 %v1989_v12, %v1988_v61  ;;  %v1991_v49 = vmul.f32 %v6207_v1, %v1967_v37  ;;  %v6209_v35 = vpop.eup %6208  ;;  %v8206_v37 = vpop.f32.mrf.mxu3 }
 0x50a   : > { %v2461_v2 = vpop.xlane.xlu0 %2460  ;;  %v6211_v48 = vpop.eup %6210  ;;  %v1990_v42 = vmul.f32 %v6209_v35, %v8134_v38  ;;  %v2910_v35 = vsel %vm1184_vm2, %v8157_v15, 0.0 }
 0x50b   : > { %6216 = vrcp.f32 %v2461_v2  ;;  %v10052_v2 = vpack.i.bf16 %v8081_v31, %v8070_v8  ;;  %v2694_v8 = vsel %vm1184_vm2, %v8077_v7, 0.0 }
 0x50c   : > { %v5930_v12 = vpack.i.bf16 %v1991_v49, %v1990_v42  ;;  %v1919_v42 = vpop.xlane.xlu2 %1918 }
 0x50d   : > { %v8189_v59 = vpop.f32.mrf.mxu1 }
 0x510   : > { %5429 = vmatmul.msk.bf16.gmra.mxu1 %vm1184_vm2, %v2930_v4 }
 0x511   : > { %v8217_v4 = vpop.f32.mrf.mxu3 }
 0x512   : > { %5921 = vrot.lane.b32.xlu1 %v5920_v47, %s6585_s18  ;;  %v8204_v47 = vpop.eup %6212  ;;  %v2464_v58 = vpop.xlane.xlu0 %2463 }
 0x513   : > { %v8208_v54 = vpop.eup %6214  ;;  %6218 = vrcp.f32 %v2464_v58 }
 0x514   : > { %v6217_v38 = vpop.eup %6216  ;;  %6220 = vrcp.f32 %v8155_v5  ;;  %v8235_v63 = vpop.xlane.xlu2 %2683 }
 0x515   : > { %v2521_v6 = vpop.f32.mrf.mxu1  ;;  %6222 = vrcp.f32 %v8174_v10  ;;  %v2697_v10 = vsel %vm1184_vm2, %v8075_v55, 0.0 }
 0x516   : > { %v8199_v27 = vmul.f32 %v6211_v48, %v2521_v6  ;;  %v2931_v6 = vpack.c.bf16 %v8204_v47, %v8208_v54 }
 0x519   : > { %v6219_v61 = vpop.eup %6218  ;;  %v8227_v49 = vpop.f32.mrf.mxu3 }
 0x51a   : > { %5931 = vrot.lane.b32.xlu1 %v5930_v12, %s6585_s18 }
 0x51b   : > { %2469 = vadd.xlane.f32.xlu0 %v2468_v9  ;;  %v6221_v9 = vpop.eup %6220 }
 0x51c   : > { %v1993_v58 = vmul.f32 %v6221_v9, %v8164_v11  ;;  %v6223_v31 = vpop.eup %6222  ;;  %v2690_v5 = vpop.xlane.xlu2 %2689  ;;  %v5757_v11 = vld [vmem:[%s9983_s4 + $0x38] sm:$0xff] }
 0x51d   : > { %v2523_v50 = vpop.f32.mrf.mxu1  ;;  %v1992_v15 = vmul.f32 %v6223_v31, %v8152_v33  ;;  %3197 = vmatpush.bf16.msra.mxu2 %v5757_v11  ;;  %v5756_v33 = vld [vmem:[%s9983_s4 + $0x30] sm:$0xff] }
 0x51e   : > { %v8212_v48 = vmul.f32 %v6217_v38, %v2523_v50 }
 0x51f   : > { %v5935_v50 = vpack.i.bf16 %v1993_v58, %v1992_v15 }
 0x520   : > { %5430 = vmatmul.msk.bf16.gmra.mxu1 %vm1184_vm2, %v2931_v6  ;;  %v5950_v0 = vpack.i.bf16 %v8212_v48, %v8199_v27 }
 0x521   : > { %v8231_v12 = vpop.f32.mrf.mxu3  ;;  %3198 = vmatpush.bf16.msra.mxu2 %v5756_v33 }
 0x524   : > { %v8260_v55 = vpop.permute.xlu2 %5896 }
 0x525   : > { %v2526_v30 = vpop.f32.mrf.mxu1  ;;  %v8243_v6 = vpop.permute.xlu0 %5891 }
 0x526   : > { %v8219_v1 = vmul.f32 %v6219_v61, %v2526_v30  ;;  %v10053_v30 = vpack.i.bf16 %v8116_v36, %v8113_v25 }
 0x528   : > { %1255 = vadd.xlane.f32.xlu2 %v1254_v26  ;;  %v2919_v26 = vsel %vm1184_vm2, %v8182_v39, 0.0  ;;  %v5753_v39 = vld [vmem:[%s9983_s4 + $0x18] sm:$0xff] }
 0x529   : > { %v8240_v38 = vpop.f32.mrf.mxu3 }
 0x52d   : > { %v2528_v58 = vpop.f32.mrf.mxu1 }
 0x52f   : > { %5911 = vrot.lane.b32.xlu0 %v10052_v2, %s6586_s20  ;;  %v5755_v2 = vld [vmem:[%s9983_s4 + $0x28] sm:$0xff] }
 0x530   : > { %2911 = vadd.xlane.f32.xlu2 %v2910_v35  ;;  %3199 = vmatpush.bf16.msra.mxu2 %v5755_v2  ;;  %v5754_v35 = vld [vmem:[%s9983_s4 + $0x20] sm:$0xff] }
 0x531   : > { %v8251_v7 = vpop.f32.mrf.mxu3 }
 0x534   : > { %3200 = vmatpush.bf16.msra.mxu2 %v5754_v35  ;;  %v2471_v35 = vsel %vm1184_vm2, %v8090_v21, 0.0  ;;  %v2238_v21 = vsel %vm1184_vm2, %v7890_v24, 0.0  ;;  %v2703_v24 = vsel %vm1184_vm2, %v8132_v43, 0.0 }
 0x538   : > { %3201 = vmatpush.bf16.msra.mxu2 %v5753_v39 }
 0x539   : > { %v2748_v25 = vpop.f32.mrf.mxu3 }
 0x544   : > { %2695 = vadd.xlane.f32.xlu1 %v2694_v8  ;;  %v2907_v8 = vsel %vm1184_vm2, %v8142_v18, 0.0  ;;  %v2913_v18 = vsel %vm1184_vm2, %v8159_v40, 0.0 }
 0x548   : > { %5936 = vrot.lane.b32.xlu2 %v5935_v50, %s6585_s18  ;;  %v5752_v50 = vld [vmem:[%s9983_s4 + $0x10] sm:$0xff] }
 0x549   : > { %3202 = vmatpush.bf16.msra.mxu2 %v5752_v50 }
 0x54c   : > { %2698 = vadd.xlane.f32.xlu1 %v2697_v10 }
 0x550   : > { %v2467_v61 = vpop.xlane.xlu0 %2466  ;;  %5941 = vrot.lane.b32.xlu2 %v10053_v30, %s6584_s12 }
 0x551   : > { %6224 = vrcp.f32 %v2467_v61  ;;  %v2750_v61 = vpop.f32.mrf.mxu3 }
 0x552   : > { %6226 = vrcp.f32 %v2690_v5  ;;  %v5751_v5 = vld [vmem:[%s9983_s4 + $0x8] sm:$0xff] }
 0x553   : > { %3203 = vmatpush.bf16.msra.mxu2 %v5751_v5 }
 0x554   : > { %2920 = vadd.xlane.f32.xlu1 %v2919_v26  ;;  %v8292_v26 = vpop.xlane.xlu1 %1252 }
 0x557   : > { %v6225_v9 = vpop.eup %6224 }
 0x558   : > { %v8270_v36 = vmul.f32 %v6225_v9, %v2528_v58  ;;  %v6227_v10 = vpop.eup %6226  ;;  %v5750_v9 = vld [vmem:[%s9983_s4] sm:$0xff] }
 0x559   : > { %2908 = vadd.xlane.f32.xlu0 %v2907_v8  ;;  %v8288_v33 = vmul.f32 %v6227_v10, %v2748_v25  ;;  %3204 = vmatpush.bf16.msra.mxu2 %v5750_v9  ;;  %v5893_v10 = vunpack.i.l.bf16 %v8243_v6  ;;  %v2753_v27 = vpop.f32.mrf.mxu3 }
 0x55a   : > { %v5965_v31 = vpack.i.bf16 %v8270_v36, %v8219_v1  ;;  %v2693_v15 = vpop.xlane.xlu2 %2692 }
 0x55b   : > { %6228 = vrcp.f32 %v2693_v15  ;;  %v10054_v15 = vpack.i.bf16 %v8111_v53, %v8095_v45  ;;  %v5899_v45 = vunpack.i.h.bf16 %v8260_v55  ;;  %v5898_v53 = vunpack.i.l.bf16 %v8260_v55 }
 0x55c   : > { %6230 = vrcp.f32 %v8176_v28  ;;  %v8303_v8 = vpop.xlane.xlu1 %2686  ;;  %v2922_v55 = vsel %vm1184_vm2, %v8208_v54, 0.0 }
 0x55d   : > { %6232 = vrcp.f32 %v1919_v42 }
 0x55e   : > { %6234 = vrcp.f32 %v7744_v14 }
 0x55f   : > { %6236 = vrcp.f32 %v7766_v32 }
 0x560   : > { %6238 = vrcp.f32 %v7780_v57 }
 0x561   : > { %2914 = vadd.xlane.f32.xlu0 %v2913_v18  ;;  %v6229_v11 = vpop.eup %6228  ;;  %v5894_v18 = vunpack.i.h.bf16 %v8243_v6  ;;  %6240 = vrcp.f32 %v7782_v3 }
 0x562   : > { %v8290_v30 = vmul.f32 %v6229_v11, %v2750_v61  ;;  %v6231_v40 = vpop.eup %6230  ;;  %6242 = vrcp.f32 %v7799_v41 }
 0x563   : > { %v1995_v2 = vmul.f32 %v6231_v40, %v8189_v59  ;;  %v6233_v42 = vpop.eup %6232  ;;  %6244 = vrcp.f32 %v7816_v60 }
 0x564   : > { %v5970_v28 = vpack.i.bf16 %v8290_v30, %v8288_v33  ;;  %v1994_v58 = vmul.f32 %v6233_v42, %v8178_v20  ;;  %v8306_v39 = vpop.permute.xlu1 %5916  ;;  %v6235_v20 = vpop.eup %6234  ;;  %6246 = vrcp.f32 %v8303_v8 }
 0x565   : > { %v6237_v50 = vpop.eup %6236  ;;  %v1310_v14 = vmul.f32 %v6235_v20, %v7841_v22  ;;  %6248 = vrcp.f32 %v8235_v63 }
 0x566   : > { %v5945_v25 = vpack.i.bf16 %v1995_v2, %v1994_v58  ;;  %v1311_v32 = vmul.f32 %v6237_v50, %v7860_v51  ;;  %v6239_v57 = vpop.eup %6238  ;;  %v5907_v58 = vpop.permute.xlu2 %5906 }
 0x567   : > { %v2092_v61 = vsel %vm1122_vm1, %v1310_v14, %v5893_v10  ;;  %v6241_v9 = vpop.eup %6240  ;;  %v5909_v50 = vunpack.i.h.bf16 %v5907_v58  ;;  %v2925_v10 = vsel %vm1184_vm2, %v8204_v47, 0.0 }
 0x568   : > { %v2093_v11 = vsel %vm1122_vm1, %v1311_v32, %v5894_v18  ;;  %v2100_v51 = vsel %vm1184_vm2, %v2092_v61, %v5898_v53  ;;  %v1313_v20 = vmul.f32 %v6241_v9, %v7904_v23  ;;  %v5908_v18 = vunpack.i.l.bf16 %v5907_v58 }
 0x569   : > { %2472 = vadd.xlane.f32.xlu0 %v2471_v35  ;;  %v2101_v43 = vsel %vm1184_vm2, %v2093_v11, %v5899_v45  ;;  %v5902_v35 = vpop.permute.xlu0 %5901  ;;  %v2241_v45 = vsel %vm1184_vm2, %v7887_v46, 0.0  ;;  %v5919_v58 = vunpack.i.h.bf16 %v8306_v39 }
 0x56a   : > { %v5903_v3 = vunpack.i.l.bf16 %v5902_v35 }
 0x56c   : > { %v8312_v59 = vpop.xlane.xlu1 %2905 }
 0x56d   : > { %5946 = vrot.lane.b32.xlu1 %v5945_v25, %s6585_s18  ;;  %v5904_v25 = vunpack.i.h.bf16 %v5902_v35  ;;  %6250 = vrcp.f32 %v8312_v59 }
 0x56f   : > { %v2095_v54 = vsel %vm1122_vm1, %v1313_v20, %v5904_v25 }
 0x570   : > { %v2103_v61 = vsel %vm1184_vm2, %v2095_v54, %v5909_v50 }
 0x579   : > { %2239 = vadd.xlane.f32.xlu2 %v2238_v21 }
 0x57d   : > { %5926 = vrot.lane.b32.xlu0 %v10054_v15, %s6586_s20  ;;  %v1312_v15 = vmul.f32 %v6239_v57, %v7878_v29 }
 0x57f   : > { %v2094_v14 = vsel %vm1122_vm1, %v1312_v15, %v5903_v3 }
 0x580   : > { %v2102_v11 = vsel %vm1184_vm2, %v2094_v14, %v5908_v18  ;;  %v2477_v18 = vsel %vm1184_vm2, %v8100_v44, 0.0 }
 0x581   : > { %2704 = vadd.xlane.f32.xlu2 %v2703_v24 }
 0x584   : > { %v5922_v5 = vpop.permute.xlu1 %5921 }
 0x585   : > { %v5924_v6 = vunpack.i.h.bf16 %v5922_v5  ;;  %v5923_v22 = vunpack.i.l.bf16 %v5922_v5 }
 0x587   : > { %v2109_v40 = vsel %vm2108_vm3, %v2100_v51, %v5923_v22  ;;  %v2110_v2 = vsel %vm2108_vm3, %v2101_v43, %v5924_v6  ;;  %v8355_v6 = vpop.f32.mrf.mxu1  ;;  %v6243_v43 = vpop.eup %6242 }
 0x588   : > { %v3121_v42 = vpack.c.bf16 %v2110_v2, %v2109_v40  ;;  %v6245_v46 = vpop.eup %6244  ;;  %v2916_v40 = vsel %vm1184_vm2, %v8185_v16, 0.0  ;;  %v1314_v41 = vmul.f32 %v6243_v43, %v7926_v17  ;;  %v5918_v16 = vunpack.i.l.bf16 %v8306_v39 }
 0x589   : > { %2923 = vadd.xlane.f32.xlu2 %v2922_v55  ;;  %v6247_v55 = vpop.eup %6246  ;;  %v1315_v60 = vmul.f32 %v6245_v46, %v7948_v34  ;;  %v2474_v34 = vsel %vm1184_vm2, %v8102_v52, 0.0  ;;  %v2700_v52 = vsel %vm1184_vm2, %v8129_v56, 0.0 }
 0x58a   : > { %3205 = vmatmul.bf16.vlgmr.msra.gmra.mxu2 %v3121_v42  ;;  %v2772_v8 = vmul.f32 %v6247_v55, %v8251_v7  ;;  %v6249_v35 = vpop.eup %6248 }
 0x58b   : > { %v2771_v63 = vmul.f32 %v6249_v35, %v8240_v38 }
 0x58c   : > { %v5932_v21 = vpop.permute.xlu1 %5931 }
 0x58d   : > { %v5934_v32 = vunpack.i.h.bf16 %v5932_v21  ;;  %v5933_v24 = vunpack.i.l.bf16 %v5932_v21  ;;  %v5955_v20 = vpack.i.bf16 %v2772_v8, %v2771_v63 }
 0x58e   : > { %v8348_v53 = vpop.xlane.xlu0 %2469 }
 0x58f   : > { %v2111_v23 = vsel %vm2108_vm3, %v2102_v11, %v5933_v24  ;;  %v2112_v29 = vsel %vm2108_vm3, %v2103_v61, %v5934_v32  ;;  %v8368_v3 = vpop.f32.mrf.mxu1  ;;  %v6251_v24 = vpop.eup %6250 }
 0x590   : > { %v3122_v47 = vpack.c.bf16 %v2112_v29, %v2111_v23 }
 0x591   : > { %2926 = vadd.xlane.f32.xlu2 %v2925_v10 }
 0x597   : > { %2242 = vadd.xlane.f32.xlu1 %v2241_v45  ;;  %v8379_v10 = vpop.f32.mrf.mxu1  ;;  %v2247_v45 = vsel %vm1184_vm2, %v7924_v13, 0.0 }
 0x59a   : > { %3210 = vmatmul.bf16.gmra.mxu2 %v3122_v47 }
 0x59b   : > { %v8350_v5 = vpop.xlane.xlu2 %1255 }
 0x59f   : > { %v8383_v54 = vpop.f32.mrf.mxu1 }
 0x5a1   : > { %v5912_v22 = vpop.permute.xlu0 %5911 }
 0x5a2   : > { %v5914_v2 = vunpack.i.h.bf16 %v5912_v22  ;;  %v5913_v42 = vunpack.i.l.bf16 %v5912_v22 }
 0x5a3   : > { %v2912_v51 = vpop.xlane.xlu2 %2911 }
 0x5a4   : > { %v2097_v57 = vsel %vm1122_vm1, %v1315_v60, %v5914_v2  ;;  %v2096_v9 = vsel %vm1122_vm1, %v1314_v41, %v5913_v42 }
 0x5a5   : > { %v2104_v7 = vsel %vm1184_vm2, %v2096_v9, %v5918_v16  ;;  %v2105_v15 = vsel %vm1184_vm2, %v2097_v57, %v5919_v58  ;;  %v10055_v57 = vld [vmem:[#allocation14_spill] sm:$0xff] }
 0x5a7   : > { %2917 = vadd.xlane.f32.xlu0 %v2916_v40  ;;  %v2965_v14 = vpop.f32.mrf.mxu1  ;;  %v2755_v40 = vpop.f32.mrf.mxu3 }
 0x5a8   : > { %v2993_v44 = vmul.f32 %v6251_v24, %v2965_v14 }
 0x5ab   : > { %v5937_v25 = vpop.permute.xlu2 %5936 }
 0x5ac   : > { %v5939_v21 = vunpack.i.h.bf16 %v5937_v25  ;;  %v5938_v17 = vunpack.i.l.bf16 %v5937_v25 }
 0x5ae   : > { %v2113_v38 = vsel %vm2108_vm3, %v2104_v7, %v5938_v17  ;;  %v2114_v50 = vsel %vm2108_vm3, %v2105_v15, %v5939_v21 }
 0x5af   : > { %2475 = vadd.xlane.f32.xlu0 %v2474_v34  ;;  %v3123_v39 = vpack.c.bf16 %v2114_v50, %v2113_v38  ;;  %v2967_v61 = vpop.f32.mrf.mxu1  ;;  %v10056_v38 = vld [vmem:[#allocation12_spill] sm:$0xff] }
 0x5b0   : > { %5956 = vrot.lane.b32.xlu1 %v5955_v20, %s6584_s12  ;;  %v2244_v50 = vsel %vm1184_vm2, %v10056_v38, 0.0 }
 0x5b1   : > { %3215 = vmatmul.bf16.gmra.mxu2 %v3123_v39  ;;  %v10057_v39 = vld [vmem:[#allocation13_spill] sm:$0xff] }
 0x5b3   : > { %v5942_v55 = vpop.permute.xlu2 %5941 }
 0x5b4   : > { %v5944_v9 = vunpack.i.h.bf16 %v5942_v55  ;;  %v5943_v63 = vunpack.i.l.bf16 %v5942_v55 }
 0x5b7   : > { %2478 = vadd.xlane.f32.xlu0 %v2477_v18  ;;  %v2696_v23 = vpop.xlane.xlu1 %2695  ;;  %v2970_v22 = vpop.f32.mrf.mxu1  ;;  %v2250_v18 = vsel %vm1184_vm2, %v10057_v39, 0.0 }
 0x5bf   : > { %2701 = vadd.xlane.f32.xlu0 %v2700_v52  ;;  %v2699_v59 = vpop.xlane.xlu1 %2698  ;;  %v2972_v1 = vpop.f32.mrf.mxu1 }
 0x5c7   : > { %v2921_v13 = vpop.xlane.xlu1 %2920 }
 0x5cc   : > { %v2909_v32 = vpop.xlane.xlu0 %2908 }
 0x5cd   : > { %6252 = vrcp.f32 %v2909_v32 }
 0x5d3   : > { %v6253_v11 = vpop.eup %6252  ;;  %5951 = vrot.lane.b32.xlu0 %v5950_v0, %s6586_s20 }
 0x5d4   : > { %v2994_v29 = vmul.f32 %v6253_v11, %v2967_v61  ;;  %v2915_v47 = vpop.xlane.xlu0 %2914 }
 0x5d5   : > { %6254 = vrcp.f32 %v2915_v47 }
 0x5d6   : > { %v5960_v56 = vpack.i.bf16 %v2994_v29, %v2993_v44  ;;  %6256 = vrcp.f32 %v2912_v51 }
 0x5d7   : > { %6258 = vrcp.f32 %v2699_v59 }
 0x5d8   : > { %5961 = vrot.lane.b32.xlu2 %v5960_v56, %s6585_s18  ;;  %6260 = vrcp.f32 %v8292_v26  ;;  %v10058_v56 = vld [vmem:[#allocation11_spill] sm:$0xff] }
 0x5d9   : > { %6262 = vrcp.f32 %v2696_v23  ;;  %v2975_v23 = vpop.f32.mrf.mxu1 }
 0x5da   : > { %2248 = vadd.xlane.f32.xlu1 %v2247_v45  ;;  %6264 = vrcp.f32 %v8350_v5  ;;  %v2253_v45 = vsel %vm1184_vm2, %v10058_v56, 0.0 }
 0x5db   : > { %v6255_v48 = vpop.eup %6254 }
 0x5dc   : > { %v2473_v0 = vpop.xlane.xlu0 %2472  ;;  %v6257_v43 = vpop.eup %6256 }
 0x5dd   : > { %v6259_v36 = vpop.eup %6258  ;;  %v2995_v2 = vmul.f32 %v6257_v43, %v2970_v22  ;;  %6266 = vrcp.f32 %v2473_v0  ;;  %v8434_v22 = vld [vmem:[%s6850_s29] sm:$0x3f] }
 0x5de   : > { %v6261_v46 = vpop.eup %6260  ;;  %v2776_v42 = vmul.f32 %v6259_v36, %v2755_v40  ;;  %6268 = vrcp.f32 %v8348_v53  ;;  %v8427_v53 = vld [vmem:[%s9984_s5] ss:$0 sm:$0xff]  ;;  %v6463_v40 = vld [vmem:[%s6709_s25 + $0x8] sm:$0xff] }
 0x5df   : > { %v6263_v51 = vpop.eup %6262  ;;  %v5947_v60 = vpop.permute.xlu1 %5946  ;;  %v1316_v35 = vmul.f32 %v6261_v46, %v7971_v19  ;;  %6270 = vrcp.f32 %v2921_v13 }
 0x5e0   : > { %5966 = vrot.lane.b32.xlu2 %v5965_v31, %s6586_s20  ;;  %v2996_v31 = vmul.f32 %v6255_v48, %v2972_v1  ;;  %v6265_v26 = vpop.eup %6264  ;;  %v2775_v5 = vmul.f32 %v6263_v51, %v2753_v27  ;;  %v5949_v16 = vunpack.i.h.bf16 %v5947_v60  ;;  %v5948_v25 = vunpack.i.l.bf16 %v5947_v60  ;;  %v2758_v60 = vpop.f32.mrf.mxu3 }
 0x5e1   : > { %v1317_v33 = vmul.f32 %v6265_v26, %v10055_v57  ;;  %v8437_v27 = vperm.slane %v8434_v22, 2  ;;  %v2977_v1 = vpop.f32.mrf.mxu1 }
 0x5e2   : > { %v5975_v41 = vpack.i.bf16 %v2996_v31, %v2995_v2  ;;  %v5985_v58 = vpack.i.bf16 %v2776_v42, %v2775_v5 }
 0x5e3   : > { %v6267_v14 = vpop.eup %6266 }
 0x5e4   : > { %v6269_v32 = vpop.eup %6268  ;;  %v2554_v24 = vmul.f32 %v6267_v14, %v8368_v3  ;;  %v10059_v3 = vld [vmem:[#allocation15_spill] sm:$0xff] }
 0x5e5   : > { %v2553_v11 = vmul.f32 %v6269_v32, %v8355_v6  ;;  %v2259_v47 = vsel %vm1184_vm2, %v10059_v3, 0.0  ;;  %v6271_v48 = vpop.eup %6270 }
 0x5e6   : > { %v2998_v36 = vmul.f32 %v6271_v48, %v2977_v1 }
 0x5e7   : > { %v5980_v44 = vpack.i.bf16 %v2554_v24, %v2553_v11 }
 0x5e8   : > { %5971 = vrot.lane.b32.xlu2 %v5970_v28, %s6584_s12 }
 0x5ec   : > { %v2240_v61 = vpop.xlane.xlu2 %2239 }
 0x5ef   : > { %v5927_v8 = vpop.permute.xlu0 %5926 }
 0x5f0   : > { %v5929_v30 = vunpack.i.h.bf16 %v5927_v8  ;;  %v5928_v28 = vunpack.i.l.bf16 %v5927_v8  ;;  %5976 = vrot.lane.b32.xlu2 %v5975_v41, %s6585_s18 }
 0x5f2   : > { %v2099_v21 = vsel %vm1122_vm1, %v1317_v33, %v5929_v30  ;;  %v2098_v17 = vsel %vm1122_vm1, %v1316_v35, %v5928_v28 }
 0x5f3   : > { %5986 = vrot.lane.b32.xlu1 %v5985_v58, %s6584_s12  ;;  %v2106_v20 = vsel %vm1184_vm2, %v2098_v17, %v5943_v63  ;;  %v2107_v19 = vsel %vm1184_vm2, %v2099_v21, %v5944_v9  ;;  %v2980_v9 = vpop.f32.mrf.mxu1  ;;  %v2760_v17 = vpop.f32.mrf.mxu3 }
 0x5f4   : > { %v2115_v34 = vsel %vm2108_vm3, %v2106_v20, %v5948_v25  ;;  %v2116_v7 = vsel %vm2108_vm3, %v2107_v19, %v5949_v16  ;;  %v2705_v0 = vpop.xlane.xlu2 %2704  ;;  %v6464_v19 = vld [vmem:[%s6709_s25 + $0x20] sm:$0xff] }
 0x5f5   : > { %v3124_v15 = vpack.c.bf16 %v2116_v7, %v2115_v34 }
 0x5f7   : > { %3220 = vmatmul.bf16.gmra.mxu2 %v3124_v15 }
 0x5fc   : > { %v2924_v42 = vpop.xlane.xlu2 %2923 }
 0x5fd   : > { %2245 = vadd.xlane.f32.xlu0 %v2244_v50  ;;  %v2982_v50 = vpop.f32.mrf.mxu1 }
 0x604   : > { %v2927_v30 = vpop.xlane.xlu2 %2926 }
 0x605   : > { %2251 = vadd.xlane.f32.xlu0 %v2250_v18 }
 0x60d   : > { %v8418_v52 = vpop.f32.mrf.mxu2 }
 0x615   : > { %v3208_v29 = vpop.f32.mrf.mxu2 }
 0x616   : > { %v3209_v6 = vadd.f32 %v8427_v53, %v3208_v29  ;;  %v10062_v29 = vld [vmem:[#allocation17_spill] sm:$0xff] }
 0x618   : > { %v3249_v13 = vmul.f32 %v8437_v27, %v3209_v6 }
 0x619   : > { %2254 = vadd.xlane.f32.xlu2 %v2253_v45  ;;  %5981 = vrot.lane.b32.xlu0 %v5980_v44, %s6586_s20 }
 0x61a   : > { %v2918_v59 = vpop.xlane.xlu0 %2917  ;;  %v8443_v2 = vadd.f32 %v6463_v40, %v3249_v13 }
 0x61b   : > { %6272 = vrcp.f32 %v2918_v59 }
 0x61c   : > { %10060 = vst [vmem:[#allocation14_spill] sm:$0xff] %v8443_v2 }
 0x61d   : > { %2260 = vadd.xlane.f32.xlu1 %v2259_v47  ;;  %v8440_v51 = vpop.f32.mrf.mxu2 }
 0x621   : > { %v6273_v43 = vpop.eup %6272 }
 0x622   : > { %v2997_v31 = vmul.f32 %v6273_v43, %v2975_v23  ;;  %v2476_v46 = vpop.xlane.xlu0 %2475 }
 0x623   : > { %6274 = vrcp.f32 %v2476_v46 }
 0x624   : > { %v5990_v26 = vpack.i.bf16 %v2998_v36, %v2997_v31 }
 0x625   : > { %3282 = vadd.xlane.f32.xlu1 %v8443_v2  ;;  %v8447_v41 = vpop.f32.mrf.mxu2 }
 0x626   : > { %5991 = vrot.lane.b32.xlu0 %v5990_v26, %s6585_s18  ;;  %v3207_v26 = vadd.f32 %v8427_v53, %v8418_v52 }
 0x629   : > { %v6275_v5 = vpop.eup %6274 }
 0x62a   : > { %v2479_v55 = vpop.xlane.xlu0 %2478  ;;  %v2555_v35 = vmul.f32 %v6275_v5, %v8379_v10  ;;  %v3248_v5 = vmul.f32 %v8437_v27, %v3207_v26 }
 0x62b   : > { %6276 = vrcp.f32 %v2479_v55 }
 0x62c   : > { %6278 = vrcp.f32 %v2705_v0 }
 0x631   : > { %v6277_v8 = vpop.eup %6276 }
 0x632   : > { %v2556_v57 = vmul.f32 %v6277_v8, %v8383_v54  ;;  %v2702_v33 = vpop.xlane.xlu0 %2701  ;;  %v6279_v16 = vpop.eup %6278  ;;  %v6465_v8 = vld [vmem:[%s6709_s25] sm:$0xff] }
 0x633   : > { %6280 = vrcp.f32 %v2702_v33  ;;  %v2778_v10 = vmul.f32 %v6279_v16, %v2760_v17  ;;  %v2243_v54 = vpop.xlane.xlu1 %2242  ;;  %v5962_v23 = vpop.permute.xlu2 %5961  ;;  %v6467_v16 = vld [vmem:[%s6709_s25 + $0x28] sm:$0xff] }
 0x634   : > { %v5995_v28 = vpack.i.bf16 %v2556_v57, %v2555_v35  ;;  %v3216_v63 = vpop.f32.mrf.mxu2  ;;  %6282 = vrcp.f32 %v2927_v30  ;;  %v5964_v48 = vunpack.i.h.bf16 %v5962_v23  ;;  %v5963_v13 = vunpack.i.l.bf16 %v5962_v23  ;;  %v6466_v30 = vld [vmem:[%s6709_s25 + $0x18] sm:$0xff] }
 0x635   : > { %v3217_v58 = vadd.f32 %v8427_v53, %v3216_v63  ;;  %6284 = vrcp.f32 %v2924_v42  ;;  %v10064_v42 = vld [vmem:[#allocation16_spill] sm:$0xff]  ;;  %v8476_v35 = vadd.f32 %v6465_v8, %v3248_v5 }
 0x636   : > { %5996 = vrot.lane.b32.xlu2 %v5995_v28, %s6586_s20  ;;  %6286 = vrcp.f32 %v2240_v61  ;;  %v10063_v61 = vld [vmem:[#allocation18_spill] sm:$0xff]  ;;  %v2256_v55 = vsel %vm1184_vm2, %v10064_v42, 0.0 }
 0x637   : > { %v3252_v25 = vmul.f32 %v8437_v27, %v3217_v58  ;;  %6288 = vrcp.f32 %v2243_v54 }
 0x639   : > { %v6281_v21 = vpop.eup %6280  ;;  %v8455_v34 = vadd.f32 %v6464_v19, %v3252_v25 }
 0x63a   : > { %v2777_v20 = vmul.f32 %v6281_v21, %v2758_v60  ;;  %v6283_v15 = vpop.eup %6282  ;;  %v3214_v60 = vadd.f32 %v8427_v53, %v8447_v41  ;;  %v3212_v41 = vadd.f32 %v8427_v53, %v8440_v51 }
 0x63b   : > { %10061 = vst [vmem:[#allocation12_spill] sm:$0xff] %v8455_v34  ;;  %3288 = vadd.xlane.f32.xlu1 %v8455_v34  ;;  %v6285_v38 = vpop.eup %6284  ;;  %v3000_v39 = vmul.f32 %v6283_v15, %v2982_v50  ;;  %v5957_v24 = vpop.permute.xlu1 %5956 }
 0x63c   : > { %v6000_v7 = vpack.i.bf16 %v2778_v10, %v2777_v20  ;;  %v6287_v18 = vpop.eup %6286  ;;  %v2999_v14 = vmul.f32 %v6285_v38, %v2980_v9  ;;  %v5959_v3 = vunpack.i.h.bf16 %v5957_v24  ;;  %v5958_v47 = vunpack.i.l.bf16 %v5957_v24  ;;  %v3218_v33 = vpop.f32.mrf.mxu2  ;;  %v6468_v10 = vld [vmem:[%s6709_s25 + $0x10] sm:$0xff] }
 0x63d   : > { %v6289_v32 = vpop.eup %6288  ;;  %v2315_v56 = vmul.f32 %v6287_v18, %v10062_v29  ;;  %v3251_v57 = vmul.f32 %v8437_v27, %v3214_v60  ;;  %v3219_v52 = vadd.f32 %v8427_v53, %v3218_v33  ;;  %v5967_v63 = vpop.permute.xlu2 %5966  ;;  %v3250_v21 = vmul.f32 %v8437_v27, %v3212_v41  ;;  %v10069_v33 = vld [vmem:[#allocation8_spill] sm:$0xff] }
 0x63e   : > { %6001 = vrot.lane.b32.xlu2 %v6000_v7, %s6584_s12  ;;  %v6005_v11 = vpack.i.bf16 %v3000_v39, %v2999_v14  ;;  %v2316_v45 = vmul.f32 %v6289_v32, %v10063_v61  ;;  %v5969_v7 = vunpack.i.h.bf16 %v5967_v63  ;;  %v5968_v18 = vunpack.i.l.bf16 %v5967_v63  ;;  %v10068_v14 = vld [vmem:[#allocation19_spill] sm:$0xff] }
 0x63f   : > { %v8482_v28 = vadd.f32 %v6466_v30, %v3251_v57  ;;  %v3253_v9 = vmul.f32 %v8437_v27, %v3219_v52  ;;  %v8494_v54 = vadd.f32 %v6468_v10, %v3250_v21  ;;  %v6469_v10 = vld [vmem:[%s6709_s25 + $0x38] sm:$0xff] }
 0x641   : > { %10065 = vst [vmem:[#allocation13_spill] sm:$0xff] %v8482_v28  ;;  %v8489_v25 = vadd.f32 %v6467_v16, %v3253_v9 }
 0x642   : > { %10067 = vst [vmem:[#allocation15_spill] sm:$0xff] %v8494_v54 }
 0x643   : > { %10066 = vst [vmem:[#allocation11_spill] sm:$0xff] %v8489_v25 }
 0x645   : > { %v5952_v44 = vpop.permute.xlu0 %5951  ;;  %v5972_v17 = vpop.permute.xlu2 %5971 }
 0x646   : > { %v5954_v59 = vunpack.i.h.bf16 %v5952_v44  ;;  %v5953_v6 = vunpack.i.l.bf16 %v5952_v44  ;;  %6006 = vrot.lane.b32.xlu2 %v6005_v11, %s6585_s18  ;;  %v5974_v50 = vunpack.i.h.bf16 %v5972_v17  ;;  %v5973_v24 = vunpack.i.l.bf16 %v5972_v17 }
 0x648   : > { %v3098_v0 = vsel %vm1122_vm1, %v2316_v45, %v5954_v59  ;;  %v3097_v43 = vsel %vm1122_vm1, %v2315_v56, %v5953_v6 }
 0x649   : > { %v3105_v1 = vsel %vm1184_vm2, %v3097_v43, %v5958_v47  ;;  %v3106_v36 = vsel %vm1184_vm2, %v3098_v0, %v5959_v3 }
 0x64a   : > { %v3113_v31 = vsel %vm2108_vm3, %v3105_v1, %v5963_v13  ;;  %v3114_v46 = vsel %vm2108_vm3, %v3106_v36, %v5964_v48 }
 0x64b   : > { %v3125_v40 = vpack.c.bf16 %v3114_v46, %v3113_v31 }
 0x64d   : > { %3225 = vmatmul.bf16.gmra.mxu2 %v3125_v40  ;;  %v2249_v58 = vpop.xlane.xlu1 %2248  ;;  %v5977_v39 = vpop.permute.xlu2 %5976 }
 0x64e   : > { %6290 = vrcp.f32 %v2249_v58  ;;  %v5979_v23 = vunpack.i.h.bf16 %v5977_v39  ;;  %v5978_v44 = vunpack.i.l.bf16 %v5977_v39 }
 0x650   : > { %2257 = vadd.xlane.f32.xlu0 %v2256_v55 }
 0x654   : > { %v6291_v20 = vpop.eup %6290 }
 0x655   : > { %v2318_v51 = vmul.f32 %v6291_v20, %v8195_v62 }
 0x657   : > { %v3100_v15 = vsel %vm1122_vm1, %v2318_v51, %v5969_v7 }
 0x658   : > { %3280 = vadd.xlane.f32.xlu0 %v8476_v35  ;;  %v3108_v11 = vsel %vm1184_vm2, %v3100_v15, %v5974_v50 }
 0x659   : > { %v3116_v61 = vsel %vm2108_vm3, %v3108_v11, %v5979_v23 }
 0x660   : > { %3286 = vadd.xlane.f32.xlu0 %v8482_v28 }
 0x665   : > { %v5987_v59 = vpop.permute.xlu1 %5986 }
 0x666   : > { %v5989_v42 = vunpack.i.h.bf16 %v5987_v59  ;;  %v5988_v55 = vunpack.i.l.bf16 %v5987_v59 }
 0x668   : > { %3290 = vadd.xlane.f32.xlu0 %v8489_v25 }
 0x66f   : > { %3284 = vadd.xlane.f32.xlu2 %v8494_v54 }
 0x670   : > { %v2246_v19 = vpop.xlane.xlu0 %2245 }
 0x671   : > { %6292 = vrcp.f32 %v2246_v19 }
 0x677   : > { %v6293_v38 = vpop.eup %6292 }
 0x678   : > { %v2317_v32 = vmul.f32 %v6293_v38, %v10068_v14  ;;  %v2252_v6 = vpop.xlane.xlu0 %2251 }
 0x679   : > { %6294 = vrcp.f32 %v2252_v6 }
 0x67a   : > { %v3099_v29 = vsel %vm1122_vm1, %v2317_v32, %v5968_v18  ;;  %v3221_v47 = vpop.f32.mrf.mxu2 }
 0x67b   : > { %v3107_v56 = vsel %vm1184_vm2, %v3099_v29, %v5973_v24 }
 0x67c   : > { %v3115_v62 = vsel %vm2108_vm3, %v3107_v56, %v5978_v44 }
 0x67d   : > { %v3126_v45 = vpack.c.bf16 %v3116_v61, %v3115_v62 }
 0x67f   : > { %3230 = vmatmul.bf16.gmra.mxu2 %v3126_v45  ;;  %v6295_v0 = vpop.eup %6294 }
 0x680   : > { %v2319_v31 = vmul.f32 %v6295_v0, %v8206_v37 }
 0x682   : > { %v3223_v30 = vpop.f32.mrf.mxu2 }
 0x683   : > { %v3224_v16 = vadd.f32 %v8427_v53, %v3223_v30 }
 0x685   : > { %v3255_v17 = vmul.f32 %v8437_v27, %v3224_v16 }
 0x687   : > { %v8522_v20 = vadd.f32 %v6469_v10, %v3255_v17 }
 0x689   : > { %10070 = vst [vmem:[#allocation17_spill] sm:$0xff] %v8522_v20 }
 0x68b   : > { %v5982_v48 = vpop.permute.xlu0 %5981 }
 0x68c   : > { %v2255_v3 = vpop.xlane.xlu2 %2254  ;;  %v5983_v1 = vunpack.i.l.bf16 %v5982_v48  ;;  %v5984_v46 = vunpack.i.h.bf16 %v5982_v48 }
 0x68d   : > { %6296 = vrcp.f32 %v2255_v3  ;;  %v3222_v3 = vadd.f32 %v8427_v53, %v3221_v47 }
 0x68e   : > { %v3101_v40 = vsel %vm1122_vm1, %v2319_v31, %v5983_v1 }
 0x68f   : > { %v3109_v9 = vsel %vm1184_vm2, %v3101_v40, %v5988_v55  ;;  %v3254_v1 = vmul.f32 %v8437_v27, %v3222_v3 }
 0x690   : > { %v2261_v13 = vpop.xlane.xlu1 %2260 }
 0x691   : > { %6298 = vrcp.f32 %v2261_v13 }
 0x693   : > { %v6297_v43 = vpop.eup %6296 }
 0x694   : > { %v2320_v36 = vmul.f32 %v6297_v43, %v8217_v4  ;;  %v5997_v19 = vpop.permute.xlu2 %5996 }
 0x695   : > { %v5999_v14 = vunpack.i.h.bf16 %v5997_v19  ;;  %v5998_v32 = vunpack.i.l.bf16 %v5997_v19  ;;  %v6473_v19 = vld [vmem:[%s6709_s25 + $0x40] sm:$0xff] }
 0x696   : > { %v3102_v26 = vsel %vm1122_vm1, %v2320_v36, %v5984_v46 }
 0x697   : > { %v3110_v4 = vsel %vm1184_vm2, %v3102_v26, %v5989_v42  ;;  %v6299_v15 = vpop.eup %6298  ;;  %v6470_v26 = vld [vmem:[%s6709_s25 + $0x30] sm:$0xff] }
 0x698   : > { %v5992_v5 = vpop.permute.xlu0 %5991  ;;  %v3283_v60 = vpop.xlane.xlu1 %3282  ;;  %v2322_v50 = vmul.f32 %v6299_v15, %v8231_v12  ;;  %v8547_v42 = vadd.f32 %v6470_v26, %v3254_v1 }
 0x699   : > { %v5994_v8 = vunpack.i.h.bf16 %v5992_v5  ;;  %v5993_v57 = vunpack.i.l.bf16 %v5992_v5  ;;  %v3313_v52 = vmul.f32 %v3283_v60, %v10069_v33  ;;  %v8552_v5 = vld [vmem:[%s6850_s29 + $0x8] sm:$0x3f] }
 0x69a   : > { %v3104_v56 = vsel %vm1122_vm1, %v2322_v50, %v5999_v14  ;;  %10071 = vst [vmem:[#allocation18_spill] sm:$0xff] %v8547_v42  ;;  %v8555_v27 = vperm.slane %v8552_v5, 2 }
 0x69b   : > { %v8513_v37 = vsub.f32 %v8443_v2, %v3313_v52  ;;  %v3117_v63 = vsel %vm2108_vm3, %v3109_v9, %v5993_v57  ;;  %v3118_v41 = vsel %vm2108_vm3, %v3110_v4, %v5994_v8  ;;  %v6472_v52 = vld [vmem:[%s6709_s25 + $0x48] sm:$0xff] }
 0x69c   : > { %v3127_v58 = vpack.c.bf16 %v3118_v41, %v3117_v63  ;;  %v6002_v51 = vpop.permute.xlu2 %6001 }
 0x69d   : > { %v3345_v21 = vmul.f32 %v8513_v37, %v8513_v37  ;;  %v6004_v18 = vunpack.i.h.bf16 %v6002_v51  ;;  %v6003_v44 = vunpack.i.l.bf16 %v6002_v51 }
 0x69e   : > { %3235 = vmatmul.bf16.gmra.mxu2 %v3127_v58 }
 0x69f   : > { %3362 = vadd.xlane.f32.xlu0 %v3345_v21  ;;  %v3112_v45 = vsel %vm1184_vm2, %v3104_v56, %v6004_v18  ;;  %v6474_v18 = vld [vmem:[%s6709_s25 + $0x50] sm:$0xff] }
 0x6a4   : > { %v6007_v38 = vpop.permute.xlu2 %6006 }
 0x6a5   : > { %v6009_v24 = vunpack.i.h.bf16 %v6007_v38  ;;  %v6008_v62 = vunpack.i.l.bf16 %v6007_v38 }
 0x6a7   : > { %3294 = vadd.xlane.f32.xlu0 %v8522_v20 }
 0x6ae   : > { %v3289_v31 = vpop.xlane.xlu1 %3288 }
 0x6af   : > { %v3316_v47 = vmul.f32 %v3289_v31, %v10069_v33 }
 0x6b1   : > { %v8561_v57 = vsub.f32 %v8455_v34, %v3316_v47 }
 0x6b3   : > { %v3348_v9 = vmul.f32 %v8561_v57, %v8561_v57 }
 0x6c3   : > { %v2258_v7 = vpop.xlane.xlu0 %2257 }
 0x6c4   : > { %6300 = vrcp.f32 %v2258_v7 }
 0x6ca   : > { %v6301_v39 = vpop.eup %6300 }
 0x6cb   : > { %v2321_v11 = vmul.f32 %v6301_v39, %v8227_v49  ;;  %v3281_v23 = vpop.xlane.xlu0 %3280  ;;  %v3120_v49 = vsel %vm2108_vm3, %v3112_v45, %v6009_v24  ;;  %v5789_v45 = vld [vmem:[%s9985_s6 + $0xf4] sm:$0xf0] }
 0x6cc   : > { %v3312_v29 = vmul.f32 %v3281_v23, %v10069_v33  ;;  %v5577_v23 = vld [vmem:[%s9985_s6 + $0xe0] sm:$0xf] }
 0x6cd   : > { %v3103_v61 = vsel %vm1122_vm1, %v2321_v11, %v5998_v32 }
 0x6ce   : > { %v8532_v12 = vsub.f32 %v8476_v35, %v3312_v29  ;;  %v3111_v59 = vsel %vm1184_vm2, %v3103_v61, %v6003_v44  ;;  %v5788_v44 = vld [vmem:[%s9985_s6 + $0xec] sm:$0xf0]  ;;  %v5786_v29 = vld [vmem:[%s9985_s6 + $0xe4] sm:$0xf]  ;;  %v5585_v61 = vld [vmem:[%s9985_s6 + $0xe8] sm:$0xf] }
 0x6cf   : > { %v3119_v6 = vsel %vm2108_vm3, %v3111_v59, %v6008_v62  ;;  %v5578_v56 = vor.u32 %v5788_v44, %v5577_v23  ;;  %v5579_v62 = vld [vmem:[%s9985_s6 + $0xf0] sm:$0xf0]  ;;  %v6475_v59 = vld [vmem:[%s6709_s25 + $0x58] sm:$0xff]  ;;  %v5586_v3 = vor.u32 %v5789_v45, %v5585_v61 }
 0x6d0   : > { %v3226_v48 = vpop.f32.mrf.mxu2  ;;  %v3128_v13 = vpack.c.bf16 %v3120_v49, %v3119_v6  ;;  %v3344_v0 = vmul.f32 %v8532_v12, %v8532_v12  ;;  %v5582_v49 = vor.u32 %v5786_v29, %v5579_v62  ;;  %v5781_v23 = vld [vmem:[%s9985_s6 + $0xb4] sm:$0xf0]  ;;  %v5555_v62 = vld [vmem:[%s9985_s6 + $0xb8] sm:$0xf0] }
 0x6d1   : > { %v3227_v58 = vadd.f32 %v8427_v53, %v3226_v48  ;;  %v5787_v48 = vld [vmem:[%s9985_s6 + $0xec] sm:$0xf]  ;;  %3846 = vmatpush.bf16.msra.mxu3 %v5578_v56  ;;  %3944 = vmatpush.bf16.msrb.mxu1 %v5586_v3  ;;  %v5774_v3 = vld [vmem:[%s9985_s6 + $0x84] sm:$0xf] }
 0x6d2   : > { %3240 = vmatmul.bf16.gmra.mxu2 %v3128_v13  ;;  %3360 = vadd.xlane.f32.xlu1 %v3344_v0  ;;  %v5587_v13 = vld [vmem:[%s9985_s6 + $0xf8] sm:$0xf0]  ;;  %v5779_v56 = vld [vmem:[%s9985_s6 + $0xac] sm:$0xf] }
 0x6d3   : > { %v3287_v43 = vpop.xlane.xlu0 %3286  ;;  %v3256_v21 = vmul.f32 %v8555_v27, %v3227_v58  ;;  %v5590_v0 = vor.u32 %v5787_v48, %v5587_v13  ;;  %3895 = vmatpush.bf16.msrb.mxu0 %v5582_v49  ;;  %v5563_v58 = vld [vmem:[%s9985_s6 + $0xd0] sm:$0xf0]  ;;  %v5558_v45 = vor.u32 %v5779_v56, %v5555_v62  ;;  %v5776_v49 = vld [vmem:[%s9985_s6 + $0x8c] sm:$0xf0]  ;;  %v5507_v56 = vld [vmem:[%s9985_s6 + $0x58] sm:$0xf0] }
 0x6d4   : > { %v3315_v36 = vmul.f32 %v3287_v43, %v10069_v33  ;;  %v5531_v13 = vld [vmem:[%s9985_s6 + $0x90] sm:$0xf0] }
 0x6d5   : > { %v8579_v51 = vadd.f32 %v6473_v19, %v3256_v21  ;;  %3993 = vmatpush.bf16.msrb.mxu2 %v5590_v0  ;;  %v5785_v21 = vld [vmem:[%s9985_s6 + $0xd4] sm:$0xf0]  ;;  %v5783_v19 = vld [vmem:[%s9985_s6 + $0xcc] sm:$0xf]  ;;  %v5537_v0 = vld [vmem:[%s9985_s6 + $0x88] sm:$0xf] }
 0x6d6   : > { %v8543_v46 = vsub.f32 %v8482_v28, %v3315_v36 }
 0x6d7   : > { %10073 = vst [vmem:[#allocation19_spill] sm:$0xff] %v8579_v51 }
 0x6d8   : > { %v3228_v40 = vpop.f32.mrf.mxu2  ;;  %v3347_v55 = vmul.f32 %v8543_v46, %v8543_v46 }
 0x6d9   : > { %v3229_v60 = vadd.f32 %v8427_v53, %v3228_v40 }
 0x6da   : > { %3292 = vadd.xlane.f32.xlu1 %v8547_v42  ;;  %3366 = vadd.xlane.f32.xlu0 %v3347_v55 }
 0x6db   : > { %v3257_v8 = vmul.f32 %v8555_v27, %v3229_v60  ;;  %v3291_v17 = vpop.xlane.xlu0 %3290  ;;  %v6476_v60 = vld [vmem:[%s6709_s25 + $0x60] sm:$0xff] }
 0x6dc   : > { %v3317_v10 = vmul.f32 %v3291_v17, %v10069_v33 }
 0x6dd   : > { %v8564_v30 = vadd.f32 %v6472_v52, %v3257_v8  ;;  %v5561_v52 = vld [vmem:[%s9985_s6 + $0xc0] sm:$0xf] }
 0x6de   : > { %v8583_v7 = vsub.f32 %v8489_v25, %v3317_v10 }
 0x6df   : > { %10072 = vst [vmem:[#allocation16_spill] sm:$0xff] %v8564_v30  ;;  %3298 = vadd.xlane.f32.xlu2 %v8564_v30 }
 0x6e0   : > { %v3349_v15 = vmul.f32 %v8583_v7, %v8583_v7 }
 0x6e2   : > { %v3285_v4 = vpop.xlane.xlu2 %3284  ;;  %3368 = vadd.xlane.f32.xlu0 %v3348_v9  ;;  %v5784_v9 = vld [vmem:[%s9985_s6 + $0xcc] sm:$0xf0] }
 0x6e3   : > { %v3314_v63 = vmul.f32 %v3285_v4, %v10069_v33  ;;  %v5782_v4 = vld [vmem:[%s9985_s6 + $0xc4] sm:$0xf] }
 0x6e4   : > { %v5566_v17 = vor.u32 %v5782_v4, %v5563_v58  ;;  %v5521_v58 = vld [vmem:[%s9985_s6 + $0x68] sm:$0xf] }
 0x6e5   : > { %v8571_v41 = vsub.f32 %v8494_v54, %v3314_v63  ;;  %v5562_v63 = vor.u32 %v5784_v9, %v5561_v52  ;;  %v5772_v52 = vld [vmem:[%s9985_s6 + $0x6c] sm:$0xf0]  ;;  %v5770_v9 = vld [vmem:[%s9985_s6 + $0x64] sm:$0xf] }
 0x6e6   : > { %3896 = vmatpush.bf16.msrb.mxu0 %v5566_v17 }
 0x6e7   : > { %v3346_v16 = vmul.f32 %v8571_v41, %v8571_v41  ;;  %3847 = vmatpush.bf16.msra.mxu3 %v5562_v63  ;;  %v5515_v63 = vld [vmem:[%s9985_s6 + $0x70] sm:$0xf0] }
 0x6e9   : > { %3364 = vadd.xlane.f32.xlu1 %v3346_v16  ;;  %v5569_v16 = vld [vmem:[%s9985_s6 + $0xc8] sm:$0xf] }
 0x6ea   : > { %v5570_v10 = vor.u32 %v5785_v21, %v5569_v16  ;;  %v5773_v16 = vld [vmem:[%s9985_s6 + $0x74] sm:$0xf0]  ;;  %v5518_v21 = vor.u32 %v5770_v9, %v5515_v63  ;;  %v5467_v63 = vld [vmem:[%s9985_s6 + $0x10] sm:$0xf0] }
 0x6eb   : > { %v5522_v17 = vor.u32 %v5773_v16, %v5521_v58  ;;  %v5473_v58 = vld [vmem:[%s9985_s6 + $0x8] sm:$0xf]  ;;  %v5761_v16 = vld [vmem:[%s9985_s6 + $0x14] sm:$0xf0] }
 0x6ec   : > { %3945 = vmatpush.bf16.msrb.mxu1 %v5570_v10  ;;  %v5771_v10 = vld [vmem:[%s9985_s6 + $0x6c] sm:$0xf] }
 0x6f1   : > { %3296 = vadd.xlane.f32.xlu1 %v8579_v51 }
 0x6f9   : > { %3370 = vadd.xlane.f32.xlu1 %v3349_v15  ;;  %v5571_v15 = vld [vmem:[%s9985_s6 + $0xd8] sm:$0xf0] }
 0x702   : > { %v3231_v38 = vpop.f32.mrf.mxu2 }
 0x703   : > { %v3232_v50 = vadd.f32 %v8427_v53, %v3231_v38  ;;  %v5574_v38 = vor.u32 %v5783_v19, %v5571_v15  ;;  %v5523_v19 = vld [vmem:[%s9985_s6 + $0x78] sm:$0xf0] }
 0x704   : > { %v5526_v15 = vor.u32 %v5771_v10, %v5523_v19  ;;  %v5759_v10 = vld [vmem:[%s9985_s6 + $0xc] sm:$0xf]  ;;  %v5475_v19 = vld [vmem:[%s9985_s6 + $0x18] sm:$0xf0] }
 0x705   : > { %v3258_v39 = vmul.f32 %v8555_v27, %v3232_v50  ;;  %v5545_v50 = vld [vmem:[%s9985_s6 + $0xa0] sm:$0xf]  ;;  %3994 = vmatpush.bf16.msrb.mxu2 %v5574_v38 }
 0x706   : > { %v5497_v38 = vld [vmem:[%s9985_s6 + $0x40] sm:$0xf] }
 0x707   : > { %v8590_v14 = vadd.f32 %v6474_v18, %v3258_v39  ;;  %v5780_v39 = vld [vmem:[%s9985_s6 + $0xac] sm:$0xf0]  ;;  %v5778_v18 = vld [vmem:[%s9985_s6 + $0xa4] sm:$0xf] }
 0x709   : > { %10074 = vst [vmem:[#allocation8_spill] sm:$0xff] %v8590_v14  ;;  %3300 = vadd.xlane.f32.xlu2 %v8590_v14  ;;  %3995 = vmatpush.bf16.msrb.mxu2 %v5558_v45  ;;  %v5764_v45 = vld [vmem:[%s9985_s6 + $0x2c] sm:$0xf0] }
 0x70a   : > { %v3233_v32 = vpop.f32.mrf.mxu2 }
 0x70b   : > { %v3234_v24 = vadd.f32 %v8427_v53, %v3233_v32  ;;  %v5546_v32 = vor.u32 %v5780_v39, %v5545_v50  ;;  %v5768_v50 = vld [vmem:[%s9985_s6 + $0x4c] sm:$0xf0]  ;;  %v5766_v39 = vld [vmem:[%s9985_s6 + $0x44] sm:$0xf] }
 0x70d   : > { %v3259_v11 = vmul.f32 %v8555_v27, %v3234_v24  ;;  %v5547_v24 = vld [vmem:[%s9985_s6 + $0xb0] sm:$0xf0]  ;;  %3848 = vmatpush.bf16.msra.mxu3 %v5546_v32 }
 0x70e   : > { %v5550_v44 = vor.u32 %v5778_v18, %v5547_v24  ;;  %v5498_v18 = vor.u32 %v5768_v50, %v5497_v38  ;;  %v5499_v32 = vld [vmem:[%s9985_s6 + $0x50] sm:$0xf0]  ;;  %v5505_v24 = vld [vmem:[%s9985_s6 + $0x48] sm:$0xf] }
 0x70f   : > { %v8614_v6 = vadd.f32 %v6475_v59, %v3259_v11  ;;  %v5553_v11 = vld [vmem:[%s9985_s6 + $0xa8] sm:$0xf]  ;;  %v5529_v59 = vld [vmem:[%s9985_s6 + $0x80] sm:$0xf] }
 0x710   : > { %v5554_v29 = vor.u32 %v5781_v23, %v5553_v11  ;;  %3897 = vmatpush.bf16.msrb.mxu0 %v5550_v44  ;;  %v5530_v48 = vor.u32 %v5776_v49, %v5529_v59  ;;  %v5769_v11 = vld [vmem:[%s9985_s6 + $0x54] sm:$0xf0]  ;;  %v5502_v23 = vor.u32 %v5766_v39, %v5499_v32  ;;  %v5762_v59 = vld [vmem:[%s9985_s6 + $0x24] sm:$0xf] }
 0x711   : > { %10075 = vst [vmem:[#allocation20_spill] sm:$0xff] %v8614_v6  ;;  %3302 = vadd.xlane.f32.xlu0 %v8614_v6  ;;  %v5506_v44 = vor.u32 %v5769_v11, %v5505_v24 }
 0x712   : > { %v3363_v43 = vpop.xlane.xlu0 %3362  ;;  %3946 = vmatpush.bf16.msrb.mxu1 %v5554_v29  ;;  %3849 = vmatpush.bf16.msra.mxu3 %v5530_v48  ;;  %v5767_v29 = vld [vmem:[%s9985_s6 + $0x4c] sm:$0xf]  ;;  %v5489_v48 = vld [vmem:[%s9985_s6 + $0x28] sm:$0xf] }
 0x713   : > { %v3393_v61 = vmul.f32 %v3363_v43, %v10069_v33  ;;  %v5777_v43 = vld [vmem:[%s9985_s6 + $0x94] sm:$0xf0]  ;;  %v5510_v62 = vor.u32 %v5767_v29, %v5507_v56 }
 0x71a   : > { %v3295_v1 = vpop.xlane.xlu0 %3294 }
 0x71b   : > { %v3319_v36 = vmul.f32 %v3295_v1, %v10069_v33  ;;  %v5534_v1 = vor.u32 %v5774_v3, %v5531_v13  ;;  %v5483_v3 = vld [vmem:[%s9985_s6 + $0x30] sm:$0xf0]  ;;  %v5765_v13 = vld [vmem:[%s9985_s6 + $0x34] sm:$0xf0] }
 0x71d   : > { %v8625_v31 = vsub.f32 %v8522_v20, %v3319_v36  ;;  %v5538_v36 = vor.u32 %v5777_v43, %v5537_v0  ;;  %3898 = vmatpush.bf16.msrb.mxu0 %v5534_v1  ;;  %v5486_v43 = vor.u32 %v5762_v59, %v5483_v3  ;;  %v5490_v1 = vor.u32 %v5765_v13, %v5489_v48 }
 0x71f   : > { %v3351_v47 = vmul.f32 %v8625_v31, %v8625_v31  ;;  %3947 = vmatpush.bf16.msrb.mxu1 %v5538_v36  ;;  %v5763_v36 = vld [vmem:[%s9985_s6 + $0x2c] sm:$0xf] }
 0x721   : > { %v3236_v40 = vpop.f32.mrf.mxu2  ;;  %3374 = vadd.xlane.f32.xlu2 %v3351_v47  ;;  %v5775_v47 = vld [vmem:[%s9985_s6 + $0x8c] sm:$0xf]  ;;  %3899 = vmatpush.bf16.msrb.mxu0 %v5518_v21 }
 0x722   : > { %v3237_v26 = vadd.f32 %v8427_v53, %v3236_v40  ;;  %v5539_v40 = vld [vmem:[%s9985_s6 + $0x98] sm:$0xf0] }
 0x723   : > { %3948 = vmatpush.bf16.msrb.mxu1 %v5522_v17  ;;  %v5474_v17 = vor.u32 %v5761_v16, %v5473_v58  ;;  %v10077_v58 = vld [vmem:[#allocation9_spill] sm:$0xff] }
 0x724   : > { %v3260_v55 = vmul.f32 %v8555_v27, %v3237_v26  ;;  %v8708_v26 = vadd.f32 1e-06, %v3393_v61  ;;  %v5481_v61 = vld [vmem:[%s9985_s6 + $0x20] sm:$0xf]  ;;  %v8837_v16 = vperm.slane %v10077_v58, 4 }
 0x725   : > { %3900 = vmatpush.bf16.msrb.mxu0 %v5502_v23  ;;  %v5482_v49 = vor.u32 %v5764_v45, %v5481_v61 }
 0x726   : > { %v8632_v8 = vadd.f32 %v6476_v60, %v3260_v55  ;;  %v5542_v55 = vor.u32 %v5775_v47, %v5539_v40  ;;  %v5513_v60 = vld [vmem:[%s9985_s6 + $0x60] sm:$0xf]  ;;  %6302 = vrsqrt.f32 %v8708_v26  ;;  %v5491_v47 = vld [vmem:[%s9985_s6 + $0x38] sm:$0xf0]  ;;  %vm3440_vm5 = vweird.f32 %v8708_v26 }
 0x727   : > { %v5514_v4 = vor.u32 %v5772_v52, %v5513_v60  ;;  %3949 = vmatpush.bf16.msrb.mxu1 %v5506_v44  ;;  %v5494_v40 = vor.u32 %v5763_v36, %v5491_v47  ;;  %v5760_v60 = vld [vmem:[%s9985_s6 + $0xc] sm:$0xf0]  ;;  %v5758_v52 = vld [vmem:[%s9985_s6 + $0x4] sm:$0xf] }
 0x728   : > { %10076 = vst [vmem:[#allocation21_spill] sm:$0xff] %v8632_v8  ;;  %3304 = vadd.xlane.f32.xlu0 %v8632_v8  ;;  %3996 = vmatpush.bf16.msrb.mxu2 %v5542_v55  ;;  %v5465_v55 = vld [vmem:[%s9985_s6] sm:$0xf]  ;;  %v5470_v21 = vor.u32 %v5758_v52, %v5467_v63 }
 0x729   : > { %3850 = vmatpush.bf16.msra.mxu3 %v5514_v4  ;;  %3901 = vmatpush.bf16.msrb.mxu0 %v5486_v43  ;;  %v5466_v4 = vor.u32 %v5760_v60, %v5465_v55  ;;  %v3238_v56 = vpop.f32.mrf.mxu2 }
 0x72a   : > { %v3239_v3 = vadd.f32 %v8427_v53, %v3238_v56 }
 0x72b   : > { %3950 = vmatpush.bf16.msrb.mxu1 %v5490_v1 }
 0x72c   : > { %3997 = vmatpush.bf16.msrb.mxu2 %v5526_v15  ;;  %v8777_v0 = vpop.eup %6302  ;;  %v5478_v15 = vor.u32 %v5759_v10, %v5475_v19  ;;  %v3261_v60 = vmul.f32 %v8555_v27, %v3239_v3  ;;  %v6477_v19 = vld [vmem:[%s6709_s25 + $0x68] sm:$0xff] }
 0x72d   : > { %3851 = vmatpush.bf16.msra.mxu3 %v5498_v18  ;;  %v3435_v9 = vmul.f32 %v8777_v0, %v8708_v26  ;;  %3902 = vmatpush.bf16.msrb.mxu0 %v5470_v21  ;;  %vm3441_vm4 = vweird.f32 %v8777_v0 }
 0x72e   : > { %vm3442_vm6 = vmor %vm3440_vm5, %vm3441_vm4 }
 0x72f   : > { %3951 = vmatpush.bf16.msrb.mxu1 %v5474_v17  ;;  %v3436_v38 = vmul.f32 %v8777_v0, %v3435_v9 }
 0x730   : > { %3998 = vmatpush.bf16.msrb.mxu2 %v5510_v62 }
 0x731   : > { %3852 = vmatpush.bf16.msra.mxu3 %v5482_v49  ;;  %v3437_v32 = vmul.f32 0.5, %v3436_v38 }
 0x733   : > { %v3438_v24 = vsub.f32 1.5, %v3437_v32 }
 0x734   : > { %3999 = vmatpush.bf16.msrb.mxu2 %v5494_v40 }
 0x735   : > { %3853 = vmatpush.bf16.msra.mxu3 %v5466_v4  ;;  %v3439_v59 = vmul.f32 %v8777_v0, %v3438_v24 }
 0x737   : > { %v3443_v36 = vsel %vm3442_vm6, %v8777_v0, %v3439_v59 }
 0x738   : > { %4000 = vmatpush.bf16.msrb.mxu2 %v5478_v15  ;;  %v3585_v0 = vmul.f32 %v3443_v36, %v8513_v37  ;;  %v8843_v15 = vadd.f32 %v6477_v19, %v3261_v60 }
 0x73a   : > { %10078 = vst [vmem:[#allocation9_spill] sm:$0xff] %v8843_v15  ;;  %v3603_v37 = vmul.f32 %v8837_v16, %v3585_v0 }
 0x745   : > { %v3361_v50 = vpop.xlane.xlu1 %3360 }
 0x746   : > { %v3392_v39 = vmul.f32 %v3361_v50, %v10069_v33 }
 0x748   : > { %v3408_v18 = vadd.f32 1e-06, %v3392_v39  ;;  %v8848_v39 = vperm.slane %v8434_v22, 3 }
 0x74a   : > { %6304 = vrsqrt.f32 %v3408_v18  ;;  %vm3430_vm8 = vweird.f32 %v3408_v18  ;;  %v3621_v22 = vadd.f32 %v8848_v39, %v3603_v37 }
 0x74d   : > { %v3293_v11 = vpop.xlane.xlu1 %3292  ;;  %v3367_v23 = vpop.xlane.xlu0 %3366 }
 0x74e   : > { %v3318_v44 = vmul.f32 %v3293_v11, %v10069_v33  ;;  %v3395_v29 = vmul.f32 %v3367_v23, %v10069_v33 }
 0x750   : > { %v6305_v62 = vpop.eup %6304  ;;  %v8816_v61 = vsub.f32 %v8547_v42, %v3318_v44  ;;  %v8818_v45 = vadd.f32 1e-06, %v3395_v29 }
 0x751   : > { %v3425_v49 = vmul.f32 %v6305_v62, %v3408_v18  ;;  %vm3431_vm7 = vweird.f32 %v6305_v62 }
 0x752   : > { %6306 = vrsqrt.f32 %v8818_v45  ;;  %v3299_v48 = vpop.xlane.xlu2 %3298  ;;  %v3350_v13 = vmul.f32 %v8816_v61, %v8816_v61  ;;  %vm3432_vm9 = vmor %vm3430_vm8, %vm3431_vm7  ;;  %vm3460_vm11 = vweird.f32 %v8818_v45 }
 0x753   : > { %v3426_v43 = vmul.f32 %v6305_v62, %v3425_v49  ;;  %v3321_v1 = vmul.f32 %v3299_v48, %v10069_v33 }
 0x754   : > { %3372 = vadd.xlane.f32.xlu1 %v3350_v13 }
 0x755   : > { %v3427_v47 = vmul.f32 0.5, %v3426_v43  ;;  %v8830_v40 = vsub.f32 %v8564_v30, %v3321_v1  ;;  %v3369_v55 = vpop.xlane.xlu0 %3368  ;;  %v3241_v9 = vpop.f32.mrf.mxu2 }
 0x756   : > { %v3396_v26 = vmul.f32 %v3369_v55, %v10069_v33  ;;  %v3242_v10 = vadd.f32 %v8427_v53, %v3241_v9 }
 0x757   : > { %v3428_v52 = vsub.f32 1.5, %v3427_v47  ;;  %v3353_v4 = vmul.f32 %v8830_v40, %v8830_v40 }
 0x758   : > { %v6307_v63 = vpop.eup %6306  ;;  %v8845_v50 = vadd.f32 1e-06, %v3396_v26  ;;  %v3262_v44 = vmul.f32 %v8555_v27, %v3242_v10 }
 0x759   : > { %v3429_v21 = vmul.f32 %v6305_v62, %v3428_v52  ;;  %v3455_v17 = vmul.f32 %v6307_v63, %v8818_v45  ;;  %3378 = vadd.xlane.f32.xlu0 %v3353_v4  ;;  %vm3461_vm10 = vweird.f32 %v6307_v63  ;;  %v6479_v45 = vld [vmem:[%s6709_s25 + $0x78] sm:$0xff] }
 0x75a   : > { %6308 = vrsqrt.f32 %v8845_v50  ;;  %vm3462_vm12 = vmor %vm3460_vm11, %vm3461_vm10  ;;  %vm3470_vm1 = vweird.f32 %v8845_v50 }
 0x75b   : > { %v3433_v38 = vsel %vm3432_vm9, %v6305_v62, %v3429_v21  ;;  %v3456_v32 = vmul.f32 %v6307_v63, %v3455_v17 }
 0x75c   : > { %v3584_v18 = vmul.f32 %v3433_v38, %v8532_v12  ;;  %v3365_v24 = vpop.xlane.xlu1 %3364  ;;  %3306 = vadd.xlane.f32.xlu1 %v8843_v15  ;;  %v6478_v12 = vld [vmem:[%s6709_s25 + $0x70] sm:$0xff] }
 0x75d   : > { %v3394_v11 = vmul.f32 %v3365_v24, %v10069_v33  ;;  %v3457_v62 = vmul.f32 0.5, %v3456_v32  ;;  %v8860_v59 = vadd.f32 %v6478_v12, %v3262_v44  ;;  %v3243_v1 = vpop.f32.mrf.mxu2 }
 0x75e   : > { %v3602_v23 = vmul.f32 %v8837_v16, %v3584_v18  ;;  %v3244_v9 = vadd.f32 %v8427_v53, %v3243_v1 }
 0x75f   : > { %v3410_v29 = vadd.f32 1e-06, %v3394_v11  ;;  %10079 = vst [vmem:[#allocation22_spill] sm:$0xff] %v8860_v59  ;;  %v3458_v3 = vsub.f32 1.5, %v3457_v62 }
 0x760   : > { %v3620_v56 = vadd.f32 %v8848_v39, %v3602_v23  ;;  %v6309_v13 = vpop.eup %6308  ;;  %v3263_v10 = vmul.f32 %v8555_v27, %v3244_v9 }
 0x761   : > { %6310 = vrsqrt.f32 %v3410_v29  ;;  %v3459_v55 = vmul.f32 %v6307_v63, %v3458_v3  ;;  %v3465_v60 = vmul.f32 %v6309_v13, %v8845_v50  ;;  %vm3450_vm14 = vweird.f32 %v3410_v29 }
 0x762   : > { %v3636_v49 = vpack.c.bf16 %v3621_v22, %v3620_v56  ;;  %v8876_v24 = vadd.f32 %v6479_v45, %v3263_v10  ;;  %vm3471_vm0 = vweird.f32 %v6309_v13 }
 0x763   : > { %v3463_v58 = vsel %vm3462_vm12, %v6307_v63, %v3459_v55  ;;  %v3466_v0 = vmul.f32 %v6309_v13, %v3465_v60  ;;  %vm3472_vm2 = vmor %vm3470_vm1, %vm3471_vm0 }
 0x764   : > { %v3297_v48 = vpop.xlane.xlu1 %3296  ;;  %3308 = vadd.xlane.f32.xlu1 %v8860_v59  ;;  %3854 = vmatmul.bf16.vlgmr.msra.gmra.mxu3 %v3636_v49  ;;  %v3587_v53 = vmul.f32 %v3463_v58, %v8543_v46  ;;  %10080 = vst [vmem:[#allocation23_spill] sm:$0xff] %v8876_v24 }
 0x765   : > { %v3320_v43 = vmul.f32 %v3297_v48, %v10069_v33  ;;  %3903 = vmatmul.bf16.vlgmr.msrb.gmra.mxu0 %v3636_v49  ;;  %3952 = vmatmul.bf16.vlgmr.msrb.gmra.mxu1 %v3636_v49  ;;  %v3467_v18 = vmul.f32 0.5, %v3466_v0 }
 0x766   : > { %4001 = vmatmul.bf16.vlgmr.msrb.gmra.mxu2 %v3636_v49  ;;  %v3605_v27 = vmul.f32 %v8837_v16, %v3587_v53 }
 0x767   : > { %v6311_v36 = vpop.eup %6310  ;;  %v8865_v47 = vsub.f32 %v8579_v51, %v3320_v43  ;;  %v3468_v23 = vsub.f32 1.5, %v3467_v18 }
 0x768   : > { %v3445_v52 = vmul.f32 %v6311_v36, %v3410_v29  ;;  %vm3451_vm13 = vweird.f32 %v6311_v36  ;;  %v3623_v29 = vadd.f32 %v8848_v39, %v3605_v27 }
 0x769   : > { %v3352_v26 = vmul.f32 %v8865_v47, %v8865_v47  ;;  %vm3452_vm15 = vmor %vm3450_vm14, %vm3451_vm13  ;;  %v3469_v56 = vmul.f32 %v6309_v13, %v3468_v23 }
 0x76a   : > { %v3446_v4 = vmul.f32 %v6311_v36, %v3445_v52 }
 0x76b   : > { %3376 = vadd.xlane.f32.xlu2 %v3352_v26 }
 0x76c   : > { %v3447_v21 = vmul.f32 0.5, %v3446_v4  ;;  %v3371_v17 = vpop.xlane.xlu1 %3370 }
 0x76d   : > { %v3397_v19 = vmul.f32 %v3371_v17, %v10069_v33 }
 0x76e   : > { %v3448_v38 = vsub.f32 1.5, %v3447_v21 }
 0x76f   : > { %v3413_v37 = vadd.f32 1e-06, %v3397_v19 }
 0x770   : > { %v3449_v32 = vmul.f32 %v6311_v36, %v3448_v38 }
 0x771   : > { %6312 = vrsqrt.f32 %v3413_v37  ;;  %vm3480_vm4 = vweird.f32 %v3413_v37 }
 0x772   : > { %v3453_v63 = vsel %vm3452_vm15, %v6311_v36, %v3449_v32 }
 0x773   : > { %v3586_v11 = vmul.f32 %v3453_v63, %v8571_v41  ;;  %3310 = vadd.xlane.f32.xlu2 %v8876_v24  ;;  %v3473_v41 = vsel %vm3472_vm2, %v6309_v13, %v3469_v56 }
 0x774   : > { %v3588_v36 = vmul.f32 %v3473_v41, %v8561_v57 }
 0x775   : > { %v3604_v44 = vmul.f32 %v8837_v16, %v3586_v11 }
 0x776   : > { %v3606_v9 = vmul.f32 %v8837_v16, %v3588_v36 }
 0x777   : > { %v6313_v46 = vpop.eup %6312  ;;  %v3622_v22 = vadd.f32 %v8848_v39, %v3604_v44 }
 0x778   : > { %v3475_v62 = vmul.f32 %v6313_v46, %v3413_v37  ;;  %vm3481_vm3 = vweird.f32 %v6313_v46  ;;  %v3624_v0 = vadd.f32 %v8848_v39, %v3606_v9 }
 0x779   : > { %v3637_v12 = vpack.c.bf16 %v3623_v29, %v3622_v22  ;;  %vm3482_vm5 = vmor %vm3480_vm4, %vm3481_vm3 }
 0x77a   : > { %v3476_v49 = vmul.f32 %v6313_v46, %v3475_v62 }
 0x77b   : > { %3859 = vmatmul.bf16.gmra.mxu3 %v3637_v12  ;;  %3908 = vmatmul.bf16.gmra.mxu0 %v3637_v12 }
 0x77c   : > { %v3477_v3 = vmul.f32 0.5, %v3476_v49  ;;  %3957 = vmatmul.bf16.gmra.mxu1 %v3637_v12  ;;  %4006 = vmatmul.bf16.gmra.mxu2 %v3637_v12  ;;  %v3301_v48 = vpop.xlane.xlu2 %3300 }
 0x77d   : > { %v3322_v43 = vmul.f32 %v3301_v48, %v10069_v33 }
 0x77e   : > { %v3478_v1 = vsub.f32 1.5, %v3477_v3 }
 0x77f   : > { %v8888_v55 = vsub.f32 %v8590_v14, %v3322_v43 }
 0x780   : > { %v3479_v60 = vmul.f32 %v6313_v46, %v3478_v1 }
 0x781   : > { %v3354_v50 = vmul.f32 %v8888_v55, %v8888_v55 }
 0x782   : > { %v3483_v13 = vsel %vm3482_vm5, %v6313_v46, %v3479_v60 }
 0x783   : > { %v3589_v52 = vmul.f32 %v3483_v13, %v8583_v7  ;;  %3380 = vadd.xlane.f32.xlu0 %v3354_v50 }
 0x784   : > { %v3303_v26 = vpop.xlane.xlu0 %3302 }
 0x785   : > { %v3323_v4 = vmul.f32 %v3303_v26, %v10069_v33  ;;  %v3607_v57 = vmul.f32 %v8837_v16, %v3589_v52 }
 0x787   : > { %v8897_v58 = vsub.f32 %v8614_v6, %v3323_v4  ;;  %v3625_v21 = vadd.f32 %v8848_v39, %v3607_v57 }
 0x789   : > { %v3638_v17 = vpack.c.bf16 %v3625_v21, %v3624_v0  ;;  %v3355_v10 = vmul.f32 %v8897_v58, %v8897_v58 }
 0x78b   : > { %3864 = vmatmul.bf16.gmra.mxu3 %v3638_v17  ;;  %3913 = vmatmul.bf16.gmra.mxu0 %v3638_v17 }
 0x78c   : > { %3962 = vmatmul.bf16.gmra.mxu1 %v3638_v17  ;;  %4011 = vmatmul.bf16.gmra.mxu2 %v3638_v17 }
 0x78d   : > { %3382 = vadd.xlane.f32.xlu1 %v3355_v10 }
 0x794   : > { %v3375_v37 = vpop.xlane.xlu2 %3374 }
 0x795   : > { %v3399_v18 = vmul.f32 %v3375_v37, %v10069_v33 }
 0x797   : > { %v3415_v32 = vadd.f32 1e-06, %v3399_v18 }
 0x799   : > { %6314 = vrsqrt.f32 %v3415_v32  ;;  %vm3500_vm7 = vweird.f32 %v3415_v32 }
 0x79b   : > { %v3305_v7 = vpop.xlane.xlu0 %3304 }
 0x79c   : > { %v3324_v19 = vmul.f32 %v3305_v7, %v10069_v33 }
 0x79e   : > { %v8905_v38 = vsub.f32 %v8632_v8, %v3324_v19 }
 0x79f   : > { %v6315_v45 = vpop.eup %6314 }
 0x7a0   : > { %v3356_v53 = vmul.f32 %v8905_v38, %v8905_v38  ;;  %v3495_v63 = vmul.f32 %v6315_v45, %v3415_v32  ;;  %vm3501_vm6 = vweird.f32 %v6315_v45 }
 0x7a1   : > { %vm3502_vm8 = vmor %vm3500_vm7, %vm3501_vm6 }
 0x7a2   : > { %3384 = vadd.xlane.f32.xlu2 %v3356_v53  ;;  %v3496_v11 = vmul.f32 %v6315_v45, %v3495_v63 }
 0x7a4   : > { %v3497_v46 = vmul.f32 0.5, %v3496_v11 }
 0x7a6   : > { %v3498_v56 = vsub.f32 1.5, %v3497_v46 }
 0x7a8   : > { %v3499_v48 = vmul.f32 %v6315_v45, %v3498_v56 }
 0x7aa   : > { %v3503_v60 = vsel %vm3502_vm8, %v6315_v45, %v3499_v48 }
 0x7ab   : > { %v3591_v4 = vmul.f32 %v3503_v60, %v8625_v31 }
 0x7ad   : > { %v3609_v53 = vmul.f32 %v8837_v16, %v3591_v4 }
 0x7af   : > { %v3627_v63 = vadd.f32 %v8848_v39, %v3609_v53 }
 0x7c7   : > { %v3373_v27 = vpop.xlane.xlu1 %3372 }
 0x7c8   : > { %v3398_v23 = vmul.f32 %v3373_v27, %v10069_v33 }
 0x7ca   : > { %v3414_v44 = vadd.f32 1e-06, %v3398_v23 }
 0x7cc   : > { %6316 = vrsqrt.f32 %v3414_v44  ;;  %v3379_v22 = vpop.xlane.xlu0 %3378  ;;  %vm3490_vm10 = vweird.f32 %v3414_v44 }
 0x7cd   : > { %v3401_v29 = vmul.f32 %v3379_v22, %v10069_v33 }
 0x7cf   : > { %v3417_v62 = vadd.f32 1e-06, %v3401_v29  ;;  %v3307_v12 = vpop.xlane.xlu1 %3306 }
 0x7d0   : > { %v3325_v49 = vmul.f32 %v3307_v12, %v10069_v33 }
 0x7d1   : > { %6318 = vrsqrt.f32 %v3417_v62  ;;  %vm3520_vm13 = vweird.f32 %v3417_v62 }
 0x7d2   : > { %v6317_v41 = vpop.eup %6316  ;;  %v8914_v3 = vsub.f32 %v8843_v15, %v3325_v49 }
 0x7d3   : > { %v3485_v43 = vmul.f32 %v6317_v41, %v3414_v44  ;;  %vm3491_vm9 = vweird.f32 %v6317_v41 }
 0x7d4   : > { %v3357_v1 = vmul.f32 %v8914_v3, %v8914_v3  ;;  %vm3492_vm11 = vmor %vm3490_vm10, %vm3491_vm9 }
 0x7d5   : > { %v3486_v36 = vmul.f32 %v6317_v41, %v3485_v43 }
 0x7d6   : > { %3386 = vadd.xlane.f32.xlu0 %v3357_v1  ;;  %v10081_v1 = vld [vmem:[#allocation10_spill] sm:$0xff] }
 0x7d7   : > { %v3487_v50 = vmul.f32 0.5, %v3486_v36  ;;  %v3309_v13 = vpop.xlane.xlu1 %3308  ;;  %v6319_v52 = vpop.eup %6318  ;;  %v8939_v36 = vperm.slane %v10081_v1, 4 }
 0x7d8   : > { %v3326_v9 = vmul.f32 %v3309_v13, %v10069_v33  ;;  %v3515_v21 = vmul.f32 %v6319_v52, %v3417_v62  ;;  %vm3521_vm12 = vweird.f32 %v6319_v52 }
 0x7d9   : > { %v3488_v26 = vsub.f32 1.5, %v3487_v50  ;;  %vm3522_vm14 = vmor %vm3520_vm13, %vm3521_vm12 }
 0x7da   : > { %v8921_v57 = vsub.f32 %v8860_v59, %v3326_v9  ;;  %v3516_v37 = vmul.f32 %v6319_v52, %v3515_v21  ;;  %v8944_v9 = vperm.slane %v8552_v5, 3 }
 0x7db   : > { %v3489_v0 = vmul.f32 %v6317_v41, %v3488_v26 }
 0x7dc   : > { %v3358_v17 = vmul.f32 %v8921_v57, %v8921_v57  ;;  %v3517_v11 = vmul.f32 0.5, %v3516_v37 }
 0x7dd   : > { %v3493_v10 = vsel %vm3492_vm11, %v6317_v41, %v3489_v0 }
 0x7de   : > { %v3590_v7 = vmul.f32 %v3493_v10, %v8816_v61  ;;  %v3377_v19 = vpop.xlane.xlu2 %3376  ;;  %3388 = vadd.xlane.f32.xlu1 %v3358_v17  ;;  %v3518_v61 = vsub.f32 1.5, %v3517_v11 }
 0x7df   : > { %v3400_v31 = vmul.f32 %v3377_v19, %v10069_v33 }
 0x7e0   : > { %v3608_v18 = vmul.f32 %v8837_v16, %v3590_v7  ;;  %v3519_v29 = vmul.f32 %v6319_v52, %v3518_v61 }
 0x7e1   : > { %v3416_v32 = vadd.f32 1e-06, %v3400_v31 }
 0x7e2   : > { %v3626_v45 = vadd.f32 %v8848_v39, %v3608_v18  ;;  %v3523_v49 = vsel %vm3522_vm14, %v6319_v52, %v3519_v29  ;;  %v3953_v1 = vpop.f32.mrf.mxu1 }
 0x7e3   : > { %6320 = vrsqrt.f32 %v3416_v32  ;;  %v3593_v48 = vmul.f32 %v3523_v49, %v8830_v40  ;;  %vm3510_vm0 = vweird.f32 %v3416_v32 }
 0x7e4   : > { %v3639_v27 = vpack.c.bf16 %v3627_v63, %v3626_v45 }
 0x7e5   : > { %v3611_v62 = vmul.f32 %v8939_v36, %v3593_v48 }
 0x7e6   : > { %v3311_v23 = vpop.xlane.xlu2 %3310  ;;  %3869 = vmatmul.bf16.gmra.mxu3 %v3639_v27  ;;  %3918 = vmatmul.bf16.gmra.mxu0 %v3639_v27 }
 0x7e7   : > { %v3327_v44 = vmul.f32 %v3311_v23, %v10069_v33  ;;  %3967 = vmatmul.bf16.gmra.mxu1 %v3639_v27  ;;  %4016 = vmatmul.bf16.gmra.mxu2 %v3639_v27  ;;  %v3629_v0 = vadd.f32 %v8944_v9, %v3611_v62 }
 0x7e9   : > { %v6321_v46 = vpop.eup %6320  ;;  %v8933_v22 = vsub.f32 %v8876_v24, %v3327_v44 }
 0x7ea   : > { %v3505_v16 = vmul.f32 %v6321_v46, %v3416_v32  ;;  %vm3511_vm15 = vweird.f32 %v6321_v46 }
 0x7eb   : > { %v3359_v39 = vmul.f32 %v8933_v22, %v8933_v22  ;;  %vm3512_vm1 = vmor %vm3510_vm0, %vm3511_vm15 }
 0x7ec   : > { %v3506_v56 = vmul.f32 %v6321_v46, %v3505_v16 }
 0x7ed   : > { %3390 = vadd.xlane.f32.xlu2 %v3359_v39 }
 0x7ee   : > { %v3507_v12 = vmul.f32 0.5, %v3506_v56 }
 0x7f0   : > { %v3508_v41 = vsub.f32 1.5, %v3507_v12 }
 0x7f2   : > { %v3509_v43 = vmul.f32 %v6321_v46, %v3508_v41  ;;  %v3904_v41 = vpop.f32.mrf.mxu0 }
 0x7f4   : > { %v3513_v60 = vsel %vm3512_vm1, %v6321_v46, %v3509_v43  ;;  %v3855_v43 = vpop.f32.mrf.mxu3 }
 0x7f5   : > { %v3592_v50 = vmul.f32 %v3513_v60, %v8865_v47 }
 0x7f6   : > { %v3381_v13 = vpop.xlane.xlu0 %3380 }
 0x7f7   : > { %v3402_v52 = vmul.f32 %v3381_v13, %v10069_v33  ;;  %v3610_v26 = vmul.f32 %v8939_v36, %v3592_v50 }
 0x7f9   : > { %v3418_v40 = vadd.f32 1e-06, %v3402_v52  ;;  %v3628_v4 = vadd.f32 %v8944_v9, %v3610_v26  ;;  %v4002_v26 = vpop.f32.mrf.mxu2 }
 0x7fb   : > { %6322 = vrsqrt.f32 %v3418_v40  ;;  %v3640_v21 = vpack.c.bf16 %v3629_v0, %v3628_v4  ;;  %vm3530_vm3 = vweird.f32 %v3418_v40 }
 0x7fd   : > { %3874 = vmatmul.bf16.gmra.mxu3 %v3640_v21  ;;  %3923 = vmatmul.bf16.gmra.mxu0 %v3640_v21 }
 0x7fe   : > { %3972 = vmatmul.bf16.gmra.mxu1 %v3640_v21  ;;  %4021 = vmatmul.bf16.gmra.mxu2 %v3640_v21 }
 0x800   : > { %v3383_v47 = vpop.xlane.xlu1 %3382 }
 0x801   : > { %v6323_v17 = vpop.eup %6322  ;;  %v3403_v5 = vmul.f32 %v3383_v47, %v10069_v33 }
 0x802   : > { %v3525_v10 = vmul.f32 %v6323_v17, %v3418_v40  ;;  %vm3531_vm2 = vweird.f32 %v6323_v17  ;;  %v3906_v40 = vpop.f32.mrf.mxu0 }
 0x803   : > { %v3419_v7 = vadd.f32 1e-06, %v3403_v5  ;;  %vm3532_vm4 = vmor %vm3530_vm3, %vm3531_vm2  ;;  %v3857_v5 = vpop.f32.mrf.mxu3 }
 0x804   : > { %v3526_v19 = vmul.f32 %v6323_v17, %v3525_v10 }
 0x805   : > { %6324 = vrsqrt.f32 %v3419_v7  ;;  %vm3540_vm6 = vweird.f32 %v3419_v7 }
 0x806   : > { %v3527_v53 = vmul.f32 0.5, %v3526_v19 }
 0x808   : > { %v3528_v37 = vsub.f32 1.5, %v3527_v53 }
 0x80a   : > { %v3529_v18 = vmul.f32 %v6323_v17, %v3528_v37 }
 0x80b   : > { %v6325_v31 = vpop.eup %6324 }
 0x80c   : > { %v3535_v32 = vmul.f32 %v6325_v31, %v3419_v7  ;;  %v3533_v63 = vsel %vm3532_vm4, %v6323_v17, %v3529_v18  ;;  %vm3541_vm5 = vweird.f32 %v6325_v31  ;;  %v3955_v7 = vpop.f32.mrf.mxu1 }
 0x80d   : > { %v3594_v23 = vmul.f32 %v3533_v63, %v8888_v55  ;;  %vm3542_vm7 = vmor %vm3540_vm6, %vm3541_vm5 }
 0x80e   : > { %v3536_v45 = vmul.f32 %v6325_v31, %v3535_v32 }
 0x80f   : > { %v3612_v16 = vmul.f32 %v8939_v36, %v3594_v23 }
 0x810   : > { %v3537_v11 = vmul.f32 0.5, %v3536_v45 }
 0x811   : > { %v3630_v56 = vadd.f32 %v8944_v9, %v3612_v16  ;;  %v4004_v16 = vpop.f32.mrf.mxu2 }
 0x812   : > { %v3538_v27 = vsub.f32 1.5, %v3537_v11 }
 0x814   : > { %v3539_v61 = vmul.f32 %v6325_v31, %v3538_v27 }
 0x815   : > { %v3385_v55 = vpop.xlane.xlu2 %3384 }
 0x816   : > { %v3543_v44 = vsel %vm3542_vm7, %v6325_v31, %v3539_v61  ;;  %v3404_v49 = vmul.f32 %v3385_v55, %v10069_v33 }
 0x817   : > { %v3595_v46 = vmul.f32 %v3543_v44, %v8897_v58  ;;  %v3676_v58 = vld [vmem:[%s9986_s7] sm:$0xf] }
 0x818   : > { %v8958_v48 = vadd.f32 1e-06, %v3404_v49  ;;  %v8963_v60 = vperm.slane %v3676_v58, 1  ;;  %v8966_v50 = vperm.slane %v3676_v58, 2  ;;  %v8968_v13 = vperm.slane %v3676_v58, 0 }
 0x819   : > { %v3613_v29 = vmul.f32 %v8939_v36, %v3595_v46  ;;  %v8981_v21 = vperm.slane %v3676_v58, 3 }
 0x81a   : > { %6326 = vrsqrt.f32 %v8958_v48  ;;  %v8971_v62 = vadd.f32 %v3904_v41, %v8963_v60  ;;  %v8974_v52 = vadd.f32 %v3953_v1, %v8966_v50  ;;  %v8979_v0 = vadd.f32 %v3855_v43, %v8968_v13  ;;  %v9019_v1 = vpop.f32.mrf.mxu3 }
 0x81b   : > { %v3631_v39 = vadd.f32 %v8944_v9, %v3613_v29  ;;  %v8985_v17 = vadd.f32 %v3906_v40, %v8963_v60  ;;  %v8992_v37 = vadd.f32 %v4002_v26, %v8981_v21  ;;  %v8995_v31 = vadd.f32 %v3857_v5, %v8968_v13  ;;  %v9023_v40 = vpop.f32.mrf.mxu0 }
 0x81c   : > { %v4107_v47 = vmul.f32 0.044715, %v8971_v62  ;;  %v4108_v10 = vmul.f32 0.044715, %v8974_v52  ;;  %v4106_v53 = vmul.f32 0.044715, %v8979_v0  ;;  %v9000_v45 = vadd.f32 %v3955_v7, %v8966_v50 }
 0x81d   : > { %v3641_v12 = vpack.c.bf16 %v3631_v39, %v3630_v56  ;;  %v4111_v32 = vmul.f32 0.044715, %v8985_v17  ;;  %v4109_v61 = vmul.f32 0.044715, %v8992_v37  ;;  %v4110_v46 = vmul.f32 0.044715, %v8995_v31 }
 0x81e   : > { %v4171_v18 = vmul.f32 %v4107_v47, %v8971_v62  ;;  %v4172_v63 = vmul.f32 %v4108_v10, %v8974_v52  ;;  %v4170_v23 = vmul.f32 %v4106_v53, %v8979_v0  ;;  %v4112_v39 = vmul.f32 0.044715, %v9000_v45 }
 0x81f   : > { %3879 = vmatmul.bf16.gmra.mxu3 %v3641_v12  ;;  %3928 = vmatmul.bf16.gmra.mxu0 %v3641_v12  ;;  %v4175_v56 = vmul.f32 %v4111_v32, %v8985_v17  ;;  %v4173_v58 = vmul.f32 %v4109_v61, %v8992_v37  ;;  %v9017_v43 = vadd.f32 %v4004_v16, %v8981_v21  ;;  %v5813_v61 = vld [vmem:[%s9987_s8 + $0xb8] sm:$0xff]  ;;  %vm3550_vm9 = vweird.f32 %v8958_v48 }
 0x820   : > { %3977 = vmatmul.bf16.gmra.mxu1 %v3641_v12  ;;  %4026 = vmatmul.bf16.gmra.mxu2 %v3641_v12  ;;  %v8976_v4 = vpop.eup %6326  ;;  %v4235_v29 = vmul.f32 %v4171_v18, %v8971_v62  ;;  %v4236_v55 = vmul.f32 %v4172_v63, %v8974_v52  ;;  %v4234_v41 = vmul.f32 %v4170_v23, %v8979_v0  ;;  %v5805_v23 = vld [vmem:[%s9987_s8 + $0x78] sm:$0xff] }
 0x821   : > { %v3545_v19 = vmul.f32 %v8976_v4, %v8958_v48  ;;  %v4174_v26 = vmul.f32 %v4110_v46, %v8995_v31  ;;  %v4239_v5 = vmul.f32 %v4175_v56, %v8985_v17  ;;  %v4176_v10 = vmul.f32 %v4112_v39, %v9000_v45  ;;  %v5821_v46 = vld [vmem:[%s9987_s8 + $0xf8] sm:$0xff]  ;;  %4959 = vmatpush.bf16.msra.mxu0 %v5805_v23  ;;  %v9109_v48 = vpop.f32.mrf.mxu2 }
 0x822   : > { %v4299_v47 = vadd.f32 %v4235_v29, %v8971_v62  ;;  %v4300_v7 = vadd.f32 %v4236_v55, %v8974_v52  ;;  %v4298_v18 = vadd.f32 %v4234_v41, %v8979_v0  ;;  %v4237_v32 = vmul.f32 %v4173_v58, %v8992_v37  ;;  %5008 = vmatpush.bf16.msra.mxu1 %v5813_v61  ;;  %v3862_v61 = vpop.f32.mrf.mxu3 }
 0x823   : > { %v3546_v11 = vmul.f32 %v8976_v4, %v3545_v19  ;;  %v4113_v63 = vmul.f32 0.044715, %v9017_v43  ;;  %v4303_v56 = vadd.f32 %v4239_v5, %v8985_v17  ;;  %v4240_v39 = vmul.f32 %v4176_v10, %v9000_v45  ;;  %5057 = vmatpush.bf16.msra.mxu2 %v5821_v46  ;;  %v3958_v10 = vpop.f32.mrf.mxu1 }
 0x824   : > { %v4363_v29 = vmul.f32 0.7978846, %v4299_v47  ;;  %vm3551_vm8 = vweird.f32 %v8976_v4  ;;  %v4301_v47 = vadd.f32 %v4237_v32, %v8992_v37  ;;  %v9094_v46 = vmul.f32 0.5, %v8979_v0 }
 0x825   : > { %v3547_v49 = vmul.f32 0.5, %v3546_v11  ;;  %v4177_v5 = vmul.f32 %v4113_v63, %v9017_v43  ;;  %v5812_v63 = vld [vmem:[%s9987_s8 + $0xb0] sm:$0xff]  ;;  %v4304_v23 = vadd.f32 %v4240_v39, %v9000_v45  ;;  %vm9083_vm10 = vmor %vm3550_vm9, %vm3551_vm8  ;;  %v9106_v0 = vmul.f32 0.5, %v8992_v37 }
 0x826   : > { %5009 = vmatpush.bf16.msra.mxu1 %v5812_v63  ;;  %v9168_v24 = vmul.f32 0.5, %v9017_v43 }
 0x827   : > { %v3548_v19 = vsub.f32 1.5, %v3547_v49  ;;  %v4364_v49 = vmul.f32 0.7978846, %v4300_v7  ;;  %v5796_v7 = vld [vmem:[%s9987_s8 + $0x30] sm:$0xff] }
 0x829   : > { %v3549_v41 = vmul.f32 %v8976_v4, %v3548_v19  ;;  %v5804_v19 = vld [vmem:[%s9987_s8 + $0x70] sm:$0xff] }
 0x82a   : > { %4960 = vmatpush.bf16.msra.mxu0 %v5804_v19  ;;  %v4241_v19 = vmul.f32 %v4177_v5, %v9017_v43 }
 0x849   : > { %v3387_v27 = vpop.xlane.xlu0 %3386 }
 0x84a   : > { %v3405_v44 = vmul.f32 %v3387_v27, %v10069_v33  ;;  %v5797_v27 = vld [vmem:[%s9987_s8 + $0x38] sm:$0xff] }
 0x84b   : > { %4910 = vmatpush.bf16.msrb.mxu3 %v5797_v27  ;;  %v9078_v27 = vmul.f32 0.5, %v8974_v52  ;;  %v5803_v52 = vld [vmem:[%s9987_s8 + $0x68] sm:$0xff] }
 0x84c   : > { %v9011_v12 = vadd.f32 1e-06, %v3405_v44  ;;  %v4238_v44 = vmul.f32 %v4174_v26, %v8995_v31  ;;  %v4362_v26 = vmul.f32 0.7978846, %v4298_v18  ;;  %4961 = vmatpush.bf16.msra.mxu0 %v5803_v52  ;;  %v5810_v52 = vld [vmem:[%s9987_s8 + $0xa0] sm:$0xff] }
 0x84e   : > { %6328 = vrsqrt.f32 %v9011_v12  ;;  %v4302_v18 = vadd.f32 %v4238_v44, %v8995_v31  ;;  %v5795_v44 = vld [vmem:[%s9987_s8 + $0x28] sm:$0xff]  ;;  %vm3560_vm12 = vweird.f32 %v9011_v12 }
 0x84f   : > { %4911 = vmatpush.bf16.msrb.mxu3 %v5796_v7  ;;  %v5819_v7 = vld [vmem:[%s9987_s8 + $0xe8] sm:$0xff] }
 0x851   : > { %v3389_v53 = vpop.xlane.xlu1 %3388 }
 0x852   : > { %v3406_v11 = vmul.f32 %v3389_v53, %v10069_v33  ;;  %v9066_v53 = vmul.f32 0.5, %v8971_v62  ;;  %v4367_v62 = vmul.f32 0.7978846, %v4303_v56  ;;  %v3553_v56 = vsel %vm9083_vm10, %v8976_v4, %v3549_v41 }
 0x853   : > { %v4366_v4 = vmul.f32 0.7978846, %v4302_v18  ;;  %v9112_v41 = vadd.f32 %v3862_v61, %v8968_v13  ;;  %v3596_v37 = vmul.f32 %v3553_v56, %v8905_v38  ;;  %4912 = vmatpush.bf16.msrb.mxu3 %v5795_v44  ;;  %v9134_v38 = vadd.f32 %v9023_v40, %v8963_v60  ;;  %v5802_v61 = vld [vmem:[%s9987_s8 + $0x60] sm:$0xff] }
 0x854   : > { %v9046_v16 = vpop.eup %6328  ;;  %v9050_v55 = vadd.f32 1e-06, %v3406_v11  ;;  %v5820_v11 = vld [vmem:[%s9987_s8 + $0xf0] sm:$0xff]  ;;  %v4305_v44 = vadd.f32 %v4241_v19, %v9017_v43  ;;  %4962 = vmatpush.bf16.msra.mxu0 %v5802_v61 }
 0x855   : > { %v3555_v58 = vmul.f32 %v9046_v16, %v9011_v12  ;;  %5058 = vmatpush.bf16.msra.mxu2 %v5820_v11  ;;  %vm3561_vm11 = vweird.f32 %v9046_v16  ;;  %v4368_v11 = vmul.f32 0.7978846, %v4304_v23  ;;  %v9130_v23 = vmul.f32 0.5, %v8985_v17  ;;  %v5794_v12 = vld [vmem:[%s9987_s8 + $0x20] sm:$0xff] }
 0x856   : > { %6330 = vrsqrt.f32 %v9050_v55  ;;  %vm3562_vm13 = vmor %vm3560_vm12, %vm3561_vm11  ;;  %v4118_v40 = vmul.f32 0.044715, %v9112_v41  ;;  %v3614_v19 = vmul.f32 %v8939_v36, %v3596_v37  ;;  %v4369_v61 = vmul.f32 0.7978846, %v4305_v44 }
 0x857   : > { %v3556_v32 = vmul.f32 %v9046_v16, %v3555_v58  ;;  %6332 = vtanh.f32 %v4363_v29  ;;  %v3911_v29 = vpop.f32.mrf.mxu0  ;;  %v5811_v58 = vld [vmem:[%s9987_s8 + $0xa8] sm:$0xff]  ;;  %4913 = vmatpush.bf16.msrb.mxu3 %v5794_v12  ;;  %v5809_v12 = vld [vmem:[%s9987_s8 + $0x98] sm:$0xff]  ;;  %vm3570_vm15 = vweird.f32 %v9050_v55 }
 0x858   : > { %6334 = vtanh.f32 %v4364_v49  ;;  %v4365_v49 = vmul.f32 0.7978846, %v4301_v47  ;;  %v9123_v47 = vadd.f32 %v9019_v1, %v8968_v13  ;;  %5010 = vmatpush.bf16.msra.mxu1 %v5811_v58  ;;  %v9137_v1 = vadd.f32 %v3958_v10, %v8966_v50 }
 0x859   : > { %v3557_v39 = vmul.f32 0.5, %v3556_v32  ;;  %6336 = vtanh.f32 %v4362_v26  ;;  %v9118_v26 = vadd.f32 %v3911_v29, %v8963_v60  ;;  %5059 = vmatpush.bf16.msra.mxu2 %v5819_v7  ;;  %v5818_v29 = vld [vmem:[%s9987_s8 + $0xe0] sm:$0xff]  ;;  %v3960_v7 = vpop.f32.mrf.mxu1  ;;  %v3632_v15 = vadd.f32 %v8944_v9, %v3614_v19  ;;  %v5792_v19 = vld [vmem:[%s9987_s8 + $0x10] sm:$0xff] }
 0x85a   : > { %6338 = vtanh.f32 %v4367_v62 }
 0x85b   : > { %v3558_v32 = vsub.f32 1.5, %v3557_v39  ;;  %6340 = vtanh.f32 %v4365_v49  ;;  %v9157_v39 = vmul.f32 0.5, %v9000_v45  ;;  %v4119_v58 = vmul.f32 0.044715, %v9118_v26 }
 0x85c   : > { %v9115_v63 = vpop.eup %6330  ;;  %6342 = vtanh.f32 %v4366_v4  ;;  %v4114_v4 = vmul.f32 0.044715, %v9123_v47  ;;  %5011 = vmatpush.bf16.msra.mxu1 %v5810_v52  ;;  %v5817_v52 = vld [vmem:[%s9987_s8 + $0xd8] sm:$0xff] }
 0x85d   : > { %v3559_v5 = vmul.f32 %v9046_v16, %v3558_v32  ;;  %v3565_v18 = vmul.f32 %v9115_v63, %v9050_v55  ;;  %v6333_v62 = vpop.eup %6332  ;;  %6344 = vtanh.f32 %v4368_v11  ;;  %5060 = vmatpush.bf16.msra.mxu2 %v5818_v29  ;;  %vm3571_vm14 = vweird.f32 %v9115_v63 }
 0x85e   : > { %v6335_v17 = vpop.eup %6334  ;;  %v4491_v43 = vadd.f32 1.0, %v6333_v62  ;;  %v4178_v6 = vmul.f32 %v4114_v4, %v9123_v47  ;;  %v9205_v4 = vadd.f32 %v9109_v48, %v8981_v21  ;;  %vm9303_vm0 = vmor %vm3570_vm15, %vm3571_vm14 }
 0x85f   : > { %v3563_v10 = vsel %vm3562_vm13, %v9046_v16, %v3559_v5  ;;  %v6337_v56 = vpop.eup %6336  ;;  %v9163_v16 = vmul.f32 0.5, %v8995_v31  ;;  %v3566_v32 = vmul.f32 %v9115_v63, %v3565_v18  ;;  %v5793_v31 = vld [vmem:[%s9987_s8 + $0x18] sm:$0xff]  ;;  %v4492_v8 = vadd.f32 1.0, %v6335_v17 }
 0x860   : > { %v3597_v49 = vmul.f32 %v3563_v10, %v8914_v3  ;;  %v3391_v5 = vpop.xlane.xlu2 %3390  ;;  %v6339_v45 = vpop.eup %6338  ;;  %v4115_v3 = vmul.f32 0.044715, %v9134_v38  ;;  %v5801_v18 = vld [vmem:[%s9987_s8 + $0x58] sm:$0xff]  ;;  %v4116_v10 = vmul.f32 0.044715, %v9137_v1  ;;  %4914 = vmatpush.bf16.msrb.mxu3 %v5793_v31  ;;  %5012 = vmatpush.bf16.msra.mxu1 %v5809_v12 }
 0x861   : > { %v3407_v37 = vmul.f32 %v3391_v5, %v10069_v33  ;;  %v4182_v33 = vmul.f32 %v4118_v40, %v9112_v41  ;;  %v6341_v29 = vpop.eup %6340  ;;  %v9188_v5 = vpop.f32.mrf.mxu2  ;;  %4963 = vmatpush.bf16.msra.mxu0 %v5801_v18  ;;  %v4490_v40 = vadd.f32 1.0, %v6337_v56  ;;  %v3567_v14 = vmul.f32 0.5, %v3566_v32  ;;  %5061 = vmatpush.bf16.msra.mxu2 %v5817_v52  ;;  %v5816_v32 = vld [vmem:[%s9987_s8 + $0xd0] sm:$0xff] }
 0x862   : > { %v3615_v11 = vmul.f32 %v8939_v36, %v3597_v49  ;;  %v4183_v49 = vmul.f32 %v4119_v58, %v9118_v26  ;;  %v6343_v44 = vpop.eup %6342  ;;  %v4179_v58 = vmul.f32 %v4115_v3, %v9134_v38  ;;  %v4495_v17 = vadd.f32 1.0, %v6339_v45  ;;  %v9218_v12 = vpop.f32.mrf.mxu0 }
 0x863   : > { %v9190_v59 = vadd.f32 1e-06, %v3407_v37  ;;  %v6345_v56 = vpop.eup %6344  ;;  %v4493_v31 = vadd.f32 1.0, %v6341_v29  ;;  %v4246_v3 = vmul.f32 %v4182_v33, %v9112_v41  ;;  %v4180_v18 = vmul.f32 %v4116_v10, %v9137_v1 }
 0x864   : > { %v3633_v62 = vadd.f32 %v8944_v9, %v3615_v11  ;;  %v5800_v11 = vld [vmem:[%s9987_s8 + $0x50] sm:$0xff]  ;;  %v9216_v45 = vadd.f32 %v3960_v7, %v8966_v50  ;;  %v4494_v48 = vadd.f32 1.0, %v6343_v44  ;;  %v3568_v52 = vsub.f32 1.5, %v3567_v14  ;;  %v3963_v7 = vpop.f32.mrf.mxu1  ;;  %4915 = vmatpush.bf16.msrb.mxu3 %v5792_v19  ;;  %v5799_v14 = vld [vmem:[%s9987_s8 + $0x48] sm:$0xff] }
 0x865   : > { %6346 = vrsqrt.f32 %v9190_v59  ;;  %v9222_v29 = vmul.f32 %v4491_v43, %v9066_v53  ;;  %v9225_v33 = vmul.f32 %v4492_v8, %v9078_v27  ;;  %v4242_v10 = vmul.f32 %v4178_v6, %v9123_v47  ;;  %4964 = vmatpush.bf16.msra.mxu0 %v5800_v11  ;;  %5062 = vmatpush.bf16.msra.mxu2 %v5816_v32  ;;  %v5807_v44 = vld [vmem:[%s9987_s8 + $0x88] sm:$0xff] }
 0x866   : > { %v3642_v37 = vpack.c.bf16 %v3633_v62, %v3632_v15  ;;  %6348 = vtanh.f32 %v4369_v61  ;;  %v5808_v15 = vld [vmem:[%s9987_s8 + $0x90] sm:$0xff]  ;;  %v4247_v61 = vmul.f32 %v4183_v49, %v9118_v26  ;;  %v9228_v62 = vpop.f32.mrf.mxu3  ;;  %v5791_v49 = vld [vmem:[%s9987_s8 + $0x8] sm:$0xff]  ;;  %v9237_v53 = vmul.f32 %v4495_v17, %v9130_v23 }
 0x867   : > { %v4496_v8 = vadd.f32 1.0, %v6345_v56  ;;  %v9240_v27 = vmul.f32 0.5, %v9134_v38  ;;  %v4243_v6 = vmul.f32 %v4179_v58, %v9134_v38  ;;  %v4117_v43 = vmul.f32 0.044715, %v9205_v4  ;;  %5013 = vmatpush.bf16.msra.mxu1 %v5808_v15 }
 0x868   : > { %3884 = vmatmul.bf16.gmra.mxu3 %v3642_v37  ;;  %3933 = vmatmul.bf16.gmra.mxu0 %v3642_v37  ;;  %v9251_v23 = vmul.f32 %v4490_v40, %v9094_v46  ;;  %v9254_v19 = vmul.f32 %v4493_v31, %v9106_v0  ;;  %v4310_v58 = vadd.f32 %v4246_v3, %v9112_v41  ;;  %v4120_v17 = vmul.f32 0.044715, %v9216_v45  ;;  %v5798_v3 = vld [vmem:[%s9987_s8 + $0x40] sm:$0xff] }
 0x869   : > { %3982 = vmatmul.bf16.gmra.mxu1 %v3642_v37  ;;  %4031 = vmatmul.bf16.gmra.mxu2 %v3642_v37  ;;  %v5815_v37 = vld [vmem:[%s9987_s8 + $0xc8] sm:$0xff]  ;;  %v9261_v56 = vmul.f32 %v4494_v48, %v9163_v16  ;;  %v4311_v15 = vadd.f32 %v4247_v61, %v9118_v26  ;;  %v4244_v32 = vmul.f32 %v4180_v18, %v9137_v1  ;;  %v4012_v31 = vpop.f32.mrf.mxu2  ;;  %v5790_v16 = vld [vmem:[%s9987_s8] sm:$0xff]  ;;  %vm3580_vm2 = vweird.f32 %v9190_v59 }
 0x86a   : > { %v3569_v46 = vmul.f32 %v9115_v63, %v3568_v52  ;;  %v4306_v40 = vadd.f32 %v4242_v10, %v9123_v47  ;;  %4916 = vmatpush.bf16.msrb.mxu3 %v5791_v49  ;;  %4965 = vmatpush.bf16.msra.mxu0 %v5799_v14  ;;  %v9279_v48 = vmul.f32 %v4496_v8, %v9157_v39  ;;  %v9283_v52 = vmul.f32 0.5, %v9137_v1  ;;  %v5806_v14 = vld [vmem:[%s9987_s8 + $0x80] sm:$0xff]  ;;  %v3916_v18 = vpop.f32.mrf.mxu0 }
 0x86b   : > { %v9257_v11 = vpop.eup %6346  ;;  %v4307_v61 = vadd.f32 %v4243_v6, %v9134_v38  ;;  %v9286_v10 = vmul.f32 %v4117_v43, %v9205_v4  ;;  %5014 = vmatpush.bf16.msra.mxu1 %v5807_v44  ;;  %5063 = vmatpush.bf16.msra.mxu2 %v5815_v37  ;;  %v5814_v38 = vld [vmem:[%s9987_s8 + $0xc0] sm:$0xff]  ;;  %v4374_v39 = vmul.f32 0.7978846, %v4310_v58  ;;  %v4184_v8 = vmul.f32 %v4120_v17, %v9216_v45 }
 0x86c   : > { %v6349_v30 = vpop.eup %6348  ;;  %v3575_v0 = vmul.f32 %v9257_v11, %v9190_v59  ;;  %v9299_v6 = vadd.f32 %v9188_v5, %v8981_v21  ;;  %v4375_v44 = vmul.f32 0.7978846, %v4311_v15  ;;  %v3573_v37 = vsel %vm9303_vm0, %v9115_v63, %v3569_v46 }
 0x86d   : > { %v4497_v43 = vadd.f32 1.0, %v6349_v30  ;;  %v4370_v17 = vmul.f32 0.7978846, %v4306_v40  ;;  %v9314_v5 = vadd.f32 %v9218_v12, %v8963_v60  ;;  %v9319_v15 = vmul.f32 0.5, %v9118_v26  ;;  %v3965_v40 = vpop.f32.mrf.mxu1 }
 0x86e   : > { %v3576_v49 = vmul.f32 %v9257_v11, %v3575_v0  ;;  %4917 = vmatpush.bf16.msrb.mxu3 %v5790_v16  ;;  %4966 = vmatpush.bf16.msra.mxu0 %v5798_v3  ;;  %v4371_v55 = vmul.f32 0.7978846, %v4307_v61  ;;  %v9322_v63 = vadd.f32 %v3963_v7, %v8966_v50  ;;  %vm3581_vm1 = vweird.f32 %v9257_v11  ;;  %v3867_v16 = vpop.f32.mrf.mxu3 }
 0x86f   : > { %5015 = vmatpush.bf16.msra.mxu1 %v5806_v14  ;;  %5064 = vmatpush.bf16.msra.mxu2 %v5814_v38  ;;  %6350 = vtanh.f32 %v4374_v39  ;;  %v9327_v12 = vadd.f32 %v9228_v62, %v8968_v13  ;;  %v3598_v3 = vmul.f32 %v3573_v37, %v8921_v57  ;;  %v9331_v26 = vmul.f32 %v4497_v43, %v9168_v24  ;;  %vm3582_vm3 = vmor %vm3580_vm2, %vm3581_vm1 }
 0x870   : > { %v3577_v0 = vmul.f32 0.5, %v3576_v49  ;;  %6352 = vtanh.f32 %v4375_v44  ;;  %v4248_v61 = vmul.f32 %v4184_v8, %v9216_v45  ;;  %v4121_v49 = vmul.f32 0.044715, %v9299_v6 }
 0x871   : > { %6354 = vtanh.f32 %v4370_v17  ;;  %v4123_v62 = vmul.f32 0.044715, %v9314_v5  ;;  %v4308_v57 = vadd.f32 %v4244_v32, %v9137_v1  ;;  %v4124_v24 = vmul.f32 0.044715, %v9322_v63  ;;  %v4014_v8 = vpop.f32.mrf.mxu2 }
 0x872   : > { %v3578_v46 = vsub.f32 1.5, %v3577_v0  ;;  %6356 = vtanh.f32 %v4371_v55  ;;  %v9343_v14 = vadd.f32 %v4012_v31, %v8981_v21  ;;  %v9346_v59 = vadd.f32 %v3867_v16, %v8968_v13  ;;  %v3919_v55 = vpop.f32.mrf.mxu0 }
 0x873   : > { %v9350_v39 = vadd.f32 %v3916_v18, %v8963_v60  ;;  %v3616_v44 = vmul.f32 %v8939_v36, %v3598_v3  ;;  %v4054_v1 = vmul.f32 0.5, %v9112_v41  ;;  %v4122_v37 = vmul.f32 0.044715, %v9327_v12 }
 0x874   : > { %v3579_v7 = vmul.f32 %v9257_v11, %v3578_v46  ;;  %v9357_v31 = vadd.f32 %v3965_v40, %v8966_v50  ;;  %v4185_v17 = vmul.f32 %v4121_v49, %v9299_v6  ;;  %v4372_v41 = vmul.f32 0.7978846, %v4308_v57 }
 0x875   : > { %v6351_v32 = vpop.eup %6350  ;;  %v9366_v3 = vmul.f32 %v4124_v24, %v9322_v63  ;;  %v4125_v40 = vmul.f32 0.044715, %v9343_v14  ;;  %v4127_v49 = vmul.f32 0.044715, %v9350_v39  ;;  %v3968_v0 = vpop.f32.mrf.mxu1 }
 0x876   : > { %v3583_v38 = vsel %vm3582_vm3, %v9257_v11, %v3579_v7  ;;  %v4312_v11 = vadd.f32 %v4248_v61, %v9216_v45  ;;  %v6353_v18 = vpop.eup %6352  ;;  %v4126_v7 = vmul.f32 0.044715, %v9346_v59  ;;  %v4502_v57 = vadd.f32 1.0, %v6351_v32 }
 0x877   : > { %v3599_v43 = vmul.f32 %v3583_v38, %v8933_v22  ;;  %v4187_v22 = vmul.f32 %v4123_v62, %v9314_v5  ;;  %v6355_v16 = vpop.eup %6354  ;;  %v9371_v38 = vadd.f32 %v4014_v8, %v8981_v21  ;;  %v3634_v62 = vadd.f32 %v8944_v9, %v3616_v44 }
 0x878   : > { %v6357_v61 = vpop.eup %6356  ;;  %v4128_v24 = vmul.f32 0.044715, %v9357_v31  ;;  %v4503_v30 = vadd.f32 1.0, %v6353_v18  ;;  %v4376_v58 = vmul.f32 0.7978846, %v4312_v11  ;;  %v4498_v20 = vadd.f32 1.0, %v6355_v16 }
 0x879   : > { %v3617_v46 = vmul.f32 %v8939_v36, %v3599_v43  ;;  %v4186_v43 = vmul.f32 %v4122_v37, %v9327_v12  ;;  %6358 = vtanh.f32 %v4372_v41  ;;  %v4245_v8 = vmul.f32 %v9286_v10, %v9205_v4 }
 0x87a   : > { %v4189_v42 = vmul.f32 %v4125_v40, %v9343_v14  ;;  %v4190_v25 = vmul.f32 %v4126_v7, %v9346_v59  ;;  %v4129_v44 = vmul.f32 0.044715, %v9371_v38  ;;  %v4191_v32 = vmul.f32 %v4127_v49, %v9350_v39  ;;  %v9396_v7 = vpop.f32.mrf.mxu2 }
 0x87b   : > { %v3635_v36 = vadd.f32 %v8944_v9, %v3617_v46  ;;  %v4499_v9 = vadd.f32 1.0, %v6357_v61  ;;  %v4050_v37 = vmul.f32 0.5, %v9123_v47  ;;  %v9385_v11 = vmul.f32 %v4502_v57, %v4054_v1  ;;  %v3870_v46 = vpop.f32.mrf.mxu3  ;;  %v3921_v61 = vpop.f32.mrf.mxu0 }
 0x87c   : > { %v4249_v18 = vmul.f32 %v4185_v17, %v9299_v6  ;;  %v9389_v10 = vmul.f32 %v4503_v30, %v9319_v15  ;;  %v9392_v41 = vmul.f32 0.5, %v9216_v45  ;;  %6360 = vtanh.f32 %v4376_v58 }
 0x87d   : > { %v3643_v51 = vpack.c.bf16 %v3635_v36, %v3634_v62  ;;  %v4250_v16 = vmul.f32 %v4186_v43, %v9327_v12  ;;  %v4192_v40 = vmul.f32 %v4128_v24, %v9357_v31  ;;  %v9398_v47 = vmul.f32 %v4498_v20, %v4050_v37  ;;  %v3970_v24 = vpop.f32.mrf.mxu1 }
 0x87e   : > { %v9401_v1 = vmul.f32 0.5, %v9205_v4  ;;  %v4193_v30 = vmul.f32 %v4129_v44, %v9371_v38  ;;  %v9406_v15 = vmul.f32 %v4499_v9, %v9240_v27  ;;  %v9409_v45 = vmul.f32 0.5, %v9299_v6 }
 0x87f   : > { %3889 = vmatmul.bf16.gmra.mxu3 %v3643_v51  ;;  %3938 = vmatmul.bf16.gmra.mxu0 %v3643_v51  ;;  %v4254_v58 = vmul.f32 %v4190_v25, %v9346_v59  ;;  %v6359_v17 = vpop.eup %6358  ;;  %v4313_v49 = vadd.f32 %v4249_v18, %v9299_v6  ;;  %v9416_v62 = vmul.f32 0.5, %v9327_v12  ;;  %v9422_v36 = vmul.f32 0.5, %v9346_v59 }
 0x880   : > { %3987 = vmatmul.bf16.gmra.mxu1 %v3643_v51  ;;  %4036 = vmatmul.bf16.gmra.mxu2 %v3643_v51  ;;  %v4309_v51 = vadd.f32 %v4245_v8, %v9205_v4  ;;  %v4251_v4 = vmul.f32 %v4187_v22, %v9314_v5  ;;  %v4314_v25 = vadd.f32 %v4250_v16, %v9327_v12  ;;  %v9430_v8 = vmul.f32 0.5, %v9314_v5 }
 0x881   : > { %v4255_v57 = vmul.f32 %v4191_v32, %v9350_v39  ;;  %v9427_v43 = vadd.f32 %v3919_v55, %v8963_v60  ;;  %v4256_v22 = vmul.f32 %v4192_v40, %v9357_v31  ;;  %v9434_v9 = vadd.f32 %v3921_v61, %v8963_v60 }
 0x882   : > { %v4373_v6 = vmul.f32 0.7978846, %v4309_v51  ;;  %v6361_v44 = vpop.eup %6360  ;;  %v4500_v37 = vadd.f32 1.0, %v6359_v17  ;;  %v4318_v18 = vadd.f32 %v4254_v58, %v9346_v59  ;;  %v4257_v12 = vmul.f32 %v4193_v30, %v9371_v38 }
 0x883   : > { %v9439_v32 = vadd.f32 %v3968_v0, %v8966_v50  ;;  %v4377_v55 = vmul.f32 0.7978846, %v4313_v49  ;;  %v4315_v16 = vadd.f32 %v4251_v4, %v9314_v5  ;;  %v4252_v51 = vmul.f32 %v9366_v3, %v9322_v63  ;;  %v3872_v49 = vpop.f32.mrf.mxu3 }
 0x884   : > { %v9445_v40 = vadd.f32 %v3970_v24, %v8966_v50  ;;  %v4378_v27 = vmul.f32 0.7978846, %v4314_v25  ;;  %v4319_v61 = vadd.f32 %v4255_v57, %v9350_v39  ;;  %v4253_v17 = vmul.f32 %v4189_v42, %v9343_v14  ;;  %v4019_v57 = vpop.f32.mrf.mxu2 }
 0x885   : > { %v4131_v59 = vmul.f32 0.044715, %v9427_v43  ;;  %v9451_v30 = vadd.f32 %v3870_v46, %v8968_v13  ;;  %v4504_v0 = vadd.f32 1.0, %v6361_v44  ;;  %v4320_v58 = vadd.f32 %v4256_v22, %v9357_v31 }
 0x886   : > { %v4135_v5 = vmul.f32 0.044715, %v9434_v9  ;;  %6362 = vtanh.f32 %v4373_v6  ;;  %v4382_v3 = vmul.f32 0.7978846, %v4318_v18  ;;  %v4321_v4 = vadd.f32 %v4257_v12, %v9371_v38 }
 0x887   : > { %v4132_v25 = vmul.f32 0.044715, %v9439_v32  ;;  %6364 = vtanh.f32 %v4377_v55  ;;  %v4379_v42 = vmul.f32 0.7978846, %v4315_v16  ;;  %v4316_v24 = vadd.f32 %v4252_v51, %v9322_v63 }
 0x888   : > { %v4136_v46 = vmul.f32 0.044715, %v9445_v40  ;;  %6366 = vtanh.f32 %v4378_v27  ;;  %v4383_v44 = vmul.f32 0.7978846, %v4319_v61  ;;  %v4317_v22 = vadd.f32 %v4253_v17, %v9343_v14 }
 0x889   : > { %v4195_v20 = vmul.f32 %v4131_v59, %v9427_v43  ;;  %v4130_v6 = vmul.f32 0.044715, %v9451_v30  ;;  %v9463_v18 = vadd.f32 %v3872_v49, %v8968_v13  ;;  %v4384_v12 = vmul.f32 0.7978846, %v4320_v58 }
 0x88a   : > { %v4199_v34 = vmul.f32 %v4135_v5, %v9434_v9  ;;  %v9467_v55 = vadd.f32 %v4019_v57, %v8981_v21  ;;  %6368 = vtanh.f32 %v4382_v3  ;;  %v4385_v16 = vmul.f32 0.7978846, %v4321_v4 }
 0x88b   : > { %v4196_v27 = vmul.f32 %v4132_v25, %v9439_v32  ;;  %v9472_v51 = vadd.f32 %v9396_v7, %v8981_v21  ;;  %v10086_v61 = vpack.c.bf16 %v9261_v56, %v9251_v23  ;;  %v10087_v17 = vpack.c.bf16 %v9237_v53, %v9222_v29 }
 0x88c   : > { %6370 = vtanh.f32 %v4379_v42  ;;  %v4380_v59 = vmul.f32 0.7978846, %v4316_v24  ;;  %v6363_v58 = vpop.eup %6362  ;;  %v4200_v5 = vmul.f32 %v4136_v46, %v9445_v40  ;;  %v10088_v49 = vpack.c.bf16 %v9279_v48, %v9225_v33  ;;  %v9505_v24 = vpop.f32.mrf.mxu1 }
 0x88d   : > { %v10089_v7 = vpack.c.bf16 %v9331_v26, %v9254_v19  ;;  %v9488_v23 = vmul.f32 0.5, %v9350_v39  ;;  %6372 = vtanh.f32 %v4383_v44  ;;  %v4381_v56 = vmul.f32 0.7978846, %v4317_v22  ;;  %v6365_v29 = vpop.eup %6364  ;;  %v9499_v39 = vpop.f32.mrf.mxu0 }
 0x88e   : > { %v4194_v53 = vmul.f32 %v4130_v6, %v9451_v30  ;;  %v4134_v3 = vmul.f32 0.044715, %v9463_v18  ;;  %6374 = vtanh.f32 %v4384_v12  ;;  %v4259_v4 = vmul.f32 %v4195_v20, %v9427_v43  ;;  %v6367_v25 = vpop.eup %6366  ;;  %v9509_v22 = vpop.f32.mrf.mxu3 }
 0x88f   : > { %4918 = vmatmul.bf16.vlgmr.msrb.gmra.mxu3 %v10086_v61  ;;  %4967 = vmatmul.bf16.vlgmr.msra.gmra.mxu0 %v10087_v17  ;;  %v4137_v33 = vmul.f32 0.044715, %v9467_v55  ;;  %v9495_v48 = vmul.f32 %v4500_v37, %v9283_v52  ;;  %6376 = vtanh.f32 %v4385_v16  ;;  %v4263_v19 = vmul.f32 %v4199_v34, %v9434_v9 }
 0x890   : > { %5016 = vmatmul.bf16.vlgmr.msra.gmra.mxu1 %v10088_v49  ;;  %5065 = vmatmul.bf16.vlgmr.msra.gmra.mxu2 %v10089_v7  ;;  %v4133_v26 = vmul.f32 0.044715, %v9472_v51  ;;  %v9502_v57 = vmul.f32 %v4504_v0, %v9392_v41  ;;  %6378 = vtanh.f32 %v4380_v59  ;;  %v4260_v42 = vmul.f32 %v4196_v27, %v9439_v32  ;;  %v6369_v20 = vpop.eup %6368  ;;  %v9515_v27 = vpop.f32.mrf.mxu2 }
 0x891   : > { %v4501_v46 = vadd.f32 1.0, %v6363_v58  ;;  %v4505_v44 = vadd.f32 1.0, %v6365_v29  ;;  %6380 = vtanh.f32 %v4381_v56  ;;  %v4264_v52 = vmul.f32 %v4200_v5, %v9445_v40 }
 0x892   : > { %v6371_v37 = vpop.eup %6370  ;;  %v4198_v34 = vmul.f32 %v4134_v3, %v9463_v18  ;;  %v4060_v6 = vmul.f32 0.5, %v9322_v63  ;;  %v4258_v41 = vmul.f32 %v4194_v53, %v9451_v30  ;;  %v4323_v0 = vadd.f32 %v4259_v4, %v9427_v43 }
 0x893   : > { %v6373_v12 = vpop.eup %6372  ;;  %v4201_v16 = vmul.f32 %v4137_v33, %v9467_v55  ;;  %v4506_v61 = vadd.f32 1.0, %v6367_v25  ;;  %v4064_v17 = vmul.f32 0.5, %v9357_v31  ;;  %v4327_v59 = vadd.f32 %v4263_v19, %v9434_v9 }
 0x894   : > { %v6375_v58 = vpop.eup %6374  ;;  %v4197_v5 = vmul.f32 %v4133_v26, %v9472_v51  ;;  %v4624_v63 = vpack.c.bf16 %v9502_v57, %v9495_v48  ;;  %v4061_v49 = vmul.f32 0.5, %v9343_v14  ;;  %v4324_v7 = vadd.f32 %v4260_v42, %v9439_v32 }
 0x895   : > { %v6377_v56 = vpop.eup %6376  ;;  %v4565_v29 = vmul.f32 %v4501_v46, %v9401_v1  ;;  %v4569_v53 = vmul.f32 %v4505_v44, %v9409_v45  ;;  %v4065_v3 = vmul.f32 0.5, %v9371_v38  ;;  %v4328_v31 = vadd.f32 %v4264_v52, %v9445_v40  ;;  %v3926_v54 = vpop.f32.mrf.mxu0 }
 0x896   : > { %v6379_v4 = vpop.eup %6378  ;;  %v4510_v25 = vadd.f32 1.0, %v6369_v20  ;;  %v4262_v33 = vmul.f32 %v4198_v34, %v9463_v18  ;;  %v4322_v19 = vadd.f32 %v4258_v41, %v9451_v30  ;;  %v4387_v48 = vmul.f32 0.7978846, %v4323_v0 }
 0x897   : > { %v6381_v26 = vpop.eup %6380  ;;  %v9531_v14 = vmul.f32 %v4506_v61, %v9416_v62  ;;  %v4511_v57 = vadd.f32 1.0, %v6373_v12  ;;  %v4391_v42 = vmul.f32 0.7978846, %v4327_v59  ;;  %v4265_v1 = vmul.f32 %v4201_v16, %v9467_v55  ;;  %v3975_v62 = vpop.f32.mrf.mxu1 }
 0x898   : > { %v4512_v45 = vadd.f32 1.0, %v6375_v58  ;;  %v4513_v46 = vadd.f32 1.0, %v6377_v56  ;;  %v4388_v38 = vmul.f32 0.7978846, %v4324_v7  ;;  %v4261_v44 = vmul.f32 %v4197_v5, %v9472_v51  ;;  %v3877_v59 = vpop.f32.mrf.mxu3  ;;  %v4024_v56 = vpop.f32.mrf.mxu2 }
 0x899   : > { %v4625_v52 = vpack.c.bf16 %v4569_v53, %v4565_v29  ;;  %v4507_v20 = vadd.f32 1.0, %v6371_v37  ;;  %v4508_v28 = vadd.f32 1.0, %v6379_v4  ;;  %v4392_v34 = vmul.f32 0.7978846, %v4328_v31 }
 0x89a   : > { %v4509_v41 = vadd.f32 1.0, %v6381_v26  ;;  %v4326_v0 = vadd.f32 %v4262_v33, %v9463_v18  ;;  %v4386_v2 = vmul.f32 0.7978846, %v4322_v19  ;;  %6382 = vtanh.f32 %v4387_v48 }
 0x89b   : > { %v9537_v12 = vmul.f32 %v4510_v25, %v9422_v36  ;;  %v9540_v16 = vmul.f32 %v4511_v57, %v9488_v23  ;;  %6384 = vtanh.f32 %v4391_v42  ;;  %v4329_v61 = vadd.f32 %v4265_v1, %v9467_v55 }
 0x89c   : > { %v10090_v37 = vpack.c.bf16 %v9385_v11, %v9398_v47  ;;  %v10091_v58 = vpack.c.bf16 %v9389_v10, %v9406_v15  ;;  %v9549_v5 = vmul.f32 %v4512_v45, %v4064_v17  ;;  %v9551_v7 = vmul.f32 %v4513_v46, %v4065_v3 }
 0x89d   : > { %6386 = vtanh.f32 %v4388_v38  ;;  %v4325_v36 = vadd.f32 %v4261_v44, %v9472_v51  ;;  %v9556_v23 = vadd.f32 %v9499_v39, %v8963_v60  ;;  %v9559_v11 = vmul.f32 %v4507_v20, %v9430_v8  ;;  %v3929_v48 = vpop.f32.mrf.mxu0 }
 0x89e   : > { %v9561_v47 = vmul.f32 %v4508_v28, %v4060_v6  ;;  %6388 = vtanh.f32 %v4392_v34  ;;  %v9565_v10 = vadd.f32 %v9505_v24, %v8966_v50  ;;  %v9567_v15 = vmul.f32 %v4509_v41, %v4061_v49 }
 0x89f   : > { %4923 = vmatmul.bf16.gmra.mxu3 %v10090_v37  ;;  %4972 = vmatmul.bf16.gmra.mxu0 %v10091_v58  ;;  %v4390_v17 = vmul.f32 0.7978846, %v4326_v0  ;;  %6390 = vtanh.f32 %v4386_v2  ;;  %v9570_v39 = vadd.f32 %v3926_v54, %v8963_v60  ;;  %v4627_v8 = vpack.c.bf16 %v9540_v16, %v9559_v11 }
 0x8a0   : > { %5021 = vmatmul.bf16.gmra.mxu1 %v4624_v63  ;;  %5070 = vmatmul.bf16.gmra.mxu2 %v4625_v52  ;;  %v4626_v63 = vpack.c.bf16 %v9537_v12, %v9531_v14  ;;  %v4393_v28 = vmul.f32 0.7978846, %v4329_v61  ;;  %v6383_v6 = vpop.eup %6382  ;;  %v9577_v29 = vadd.f32 %v3975_v62, %v8966_v50  ;;  %v4628_v24 = vpack.c.bf16 %v9549_v5, %v9561_v47 }
 0x8a1   : > { %v4629_v2 = vpack.c.bf16 %v9551_v7, %v9567_v15  ;;  %v4389_v49 = vmul.f32 0.7978846, %v4325_v36  ;;  %v6385_v54 = vpop.eup %6384  ;;  %v4139_v53 = vmul.f32 0.044715, %v9556_v23  ;;  %v9585_v3 = vadd.f32 %v3877_v59, %v8968_v13 }
 0x8a2   : > { %v4067_v31 = vmul.f32 0.5, %v9427_v43  ;;  %v4068_v4 = vmul.f32 0.5, %v9439_v32  ;;  %v4140_v33 = vmul.f32 0.044715, %v9565_v10  ;;  %v9591_v19 = vadd.f32 %v4024_v56, %v8981_v21  ;;  %v3978_v43 = vpop.f32.mrf.mxu1 }
 0x8a3   : > { %v6387_v25 = vpop.eup %6386  ;;  %v4066_v26 = vmul.f32 0.5, %v9451_v30  ;;  %6392 = vtanh.f32 %v4390_v17  ;;  %v9596_v42 = vadd.f32 %v9509_v22, %v8968_v13  ;;  %v4143_v1 = vmul.f32 0.044715, %v9570_v39  ;;  %v9605_v30 = vpop.f32.mrf.mxu3 }
 0x8a4   : > { %v6389_v57 = vpop.eup %6388  ;;  %v4071_v32 = vmul.f32 0.5, %v9434_v9  ;;  %6394 = vtanh.f32 %v4393_v28  ;;  %v9602_v46 = vadd.f32 %v9515_v27, %v8981_v21  ;;  %v4144_v38 = vmul.f32 0.044715, %v9577_v29  ;;  %v9609_v20 = vpop.f32.mrf.mxu2 }
 0x8a5   : > { %v6391_v45 = vpop.eup %6390  ;;  %v4519_v44 = vadd.f32 1.0, %v6385_v54  ;;  %6396 = vtanh.f32 %v4389_v49  ;;  %v4203_v22 = vmul.f32 %v4139_v53, %v9556_v23  ;;  %v4142_v52 = vmul.f32 0.044715, %v9585_v3 }
 0x8a6   : > { %v4515_v34 = vadd.f32 1.0, %v6383_v6  ;;  %v4072_v9 = vmul.f32 0.5, %v9445_v40  ;;  %v4204_v41 = vmul.f32 %v4140_v33, %v9565_v10  ;;  %v4145_v27 = vmul.f32 0.044715, %v9591_v19 }
 0x8a7   : > { %v4516_v0 = vadd.f32 1.0, %v6387_v25  ;;  %v4520_v62 = vadd.f32 1.0, %v6389_v57  ;;  %v4138_v61 = vmul.f32 0.044715, %v9596_v42  ;;  %v4207_v59 = vmul.f32 %v4143_v1, %v9570_v39 }
 0x8a8   : > { %v4514_v37 = vadd.f32 1.0, %v6391_v45  ;;  %v9617_v58 = vmul.f32 0.5, %v9472_v51  ;;  %v4141_v56 = vmul.f32 0.044715, %v9602_v46  ;;  %v4208_v17 = vmul.f32 %v4144_v38, %v9577_v29 }
 0x8a9   : > { %v6393_v36 = vpop.eup %6392  ;;  %v4070_v40 = vmul.f32 0.5, %v9463_v18  ;;  %v9622_v28 = vmul.f32 %v4519_v44, %v4071_v32  ;;  %v4206_v49 = vmul.f32 %v4142_v52, %v9585_v3  ;;  %v9625_v54 = vmul.f32 %v4515_v34, %v4067_v31  ;;  %v3931_v44 = vpop.f32.mrf.mxu0 }
 0x8aa   : > { %v6395_v6 = vpop.eup %6394  ;;  %v4073_v53 = vmul.f32 0.5, %v9467_v55  ;;  %v4267_v25 = vmul.f32 %v4203_v22, %v9556_v23  ;;  %v4209_v33 = vmul.f32 %v4145_v27, %v9591_v19  ;;  %v9630_v57 = vmul.f32 %v4516_v0, %v4068_v4  ;;  %v3980_v34 = vpop.f32.mrf.mxu1 }
 0x8ab   : > { %v6397_v51 = vpop.eup %6396  ;;  %v9632_v1 = vmul.f32 %v4520_v62, %v4072_v9  ;;  %v4268_v18 = vmul.f32 %v4204_v41, %v9565_v10  ;;  %v4202_v32 = vmul.f32 %v4138_v61, %v9596_v42  ;;  %v4518_v45 = vadd.f32 1.0, %v6393_v36 }
 0x8ac   : > { %v9636_v38 = vmul.f32 %v4514_v37, %v4066_v26  ;;  %v4271_v31 = vmul.f32 %v4207_v59, %v9570_v39  ;;  %v4205_v55 = vmul.f32 %v4141_v56, %v9602_v46  ;;  %v4631_v4 = vpack.c.bf16 %v9622_v28, %v9625_v54  ;;  %v4029_v7 = vpop.f32.mrf.mxu2 }
 0x8ad   : > { %v4521_v22 = vadd.f32 1.0, %v6395_v6  ;;  %v4272_v26 = vmul.f32 %v4208_v17, %v9577_v29  ;;  %v9650_v52 = vadd.f32 %v3929_v48, %v8963_v60  ;;  %v4517_v14 = vadd.f32 1.0, %v6397_v51 }
 0x8ae   : > { %v4270_v12 = vmul.f32 %v4206_v49, %v9585_v3  ;;  %v4331_v16 = vadd.f32 %v4267_v25, %v9556_v23  ;;  %v9661_v11 = vadd.f32 %v3978_v43, %v8966_v50  ;;  %v4332_v48 = vadd.f32 %v4268_v18, %v9565_v10 }
 0x8af   : > { %4928 = vmatmul.bf16.gmra.mxu3 %v4626_v63  ;;  %4977 = vmatmul.bf16.gmra.mxu0 %v4627_v8  ;;  %v3882_v63 = vpop.f32.mrf.mxu3  ;;  %v4632_v8 = vpack.c.bf16 %v9632_v1, %v9630_v57  ;;  %v4273_v5 = vmul.f32 %v4209_v33, %v9591_v19  ;;  %v9668_v47 = vadd.f32 %v3931_v44, %v8963_v60  ;;  %v4147_v0 = vmul.f32 0.044715, %v9650_v52 }
 0x8b0   : > { %5026 = vmatmul.bf16.gmra.mxu1 %v4628_v24  ;;  %5075 = vmatmul.bf16.gmra.mxu2 %v4629_v2  ;;  %v4582_v15 = vmul.f32 %v4518_v45, %v4070_v40  ;;  %v4266_v24 = vmul.f32 %v4202_v32, %v9596_v42  ;;  %v4335_v2 = vadd.f32 %v4271_v31, %v9570_v39  ;;  %v4395_v59 = vmul.f32 0.7978846, %v4331_v16 }
 0x8b1   : > { %v9673_v43 = vadd.f32 %v3980_v34, %v8966_v50  ;;  %v4585_v9 = vmul.f32 %v4521_v22, %v4073_v53  ;;  %v4336_v41 = vadd.f32 %v4272_v26, %v9577_v29  ;;  %v4269_v27 = vmul.f32 %v4205_v55, %v9602_v46 }
 0x8b2   : > { %v9679_v62 = vadd.f32 %v3882_v63, %v8968_v13  ;;  %v4334_v61 = vadd.f32 %v4270_v12, %v9585_v3  ;;  %v4148_v37 = vmul.f32 0.044715, %v9661_v11  ;;  %v9684_v36 = vadd.f32 %v4029_v7, %v8981_v21 }
 0x8b3   : > { %v4396_v56 = vmul.f32 0.7978846, %v4332_v48  ;;  %v4337_v17 = vadd.f32 %v4273_v5, %v9591_v19  ;;  %v9689_v40 = vadd.f32 %v9605_v30, %v8968_v13  ;;  %v4151_v6 = vmul.f32 0.044715, %v9668_v47 }
 0x8b4   : > { %v4330_v49 = vadd.f32 %v4266_v24, %v9596_v42  ;;  %v4399_v53 = vmul.f32 0.7978846, %v4335_v2  ;;  %v9695_v25 = vadd.f32 %v9609_v20, %v8981_v21  ;;  %v4152_v51 = vmul.f32 0.044715, %v9673_v43 }
 0x8b5   : > { %v4400_v33 = vmul.f32 0.7978846, %v4336_v41  ;;  %v4333_v18 = vadd.f32 %v4269_v27, %v9602_v46  ;;  %v4211_v32 = vmul.f32 %v4147_v0, %v9650_v52  ;;  %v4150_v45 = vmul.f32 0.044715, %v9679_v62 }
 0x8b6   : > { %v4398_v30 = vmul.f32 0.7978846, %v4334_v61  ;;  %6398 = vtanh.f32 %v4395_v59  ;;  %v4212_v31 = vmul.f32 %v4148_v37, %v9661_v11  ;;  %v4153_v55 = vmul.f32 0.044715, %v9684_v36 }
 0x8b7   : > { %6400 = vtanh.f32 %v4396_v56  ;;  %v4401_v44 = vmul.f32 0.7978846, %v4337_v17  ;;  %v4146_v20 = vmul.f32 0.044715, %v9689_v40  ;;  %v4215_v22 = vmul.f32 %v4151_v6, %v9668_v47 }
 0x8b8   : > { %v4394_v26 = vmul.f32 0.7978846, %v4330_v49  ;;  %6402 = vtanh.f32 %v4399_v53  ;;  %v4149_v34 = vmul.f32 0.044715, %v9695_v25  ;;  %v4216_v12 = vmul.f32 %v4152_v51, %v9673_v43 }
 0x8b9   : > { %6404 = vtanh.f32 %v4400_v33  ;;  %v4397_v16 = vmul.f32 0.7978846, %v4333_v18  ;;  %v4214_v63 = vmul.f32 %v4150_v45, %v9679_v62  ;;  %v4581_v48 = vmul.f32 %v4517_v14, %v9617_v58 }
 0x8ba   : > { %6406 = vtanh.f32 %v4398_v30  ;;  %v4275_v5 = vmul.f32 %v4211_v32, %v9650_v52  ;;  %v4217_v7 = vmul.f32 %v4153_v55, %v9684_v36  ;;  %v4630_v24 = vpack.c.bf16 %v4582_v15, %v9636_v38 }
 0x8bb   : > { %6408 = vtanh.f32 %v4401_v44  ;;  %v4276_v2 = vmul.f32 %v4212_v31, %v9661_v11  ;;  %v4210_v27 = vmul.f32 %v4146_v20, %v9689_v40  ;;  %v4633_v0 = vpack.c.bf16 %v4585_v9, %v4581_v48 }
 0x8bc   : > { %v6399_v41 = vpop.eup %6398  ;;  %6410 = vtanh.f32 %v4394_v26  ;;  %v4279_v61 = vmul.f32 %v4215_v22, %v9668_v47  ;;  %v4213_v58 = vmul.f32 %v4149_v34, %v9695_v25  ;;  %v4280_v38 = vmul.f32 %v4216_v12, %v9673_v43 }
 0x8bd   : > { %v6401_v59 = vpop.eup %6400  ;;  %6412 = vtanh.f32 %v4397_v16  ;;  %v4278_v15 = vmul.f32 %v4214_v63, %v9679_v62  ;;  %v4339_v9 = vadd.f32 %v4275_v5, %v9650_v52  ;;  %v4075_v56 = vmul.f32 0.5, %v9556_v23 }
 0x8be   : > { %v6403_v14 = vpop.eup %6402  ;;  %v4076_v17 = vmul.f32 0.5, %v9565_v10  ;;  %v4340_v28 = vadd.f32 %v4276_v2, %v9661_v11  ;;  %v4281_v54 = vmul.f32 %v4217_v7, %v9684_v36  ;;  %v4074_v6 = vmul.f32 0.5, %v9596_v42 }
 0x8bf   : > { %4933 = vmatmul.bf16.gmra.mxu3 %v4630_v24  ;;  %4982 = vmatmul.bf16.gmra.mxu0 %v4631_v4  ;;  %v6405_v37 = vpop.eup %6404  ;;  %v4079_v57 = vmul.f32 0.5, %v9570_v39  ;;  %v4274_v1 = vmul.f32 %v4210_v27, %v9689_v40  ;;  %v4078_v53 = vmul.f32 0.5, %v9585_v3  ;;  %v4080_v23 = vmul.f32 0.5, %v9577_v29 }
 0x8c0   : > { %5031 = vmatmul.bf16.gmra.mxu1 %v4632_v8  ;;  %5080 = vmatmul.bf16.gmra.mxu2 %v4633_v0  ;;  %v6407_v4 = vpop.eup %6406  ;;  %v4343_v8 = vadd.f32 %v4279_v61, %v9668_v47  ;;  %v4344_v10 = vadd.f32 %v4280_v38, %v9673_v43  ;;  %v4277_v51 = vmul.f32 %v4213_v58, %v9695_v25  ;;  %v4077_v18 = vmul.f32 0.5, %v9602_v46 }
 0x8c1   : > { %v6409_v49 = vpop.eup %6408  ;;  %v4081_v42 = vmul.f32 0.5, %v9591_v19  ;;  %v4342_v39 = vadd.f32 %v4278_v15, %v9679_v62  ;;  %v4403_v32 = vmul.f32 0.7978846, %v4339_v9  ;;  %v4526_v30 = vadd.f32 1.0, %v6407_v4 }
 0x8c2   : > { %v6411_v33 = vpop.eup %6410  ;;  %v4527_v31 = vadd.f32 1.0, %v6403_v14  ;;  %v4404_v55 = vmul.f32 0.7978846, %v4340_v28  ;;  %v4345_v3 = vadd.f32 %v4281_v54, %v9684_v36  ;;  %v4528_v44 = vadd.f32 1.0, %v6405_v37 }
 0x8c3   : > { %v6413_v45 = vpop.eup %6412  ;;  %v4529_v29 = vadd.f32 1.0, %v6409_v49  ;;  %v4338_v20 = vadd.f32 %v4274_v1, %v9689_v40  ;;  %v4407_v22 = vmul.f32 0.7978846, %v4343_v8  ;;  %v4522_v26 = vadd.f32 1.0, %v6411_v33 }
 0x8c4   : > { %v4523_v34 = vadd.f32 1.0, %v6399_v41  ;;  %v4408_v12 = vmul.f32 0.7978846, %v4344_v10  ;;  %v4341_v46 = vadd.f32 %v4277_v51, %v9695_v25  ;;  %v4524_v19 = vadd.f32 1.0, %v6401_v59 }
 0x8c5   : > { %v4525_v16 = vadd.f32 1.0, %v6413_v45  ;;  %v4406_v63 = vmul.f32 0.7978846, %v4342_v39  ;;  %6414 = vtanh.f32 %v4403_v32  ;;  %v4590_v48 = vmul.f32 %v4526_v30, %v4078_v53 }
 0x8c6   : > { %v4591_v5 = vmul.f32 %v4527_v31, %v4079_v57  ;;  %6416 = vtanh.f32 %v4404_v55  ;;  %v4409_v7 = vmul.f32 0.7978846, %v4345_v3  ;;  %v4592_v24 = vmul.f32 %v4528_v44, %v4080_v23 }
 0x8c7   : > { %v4593_v2 = vmul.f32 %v4529_v29, %v4081_v42  ;;  %v4402_v27 = vmul.f32 0.7978846, %v4338_v20  ;;  %6418 = vtanh.f32 %v4407_v22  ;;  %v4586_v0 = vmul.f32 %v4522_v26, %v4074_v6 }
 0x8c8   : > { %v4587_v61 = vmul.f32 %v4523_v34, %v4075_v56  ;;  %6420 = vtanh.f32 %v4408_v12  ;;  %v4405_v58 = vmul.f32 0.7978846, %v4341_v46  ;;  %v4588_v41 = vmul.f32 %v4524_v19, %v4076_v17 }
 0x8c9   : > { %v4589_v38 = vmul.f32 %v4525_v16, %v4077_v18  ;;  %6422 = vtanh.f32 %v4406_v63  ;;  %v4634_v14 = vpack.c.bf16 %v4590_v48, %v4586_v0  ;;  %v4086_v23 = vmul.f32 0.5, %v9679_v62 }
 0x8ca   : > { %v4635_v59 = vpack.c.bf16 %v4591_v5, %v4587_v61  ;;  %6424 = vtanh.f32 %v4409_v7  ;;  %v4636_v9 = vpack.c.bf16 %v4592_v24, %v4588_v41  ;;  %v4087_v51 = vmul.f32 0.5, %v9668_v47 }
 0x8cb   : > { %v6415_v15 = vpop.eup %6414  ;;  %v4637_v37 = vpack.c.bf16 %v4593_v2, %v4589_v38  ;;  %6426 = vtanh.f32 %v4402_v27  ;;  %v4088_v18 = vmul.f32 0.5, %v9673_v43  ;;  %v4089_v39 = vmul.f32 0.5, %v9684_v36 }
 0x8cc   : > { %v6417_v28 = vpop.eup %6416  ;;  %6428 = vtanh.f32 %v4405_v58  ;;  %v4531_v33 = vadd.f32 1.0, %v6415_v15  ;;  %v4082_v45 = vmul.f32 0.5, %v9689_v40  ;;  %v4083_v31 = vmul.f32 0.5, %v9650_v52 }
 0x8cd   : > { %v6419_v54 = vpop.eup %6418  ;;  %v4532_v42 = vadd.f32 1.0, %v6417_v28  ;;  %v4084_v3 = vmul.f32 0.5, %v9661_v11  ;;  %v4085_v62 = vmul.f32 0.5, %v9695_v25 }
 0x8ce   : > { %v6421_v56 = vpop.eup %6420  ;;  %v4535_v8 = vadd.f32 1.0, %v6419_v54  ;;  %v4595_v20 = vmul.f32 %v4531_v33, %v4083_v31 }
 0x8cf   : > { %4938 = vmatmul.bf16.gmra.mxu3 %v4634_v14  ;;  %4987 = vmatmul.bf16.gmra.mxu0 %v4635_v59  ;;  %v6423_v4 = vpop.eup %6422  ;;  %v4536_v49 = vadd.f32 1.0, %v6421_v56  ;;  %v4596_v22 = vmul.f32 %v4532_v42, %v4084_v3 }
 0x8d0   : > { %5036 = vmatmul.bf16.gmra.mxu1 %v4636_v9  ;;  %5085 = vmatmul.bf16.gmra.mxu2 %v4637_v37  ;;  %v6425_v6 = vpop.eup %6424  ;;  %v4534_v1 = vadd.f32 1.0, %v6423_v4  ;;  %v4599_v55 = vmul.f32 %v4535_v8, %v4087_v51 }
 0x8d1   : > { %v6427_v17 = vpop.eup %6426  ;;  %v4537_v53 = vadd.f32 1.0, %v6425_v6  ;;  %v4600_v44 = vmul.f32 %v4536_v49, %v4088_v18 }
 0x8d2   : > { %v6429_v57 = vpop.eup %6428  ;;  %v4530_v10 = vadd.f32 1.0, %v6427_v17  ;;  %v4598_v30 = vmul.f32 %v4534_v1, %v4086_v23  ;;  %v4639_v34 = vpack.c.bf16 %v4599_v55, %v4595_v20 }
 0x8d3   : > { %v4533_v32 = vadd.f32 1.0, %v6429_v57  ;;  %v4601_v29 = vmul.f32 %v4537_v53, %v4089_v39  ;;  %v4640_v36 = vpack.c.bf16 %v4600_v44, %v4596_v22 }
 0x8d4   : > { %v4594_v47 = vmul.f32 %v4530_v10, %v4082_v45 }
 0x8d5   : > { %v4597_v43 = vmul.f32 %v4533_v32, %v4085_v62 }
 0x8d6   : > { %v4638_v26 = vpack.c.bf16 %v4598_v30, %v4594_v47 }
 0x8d7   : > { %v4641_v12 = vpack.c.bf16 %v4601_v29, %v4597_v43 }
 0x8df   : > { %4943 = vmatmul.bf16.gmra.mxu3 %v4638_v26  ;;  %4992 = vmatmul.bf16.gmra.mxu0 %v4639_v34 }
 0x8e0   : > { %5041 = vmatmul.bf16.gmra.mxu1 %v4640_v36  ;;  %5090 = vmatmul.bf16.gmra.mxu2 %v4641_v12 }
 0x8e5   : > { %v3934_v52 = vpop.f32.mrf.mxu0 }
 0x8e6   : > { %v9752_v40 = vadd.f32 %v3934_v52, %v8963_v60  ;;  %v3983_v11 = vpop.f32.mrf.mxu1 }
 0x8e7   : > { %v3984_v25 = vadd.f32 %v3983_v11, %v8966_v50 }
 0x8e8   : > { %v4155_v46 = vmul.f32 0.044715, %v9752_v40  ;;  %v4091_v52 = vmul.f32 0.5, %v9752_v40 }
 0x8e9   : > { %v4156_v19 = vmul.f32 0.044715, %v3984_v25  ;;  %v4092_v11 = vmul.f32 0.5, %v3984_v25 }
 0x8ea   : > { %v4219_v16 = vmul.f32 %v4155_v46, %v9752_v40 }
 0x8eb   : > { %v4220_v63 = vmul.f32 %v4156_v19, %v3984_v25  ;;  %v3885_v48 = vpop.f32.mrf.mxu3 }
 0x8ec   : > { %v9758_v5 = vadd.f32 %v3885_v48, %v8968_v13  ;;  %v4032_v7 = vpop.f32.mrf.mxu2  ;;  %v4283_v24 = vmul.f32 %v4219_v16, %v9752_v40 }
 0x8ed   : > { %v9762_v2 = vadd.f32 %v4032_v7, %v8981_v21  ;;  %v3936_v27 = vpop.f32.mrf.mxu0  ;;  %v4284_v0 = vmul.f32 %v4220_v63, %v3984_v25 }
 0x8ee   : > { %v4154_v61 = vmul.f32 0.044715, %v9758_v5  ;;  %v9766_v58 = vadd.f32 %v3936_v27, %v8963_v60  ;;  %v3985_v41 = vpop.f32.mrf.mxu1  ;;  %v4347_v38 = vadd.f32 %v4283_v24, %v9752_v40 }
 0x8ef   : > { %v4157_v14 = vmul.f32 0.044715, %v9762_v2  ;;  %v9771_v59 = vadd.f32 %v3985_v41, %v8966_v50  ;;  %v4348_v15 = vadd.f32 %v4284_v0, %v3984_v25  ;;  %v4090_v0 = vmul.f32 0.5, %v9758_v5 }
 0x8f0   : > { %v4218_v9 = vmul.f32 %v4154_v61, %v9758_v5  ;;  %v4159_v37 = vmul.f32 0.044715, %v9766_v58  ;;  %v4411_v56 = vmul.f32 0.7978846, %v4347_v38  ;;  %v4093_v61 = vmul.f32 0.5, %v9762_v2 }
 0x8f1   : > { %v4221_v28 = vmul.f32 %v4157_v14, %v9762_v2  ;;  %v4160_v54 = vmul.f32 0.044715, %v9771_v59  ;;  %v4412_v6 = vmul.f32 0.7978846, %v4348_v15  ;;  %v4095_v25 = vmul.f32 0.5, %v9766_v58 }
 0x8f2   : > { %v4223_v4 = vmul.f32 %v4159_v37, %v9766_v58  ;;  %v4282_v17 = vmul.f32 %v4218_v9, %v9758_v5  ;;  %6430 = vtanh.f32 %v4411_v56  ;;  %v4096_v9 = vmul.f32 0.5, %v9771_v59 }
 0x8f3   : > { %v4224_v57 = vmul.f32 %v4160_v54, %v9771_v59  ;;  %v3887_v1 = vpop.f32.mrf.mxu3  ;;  %v4285_v8 = vmul.f32 %v4221_v28, %v9762_v2  ;;  %6432 = vtanh.f32 %v4412_v6 }
 0x8f4   : > { %v3888_v49 = vadd.f32 %v3887_v1, %v8968_v13  ;;  %v4034_v53 = vpop.f32.mrf.mxu2  ;;  %v4287_v23 = vmul.f32 %v4223_v4, %v9766_v58  ;;  %v4346_v10 = vadd.f32 %v4282_v17, %v9758_v5 }
 0x8f5   : > { %v9785_v51 = vadd.f32 %v4034_v53, %v8981_v21  ;;  %v4288_v33 = vmul.f32 %v4224_v57, %v9771_v59  ;;  %v4349_v18 = vadd.f32 %v4285_v8, %v9762_v2 }
 0x8f6   : > { %v4158_v42 = vmul.f32 0.044715, %v3888_v49  ;;  %v4351_v39 = vadd.f32 %v4287_v23, %v9766_v58  ;;  %v4410_v32 = vmul.f32 0.7978846, %v4346_v10  ;;  %v4094_v28 = vmul.f32 0.5, %v3888_v49 }
 0x8f7   : > { %v4161_v45 = vmul.f32 0.044715, %v9785_v51  ;;  %v4352_v30 = vadd.f32 %v4288_v33, %v9771_v59  ;;  %v4413_v3 = vmul.f32 0.7978846, %v4349_v18 }
 0x8f8   : > { %v4222_v31 = vmul.f32 %v4158_v42, %v3888_v49  ;;  %v4415_v55 = vmul.f32 0.7978846, %v4351_v39  ;;  %6434 = vtanh.f32 %v4410_v32  ;;  %v6431_v47 = vpop.eup %6430 }
 0x8f9   : > { %v4225_v44 = vmul.f32 %v4161_v45, %v9785_v51  ;;  %v4416_v62 = vmul.f32 0.7978846, %v4352_v30  ;;  %v6433_v22 = vpop.eup %6432  ;;  %v4539_v63 = vadd.f32 1.0, %v6431_v47 }
 0x8fa   : > { %6436 = vtanh.f32 %v4415_v55  ;;  %v4286_v29 = vmul.f32 %v4222_v31, %v3888_v49  ;;  %v4540_v48 = vadd.f32 1.0, %v6433_v22 }
 0x8fb   : > { %6438 = vtanh.f32 %v4416_v62  ;;  %v4289_v20 = vmul.f32 %v4225_v44, %v9785_v51  ;;  %v4603_v56 = vmul.f32 %v4539_v63, %v4091_v52 }
 0x8fc   : > { %v4350_v43 = vadd.f32 %v4286_v29, %v3888_v49  ;;  %6440 = vtanh.f32 %v4413_v3  ;;  %v3939_v26 = vpop.f32.mrf.mxu0  ;;  %v4604_v2 = vmul.f32 %v4540_v48, %v4092_v11 }
 0x8fd   : > { %v4353_v34 = vadd.f32 %v4289_v20, %v9785_v51  ;;  %v9796_v36 = vadd.f32 %v3939_v26, %v8963_v60  ;;  %v3988_v12 = vpop.f32.mrf.mxu1 }
 0x8fe   : > { %v4414_v46 = vmul.f32 0.7978846, %v4350_v43  ;;  %v6435_v19 = vpop.eup %6434  ;;  %v9800_v16 = vadd.f32 %v3988_v12, %v8966_v50 }
 0x8ff   : > { %v4417_v7 = vmul.f32 0.7978846, %v4353_v34  ;;  %v4163_v27 = vmul.f32 0.044715, %v9796_v36  ;;  %v4538_v57 = vadd.f32 1.0, %v6435_v19 }
 0x900   : > { %v6437_v24 = vpop.eup %6436  ;;  %6442 = vtanh.f32 %v4414_v46  ;;  %v4164_v40 = vmul.f32 0.044715, %v9800_v16 }
 0x901   : > { %v6439_v41 = vpop.eup %6438  ;;  %v4543_v38 = vadd.f32 1.0, %v6437_v24  ;;  %6444 = vtanh.f32 %v4417_v7  ;;  %v4227_v15 = vmul.f32 %v4163_v27, %v9796_v36  ;;  %v4602_v62 = vmul.f32 %v4538_v57, %v4090_v0 }
 0x902   : > { %v6441_v14 = vpop.eup %6440  ;;  %v4544_v37 = vadd.f32 1.0, %v6439_v41  ;;  %v4228_v54 = vmul.f32 %v4164_v40, %v9800_v16  ;;  %v3890_v5 = vpop.f32.mrf.mxu3 }
 0x903   : > { %v4607_v4 = vmul.f32 %v4543_v38, %v4095_v25  ;;  %v9811_v6 = vadd.f32 %v3890_v5, %v8968_v13  ;;  %v4037_v17 = vpop.f32.mrf.mxu2  ;;  %v4291_v1 = vmul.f32 %v4227_v15, %v9796_v36  ;;  %v4541_v49 = vadd.f32 1.0, %v6441_v14 }
 0x904   : > { %v4608_v58 = vmul.f32 %v4544_v37, %v4096_v9  ;;  %v9815_v8 = vadd.f32 %v4037_v17, %v8981_v21  ;;  %v3941_v59 = vpop.f32.mrf.mxu0  ;;  %v4292_v23 = vmul.f32 %v4228_v54, %v9800_v16  ;;  %v9854_v9 = vld [vmem:[%s9988_s9] ss:$0 sm:$0xff] }
 0x905   : > { %v4643_v53 = vpack.c.bf16 %v4607_v4, %v4603_v56  ;;  %v4162_v33 = vmul.f32 0.044715, %v9811_v6  ;;  %v9820_v18 = vadd.f32 %v3941_v59, %v8963_v60  ;;  %v3990_v42 = vpop.f32.mrf.mxu1  ;;  %v4355_v32 = vadd.f32 %v4291_v1, %v9796_v36 }
 0x906   : > { %v6443_v10 = vpop.eup %6442  ;;  %v4644_v39 = vpack.c.bf16 %v4608_v58, %v4604_v2  ;;  %v4165_v30 = vmul.f32 0.044715, %v9815_v8  ;;  %v9825_v31 = vadd.f32 %v3990_v42, %v8966_v50  ;;  %v4356_v3 = vadd.f32 %v4292_v23, %v9800_v16 }
 0x907   : > { %v6445_v45 = vpop.eup %6444  ;;  %4997 = vmatmul.bf16.gmra.mxu0 %v4643_v53  ;;  %v4542_v55 = vadd.f32 1.0, %v6443_v10  ;;  %v4167_v44 = vmul.f32 0.044715, %v9820_v18  ;;  %v4097_v60 = vmul.f32 0.5, %v9785_v51  ;;  %v4226_v47 = vmul.f32 %v4162_v33, %v9811_v6 }
 0x908   : > { %5046 = vmatmul.bf16.gmra.mxu1 %v4644_v39  ;;  %v4545_v29 = vadd.f32 1.0, %v6445_v45  ;;  %v4168_v20 = vmul.f32 0.044715, %v9825_v31  ;;  %v4605_v43 = vmul.f32 %v4541_v49, %v4093_v61  ;;  %v4229_v50 = vmul.f32 %v4165_v30, %v9815_v8 }
 0x909   : > { %v4606_v22 = vmul.f32 %v4542_v55, %v4094_v28  ;;  %v4231_v26 = vmul.f32 %v4167_v44, %v9820_v18  ;;  %v4419_v12 = vmul.f32 0.7978846, %v4355_v32  ;;  %v4420_v19 = vmul.f32 0.7978846, %v4356_v3  ;;  %v6480_v3 = vld [vmem:[%s6850_s29] sm:$0x3f] }
 0x90a   : > { %v4609_v34 = vmul.f32 %v4545_v29, %v4097_v60  ;;  %v4232_v52 = vmul.f32 %v4168_v20, %v9825_v31  ;;  %v3892_v11 = vpop.f32.mrf.mxu3  ;;  %v4290_v61 = vmul.f32 %v4226_v47, %v9811_v6  ;;  %v4293_v25 = vmul.f32 %v4229_v50, %v9815_v8 }
 0x90b   : > { %v4642_v46 = vpack.c.bf16 %v4606_v22, %v4602_v62  ;;  %v9836_v51 = vadd.f32 %v3892_v11, %v8968_v13  ;;  %v4039_v63 = vpop.f32.mrf.mxu2  ;;  %v4295_v7 = vmul.f32 %v4231_v26, %v9820_v18  ;;  %6446 = vtanh.f32 %v4419_v12 }
 0x90c   : > { %v4645_v48 = vpack.c.bf16 %v4609_v34, %v4605_v43  ;;  %v9840_v24 = vadd.f32 %v4039_v63, %v8981_v21  ;;  %v4968_v27 = vpop.f32.mrf.mxu0  ;;  %v4296_v0 = vmul.f32 %v4232_v52, %v9825_v31  ;;  %6448 = vtanh.f32 %v4420_v19 }
 0x90d   : > { %4948 = vmatmul.bf16.gmra.mxu3 %v4642_v46  ;;  %v4166_v41 = vmul.f32 0.044715, %v9836_v51  ;;  %v5017_v40 = vpop.f32.mrf.mxu1  ;;  %v4359_v13 = vadd.f32 %v4295_v7, %v9820_v18  ;;  %v4354_v14 = vadd.f32 %v4290_v61, %v9811_v6  ;;  %v4357_v28 = vadd.f32 %v4293_v25, %v9815_v8 }
 0x90e   : > { %5095 = vmatmul.bf16.gmra.mxu2 %v4645_v48  ;;  %v4169_v38 = vmul.f32 0.044715, %v9840_v24  ;;  %v4360_v21 = vadd.f32 %v4296_v0, %v9825_v31  ;;  %v9865_v44 = vperm.slane %v6480_v3, 5  ;;  %v4099_v29 = vmul.f32 0.5, %v9796_v36 }
 0x90f   : > { %v4230_v15 = vmul.f32 %v4166_v41, %v9836_v51  ;;  %v4423_v37 = vmul.f32 0.7978846, %v4359_v13  ;;  %v4418_v56 = vmul.f32 0.7978846, %v4354_v14  ;;  %v4421_v2 = vmul.f32 0.7978846, %v4357_v28 }
 0x910   : > { %v4233_v54 = vmul.f32 %v4169_v38, %v9840_v24  ;;  %v4424_v5 = vmul.f32 0.7978846, %v4360_v21  ;;  %v4103_v47 = vmul.f32 0.5, %v9820_v18  ;;  %v4100_v50 = vmul.f32 0.5, %v9800_v16 }
 0x911   : > { %6450 = vtanh.f32 %v4423_v37  ;;  %v4294_v4 = vmul.f32 %v4230_v15, %v9836_v51  ;;  %v6447_v57 = vpop.eup %6446  ;;  %v4104_v26 = vmul.f32 0.5, %v9825_v31  ;;  %v4098_v38 = vmul.f32 0.5, %v9811_v6 }
 0x912   : > { %v4919_v17 = vpop.f32.mrf.mxu3  ;;  %6452 = vtanh.f32 %v4424_v5  ;;  %v4297_v58 = vmul.f32 %v4233_v54, %v9840_v24  ;;  %v6449_v49 = vpop.eup %6448  ;;  %v4547_v32 = vadd.f32 1.0, %v6447_v57  ;;  %v4102_v21 = vmul.f32 0.5, %v9836_v51 }
 0x913   : > { %v4920_v1 = vadd.f32 %v9854_v9, %v4919_v17  ;;  %v5066_v59 = vpop.f32.mrf.mxu2  ;;  %v4358_v53 = vadd.f32 %v4294_v4, %v9836_v51  ;;  %6454 = vtanh.f32 %v4418_v56  ;;  %v4548_v62 = vadd.f32 1.0, %v6449_v49 }
 0x914   : > { %v4970_v23 = vpop.f32.mrf.mxu0  ;;  %v4361_v10 = vadd.f32 %v4297_v58, %v9840_v24  ;;  %6456 = vtanh.f32 %v4421_v2  ;;  %v4611_v11 = vmul.f32 %v4547_v32, %v4099_v29  ;;  %v4101_v37 = vmul.f32 0.5, %v9815_v8  ;;  %v10092_v8 = vld [vmem:[#allocation14_spill] sm:$0xff] }
 0x915   : > { %v4969_v33 = vadd.f32 %v4968_v27, %v4920_v1  ;;  %v5019_v42 = vpop.f32.mrf.mxu1  ;;  %v4422_v39 = vmul.f32 0.7978846, %v4358_v53  ;;  %v4612_v63 = vmul.f32 %v4548_v62, %v4100_v50 }
 0x916   : > { %v4425_v45 = vmul.f32 0.7978846, %v4361_v10 }
 0x917   : > { %v6451_v30 = vpop.eup %6450  ;;  %v5018_v55 = vadd.f32 %v5017_v40, %v4969_v33  ;;  %6458 = vtanh.f32 %v4422_v39 }
 0x918   : > { %v6453_v60 = vpop.eup %6452  ;;  %v4551_v20 = vadd.f32 1.0, %v6451_v30  ;;  %6460 = vtanh.f32 %v4425_v45  ;;  %v10093_v30 = vld [vmem:[#allocation15_spill] sm:$0xff] }
 0x919   : > { %v6455_v22 = vpop.eup %6454  ;;  %v5067_v43 = vadd.f32 %v5066_v59, %v5018_v55  ;;  %v4552_v34 = vadd.f32 1.0, %v6453_v60 }
 0x91a   : > { %v6457_v12 = vpop.eup %6456  ;;  %v4921_v52 = vpop.f32.mrf.mxu3  ;;  %v4615_v46 = vmul.f32 %v4551_v20, %v4103_v47  ;;  %v4546_v0 = vadd.f32 1.0, %v6455_v22 }
 0x91b   : > { %v5108_v19 = vmul.f32 %v9865_v44, %v5067_v43  ;;  %v4922_v36 = vadd.f32 %v9854_v9, %v4921_v52  ;;  %v5068_v18 = vpop.f32.mrf.mxu2  ;;  %v4616_v48 = vmul.f32 %v4552_v34, %v4104_v26  ;;  %v4549_v13 = vadd.f32 1.0, %v6457_v12  ;;  %v10094_v26 = vld [vmem:[#allocation13_spill] sm:$0xff] }
 0x91c   : > { %v4973_v7 = vpop.f32.mrf.mxu0  ;;  %v4647_v27 = vpack.c.bf16 %v4615_v46, %v4611_v11  ;;  %v4610_v54 = vmul.f32 %v4546_v0, %v4098_v38 }
 0x91d   : > { %v6459_v61 = vpop.eup %6458  ;;  %v5124_v16 = vadd.f32 %v5108_v19, %v8476_v35  ;;  %v4971_v41 = vadd.f32 %v4970_v23, %v4922_v36  ;;  %v5022_v31 = vpop.f32.mrf.mxu1  ;;  %v4648_v40 = vpack.c.bf16 %v4616_v48, %v4612_v63  ;;  %v4105_v35 = vmul.f32 0.5, %v9840_v24 }
 0x91e   : > { %v6461_v25 = vpop.eup %6460  ;;  %5002 = vmatmul.bf16.gmra.mxu0 %v4647_v27  ;;  %v4550_v14 = vadd.f32 1.0, %v6459_v61  ;;  %v4613_v4 = vmul.f32 %v4549_v13, %v4101_v37 }
 0x91f   : > { %5140 = vst [vmem:[%s9878_s0] sm:$0xff] %v5124_v16  ;;  %v5020_v15 = vadd.f32 %v5019_v42, %v4971_v41  ;;  %5051 = vmatmul.bf16.gmra.mxu1 %v4648_v40  ;;  %v4553_v28 = vadd.f32 1.0, %v6461_v25 }
 0x920   : > { %v4614_v5 = vmul.f32 %v4550_v14, %v4102_v21  ;;  %v10096_v21 = vld [vmem:[#allocation11_spill] sm:$0xff] }
 0x921   : > { %v5069_v56 = vadd.f32 %v5068_v18, %v5020_v15  ;;  %v4617_v6 = vmul.f32 %v4553_v28, %v4105_v35 }
 0x922   : > { %v4924_v2 = vpop.f32.mrf.mxu3  ;;  %v4646_v51 = vpack.c.bf16 %v4614_v5, %v4610_v54 }
 0x923   : > { %v5109_v17 = vmul.f32 %v9865_v44, %v5069_v56  ;;  %v4925_v58 = vadd.f32 %v9854_v9, %v4924_v2  ;;  %v5071_v57 = vpop.f32.mrf.mxu2  ;;  %v4649_v1 = vpack.c.bf16 %v4617_v6, %v4613_v4  ;;  %v10097_v6 = vld [vmem:[#allocation18_spill] sm:$0xff] }
 0x924   : > { %4953 = vmatmul.bf16.gmra.mxu3 %v4646_v51  ;;  %v4975_v59 = vpop.f32.mrf.mxu0 }
 0x925   : > { %v5125_v24 = vadd.f32 %v5109_v17, %v10092_v8  ;;  %v4974_v53 = vadd.f32 %v4973_v7, %v4925_v58  ;;  %v5024_v49 = vpop.f32.mrf.mxu1  ;;  %5100 = vmatmul.bf16.gmra.mxu2 %v4649_v1  ;;  %v10095_v7 = vld [vmem:[#allocation12_spill] sm:$0xff] }
 0x927   : > { %5141 = vst [vmem:[%s9878_s0 + $0x8] sm:$0xff] %v5125_v24  ;;  %v5023_v23 = vadd.f32 %v5022_v31, %v4974_v53 }
 0x929   : > { %v5072_v10 = vadd.f32 %v5071_v57, %v5023_v23 }
 0x92a   : > { %v4926_v33 = vpop.f32.mrf.mxu3 }
 0x92b   : > { %v5110_v42 = vmul.f32 %v9865_v44, %v5072_v10  ;;  %v4927_v39 = vadd.f32 %v9854_v9, %v4926_v33  ;;  %v5073_v32 = vpop.f32.mrf.mxu2 }
 0x92c   : > { %v4978_v45 = vpop.f32.mrf.mxu0 }
 0x92d   : > { %v5126_v55 = vadd.f32 %v5110_v42, %v10093_v30  ;;  %v4976_v3 = vadd.f32 %v4975_v59, %v4927_v39  ;;  %v5027_v62 = vpop.f32.mrf.mxu1  ;;  %v6481_v42 = vld [vmem:[%s6850_s29 + $0x8] sm:$0x3f]  ;;  %s5823_s29 = sshll.u32 %s6665_s17, 7  ;;  %s5157_s17 = scalar_lea.sflag [#allocation4], %s386_s21 }
 0x92e   : > { %v9912_v39 = vperm.slane %v6481_v42, 5  ;;  %s5169_s27 = scalar_lea.hbm %s9989_s10, %s5823_s29 }
 0x92f   : > { %5142 = vst [vmem:[%s9878_s0 + $0x10] sm:$0xff] %v5126_v55  ;;  %v5025_v60 = vadd.f32 %v5024_v49, %v4976_v3  ;;  %v10098_v49 = vld [vmem:[#allocation17_spill] sm:$0xff]  ;;  %s5172_s30 = sshll.u32 %s5169_s27, 4  ;;  %s5173_s30 = int_to_ptr.hbm [resolvable:$true] %s5172_s30 }
 0x930   : > { %s6526_s11 = sshra.s32 %s5173_s30, 4  ;;  %s6527_s11 = int_to_ptr.hbm [resolvable:$true] %s6526_s11 }
 0x931   : > { %v5074_v29 = vadd.f32 %v5073_v32, %v5025_v60  ;;  %v10099_v60 = vld [vmem:[#allocation19_spill] sm:$0xff]  ;;  %s6528_s12 = scalar_lea.hbm %s6527_s11, 128  ;;  %p6533_p3 = scmp.lt.s32.totalorder %s6527_s11, %s9989_s10 }
 0x932   : > { %v4929_v47 = vpop.f32.mrf.mxu3  ;;  %p6529_p0 = scmp.ne.s32.totalorder %s6527_s11, %s6528_s12  ;;  %p6534_p4 = scmp.lt.s32.totalorder %s6532_s26, %s6528_s12 }
 0x933   : > { %v5111_v20 = vmul.f32 %v9865_v44, %v5074_v29  ;;  %v4930_v22 = vadd.f32 %v9854_v9, %v4929_v47  ;;  %v5076_v43 = vpop.f32.mrf.mxu2 }
 0x934   : > { %v4980_v50 = vpop.f32.mrf.mxu0  ;;  %p6530_p1 = pnand %p6529_p0, %p6682_p5  ;;  %p6535_p7 = por %p6534_p4, %p6533_p3 }
 0x935   : > { %v5127_v34 = vadd.f32 %v5111_v20, %v10094_v26  ;;  %v4979_v12 = vadd.f32 %v4978_v45, %v4930_v22  ;;  %v5029_v52 = vpop.f32.mrf.mxu1 }
 0x936   : > { %p6531_p2 = pneg %p6530_p1 }
 0x937   : > { %5143 = vst [vmem:[%s9878_s0 + $0x18] sm:$0xff] %v5127_v34  ;;  %v5028_v11 = vadd.f32 %v5027_v62, %v4979_v12 }
 0x938   : > { %p6536_p8 = pnand %p6535_p7, %p6531_p2 }
 0x939   : > { %v5077_v46 = vadd.f32 %v5076_v43, %v5028_v11 }
 0x93a   : > { %v4931_v19 = vpop.f32.mrf.mxu3 }
 0x93b   : > { %v5112_v36 = vmul.f32 %v9865_v44, %v5077_v46  ;;  %v4932_v18 = vadd.f32 %v9854_v9, %v4931_v19  ;;  %v5078_v63 = vpop.f32.mrf.mxu2 }
 0x93c   : > { %v4983_v48 = vpop.f32.mrf.mxu0 }
 0x93d   : > { %v5128_v27 = vadd.f32 %v5112_v36, %v10095_v7  ;;  %v4981_v0 = vadd.f32 %v4980_v50, %v4932_v18  ;;  %v5032_v61 = vpop.f32.mrf.mxu1 }
 0x93f   : > { %5144 = vst [vmem:[%s9878_s0 + $0x20] sm:$0xff] %v5128_v27  ;;  %v5030_v16 = vadd.f32 %v5029_v52, %v4981_v0  ;;  %v10100_v52 = vld [vmem:[#allocation16_spill] sm:$0xff] }
 0x940   : > { %v10101_v0 = vld [vmem:[#allocation8_spill] sm:$0xff] }
 0x941   : > { %v5079_v41 = vadd.f32 %v5078_v63, %v5030_v16 }
 0x942   : > { %v4934_v31 = vpop.f32.mrf.mxu3 }
 0x943   : > { %v5113_v40 = vmul.f32 %v9865_v44, %v5079_v41  ;;  %v4935_v13 = vadd.f32 %v9854_v9, %v4934_v31  ;;  %v5081_v25 = vpop.f32.mrf.mxu2 }
 0x944   : > { %v4985_v38 = vpop.f32.mrf.mxu0 }
 0x945   : > { %v5129_v14 = vadd.f32 %v5113_v40, %v10096_v21  ;;  %v4984_v15 = vadd.f32 %v4983_v48, %v4935_v13  ;;  %v5034_v37 = vpop.f32.mrf.mxu1 }
 0x947   : > { %5145 = vst [vmem:[%s9878_s0 + $0x28] sm:$0xff] %v5129_v14  ;;  %v5033_v35 = vadd.f32 %v5032_v61, %v4984_v15 }
 0x949   : > { %v5082_v28 = vadd.f32 %v5081_v25, %v5033_v35 }
 0x94a   : > { %v4936_v54 = vpop.f32.mrf.mxu3 }
 0x94b   : > { %v5114_v5 = vmul.f32 %v9865_v44, %v5082_v28  ;;  %v4937_v56 = vadd.f32 %v9854_v9, %v4936_v54  ;;  %v5083_v4 = vpop.f32.mrf.mxu2 }
 0x94c   : > { %v4988_v17 = vpop.f32.mrf.mxu0 }
 0x94d   : > { %v5130_v2 = vadd.f32 %v5114_v5, %v10097_v6  ;;  %v4986_v51 = vadd.f32 %v4985_v38, %v4937_v56  ;;  %v5037_v57 = vpop.f32.mrf.mxu1  ;;  %v10102_v38 = vld [vmem:[#allocation20_spill] sm:$0xff] }
 0x94f   : > { %5146 = vst [vmem:[%s9878_s0 + $0x30] sm:$0xff] %v5130_v2  ;;  %v5035_v58 = vadd.f32 %v5034_v37, %v4986_v51 }
 0x951   : > { %v5084_v1 = vadd.f32 %v5083_v4, %v5035_v58 }
 0x952   : > { %v4939_v59 = vpop.f32.mrf.mxu3 }
 0x953   : > { %v5115_v8 = vmul.f32 %v9865_v44, %v5084_v1  ;;  %v4940_v24 = vadd.f32 %v9854_v9, %v4939_v59  ;;  %v5086_v53 = vpop.f32.mrf.mxu2 }
 0x954   : > { %v4990_v32 = vpop.f32.mrf.mxu0 }
 0x955   : > { %v5131_v23 = vadd.f32 %v5115_v8, %v10098_v49  ;;  %v4989_v10 = vadd.f32 %v4988_v17, %v4940_v24  ;;  %v5039_v30 = vpop.f32.mrf.mxu1  ;;  %v10103_v17 = vld [vmem:[#allocation21_spill] sm:$0xff] }
 0x956   : > { %v10104_v49 = vld [vmem:[#allocation9_spill] sm:$0xff] }
 0x957   : > { %5147 = vst [vmem:[%s9878_s0 + $0x38] sm:$0xff] %v5131_v23  ;;  %v5038_v33 = vadd.f32 %v5037_v57, %v4989_v10 }
 0x959   : > { %v5087_v45 = vadd.f32 %v5086_v53, %v5038_v33 }
 0x95a   : > { %v4941_v55 = vpop.f32.mrf.mxu3 }
 0x95b   : > { %v5116_v3 = vmul.f32 %v9912_v39, %v5087_v45  ;;  %v4942_v44 = vadd.f32 %v9854_v9, %v4941_v55  ;;  %v5088_v62 = vpop.f32.mrf.mxu2 }
 0x95c   : > { %v4993_v43 = vpop.f32.mrf.mxu0 }
 0x95d   : > { %v5132_v29 = vadd.f32 %v5116_v3, %v10099_v60  ;;  %v4991_v47 = vadd.f32 %v4990_v32, %v4942_v44  ;;  %v5042_v12 = vpop.f32.mrf.mxu1 }
 0x95f   : > { %5148 = vst [vmem:[%s9878_s0 + $0x40] sm:$0xff] %v5132_v29  ;;  %v5040_v20 = vadd.f32 %v5039_v30, %v4991_v47  ;;  %v10105_v47 = vld [vmem:[#allocation22_spill] sm:$0xff] }
 0x961   : > { %v5089_v22 = vadd.f32 %v5088_v62, %v5040_v20 }
 0x962   : > { %v4944_v50 = vpop.f32.mrf.mxu3 }
 0x963   : > { %v5117_v26 = vmul.f32 %v9912_v39, %v5089_v22  ;;  %v4945_v34 = vadd.f32 %v9854_v9, %v4944_v50  ;;  %v5091_v19 = vpop.f32.mrf.mxu2 }
 0x964   : > { %v4995_v27 = vpop.f32.mrf.mxu0 }
 0x965   : > { %v5133_v11 = vadd.f32 %v5117_v26, %v10100_v52  ;;  %v4994_v46 = vadd.f32 %v4993_v43, %v4945_v34  ;;  %v5044_v41 = vpop.f32.mrf.mxu1 }
 0x967   : > { %5149 = vst [vmem:[%s9878_s0 + $0x48] sm:$0xff] %v5133_v11  ;;  %v5043_v36 = vadd.f32 %v5042_v12, %v4994_v46  ;;  %v10106_v12 = vld [vmem:[#allocation23_spill] sm:$0xff] }
 0x969   : > { %v5092_v18 = vadd.f32 %v5091_v19, %v5043_v36 }
 0x96a   : > { %v4946_v63 = vpop.f32.mrf.mxu3 }
 0x96b   : > { %v5118_v48 = vmul.f32 %v9912_v39, %v5092_v18  ;;  %v4947_v7 = vadd.f32 %v9854_v9, %v4946_v63  ;;  %v5093_v40 = vpop.f32.mrf.mxu2 }
 0x96d   : > { %v5134_v61 = vadd.f32 %v5118_v48, %v10101_v0  ;;  %v4996_v16 = vadd.f32 %v4995_v27, %v4947_v7 }
 0x96f   : > { %5150 = vst [vmem:[%s9878_s0 + $0x50] sm:$0xff] %v5134_v61  ;;  %v5045_v31 = vadd.f32 %v5044_v41, %v4996_v16 }
 0x971   : > { %v5094_v13 = vadd.f32 %v5093_v40, %v5045_v31 }
 0x973   : > { %v5119_v25 = vmul.f32 %v9912_v39, %v5094_v13 }
 0x975   : > { %v5135_v21 = vadd.f32 %v5119_v25, %v10102_v38 }
 0x977   : > { %5151 = vst [vmem:[%s9878_s0 + $0x58] sm:$0xff] %v5135_v21 }
 0x984   : > { %v4998_v14 = vpop.f32.mrf.mxu0 }
 0x985   : > { %v5047_v35 = vpop.f32.mrf.mxu1 }
 0x98c   : > { %v5000_v51 = vpop.f32.mrf.mxu0 }
 0x98d   : > { %v5049_v1 = vpop.f32.mrf.mxu1 }
 0x990   : > { %v4949_v15 = vpop.f32.mrf.mxu3 }
 0x991   : > { %v4950_v37 = vadd.f32 %v9854_v9, %v4949_v15  ;;  %v5096_v54 = vpop.f32.mrf.mxu2 }
 0x993   : > { %v4999_v28 = vadd.f32 %v4998_v14, %v4950_v37 }
 0x995   : > { %v5048_v5 = vadd.f32 %v5047_v35, %v4999_v28 }
 0x997   : > { %v5097_v56 = vadd.f32 %v5096_v54, %v5048_v5 }
 0x998   : > { %v4951_v4 = vpop.f32.mrf.mxu3 }
 0x999   : > { %v5120_v6 = vmul.f32 %v9912_v39, %v5097_v56  ;;  %v4952_v2 = vadd.f32 %v9854_v9, %v4951_v4  ;;  %v5098_v8 = vpop.f32.mrf.mxu2 }
 0x99b   : > { %v5136_v58 = vadd.f32 %v5120_v6, %v10103_v17  ;;  %v5001_v57 = vadd.f32 %v5000_v51, %v4952_v2  ;;  %v5003_v10 = vpop.f32.mrf.mxu0 }
 0x99c   : > { %v5052_v32 = vpop.f32.mrf.mxu1 }
 0x99d   : > { %5152 = vst [vmem:[%s9878_s0 + $0x60] sm:$0xff] %v5136_v58  ;;  %v5050_v59 = vadd.f32 %v5049_v1, %v5001_v57 }
 0x99f   : > { %v5099_v24 = vadd.f32 %v5098_v8, %v5050_v59 }
 0x9a1   : > { %v5121_v53 = vmul.f32 %v9912_v39, %v5099_v24 }
 0x9a3   : > { %v5137_v23 = vadd.f32 %v5121_v53, %v10104_v49  ;;  %v5005_v29 = vpop.f32.mrf.mxu0 }
 0x9a4   : > { %v5054_v43 = vpop.f32.mrf.mxu1 }
 0x9a5   : > { %5153 = vst [vmem:[%s9878_s0 + $0x68] sm:$0xff] %v5137_v23 }
 0x9a7   : > { %v4954_v33 = vpop.f32.mrf.mxu3 }
 0x9a8   : > { %v4955_v42 = vadd.f32 %v9854_v9, %v4954_v33  ;;  %v5101_v30 = vpop.f32.mrf.mxu2 }
 0x9aa   : > { %v5004_v45 = vadd.f32 %v5003_v10, %v4955_v42 }
 0x9ac   : > { %v5053_v55 = vadd.f32 %v5052_v32, %v5004_v45 }
 0x9ae   : > { %v5102_v3 = vadd.f32 %v5101_v30, %v5053_v55 }
 0x9af   : > { %v4956_v44 = vpop.f32.mrf.mxu3 }
 0x9b0   : > { %v5122_v62 = vmul.f32 %v9912_v39, %v5102_v3  ;;  %v4957_v60 = vadd.f32 %v9854_v9, %v4956_v44  ;;  %v5103_v26 = vpop.f32.mrf.mxu2 }
 0x9b2   : > { %v5138_v20 = vadd.f32 %v5122_v62, %v10105_v47  ;;  %v5006_v22 = vadd.f32 %v5005_v29, %v4957_v60 }
 0x9b4   : > { %5154 = vst [vmem:[%s9878_s0 + $0x70] sm:$0xff] %v5138_v20  ;;  %v5055_v50 = vadd.f32 %v5054_v43, %v5006_v22 }
 0x9b6   : > { %v5104_v34 = vadd.f32 %v5103_v26, %v5055_v50 }
 0x9b8   : > { %v5123_v9 = vmul.f32 %v9912_v39, %v5104_v34 }
 0x9ba   : > { %v5139_v52 = vadd.f32 %v5123_v9, %v10106_v12 }
 0x9bc   : > { %5155 = vst [vmem:[%s9878_s0 + $0x78] sm:$0xff] %v5139_v52 }
 0x9bd   : > { %6539 = shalt.err (!%p6536_p8)
}
 0x9be   : > { %s6587_s21 = smov 128   ;;  %s6588_s0 = smov 8  }
 0x9bf   : > { %5836 = dma.vmem_to_hbm [thread:$0]  (%p6682_p5), %s5171_s28, 2048, %s5173_s30, %s5157_s17, %s6587_s21, %s6587_s21, %s6588_s0  }
 0x9c0 PF: > { %p5848_p9 = scmp.ge.s32.totalorder %s6578_s16, 2  ;;  %s5187_s25 = sand.u32 1, %s6566_s13  }
 0x9c1   : > { %s5188_s27 = scalar_lea.sflag [#allocation4], %s5187_s25 }
 0x9c2   : > { %p5843_p10 = pnand %p5848_p9, %p6686_p6 }
 0x9c4   : > { %p5844_p11 = pneg %p5843_p10 }
 0x9c6   : > { %6561 = dma.done.wait (%p5844_p11), %s5188_s27, 2048  }
 0x9c7   : > { %6563 = vsyncadd (%p5844_p11), %s5188_s27, 4294965248  ;;  %p21_p12 = scmp.ge.s32.totalorder %s6669_s19, 4   ;;  %s10107_s13 = smov %s6570_s14 }
 0x9c8   : > { %s10108_s14 = smov %s6574_s15  ;;  %s10109_s15 = smov %s6680_s22 }
 0x9c9   : > { %s10110_s16 = smov %s6669_s19  ;;  %23 = sbr.rel (!%p21_p12) target bundleno = 7 (0x7), region = 103 }
 0x9ce   :  { %5194 = vsyncpa [#allocation3], 1 }
 0x9cf   :  { %5196 = vsyncpa [#allocation3 + $0x1], 1 }
 0x9d0   :  { %5197 = vsyncpa [#allocation4], 1 }
 0x9d1   :  { %5199 = vsyncpa [#allocation4 + $0x1], 1 }

</bundles_post_ra>
